<compile_context>
chip_gen: v6e
topology: v6e:2x2x1
jax: 0.10.0
libtpu: 0.0.40
codegen_flags: <defaults>
</compile_context>

<pallas_src>
import functools

import jax
import jax.numpy as jnp
from jax import lax
from jax.experimental import pallas as pl
from jax.experimental.pallas import tpu as pltpu


# ---------------------------------------------------------------------------
# In-kernel building blocks
# ---------------------------------------------------------------------------

def _conv3x3_same_relu(x4d, xp_ref, w_ref, b_ref, pad_col):
    """3x3 'same' conv + bias + ReLU as ONE im2col matmul.

    x4d    : (n, h, w, c) f32 value, NHWC.
    xp_ref : (n, h+2, wp, c) f32 VMEM scratch, wp == pad_col + w + 8,
             pad_col % 8 == 0 so every store below is sublane-aligned.
    w_ref  : (9*c, cout) weight ref, rows in (kh, kw, ci) order.
    b_ref  : (1, cout) f32.
    Returns (n*h*w, cout) f32, rows in (n, h, w) order.
    """
    n, h, w, c = x4d.shape
    wp = xp_ref.shape[2]

    # Halo-only zeroing (the interior is fully overwritten below, so nothing
    # stale is ever read); all offsets/widths are multiples of 8.
    zrow = jnp.zeros((n, 1, wp, c), jnp.float32)
    xp_ref[:, 0:1, :, :] = zrow
    xp_ref[:, h + 1:h + 2, :, :] = zrow
    xp_ref[:, 1:h + 1, 0:pad_col, :] = jnp.zeros((n, h, pad_col, c), jnp.float32)
    xp_ref[:, 1:h + 1, pad_col + w:wp, :] = jnp.zeros(
        (n, h, wp - pad_col - w, c), jnp.float32)

    # Data interior (sublane-aligned store).
    xp_ref[:, 1:h + 1, pad_col:pad_col + w, :] = x4d

    # 9 taps, lane-concatenated into one (n*h*w, 9*c) patch matrix -> ONE dot.
    taps = [xp_ref[:, kh:kh + h, pad_col - 1 + kw:pad_col - 1 + kw + w, :]
            for kh in range(3) for kw in range(3)]
    patches = jnp.concatenate(taps, axis=-1).reshape(n * h * w, 9 * c)
    acc = jnp.dot(patches.astype(w_ref.dtype), w_ref[...],
                  preferred_element_type=jnp.float32)
    return jnp.maximum(acc + b_ref[...], 0.0)


def _maxpool2x2(x2d, n, h, w, c):
    """(n*h*w, c) with rows in (n, h, w) order -> (n, h//2, w//2, c)."""
    h2, w2 = h // 2, w // 2
    x = x2d.reshape(n * h2, 2, w2, 2, c)
    return jnp.max(jnp.max(x, axis=3), axis=1).reshape(n, h2, w2, c)


def _svhn_fused_kernel(x_ref, w1_ref, b1_ref, w2_ref, b2_ref, wfc_ref, bfc_ref,
                       o_ref, xp1_ref, xp2_ref, *, Nb, H, W, C1, C2, pad_col):
    H2, W2 = H // 2, W // 2
    H4, W4 = H // 4, W // 4

    # conv1 + ReLU (single im2col matmul), then 2x2/2 max-pool.
    h1 = _conv3x3_same_relu(x_ref[...].astype(jnp.float32),
                            xp1_ref, w1_ref, b1_ref, pad_col)      # (Nb*H*W, C1)
    p1 = _maxpool2x2(h1, Nb, H, W, C1)                             # (Nb,H2,W2,C1)

    # conv2 + ReLU (single im2col matmul, 9 taps merged), then 2x2/2 max-pool.
    h2 = _conv3x3_same_relu(p1, xp2_ref, w2_ref, b2_ref, pad_col)  # (Nb*H2*W2,C2)
    feat = _maxpool2x2(h2, Nb, H2, W2, C2)                         # (Nb,H4,W4,C2)

    # Classifier: flatten in (h, w, c) order (weight rows pre-permuted in the
    # wrapper to absorb PyTorch's (c, h, w) flatten) and ONE matmul + bias.
    flat = jnp.concatenate(
        [feat[:, hh, ww, :] for hh in range(H4) for ww in range(W4)], axis=-1)
    o_ref[...] = jnp.dot(flat.astype(wfc_ref.dtype), wfc_ref[...],
                         preferred_element_type=jnp.float32) + bfc_ref[...]


# ---------------------------------------------------------------------------
# Wrapper (one-time layout glue + single batch-tiled pallas_call)
# ---------------------------------------------------------------------------

def svhn_forward(x_nchw, params, *, block_n=8, mxu_dtype=jnp.bfloat16):
    N, Cin, H, W = x_nchw.shape
    C1 = params["w1"].shape[-1]
    C2 = params["w2"].shape[-1]
    O = params["wfc"].shape[-1]
    assert H % 4 == 0 and W % 4 == 0, (H, W)

    H2, W2 = H // 2, W // 2
    H4, W4 = H // 4, W // 4

    # Batch tile; the grid axis is "parallel" (shards across TCs on v7x).
    Nb = max(1, min(block_n, N))
    while N % Nb:
        Nb -= 1

    pad_col = 8                       # sublane-aligned scratch interior offset
    wp1 = pad_col + W + 8
    wp2 = pad_col + W2 + 8

    # One-time layout glue (all tensors tiny; plain XLA).
    x_nhwc = jnp.transpose(x_nchw, (0, 2, 3, 1)).astype(mxu_dtype)
    w1m = params["w1"].reshape(9 * Cin, C1).astype(mxu_dtype)
    b1 = params["b1"].reshape(1, C1).astype(jnp.float32)
    w2m = params["w2"].reshape(9 * C1, C2).astype(mxu_dtype)
    b2 = params["b2"].reshape(1, C2).astype(jnp.float32)
    # Classifier rows re-ordered from PyTorch's (c, h, w) flatten to (h, w, c).
    wfc2 = (params["wfc"].reshape(C2, H4, W4, O).transpose(1, 2, 0, 3)
            .reshape(H4 * W4 * C2, O).astype(mxu_dtype))
    bfc = params["bfc"].reshape(1, O).astype(jnp.float32)

    kernel = functools.partial(_svhn_fused_kernel, Nb=Nb, H=H, W=W,
                               C1=C1, C2=C2, pad_col=pad_col)

    return pl.pallas_call(
        kernel,
        out_shape=jax.ShapeDtypeStruct((N, O), jnp.float32),
        grid=(N // Nb,),
        in_specs=[
            pl.BlockSpec((Nb, H, W, Cin), lambda i: (i, 0, 0, 0)),
            pl.BlockSpec((9 * Cin, C1), lambda i: (0, 0)),
            pl.BlockSpec((1, C1), lambda i: (0, 0)),
            pl.BlockSpec((9 * C1, C2), lambda i: (0, 0)),
            pl.BlockSpec((1, C2), lambda i: (0, 0)),
            pl.BlockSpec((H4 * W4 * C2, O), lambda i: (0, 0)),
            pl.BlockSpec((1, O), lambda i: (0, 0)),
        ],
        out_specs=pl.BlockSpec((Nb, O), lambda i: (i, 0)),
        scratch_shapes=[
            pltpu.VMEM((Nb, H + 2, wp1, Cin), jnp.float32),
            pltpu.VMEM((Nb, H2 + 2, wp2, C1), jnp.float32),
        ],
        compiler_params=pltpu.CompilerParams(
            dimension_semantics=("parallel",)),
    )(x_nhwc, w1m, b1, w2m, b2, wfc2, bfc)


# ---------------------------------------------------------------------------
# Pure-JAX reference mirroring the PyTorch forward (for validation)
# ---------------------------------------------------------------------------

def svhn_reference(x_nchw, params):
    def conv(x, w_hwio, b):
        w_oihw = jnp.transpose(w_hwio, (3, 2, 0, 1))
        y = lax.conv_general_dilated(
            x, w_oihw, window_strides=(1, 1), padding=((1, 1), (1, 1)),
            dimension_numbers=("NCHW", "OIHW", "NCHW"))
        return jnp.maximum(y + b.reshape(1, -1, 1, 1), 0.0)

    def pool(x):
        return lax.reduce_window(x, -jnp.inf, lax.max,
                                 (1, 1, 2, 2), (1, 1, 2, 2), "VALID")

    x = pool(conv(x_nchw, params["w1"], params["b1"]))
    x = pool(conv(x, params["w2"], params["b2"]))
    x = x.reshape(x.shape[0], -1)
    return x @ params["wfc"] + params["bfc"]


# ---------------------------------------------------------------------------
# Main
# ---------------------------------------------------------------------------

if __name__ == "__main__":
    # Small shapes consistent with the module: NCHW input (2, 4, 16, 16).
    N, Cin, H, W = 2, 4, 16, 16
    C1, C2 = 8, 16
    num_classes = 10
    n_channel = C2 * (H // 4) * (W // 4)   # flattened feature dim = 256

    key = jax.random.PRNGKey(0)
    k = jax.random.split(key, 8)
    x = jax.random.normal(k[0], (N, Cin, H, W), jnp.float32)

    params = {
        # conv weights stored HWIO; classifier stored (in, out) = Linear.weight.T
        "w1": 0.1 * jax.random.normal(k[1], (3, 3, Cin, C1), jnp.float32),
        "b1": 0.1 * jax.random.normal(k[2], (C1,), jnp.float32),
        "w2": 0.1 * jax.random.normal(k[3], (3, 3, C1, C2), jnp.float32),
        "b2": 0.1 * jax.random.normal(k[4], (C2,), jnp.float32),
        "wfc": 0.05 * jax.random.normal(k[5], (n_channel, num_classes), jnp.float32),
        "bfc": 0.05 * jax.random.normal(k[6], (num_classes,), jnp.float32),
    }

    ref = svhn_reference(x, params)

    # Exact f32 MXU path: tight check against the lax reference.
    out_f32 = jax.block_until_ready(svhn_forward(x, params, mxu_dtype=jnp.float32))
    assert out_f32.shape == (N, num_classes), out_f32.shape
    assert jnp.allclose(out_f32, ref, atol=1e-3, rtol=1e-3), (
        float(jnp.max(jnp.abs(out_f32 - ref))))

    # Default bf16-MXU path (f32 accumulation): looser tolerance for bf16 rounding.
    out_bf16 = jax.block_until_ready(svhn_forward(x, params))
    assert out_bf16.shape == (N, num_classes), out_bf16.shape
    assert jnp.allclose(out_bf16, ref, atol=3e-2, rtol=3e-2), (
        float(jnp.max(jnp.abs(out_bf16 - ref))))

    print("KERNEL_OK")
</pallas_src>

<mosaic_0001>
module attributes {stable_mosaic.version = 11 : i64} {
  func.func @_svhn_fused_kernel(%arg0: i32, %arg1: memref<2x16x16x4xf32, #tpu.memory_space<vmem>>, %arg2: memref<36x8xf32, #tpu.memory_space<vmem>>, %arg3: memref<1x8xf32, #tpu.memory_space<vmem>>, %arg4: memref<72x16xf32, #tpu.memory_space<vmem>>, %arg5: memref<1x16xf32, #tpu.memory_space<vmem>>, %arg6: memref<256x10xf32, #tpu.memory_space<vmem>>, %arg7: memref<1x10xf32, #tpu.memory_space<vmem>>, %arg8: memref<2x10xf32, #tpu.memory_space<vmem>>, %arg9: memref<2x18x32x4xf32, #tpu.memory_space<vmem>>, %arg10: memref<2x10x24x8xf32, #tpu.memory_space<vmem>>) attributes {dimension_semantics = [#tpu.dimension_semantics<parallel>], iteration_bounds = array<i64: 1>, scalar_prefetch = 0 : i64, scratch_operands = 2 : i64, tpu.core_type = #tpu.core_type<tc>, window_params = [{transform_indices = @transform_0, window_bounds = array<i64: 2, 16, 16, 4>}, {pipeline_mode = #tpu.pipeline_mode<synchronous>, transform_indices = @transform_1, window_bounds = array<i64: 36, 8>}, {pipeline_mode = #tpu.pipeline_mode<synchronous>, transform_indices = @transform_2, window_bounds = array<i64: 1, 8>}, {pipeline_mode = #tpu.pipeline_mode<synchronous>, transform_indices = @transform_3, window_bounds = array<i64: 72, 16>}, {pipeline_mode = #tpu.pipeline_mode<synchronous>, transform_indices = @transform_4, window_bounds = array<i64: 1, 16>}, {pipeline_mode = #tpu.pipeline_mode<synchronous>, transform_indices = @transform_5, window_bounds = array<i64: 256, 10>}, {pipeline_mode = #tpu.pipeline_mode<synchronous>, transform_indices = @transform_6, window_bounds = array<i64: 1, 10>}, {transform_indices = @transform_7, window_bounds = array<i64: 2, 10>}]} {
    %c0 = arith.constant 0 : index
    %c0_0 = arith.constant 0 : index
    %c0_1 = arith.constant 0 : index
    %c0_2 = arith.constant 0 : index
    %0 = vector.load %arg1[%c0, %c0_0, %c0_1, %c0_2] : memref<2x16x16x4xf32, #tpu.memory_space<vmem>>, vector<2x16x16x4xf32>
    %cst = arith.constant 0.000000e+00 : f32
    %1 = vector.broadcast %cst : f32 to vector<2x1x32x4xf32>
    %c0_3 = arith.constant 0 : index
    %c0_4 = arith.constant 0 : index
    %c0_5 = arith.constant 0 : index
    %c0_6 = arith.constant 0 : index
    %2 = vector.load %arg9[%c0_3, %c0_4, %c0_5, %c0_6] : memref<2x18x32x4xf32, #tpu.memory_space<vmem>>, vector<2x1x32x4xf32>
    tpu.vector_store %arg9[%c0_3, %c0_4, %c0_5, %c0_6], %1 {strides = array<i32>} : memref<2x18x32x4xf32, #tpu.memory_space<vmem>>, vector<2x1x32x4xf32>,
    %c0_7 = arith.constant 0 : index
    %c17 = arith.constant 17 : index
    %c0_8 = arith.constant 0 : index
    %c0_9 = arith.constant 0 : index
    %3 = vector.load %arg9[%c0_7, %c17, %c0_8, %c0_9] : memref<2x18x32x4xf32, #tpu.memory_space<vmem>>, vector<2x1x32x4xf32>
    tpu.vector_store %arg9[%c0_7, %c17, %c0_8, %c0_9], %1 {strides = array<i32>} : memref<2x18x32x4xf32, #tpu.memory_space<vmem>>, vector<2x1x32x4xf32>,
    %cst_10 = arith.constant 0.000000e+00 : f32
    %4 = vector.broadcast %cst_10 : f32 to vector<2x16x8x4xf32>
    %c0_11 = arith.constant 0 : index
    %c1 = arith.constant 1 : index
    %c0_12 = arith.constant 0 : index
    %c0_13 = arith.constant 0 : index
    %5 = vector.load %arg9[%c0_11, %c1, %c0_12, %c0_13] : memref<2x18x32x4xf32, #tpu.memory_space<vmem>>, vector<2x16x8x4xf32>
    tpu.vector_store %arg9[%c0_11, %c1, %c0_12, %c0_13], %4 {strides = array<i32>} : memref<2x18x32x4xf32, #tpu.memory_space<vmem>>, vector<2x16x8x4xf32>,
    %cst_14 = arith.constant 0.000000e+00 : f32
    %6 = vector.broadcast %cst_14 : f32 to vector<2x16x8x4xf32>
    %c0_15 = arith.constant 0 : index
    %c1_16 = arith.constant 1 : index
    %c24 = arith.constant 24 : index
    %c0_17 = arith.constant 0 : index
    %7 = vector.load %arg9[%c0_15, %c1_16, %c24, %c0_17] : memref<2x18x32x4xf32, #tpu.memory_space<vmem>>, vector<2x16x8x4xf32>
    tpu.vector_store %arg9[%c0_15, %c1_16, %c24, %c0_17], %6 {strides = array<i32>} : memref<2x18x32x4xf32, #tpu.memory_space<vmem>>, vector<2x16x8x4xf32>,
    %c0_18 = arith.constant 0 : index
    %c1_19 = arith.constant 1 : index
    %c8 = arith.constant 8 : index
    %c0_20 = arith.constant 0 : index
    %8 = vector.load %arg9[%c0_18, %c1_19, %c8, %c0_20] : memref<2x18x32x4xf32, #tpu.memory_space<vmem>>, vector<2x16x16x4xf32>
    tpu.vector_store %arg9[%c0_18, %c1_19, %c8, %c0_20], %0 {strides = array<i32>} : memref<2x18x32x4xf32, #tpu.memory_space<vmem>>, vector<2x16x16x4xf32>,
    %c0_21 = arith.constant 0 : index
    %c0_22 = arith.constant 0 : index
    %c7 = arith.constant 7 : index
    %c0_23 = arith.constant 0 : index
    %9 = vector.load %arg9[%c0_21, %c0_22, %c7, %c0_23] : memref<2x18x32x4xf32, #tpu.memory_space<vmem>>, vector<2x16x16x4xf32>
    %c0_24 = arith.constant 0 : index
    %c0_25 = arith.constant 0 : index
    %c8_26 = arith.constant 8 : index
    %c0_27 = arith.constant 0 : index
    %10 = vector.load %arg9[%c0_24, %c0_25, %c8_26, %c0_27] : memref<2x18x32x4xf32, #tpu.memory_space<vmem>>, vector<2x16x16x4xf32>
    %c0_28 = arith.constant 0 : index
    %c0_29 = arith.constant 0 : index
    %c9 = arith.constant 9 : index
    %c0_30 = arith.constant 0 : index
    %11 = vector.load %arg9[%c0_28, %c0_29, %c9, %c0_30] : memref<2x18x32x4xf32, #tpu.memory_space<vmem>>, vector<2x16x16x4xf32>
    %c0_31 = arith.constant 0 : index
    %c1_32 = arith.constant 1 : index
    %c7_33 = arith.constant 7 : index
    %c0_34 = arith.constant 0 : index
    %12 = vector.load %arg9[%c0_31, %c1_32, %c7_33, %c0_34] : memref<2x18x32x4xf32, #tpu.memory_space<vmem>>, vector<2x16x16x4xf32>
    %c0_35 = arith.constant 0 : index
    %c1_36 = arith.constant 1 : index
    %c8_37 = arith.constant 8 : index
    %c0_38 = arith.constant 0 : index
    %13 = vector.load %arg9[%c0_35, %c1_36, %c8_37, %c0_38] : memref<2x18x32x4xf32, #tpu.memory_space<vmem>>, vector<2x16x16x4xf32>
    %c0_39 = arith.constant 0 : index
    %c1_40 = arith.constant 1 : index
    %c9_41 = arith.constant 9 : index
    %c0_42 = arith.constant 0 : index
    %14 = vector.load %arg9[%c0_39, %c1_40, %c9_41, %c0_42] : memref<2x18x32x4xf32, #tpu.memory_space<vmem>>, vector<2x16x16x4xf32>
    %c0_43 = arith.constant 0 : index
    %c2 = arith.constant 2 : index
    %c7_44 = arith.constant 7 : index
    %c0_45 = arith.constant 0 : index
    %15 = vector.load %arg9[%c0_43, %c2, %c7_44, %c0_45] : memref<2x18x32x4xf32, #tpu.memory_space<vmem>>, vector<2x16x16x4xf32>
    %c0_46 = arith.constant 0 : index
    %c2_47 = arith.constant 2 : index
    %c8_48 = arith.constant 8 : index
    %c0_49 = arith.constant 0 : index
    %16 = vector.load %arg9[%c0_46, %c2_47, %c8_48, %c0_49] : memref<2x18x32x4xf32, #tpu.memory_space<vmem>>, vector<2x16x16x4xf32>
    %c0_50 = arith.constant 0 : index
    %c2_51 = arith.constant 2 : index
    %c9_52 = arith.constant 9 : index
    %c0_53 = arith.constant 0 : index
    %17 = vector.load %arg9[%c0_50, %c2_51, %c9_52, %c0_53] : memref<2x18x32x4xf32, #tpu.memory_space<vmem>>, vector<2x16x16x4xf32>
    %18 = tpu.concatenate %9, %10, %11, %12, %13, %14, %15, %16, %17 in 3 : vector<2x16x16x4xf32>, vector<2x16x16x4xf32>, vector<2x16x16x4xf32>, vector<2x16x16x4xf32>, vector<2x16x16x4xf32>, vector<2x16x16x4xf32>, vector<2x16x16x4xf32>, vector<2x16x16x4xf32>, vector<2x16x16x4xf32> -> vector<2x16x16x36xf32>
    %19 = vector.shape_cast %18 : vector<2x16x16x36xf32> to vector<512x36xf32>
    %c0_54 = arith.constant 0 : index
    %c0_55 = arith.constant 0 : index
    %20 = vector.load %arg2[%c0_54, %c0_55] : memref<36x8xf32, #tpu.memory_space<vmem>>, vector<36x8xf32>
    %cst_56 = arith.constant dense<0.000000e+00> : vector<512x8xf32>
    %21 = tpu.matmul %19, %20, %cst_56 {dimension_numbers = #tpu.dot_dimension_numbers<[1], [0], [0], [1], [0, 0, 1, 1], [], []>} : vector<512x36xf32>, vector<36x8xf32>, vector<512x8xf32> -> vector<512x8xf32>
    %c0_57 = arith.constant 0 : index
    %c0_58 = arith.constant 0 : index
    %22 = vector.load %arg3[%c0_57, %c0_58] : memref<1x8xf32, #tpu.memory_space<vmem>>, vector<1x8xf32>
    %23 = vector.broadcast %22 : vector<1x8xf32> to vector<512x8xf32>
    %24 = arith.addf %21, %23 : vector<512x8xf32>
    %cst_59 = arith.constant 0.000000e+00 : f32
    %25 = vector.broadcast %cst_59 : f32 to vector<512x8xf32>
    %26 = arith.maximumf %24, %25 : vector<512x8xf32>
    %27 = vector.shape_cast %26 : vector<512x8xf32> to vector<16x2x8x2x8xf32>
    %cst_60 = arith.constant dense<0xFF800000> : vector<16x2x8x8xf32>
    %28 = vector.multi_reduction <maximumf>, %27, %cst_60 [3] : vector<16x2x8x2x8xf32> to vector<16x2x8x8xf32>
    %cst_61 = arith.constant dense<0xFF800000> : vector<16x8x8xf32>
    %29 = vector.multi_reduction <maximumf>, %28, %cst_61 [1] : vector<16x2x8x8xf32> to vector<16x8x8xf32>
    %30 = vector.shape_cast %29 : vector<16x8x8xf32> to vector<2x8x8x8xf32>
    %cst_62 = arith.constant 0.000000e+00 : f32
    %31 = vector.broadcast %cst_62 : f32 to vector<2x1x24x8xf32>
    %c0_63 = arith.constant 0 : index
    %c0_64 = arith.constant 0 : index
    %c0_65 = arith.constant 0 : index
    %c0_66 = arith.constant 0 : index
    %32 = vector.load %arg10[%c0_63, %c0_64, %c0_65, %c0_66] : memref<2x10x24x8xf32, #tpu.memory_space<vmem>>, vector<2x1x24x8xf32>
    tpu.vector_store %arg10[%c0_63, %c0_64, %c0_65, %c0_66], %31 {strides = array<i32>} : memref<2x10x24x8xf32, #tpu.memory_space<vmem>>, vector<2x1x24x8xf32>,
    %c0_67 = arith.constant 0 : index
    %c9_68 = arith.constant 9 : index
    %c0_69 = arith.constant 0 : index
    %c0_70 = arith.constant 0 : index
    %33 = vector.load %arg10[%c0_67, %c9_68, %c0_69, %c0_70] : memref<2x10x24x8xf32, #tpu.memory_space<vmem>>, vector<2x1x24x8xf32>
    tpu.vector_store %arg10[%c0_67, %c9_68, %c0_69, %c0_70], %31 {strides = array<i32>} : memref<2x10x24x8xf32, #tpu.memory_space<vmem>>, vector<2x1x24x8xf32>,
    %cst_71 = arith.constant 0.000000e+00 : f32
    %34 = vector.broadcast %cst_71 : f32 to vector<2x8x8x8xf32>
    %c0_72 = arith.constant 0 : index
    %c1_73 = arith.constant 1 : index
    %c0_74 = arith.constant 0 : index
    %c0_75 = arith.constant 0 : index
    %35 = vector.load %arg10[%c0_72, %c1_73, %c0_74, %c0_75] : memref<2x10x24x8xf32, #tpu.memory_space<vmem>>, vector<2x8x8x8xf32>
    tpu.vector_store %arg10[%c0_72, %c1_73, %c0_74, %c0_75], %34 {strides = array<i32>} : memref<2x10x24x8xf32, #tpu.memory_space<vmem>>, vector<2x8x8x8xf32>,
    %cst_76 = arith.constant 0.000000e+00 : f32
    %36 = vector.broadcast %cst_76 : f32 to vector<2x8x8x8xf32>
    %c0_77 = arith.constant 0 : index
    %c1_78 = arith.constant 1 : index
    %c16 = arith.constant 16 : index
    %c0_79 = arith.constant 0 : index
    %37 = vector.load %arg10[%c0_77, %c1_78, %c16, %c0_79] : memref<2x10x24x8xf32, #tpu.memory_space<vmem>>, vector<2x8x8x8xf32>
    tpu.vector_store %arg10[%c0_77, %c1_78, %c16, %c0_79], %36 {strides = array<i32>} : memref<2x10x24x8xf32, #tpu.memory_space<vmem>>, vector<2x8x8x8xf32>,
    %c0_80 = arith.constant 0 : index
    %c1_81 = arith.constant 1 : index
    %c8_82 = arith.constant 8 : index
    %c0_83 = arith.constant 0 : index
    %38 = vector.load %arg10[%c0_80, %c1_81, %c8_82, %c0_83] : memref<2x10x24x8xf32, #tpu.memory_space<vmem>>, vector<2x8x8x8xf32>
    tpu.vector_store %arg10[%c0_80, %c1_81, %c8_82, %c0_83], %30 {strides = array<i32>} : memref<2x10x24x8xf32, #tpu.memory_space<vmem>>, vector<2x8x8x8xf32>,
    %c0_84 = arith.constant 0 : index
    %c0_85 = arith.constant 0 : index
    %c7_86 = arith.constant 7 : index
    %c0_87 = arith.constant 0 : index
    %39 = vector.load %arg10[%c0_84, %c0_85, %c7_86, %c0_87] : memref<2x10x24x8xf32, #tpu.memory_space<vmem>>, vector<2x8x8x8xf32>
    %c0_88 = arith.constant 0 : index
    %c0_89 = arith.constant 0 : index
    %c8_90 = arith.constant 8 : index
    %c0_91 = arith.constant 0 : index
    %40 = vector.load %arg10[%c0_88, %c0_89, %c8_90, %c0_91] : memref<2x10x24x8xf32, #tpu.memory_space<vmem>>, vector<2x8x8x8xf32>
    %c0_92 = arith.constant 0 : index
    %c0_93 = arith.constant 0 : index
    %c9_94 = arith.constant 9 : index
    %c0_95 = arith.constant 0 : index
    %41 = vector.load %arg10[%c0_92, %c0_93, %c9_94, %c0_95] : memref<2x10x24x8xf32, #tpu.memory_space<vmem>>, vector<2x8x8x8xf32>
    %c0_96 = arith.constant 0 : index
    %c1_97 = arith.constant 1 : index
    %c7_98 = arith.constant 7 : index
    %c0_99 = arith.constant 0 : index
    %42 = vector.load %arg10[%c0_96, %c1_97, %c7_98, %c0_99] : memref<2x10x24x8xf32, #tpu.memory_space<vmem>>, vector<2x8x8x8xf32>
    %c0_100 = arith.constant 0 : index
    %c1_101 = arith.constant 1 : index
    %c8_102 = arith.constant 8 : index
    %c0_103 = arith.constant 0 : index
    %43 = vector.load %arg10[%c0_100, %c1_101, %c8_102, %c0_103] : memref<2x10x24x8xf32, #tpu.memory_space<vmem>>, vector<2x8x8x8xf32>
    %c0_104 = arith.constant 0 : index
    %c1_105 = arith.constant 1 : index
    %c9_106 = arith.constant 9 : index
    %c0_107 = arith.constant 0 : index
    %44 = vector.load %arg10[%c0_104, %c1_105, %c9_106, %c0_107] : memref<2x10x24x8xf32, #tpu.memory_space<vmem>>, vector<2x8x8x8xf32>
    %c0_108 = arith.constant 0 : index
    %c2_109 = arith.constant 2 : index
    %c7_110 = arith.constant 7 : index
    %c0_111 = arith.constant 0 : index
    %45 = vector.load %arg10[%c0_108, %c2_109, %c7_110, %c0_111] : memref<2x10x24x8xf32, #tpu.memory_space<vmem>>, vector<2x8x8x8xf32>
    %c0_112 = arith.constant 0 : index
    %c2_113 = arith.constant 2 : index
    %c8_114 = arith.constant 8 : index
    %c0_115 = arith.constant 0 : index
    %46 = vector.load %arg10[%c0_112, %c2_113, %c8_114, %c0_115] : memref<2x10x24x8xf32, #tpu.memory_space<vmem>>, vector<2x8x8x8xf32>
    %c0_116 = arith.constant 0 : index
    %c2_117 = arith.constant 2 : index
    %c9_118 = arith.constant 9 : index
    %c0_119 = arith.constant 0 : index
    %47 = vector.load %arg10[%c0_116, %c2_117, %c9_118, %c0_119] : memref<2x10x24x8xf32, #tpu.memory_space<vmem>>, vector<2x8x8x8xf32>
    %48 = tpu.concatenate %39, %40, %41, %42, %43, %44, %45, %46, %47 in 3 : vector<2x8x8x8xf32>, vector<2x8x8x8xf32>, vector<2x8x8x8xf32>, vector<2x8x8x8xf32>, vector<2x8x8x8xf32>, vector<2x8x8x8xf32>, vector<2x8x8x8xf32>, vector<2x8x8x8xf32>, vector<2x8x8x8xf32> -> vector<2x8x8x72xf32>
    %49 = vector.shape_cast %48 : vector<2x8x8x72xf32> to vector<128x72xf32>
    %c0_120 = arith.constant 0 : index
    %c0_121 = arith.constant 0 : index
    %50 = vector.load %arg4[%c0_120, %c0_121] : memref<72x16xf32, #tpu.memory_space<vmem>>, vector<72x16xf32>
    %cst_122 = arith.constant dense<0.000000e+00> : vector<128x16xf32>
    %51 = tpu.matmul %49, %50, %cst_122 {dimension_numbers = #tpu.dot_dimension_numbers<[1], [0], [0], [1], [0, 0, 1, 1], [], []>} : vector<128x72xf32>, vector<72x16xf32>, vector<128x16xf32> -> vector<128x16xf32>
    %c0_123 = arith.constant 0 : index
    %c0_124 = arith.constant 0 : index
    %52 = vector.load %arg5[%c0_123, %c0_124] : memref<1x16xf32, #tpu.memory_space<vmem>>, vector<1x16xf32>
    %53 = vector.broadcast %52 : vector<1x16xf32> to vector<128x16xf32>
    %54 = arith.addf %51, %53 : vector<128x16xf32>
    %cst_125 = arith.constant 0.000000e+00 : f32
    %55 = vector.broadcast %cst_125 : f32 to vector<128x16xf32>
    %56 = arith.maximumf %54, %55 : vector<128x16xf32>
    %57 = vector.shape_cast %56 : vector<128x16xf32> to vector<8x2x4x2x16xf32>
    %cst_126 = arith.constant dense<0xFF800000> : vector<8x2x4x16xf32>
    %58 = vector.multi_reduction <maximumf>, %57, %cst_126 [3] : vector<8x2x4x2x16xf32> to vector<8x2x4x16xf32>
    %cst_127 = arith.constant dense<0xFF800000> : vector<8x4x16xf32>
    %59 = vector.multi_reduction <maximumf>, %58, %cst_127 [1] : vector<8x2x4x16xf32> to vector<8x4x16xf32>
    %60 = vector.shape_cast %59 : vector<8x4x16xf32> to vector<2x4x4x16xf32>
    %61 = vector.extract_strided_slice %60 {offsets = [0, 0, 0, 0], sizes = [2, 1, 1, 16], strides = [1, 1, 1, 1]} : vector<2x4x4x16xf32> to vector<2x1x1x16xf32>
    %62 = vector.shape_cast %61 : vector<2x1x1x16xf32> to vector<2x16xf32>
    %63 = vector.extract_strided_slice %60 {offsets = [0, 0, 1, 0], sizes = [2, 1, 1, 16], strides = [1, 1, 1, 1]} : vector<2x4x4x16xf32> to vector<2x1x1x16xf32>
    %64 = vector.shape_cast %63 : vector<2x1x1x16xf32> to vector<2x16xf32>
    %65 = vector.extract_strided_slice %60 {offsets = [0, 0, 2, 0], sizes = [2, 1, 1, 16], strides = [1, 1, 1, 1]} : vector<2x4x4x16xf32> to vector<2x1x1x16xf32>
    %66 = vector.shape_cast %65 : vector<2x1x1x16xf32> to vector<2x16xf32>
    %67 = vector.extract_strided_slice %60 {offsets = [0, 0, 3, 0], sizes = [2, 1, 1, 16], strides = [1, 1, 1, 1]} : vector<2x4x4x16xf32> to vector<2x1x1x16xf32>
    %68 = vector.shape_cast %67 : vector<2x1x1x16xf32> to vector<2x16xf32>
    %69 = vector.extract_strided_slice %60 {offsets = [0, 1, 0, 0], sizes = [2, 1, 1, 16], strides = [1, 1, 1, 1]} : vector<2x4x4x16xf32> to vector<2x1x1x16xf32>
    %70 = vector.shape_cast %69 : vector<2x1x1x16xf32> to vector<2x16xf32>
    %71 = vector.extract_strided_slice %60 {offsets = [0, 1, 1, 0], sizes = [2, 1, 1, 16], strides = [1, 1, 1, 1]} : vector<2x4x4x16xf32> to vector<2x1x1x16xf32>
    %72 = vector.shape_cast %71 : vector<2x1x1x16xf32> to vector<2x16xf32>
    %73 = vector.extract_strided_slice %60 {offsets = [0, 1, 2, 0], sizes = [2, 1, 1, 16], strides = [1, 1, 1, 1]} : vector<2x4x4x16xf32> to vector<2x1x1x16xf32>
    %74 = vector.shape_cast %73 : vector<2x1x1x16xf32> to vector<2x16xf32>
    %75 = vector.extract_strided_slice %60 {offsets = [0, 1, 3, 0], sizes = [2, 1, 1, 16], strides = [1, 1, 1, 1]} : vector<2x4x4x16xf32> to vector<2x1x1x16xf32>
    %76 = vector.shape_cast %75 : vector<2x1x1x16xf32> to vector<2x16xf32>
    %77 = vector.extract_strided_slice %60 {offsets = [0, 2, 0, 0], sizes = [2, 1, 1, 16], strides = [1, 1, 1, 1]} : vector<2x4x4x16xf32> to vector<2x1x1x16xf32>
    %78 = vector.shape_cast %77 : vector<2x1x1x16xf32> to vector<2x16xf32>
    %79 = vector.extract_strided_slice %60 {offsets = [0, 2, 1, 0], sizes = [2, 1, 1, 16], strides = [1, 1, 1, 1]} : vector<2x4x4x16xf32> to vector<2x1x1x16xf32>
    %80 = vector.shape_cast %79 : vector<2x1x1x16xf32> to vector<2x16xf32>
    %81 = vector.extract_strided_slice %60 {offsets = [0, 2, 2, 0], sizes = [2, 1, 1, 16], strides = [1, 1, 1, 1]} : vector<2x4x4x16xf32> to vector<2x1x1x16xf32>
    %82 = vector.shape_cast %81 : vector<2x1x1x16xf32> to vector<2x16xf32>
    %83 = vector.extract_strided_slice %60 {offsets = [0, 2, 3, 0], sizes = [2, 1, 1, 16], strides = [1, 1, 1, 1]} : vector<2x4x4x16xf32> to vector<2x1x1x16xf32>
    %84 = vector.shape_cast %83 : vector<2x1x1x16xf32> to vector<2x16xf32>
    %85 = vector.extract_strided_slice %60 {offsets = [0, 3, 0, 0], sizes = [2, 1, 1, 16], strides = [1, 1, 1, 1]} : vector<2x4x4x16xf32> to vector<2x1x1x16xf32>
    %86 = vector.shape_cast %85 : vector<2x1x1x16xf32> to vector<2x16xf32>
    %87 = vector.extract_strided_slice %60 {offsets = [0, 3, 1, 0], sizes = [2, 1, 1, 16], strides = [1, 1, 1, 1]} : vector<2x4x4x16xf32> to vector<2x1x1x16xf32>
    %88 = vector.shape_cast %87 : vector<2x1x1x16xf32> to vector<2x16xf32>
    %89 = vector.extract_strided_slice %60 {offsets = [0, 3, 2, 0], sizes = [2, 1, 1, 16], strides = [1, 1, 1, 1]} : vector<2x4x4x16xf32> to vector<2x1x1x16xf32>
    %90 = vector.shape_cast %89 : vector<2x1x1x16xf32> to vector<2x16xf32>
    %91 = vector.extract_strided_slice %60 {offsets = [0, 3, 3, 0], sizes = [2, 1, 1, 16], strides = [1, 1, 1, 1]} : vector<2x4x4x16xf32> to vector<2x1x1x16xf32>
    %92 = vector.shape_cast %91 : vector<2x1x1x16xf32> to vector<2x16xf32>
    %93 = tpu.concatenate %62, %64, %66, %68, %70, %72, %74, %76, %78, %80, %82, %84, %86, %88, %90, %92 in 1 : vector<2x16xf32>, vector<2x16xf32>, vector<2x16xf32>, vector<2x16xf32>, vector<2x16xf32>, vector<2x16xf32>, vector<2x16xf32>, vector<2x16xf32>, vector<2x16xf32>, vector<2x16xf32>, vector<2x16xf32>, vector<2x16xf32>, vector<2x16xf32>, vector<2x16xf32>, vector<2x16xf32>, vector<2x16xf32> -> vector<2x256xf32>
    %c0_128 = arith.constant 0 : index
    %c0_129 = arith.constant 0 : index
    %94 = vector.load %arg6[%c0_128, %c0_129] : memref<256x10xf32, #tpu.memory_space<vmem>>, vector<256x10xf32>
    %cst_130 = arith.constant dense<0.000000e+00> : vector<2x10xf32>
    %95 = tpu.matmul %93, %94, %cst_130 {dimension_numbers = #tpu.dot_dimension_numbers<[1], [0], [0], [1], [0, 0, 1, 1], [], []>} : vector<2x256xf32>, vector<256x10xf32>, vector<2x10xf32> -> vector<2x10xf32>
    %c0_131 = arith.constant 0 : index
    %c0_132 = arith.constant 0 : index
    %96 = vector.load %arg7[%c0_131, %c0_132] : memref<1x10xf32, #tpu.memory_space<vmem>>, vector<1x10xf32>
    %97 = vector.broadcast %96 : vector<1x10xf32> to vector<2x10xf32>
    %98 = arith.addf %95, %97 : vector<2x10xf32>
    %c0_133 = arith.constant 0 : index
    %c0_134 = arith.constant 0 : index
    %99 = vector.load %arg8[%c0_133, %c0_134] : memref<2x10xf32, #tpu.memory_space<vmem>>, vector<2x10xf32>
    tpu.vector_store %arg8[%c0_133, %c0_134], %98 {strides = array<i32>} : memref<2x10xf32, #tpu.memory_space<vmem>>, vector<2x10xf32>,
    return
  }
  func.func @transform_0(%arg0: i32) -> (i32, i32, i32, i32) {
    %c0_i32 = arith.constant 0 : i32
    %c0_i32_0 = arith.constant 0 : i32
    %c0_i32_1 = arith.constant 0 : i32
    %c0_i32_2 = arith.constant 0 : i32
    return %arg0, %c0_i32, %c0_i32_0, %c0_i32_1 : i32, i32, i32, i32
  }
  func.func @transform_1(%arg0: i32) -> (i32, i32) {
    %c0_i32 = arith.constant 0 : i32
    %c0_i32_0 = arith.constant 0 : i32
    %c0_i32_1 = arith.constant 0 : i32
    return %c0_i32, %c0_i32_0 : i32, i32
  }
  func.func @transform_2(%arg0: i32) -> (i32, i32) {
    %c0_i32 = arith.constant 0 : i32
    %c0_i32_0 = arith.constant 0 : i32
    %c0_i32_1 = arith.constant 0 : i32
    return %c0_i32, %c0_i32_0 : i32, i32
  }
  func.func @transform_3(%arg0: i32) -> (i32, i32) {
    %c0_i32 = arith.constant 0 : i32
    %c0_i32_0 = arith.constant 0 : i32
    %c0_i32_1 = arith.constant 0 : i32
    return %c0_i32, %c0_i32_0 : i32, i32
  }
  func.func @transform_4(%arg0: i32) -> (i32, i32) {
    %c0_i32 = arith.constant 0 : i32
    %c0_i32_0 = arith.constant 0 : i32
    %c0_i32_1 = arith.constant 0 : i32
    return %c0_i32, %c0_i32_0 : i32, i32
  }
  func.func @transform_5(%arg0: i32) -> (i32, i32) {
    %c0_i32 = arith.constant 0 : i32
    %c0_i32_0 = arith.constant 0 : i32
    %c0_i32_1 = arith.constant 0 : i32
    return %c0_i32, %c0_i32_0 : i32, i32
  }
  func.func @transform_6(%arg0: i32) -> (i32, i32) {
    %c0_i32 = arith.constant 0 : i32
    %c0_i32_0 = arith.constant 0 : i32
    %c0_i32_1 = arith.constant 0 : i32
    return %c0_i32, %c0_i32_0 : i32, i32
  }
  func.func @transform_7(%arg0: i32) -> (i32, i32) {
    %c0_i32 = arith.constant 0 : i32
    %c0_i32_0 = arith.constant 0 : i32
    return %arg0, %c0_i32 : i32, i32
  }
}

</mosaic_0001>

<bundles_post_ra>
// kernel: tpu_custom_call.1
= control target key start
LH: loop header
LB: loop body
LE: loop exit
PB: predicated region body
PF: predicated region fallthrough
CT: control target
= control target key end

     0   :  { %vm91_vm0 = vcmask 31744   ;;  %v10602_v3 = vmov 0.0   ;;  %s10603_s26 = smov 4   ;;  %s16682_s0 = inlined_call_operand.vmem [shape: f32[2,16,16,4], index: 0, kind: input, shape index: {}]   ;;  %s16683_s1 = inlined_call_operand.vmem [shape: f32[36,8], index: 1, kind: input, shape index: {}]   ;;  %s16684_s2 = inlined_call_operand.vmem [shape: f32[1,8], index: 2, kind: input, shape index: {}]   ;;  %s16685_s3 = inlined_call_operand.vmem [shape: f32[72,16], index: 3, kind: input, shape index: {}]   ;;  %s16686_s4 = inlined_call_operand.vmem [shape: f32[1,16], index: 4, kind: input, shape index: {}]   ;;  %s16687_s5 = inlined_call_operand.vmem [shape: f32[256,10], index: 5, kind: input, shape index: {}]   ;;  %s16688_s6 = inlined_call_operand.vmem [shape: f32[1,10], index: 6, kind: input, shape index: {}]   ;;  %s16689_s7 = inlined_call_operand.hbm [shape: f32[2,10], index: 7, kind: output, shape index: {}]  }
   0x1   :  { %v10663_v0 = vld [vmem:[%s16682_s0] sm:$0xff]  ;;  %v10668_v1 = vld [vmem:[%s16682_s0 + $0x8] sm:$0xff]  ;;  %v10673_v2 = vld [vmem:[%s16682_s0 + $0x10] sm:$0xff]  ;;  %93 = vst.msk [vmem:[#allocation2 + $0x8] sm:$0xff] %vm91_vm0, %v10602_v3 }
   0x2   :  { %92 = vst.msk [vmem:[#allocation2] sm:$0xff] %vm91_vm0, %v10602_v3  ;;  %94 = vst.msk [vmem:[#allocation2 + $0x10] sm:$0xff] %vm91_vm0, %v10602_v3  ;;  %v30_v4 = vld [vmem:[%s16682_s0 + $0x18] sm:$0xff]  ;;  %v31_v5 = vld [vmem:[%s16682_s0 + $0x20] sm:$0xff] }
   0x3   :  { %95 = vst.msk [vmem:[#allocation2 + $0x18] sm:$0xff] %vm91_vm0, %v10602_v3  ;;  %96 = vst.msk [vmem:[#allocation2 + $0x240] sm:$0xff] %vm91_vm0, %v10602_v3  ;;  %v32_v6 = vld [vmem:[%s16682_s0 + $0x28] sm:$0xff]  ;;  %v33_v7 = vld [vmem:[%s16682_s0 + $0x30] sm:$0xff] }
   0x4   :  { %97 = vst.msk [vmem:[#allocation2 + $0x248] sm:$0xff] %vm91_vm0, %v10602_v3  ;;  %98 = vst.msk [vmem:[#allocation2 + $0x250] sm:$0xff] %vm91_vm0, %v10602_v3  ;;  %v34_v8 = vld [vmem:[%s16682_s0 + $0x38] sm:$0xff]  ;;  %v35_v9 = vld [vmem:[%s16682_s0 + $0x40] sm:$0xff] }
   0x5   :  { %99 = vst.msk [vmem:[#allocation2 + $0x258] sm:$0xff] %vm91_vm0, %v10602_v3  ;;  %101 = vst.msk [vmem:[#allocation2 + $0x220] sm:$0xff] %vm91_vm0, %v10602_v3  ;;  %v36_v10 = vld [vmem:[%s16682_s0 + $0x48] sm:$0xff]  ;;  %v37_v11 = vld [vmem:[%s16682_s0 + $0x50] sm:$0xff] }
   0x6   :  { %102 = vst.msk [vmem:[#allocation2 + $0x228] sm:$0xff] %vm91_vm0, %v10602_v3  ;;  %103 = vst.msk [vmem:[#allocation2 + $0x230] sm:$0xff] %vm91_vm0, %v10602_v3  ;;  %v38_v12 = vld [vmem:[%s16682_s0 + $0x58] sm:$0xff]  ;;  %v39_v13 = vld [vmem:[%s16682_s0 + $0x60] sm:$0xff] }
   0x7   :  { %104 = vst.msk [vmem:[#allocation2 + $0x238] sm:$0xff] %vm91_vm0, %v10602_v3  ;;  %105 = vst.msk [vmem:[#allocation2 + $0x460] sm:$0xff] %vm91_vm0, %v10602_v3  ;;  %v40_v14 = vld [vmem:[%s16682_s0 + $0x68] sm:$0xff]  ;;  %v41_v15 = vld [vmem:[%s16682_s0 + $0x70] sm:$0xff] }
   0x8   :  { %106 = vst.msk [vmem:[#allocation2 + $0x468] sm:$0xff] %vm91_vm0, %v10602_v3  ;;  %107 = vst.msk [vmem:[#allocation2 + $0x470] sm:$0xff] %vm91_vm0, %v10602_v3  ;;  %v42_v16 = vld [vmem:[%s16682_s0 + $0x78] sm:$0xff]  ;;  %v43_v17 = vld [vmem:[%s16682_s0 + $0x80] sm:$0xff] }
   0x9   :  { %108 = vst.msk [vmem:[#allocation2 + $0x478] sm:$0xff] %vm91_vm0, %v10602_v3  ;;  %110 = vst.msk [vmem:[#allocation2 + $0x20] sm:$0xff] %vm91_vm0, %v10602_v3  ;;  %v44_v18 = vld [vmem:[%s16682_s0 + $0x88] sm:$0xff]  ;;  %v45_v19 = vld [vmem:[%s16682_s0 + $0x90] sm:$0xff] }
   0xa   :  { %111 = vst.msk [vmem:[#allocation2 + $0x40] sm:$0xff] %vm91_vm0, %v10602_v3  ;;  %112 = vst.msk [vmem:[#allocation2 + $0x60] sm:$0xff] %vm91_vm0, %v10602_v3  ;;  %v46_v20 = vld [vmem:[%s16682_s0 + $0x98] sm:$0xff]  ;;  %v47_v21 = vld [vmem:[%s16682_s0 + $0xa0] sm:$0xff] }
   0xb   :  { %113 = vst.msk [vmem:[#allocation2 + $0x80] sm:$0xff] %vm91_vm0, %v10602_v3  ;;  %114 = vst.msk [vmem:[#allocation2 + $0xa0] sm:$0xff] %vm91_vm0, %v10602_v3  ;;  %v48_v22 = vld [vmem:[%s16682_s0 + $0xa8] sm:$0xff]  ;;  %v49_v23 = vld [vmem:[%s16682_s0 + $0xb0] sm:$0xff] }
   0xc   :  { %115 = vst.msk [vmem:[#allocation2 + $0xc0] sm:$0xff] %vm91_vm0, %v10602_v3  ;;  %116 = vst.msk [vmem:[#allocation2 + $0xe0] sm:$0xff] %vm91_vm0, %v10602_v3  ;;  %v50_v24 = vld [vmem:[%s16682_s0 + $0xb8] sm:$0xff]  ;;  %v302_v25 = vld [vmem:[#allocation2 + $0x8] sm:$0xff] }
   0xd   :  { %117 = vst.msk [vmem:[#allocation2 + $0x100] sm:$0xff] %vm91_vm0, %v10602_v3  ;;  %118 = vst.msk [vmem:[#allocation2 + $0x120] sm:$0xff] %vm91_vm0, %v10602_v3  ;;  %879 = vrot.lane.b32.xlu0 %v302_v25, %s10603_s26  ;;  %v303_v27 = vld [vmem:[#allocation2 + $0x10] sm:$0xff]  ;;  %v51_v32 = vld [vmem:[%s16682_s0 + $0xc0] sm:$0xff] }
   0xe   :  { %119 = vst.msk [vmem:[#allocation2 + $0x140] sm:$0xff] %vm91_vm0, %v10602_v3  ;;  %120 = vst.msk [vmem:[#allocation2 + $0x160] sm:$0xff] %vm91_vm0, %v10602_v3  ;;  %v52_v34 = vld [vmem:[%s16682_s0 + $0xc8] sm:$0xff]  ;;  %v53_v35 = vld [vmem:[%s16682_s0 + $0xd0] sm:$0xff] }
   0xf   :  { %121 = vst.msk [vmem:[#allocation2 + $0x180] sm:$0xff] %vm91_vm0, %v10602_v3  ;;  %122 = vst.msk [vmem:[#allocation2 + $0x1a0] sm:$0xff] %vm91_vm0, %v10602_v3  ;;  %v54_v36 = vld [vmem:[%s16682_s0 + $0xd8] sm:$0xff]  ;;  %v55_v37 = vld [vmem:[%s16682_s0 + $0xe0] sm:$0xff] }
  0x10   :  { %123 = vst.msk [vmem:[#allocation2 + $0x1c0] sm:$0xff] %vm91_vm0, %v10602_v3  ;;  %124 = vst.msk [vmem:[#allocation2 + $0x1e0] sm:$0xff] %vm91_vm0, %v10602_v3  ;;  %v56_v38 = vld [vmem:[%s16682_s0 + $0xe8] sm:$0xff]  ;;  %v59_v39 = vld [vmem:[%s16682_s0 + $0x100] sm:$0xff] }
  0x11   :  { %125 = vst.msk [vmem:[#allocation2 + $0x200] sm:$0xff] %vm91_vm0, %v10602_v3  ;;  %126 = vst.msk [vmem:[#allocation2 + $0x260] sm:$0xff] %vm91_vm0, %v10602_v3  ;;  %881 = vrot.lane.b32.xlu0 %v303_v27, %s10603_s26  ;;  %v60_v40 = vld [vmem:[%s16682_s0 + $0x108] sm:$0xff]  ;;  %v61_v42 = vld [vmem:[%s16682_s0 + $0x110] sm:$0xff] }
  0x12   :  { %127 = vst.msk [vmem:[#allocation2 + $0x280] sm:$0xff] %vm91_vm0, %v10602_v3  ;;  %128 = vst.msk [vmem:[#allocation2 + $0x2a0] sm:$0xff] %vm91_vm0, %v10602_v3  ;;  %v62_v43 = vld [vmem:[%s16682_s0 + $0x118] sm:$0xff]  ;;  %v63_v44 = vld [vmem:[%s16682_s0 + $0x120] sm:$0xff] }
  0x13   :  { %129 = vst.msk [vmem:[#allocation2 + $0x2c0] sm:$0xff] %vm91_vm0, %v10602_v3  ;;  %130 = vst.msk [vmem:[#allocation2 + $0x2e0] sm:$0xff] %vm91_vm0, %v10602_v3  ;;  %v64_v46 = vld [vmem:[%s16682_s0 + $0x128] sm:$0xff]  ;;  %v65_v47 = vld [vmem:[%s16682_s0 + $0x130] sm:$0xff] }
  0x14   :  { %131 = vst.msk [vmem:[#allocation2 + $0x300] sm:$0xff] %vm91_vm0, %v10602_v3  ;;  %132 = vst.msk [vmem:[#allocation2 + $0x320] sm:$0xff] %vm91_vm0, %v10602_v3  ;;  %v66_v48 = vld [vmem:[%s16682_s0 + $0x138] sm:$0xff]  ;;  %v67_v49 = vld [vmem:[%s16682_s0 + $0x140] sm:$0xff] }
  0x15   :  { %133 = vst.msk [vmem:[#allocation2 + $0x340] sm:$0xff] %vm91_vm0, %v10602_v3  ;;  %134 = vst.msk [vmem:[#allocation2 + $0x360] sm:$0xff] %vm91_vm0, %v10602_v3  ;;  %v68_v50 = vld [vmem:[%s16682_s0 + $0x148] sm:$0xff]  ;;  %v69_v51 = vld [vmem:[%s16682_s0 + $0x150] sm:$0xff] }
  0x16   :  { %135 = vst.msk [vmem:[#allocation2 + $0x380] sm:$0xff] %vm91_vm0, %v10602_v3  ;;  %136 = vst.msk [vmem:[#allocation2 + $0x3a0] sm:$0xff] %vm91_vm0, %v10602_v3  ;;  %v70_v52 = vld [vmem:[%s16682_s0 + $0x158] sm:$0xff]  ;;  %v71_v53 = vld [vmem:[%s16682_s0 + $0x160] sm:$0xff] }
  0x17   :  { %137 = vst.msk [vmem:[#allocation2 + $0x3c0] sm:$0xff] %vm91_vm0, %v10602_v3  ;;  %138 = vst.msk [vmem:[#allocation2 + $0x3e0] sm:$0xff] %vm91_vm0, %v10602_v3  ;;  %v72_v54 = vld [vmem:[%s16682_s0 + $0x168] sm:$0xff]  ;;  %v73_v55 = vld [vmem:[%s16682_s0 + $0x170] sm:$0xff] }
  0x18   :  { %139 = vst.msk [vmem:[#allocation2 + $0x400] sm:$0xff] %vm91_vm0, %v10602_v3  ;;  %140 = vst.msk [vmem:[#allocation2 + $0x420] sm:$0xff] %vm91_vm0, %v10602_v3  ;;  %v74_v56 = vld [vmem:[%s16682_s0 + $0x178] sm:$0xff]  ;;  %v75_v59 = vld [vmem:[%s16682_s0 + $0x180] sm:$0xff] }
  0x19   :  { %141 = vst.msk [vmem:[#allocation2 + $0x440] sm:$0xff] %vm91_vm0, %v10602_v3  ;;  %142 = vst.msk [vmem:[#allocation2 + $0x38] sm:$0xff] %vm91_vm0, %v10602_v3  ;;  %v76_v60 = vld [vmem:[%s16682_s0 + $0x188] sm:$0xff] }
  0x1a   :  { %143 = vst.msk [vmem:[#allocation2 + $0x58] sm:$0xff] %vm91_vm0, %v10602_v3  ;;  %144 = vst.msk [vmem:[#allocation2 + $0x78] sm:$0xff] %vm91_vm0, %v10602_v3 }
  0x1b   :  { %145 = vst.msk [vmem:[#allocation2 + $0x98] sm:$0xff] %vm91_vm0, %v10602_v3  ;;  %146 = vst.msk [vmem:[#allocation2 + $0xb8] sm:$0xff] %vm91_vm0, %v10602_v3 }
  0x1c   :  { %147 = vst.msk [vmem:[#allocation2 + $0xd8] sm:$0xff] %vm91_vm0, %v10602_v3  ;;  %148 = vst.msk [vmem:[#allocation2 + $0xf8] sm:$0xff] %vm91_vm0, %v10602_v3 }
  0x1d   :  { %149 = vst.msk [vmem:[#allocation2 + $0x118] sm:$0xff] %vm91_vm0, %v10602_v3  ;;  %150 = vst.msk [vmem:[#allocation2 + $0x138] sm:$0xff] %vm91_vm0, %v10602_v3 }
  0x1e   :  { %151 = vst.msk [vmem:[#allocation2 + $0x158] sm:$0xff] %vm91_vm0, %v10602_v3  ;;  %152 = vst.msk [vmem:[#allocation2 + $0x178] sm:$0xff] %vm91_vm0, %v10602_v3 }
  0x1f   :  { %153 = vst.msk [vmem:[#allocation2 + $0x198] sm:$0xff] %vm91_vm0, %v10602_v3  ;;  %154 = vst.msk [vmem:[#allocation2 + $0x1b8] sm:$0xff] %vm91_vm0, %v10602_v3 }
  0x20   :  { %155 = vst.msk [vmem:[#allocation2 + $0x1d8] sm:$0xff] %vm91_vm0, %v10602_v3  ;;  %156 = vst.msk [vmem:[#allocation2 + $0x1f8] sm:$0xff] %vm91_vm0, %v10602_v3 }
  0x21   :  { %157 = vst.msk [vmem:[#allocation2 + $0x218] sm:$0xff] %vm91_vm0, %v10602_v3  ;;  %158 = vst.msk [vmem:[#allocation2 + $0x278] sm:$0xff] %vm91_vm0, %v10602_v3 }
  0x22   :  { %159 = vst.msk [vmem:[#allocation2 + $0x298] sm:$0xff] %vm91_vm0, %v10602_v3  ;;  %160 = vst.msk [vmem:[#allocation2 + $0x2b8] sm:$0xff] %vm91_vm0, %v10602_v3 }
  0x23   :  { %161 = vst.msk [vmem:[#allocation2 + $0x2d8] sm:$0xff] %vm91_vm0, %v10602_v3  ;;  %162 = vst.msk [vmem:[#allocation2 + $0x2f8] sm:$0xff] %vm91_vm0, %v10602_v3 }
  0x24   :  { %163 = vst.msk [vmem:[#allocation2 + $0x318] sm:$0xff] %vm91_vm0, %v10602_v3  ;;  %164 = vst.msk [vmem:[#allocation2 + $0x338] sm:$0xff] %vm91_vm0, %v10602_v3 }
  0x25   :  { %165 = vst.msk [vmem:[#allocation2 + $0x358] sm:$0xff] %vm91_vm0, %v10602_v3  ;;  %166 = vst.msk [vmem:[#allocation2 + $0x378] sm:$0xff] %vm91_vm0, %v10602_v3 }
  0x26   :  { %167 = vst.msk [vmem:[#allocation2 + $0x398] sm:$0xff] %vm91_vm0, %v10602_v3  ;;  %168 = vst.msk [vmem:[#allocation2 + $0x3b8] sm:$0xff] %vm91_vm0, %v10602_v3 }
  0x27   :  { %169 = vst.msk [vmem:[#allocation2 + $0x3d8] sm:$0xff] %vm91_vm0, %v10602_v3  ;;  %170 = vst.msk [vmem:[#allocation2 + $0x3f8] sm:$0xff] %vm91_vm0, %v10602_v3 }
  0x28   :  { %171 = vst.msk [vmem:[#allocation2 + $0x418] sm:$0xff] %vm91_vm0, %v10602_v3  ;;  %172 = vst.msk [vmem:[#allocation2 + $0x438] sm:$0xff] %vm91_vm0, %v10602_v3 }
  0x29   :  { %173 = vst.msk [vmem:[#allocation2 + $0x458] sm:$0xff] %vm91_vm0, %v10602_v3  ;;  %174 = vst.msk [vmem:[#allocation2 + $0x28] sm:$0xff] %vm91_vm0, %v10663_v0  ;;  %v77_v0 = vld [vmem:[%s16682_s0 + $0x190] sm:$0xff] }
  0x2a   :  { %175 = vst.msk [vmem:[#allocation2 + $0x30] sm:$0xff] %vm91_vm0, %v10668_v1  ;;  %176 = vst.msk [vmem:[#allocation2 + $0x48] sm:$0xff] %vm91_vm0, %v10673_v2  ;;  %v78_v2 = vld [vmem:[%s16682_s0 + $0x198] sm:$0xff] }
  0x2b   :  { %177 = vst.msk [vmem:[#allocation2 + $0x50] sm:$0xff] %vm91_vm0, %v30_v4  ;;  %178 = vst.msk [vmem:[#allocation2 + $0x68] sm:$0xff] %vm91_vm0, %v31_v5  ;;  %v79_v4 = vld [vmem:[%s16682_s0 + $0x1a0] sm:$0xff]  ;;  %v80_v5 = vld [vmem:[%s16682_s0 + $0x1a8] sm:$0xff] }
  0x2c   :  { %179 = vst.msk [vmem:[#allocation2 + $0x70] sm:$0xff] %vm91_vm0, %v32_v6  ;;  %180 = vst.msk [vmem:[#allocation2 + $0x88] sm:$0xff] %vm91_vm0, %v33_v7  ;;  %v81_v6 = vld [vmem:[%s16682_s0 + $0x1b0] sm:$0xff]  ;;  %v82_v7 = vld [vmem:[%s16682_s0 + $0x1b8] sm:$0xff] }
  0x2d   :  { %181 = vst.msk [vmem:[#allocation2 + $0x90] sm:$0xff] %vm91_vm0, %v34_v8  ;;  %182 = vst.msk [vmem:[#allocation2 + $0xa8] sm:$0xff] %vm91_vm0, %v35_v9  ;;  %v83_v8 = vld [vmem:[%s16682_s0 + $0x1c0] sm:$0xff]  ;;  %v84_v9 = vld [vmem:[%s16682_s0 + $0x1c8] sm:$0xff] }
  0x2e   :  { %183 = vst.msk [vmem:[#allocation2 + $0xb0] sm:$0xff] %vm91_vm0, %v36_v10  ;;  %184 = vst.msk [vmem:[#allocation2 + $0xc8] sm:$0xff] %vm91_vm0, %v37_v11  ;;  %v85_v10 = vld [vmem:[%s16682_s0 + $0x1d0] sm:$0xff]  ;;  %v86_v11 = vld [vmem:[%s16682_s0 + $0x1d8] sm:$0xff] }
  0x2f   :  { %185 = vst.msk [vmem:[#allocation2 + $0xd0] sm:$0xff] %vm91_vm0, %v38_v12  ;;  %186 = vst.msk [vmem:[#allocation2 + $0xe8] sm:$0xff] %vm91_vm0, %v39_v13 }
  0x30   :  { %187 = vst.msk [vmem:[#allocation2 + $0xf0] sm:$0xff] %vm91_vm0, %v40_v14  ;;  %188 = vst.msk [vmem:[#allocation2 + $0x108] sm:$0xff] %vm91_vm0, %v41_v15  ;;  %v304_v26 = vld [vmem:[#allocation2 + $0x28] sm:$0xff]  ;;  %v87_v14 = vld [vmem:[%s16682_s0 + $0x1e0] sm:$0xff] }
  0x31   :  { %189 = vst.msk [vmem:[#allocation2 + $0x110] sm:$0xff] %vm91_vm0, %v42_v16  ;;  %190 = vst.msk [vmem:[#allocation2 + $0x128] sm:$0xff] %vm91_vm0, %v43_v17  ;;  %883 = vrot.lane.b32.xlu1 %v304_v26, %s10603_s26  ;;  %v305_v28 = vld [vmem:[#allocation2 + $0x30] sm:$0xff]  ;;  %v306_v29 = vld [vmem:[#allocation2 + $0x48] sm:$0xff] }
  0x32   :  { %191 = vst.msk [vmem:[#allocation2 + $0x130] sm:$0xff] %vm91_vm0, %v44_v18  ;;  %192 = vst.msk [vmem:[#allocation2 + $0x148] sm:$0xff] %vm91_vm0, %v45_v19  ;;  %v307_v30 = vld [vmem:[#allocation2 + $0x50] sm:$0xff]  ;;  %v308_v31 = vld [vmem:[#allocation2 + $0x68] sm:$0xff]  ;;  %887 = vrot.lane.b32.xlu0 %v306_v29, %s10603_s26 }
  0x33   :  { %193 = vst.msk [vmem:[#allocation2 + $0x150] sm:$0xff] %vm91_vm0, %v46_v20  ;;  %194 = vst.msk [vmem:[#allocation2 + $0x168] sm:$0xff] %vm91_vm0, %v47_v21  ;;  %v309_v33 = vld [vmem:[#allocation2 + $0x70] sm:$0xff]  ;;  %v310_v41 = vld [vmem:[#allocation2 + $0x88] sm:$0xff] }
  0x34   :  { %195 = vst.msk [vmem:[#allocation2 + $0x170] sm:$0xff] %vm91_vm0, %v48_v22  ;;  %196 = vst.msk [vmem:[#allocation2 + $0x188] sm:$0xff] %vm91_vm0, %v49_v23  ;;  %v311_v45 = vld [vmem:[#allocation2 + $0x90] sm:$0xff]  ;;  %v312_v57 = vld [vmem:[#allocation2 + $0xa8] sm:$0xff] }
  0x35   :  { %197 = vst.msk [vmem:[#allocation2 + $0x190] sm:$0xff] %vm91_vm0, %v50_v24  ;;  %885 = vrot.lane.b32.xlu1 %v305_v28, %s10603_s26  ;;  %198 = vst.msk [vmem:[#allocation2 + $0x1a8] sm:$0xff] %vm91_vm0, %v51_v32  ;;  %v313_v58 = vld [vmem:[#allocation2 + $0xb0] sm:$0xff]  ;;  %v314_v61 = vld [vmem:[#allocation2 + $0xc8] sm:$0xff] }
  0x36   :  { %199 = vst.msk [vmem:[#allocation2 + $0x1b0] sm:$0xff] %vm91_vm0, %v52_v34  ;;  %200 = vst.msk [vmem:[#allocation2 + $0x1c8] sm:$0xff] %vm91_vm0, %v53_v35  ;;  %891 = vrot.lane.b32.xlu0 %v308_v31, %s10603_s26  ;;  %v315_v62 = vld [vmem:[#allocation2 + $0xd0] sm:$0xff]  ;;  %v316_v63 = vld [vmem:[#allocation2 + $0xe8] sm:$0xff] }
  0x37   :  { %201 = vst.msk [vmem:[#allocation2 + $0x1d0] sm:$0xff] %vm91_vm0, %v54_v36  ;;  %202 = vst.msk [vmem:[#allocation2 + $0x1e8] sm:$0xff] %vm91_vm0, %v55_v37  ;;  %v317_v1 = vld [vmem:[#allocation2 + $0xf0] sm:$0xff]  ;;  %v318_v12 = vld [vmem:[#allocation2 + $0x108] sm:$0xff] }
  0x38   :  { %203 = vst.msk [vmem:[#allocation2 + $0x1f0] sm:$0xff] %vm91_vm0, %v56_v38  ;;  %206 = vst.msk [vmem:[#allocation2 + $0x268] sm:$0xff] %vm91_vm0, %v59_v39  ;;  %v319_v13 = vld [vmem:[#allocation2 + $0x110] sm:$0xff]  ;;  %v88_v15 = vld [vmem:[%s16682_s0 + $0x1e8] sm:$0xff] }
  0x39   :  { %889 = vrot.lane.b32.xlu1 %v307_v30, %s10603_s26  ;;  %207 = vst.msk [vmem:[#allocation2 + $0x270] sm:$0xff] %vm91_vm0, %v60_v40  ;;  %208 = vst.msk [vmem:[#allocation2 + $0x288] sm:$0xff] %vm91_vm0, %v61_v42  ;;  %v320_v16 = vld [vmem:[#allocation2 + $0x128] sm:$0xff]  ;;  %v321_v17 = vld [vmem:[#allocation2 + $0x130] sm:$0xff] }
  0x3a   :  { %209 = vst.msk [vmem:[#allocation2 + $0x290] sm:$0xff] %vm91_vm0, %v62_v43  ;;  %210 = vst.msk [vmem:[#allocation2 + $0x2a8] sm:$0xff] %vm91_vm0, %v63_v44  ;;  %895 = vrot.lane.b32.xlu0 %v310_v41, %s10603_s26  ;;  %v322_v18 = vld [vmem:[#allocation2 + $0x148] sm:$0xff]  ;;  %v323_v19 = vld [vmem:[#allocation2 + $0x150] sm:$0xff] }
  0x3b   :  { %211 = vst.msk [vmem:[#allocation2 + $0x2b0] sm:$0xff] %vm91_vm0, %v64_v46  ;;  %212 = vst.msk [vmem:[#allocation2 + $0x2c8] sm:$0xff] %vm91_vm0, %v65_v47  ;;  %v324_v20 = vld [vmem:[#allocation2 + $0x168] sm:$0xff]  ;;  %v325_v21 = vld [vmem:[#allocation2 + $0x170] sm:$0xff] }
  0x3c   :  { %213 = vst.msk [vmem:[#allocation2 + $0x2d0] sm:$0xff] %vm91_vm0, %v66_v48  ;;  %214 = vst.msk [vmem:[#allocation2 + $0x2e8] sm:$0xff] %vm91_vm0, %v67_v49  ;;  %v326_v22 = vld [vmem:[#allocation2 + $0x188] sm:$0xff]  ;;  %v327_v23 = vld [vmem:[#allocation2 + $0x190] sm:$0xff] }
  0x3d   :  { %893 = vrot.lane.b32.xlu1 %v309_v33, %s10603_s26  ;;  %215 = vst.msk [vmem:[#allocation2 + $0x2f0] sm:$0xff] %vm91_vm0, %v68_v50  ;;  %216 = vst.msk [vmem:[#allocation2 + $0x308] sm:$0xff] %vm91_vm0, %v69_v51  ;;  %v328_v24 = vld [vmem:[#allocation2 + $0x1a8] sm:$0xff]  ;;  %v329_v25 = vld [vmem:[#allocation2 + $0x1b0] sm:$0xff] }
  0x3e   :  { %217 = vst.msk [vmem:[#allocation2 + $0x310] sm:$0xff] %vm91_vm0, %v70_v52  ;;  %218 = vst.msk [vmem:[#allocation2 + $0x328] sm:$0xff] %vm91_vm0, %v71_v53  ;;  %899 = vrot.lane.b32.xlu0 %v312_v57, %s10603_s26  ;;  %v330_v26 = vld [vmem:[#allocation2 + $0x1c8] sm:$0xff]  ;;  %v331_v27 = vld [vmem:[#allocation2 + $0x1d0] sm:$0xff] }
  0x3f   :  { %219 = vst.msk [vmem:[#allocation2 + $0x330] sm:$0xff] %vm91_vm0, %v72_v54  ;;  %220 = vst.msk [vmem:[#allocation2 + $0x348] sm:$0xff] %vm91_vm0, %v73_v55 }
  0x40   :  { %221 = vst.msk [vmem:[#allocation2 + $0x350] sm:$0xff] %vm91_vm0, %v74_v56  ;;  %222 = vst.msk [vmem:[#allocation2 + $0x368] sm:$0xff] %vm91_vm0, %v75_v59 }
  0x41   :  { %897 = vrot.lane.b32.xlu1 %v311_v45, %s10603_s26  ;;  %223 = vst.msk [vmem:[#allocation2 + $0x370] sm:$0xff] %vm91_vm0, %v76_v60  ;;  %224 = vst.msk [vmem:[#allocation2 + $0x388] sm:$0xff] %vm91_vm0, %v77_v0 }
  0x42   :  { %903 = vrot.lane.b32.xlu0 %v314_v61, %s10603_s26  ;;  %225 = vst.msk [vmem:[#allocation2 + $0x390] sm:$0xff] %vm91_vm0, %v78_v2  ;;  %226 = vst.msk [vmem:[#allocation2 + $0x3a8] sm:$0xff] %vm91_vm0, %v79_v4 }
  0x43   :  { %227 = vst.msk [vmem:[#allocation2 + $0x3b0] sm:$0xff] %vm91_vm0, %v80_v5  ;;  %228 = vst.msk [vmem:[#allocation2 + $0x3c8] sm:$0xff] %vm91_vm0, %v81_v6 }
  0x44   :  { %229 = vst.msk [vmem:[#allocation2 + $0x3d0] sm:$0xff] %vm91_vm0, %v82_v7  ;;  %230 = vst.msk [vmem:[#allocation2 + $0x3e8] sm:$0xff] %vm91_vm0, %v83_v8 }
  0x45   :  { %901 = vrot.lane.b32.xlu1 %v313_v58, %s10603_s26  ;;  %231 = vst.msk [vmem:[#allocation2 + $0x3f0] sm:$0xff] %vm91_vm0, %v84_v9  ;;  %232 = vst.msk [vmem:[#allocation2 + $0x408] sm:$0xff] %vm91_vm0, %v85_v10 }
  0x46   :  { %907 = vrot.lane.b32.xlu0 %v316_v63, %s10603_s26  ;;  %233 = vst.msk [vmem:[#allocation2 + $0x410] sm:$0xff] %vm91_vm0, %v86_v11  ;;  %234 = vst.msk [vmem:[#allocation2 + $0x428] sm:$0xff] %vm91_vm0, %v87_v14 }
  0x47   :  { %235 = vst.msk [vmem:[#allocation2 + $0x430] sm:$0xff] %vm91_vm0, %v88_v15 }
  0x49   :  { %905 = vrot.lane.b32.xlu1 %v315_v62, %s10603_s26 }
  0x4a   :  { %911 = vrot.lane.b32.xlu0 %v318_v12, %s10603_s26 }
  0x4d   :  { %909 = vrot.lane.b32.xlu1 %v317_v1, %s10603_s26 }
  0x4e   :  { %915 = vrot.lane.b32.xlu0 %v320_v16, %s10603_s26 }
  0x51   :  { %913 = vrot.lane.b32.xlu1 %v319_v13, %s10603_s26 }
  0x52   :  { %919 = vrot.lane.b32.xlu0 %v322_v18, %s10603_s26 }
  0x55   :  { %917 = vrot.lane.b32.xlu1 %v321_v17, %s10603_s26 }
  0x56   :  { %923 = vrot.lane.b32.xlu0 %v324_v20, %s10603_s26 }
  0x59   :  { %921 = vrot.lane.b32.xlu1 %v323_v19, %s10603_s26 }
  0x5a   :  { %927 = vrot.lane.b32.xlu0 %v326_v22, %s10603_s26 }
  0x5d   :  { %925 = vrot.lane.b32.xlu1 %v325_v21, %s10603_s26 }
  0x5e   :  { %931 = vrot.lane.b32.xlu0 %v328_v24, %s10603_s26 }
  0x61   :  { %929 = vrot.lane.b32.xlu1 %v327_v23, %s10603_s26 }
  0x65   :  { %933 = vrot.lane.b32.xlu1 %v329_v25, %s10603_s26 }
  0x66   :  { %12 = vsyncpa [#allocation5], 0  ;;  %935 = vrot.lane.b32.xlu0 %v330_v26, %s10603_s26  ;;  %v332_v28 = vld [vmem:[#allocation2 + $0x1e8] sm:$0xff]  ;;  %v333_v29 = vld [vmem:[#allocation2 + $0x1f0] sm:$0xff]  ;;  %vm2927_vm1 = vcmask 64512   ;;  %s10604_s10 = smov 8  }
  0x67   :  { %v334_v30 = vld [vmem:[#allocation2 + $0x248] sm:$0xff]  ;;  %v335_v31 = vld [vmem:[#allocation2 + $0x250] sm:$0xff]  ;;  %7625 = vst.msk [vmem:[#allocation3] sm:$0xff] %vm2927_vm1, %v10602_v3  ;;  %7626 = vst.msk [vmem:[#allocation3 + $0x8] sm:$0xff] %vm2927_vm1, %v10602_v3  ;;  %s10605_s14 = smov 12   ;;  %s10606_s15 = smov 16  }
  0x68   :  { %v336_v32 = vld [vmem:[#allocation2 + $0x268] sm:$0xff]  ;;  %v337_v33 = vld [vmem:[#allocation2 + $0x270] sm:$0xff]  ;;  %7627 = vst.msk [vmem:[#allocation3 + $0x10] sm:$0xff] %vm2927_vm1, %v10602_v3  ;;  %7628 = vst.msk [vmem:[#allocation3 + $0xf0] sm:$0xff] %vm2927_vm1, %v10602_v3  ;;  %vm3587_vm2 = vcmask 1043456   ;;  %s10607_s20 = smov 20  }
  0x69   :  { %937 = vrot.lane.b32.xlu1 %v331_v27, %s10603_s26  ;;  %v338_v34 = vld [vmem:[#allocation2 + $0x288] sm:$0xff]  ;;  %v339_v35 = vld [vmem:[#allocation2 + $0x290] sm:$0xff]  ;;  %7629 = vst.msk [vmem:[#allocation3 + $0xf8] sm:$0xff] %vm2927_vm1, %v10602_v3  ;;  %7630 = vst.msk [vmem:[#allocation3 + $0x100] sm:$0xff] %vm2927_vm1, %v10602_v3  ;;  %s10608_s25 = smov 24   ;;  %s10609_s29 = smov 28  }
  0x6a   :  { %939 = vrot.lane.b32.xlu0 %v332_v28, %s10603_s26  ;;  %v340_v36 = vld [vmem:[#allocation2 + $0x2a8] sm:$0xff]  ;;  %v341_v37 = vld [vmem:[#allocation2 + $0x2b0] sm:$0xff]  ;;  %7632 = vst.msk [vmem:[#allocation3 + $0xd8] sm:$0xff] %vm2927_vm1, %v10602_v3  ;;  %7633 = vst.msk [vmem:[#allocation3 + $0xe0] sm:$0xff] %vm2927_vm1, %v10602_v3  ;;  %vm16690_vm3 = vcmask 97280   ;;  %vm3057_vm4 = vcmask 130048  }
  0x6b   :  { %v342_v38 = vld [vmem:[#allocation2 + $0x2c8] sm:$0xff]  ;;  %v343_v39 = vld [vmem:[#allocation2 + $0x2d0] sm:$0xff]  ;;  %7634 = vst.msk [vmem:[#allocation3 + $0xe8] sm:$0xff] %vm2927_vm1, %v10602_v3  ;;  %7635 = vst.msk [vmem:[#allocation3 + $0x1c8] sm:$0xff] %vm2927_vm1, %v10602_v3  ;;  %vm3122_vm5 = vcmask 162816   ;;  %vm3187_vm6 = vcmask 195584  }
  0x6c   :  { %v344_v40 = vld [vmem:[#allocation2 + $0x2e8] sm:$0xff]  ;;  %v345_v41 = vld [vmem:[#allocation2 + $0x2f0] sm:$0xff]  ;;  %7636 = vst.msk [vmem:[#allocation3 + $0x1d0] sm:$0xff] %vm2927_vm1, %v10602_v3  ;;  %7637 = vst.msk [vmem:[#allocation3 + $0x1d8] sm:$0xff] %vm2927_vm1, %v10602_v3  ;;  %vm3252_vm7 = vcmask 228352   ;;  %vm3317_vm8 = vcmask 261120  }
  0x6d   :  { %941 = vrot.lane.b32.xlu1 %v333_v29, %s10603_s26  ;;  %v346_v42 = vld [vmem:[#allocation2 + $0x308] sm:$0xff]  ;;  %v347_v43 = vld [vmem:[#allocation2 + $0x310] sm:$0xff]  ;;  %7639 = vst.msk [vmem:[#allocation3 + $0x18] sm:$0xff] %vm2927_vm1, %v10602_v3  ;;  %7640 = vst.msk [vmem:[#allocation3 + $0x30] sm:$0xff] %vm2927_vm1, %v10602_v3  ;;  %vm3394_vm9 = vcmask 293888   ;;  %vm5448_vm10 = vcmask 58368  }
  0x6e   :  { %943 = vrot.lane.b32.xlu0 %v334_v30, %s10603_s26  ;;  %v348_v44 = vld [vmem:[#allocation2 + $0x328] sm:$0xff]  ;;  %v349_v45 = vld [vmem:[#allocation2 + $0x330] sm:$0xff]  ;;  %7641 = vst.msk [vmem:[#allocation3 + $0x48] sm:$0xff] %vm2927_vm1, %v10602_v3  ;;  %7642 = vst.msk [vmem:[#allocation3 + $0x60] sm:$0xff] %vm2927_vm1, %v10602_v3  ;;  %vm7799_vm11 = vcmask 1041409   ;;  %vm7801_vm12 = vcmask 1042434  }
  0x6f   :  { %v350_v46 = vld [vmem:[#allocation2 + $0x348] sm:$0xff]  ;;  %v351_v47 = vld [vmem:[#allocation2 + $0x350] sm:$0xff]  ;;  %7643 = vst.msk [vmem:[#allocation3 + $0x78] sm:$0xff] %vm2927_vm1, %v10602_v3  ;;  %7644 = vst.msk [vmem:[#allocation3 + $0x90] sm:$0xff] %vm2927_vm1, %v10602_v3  ;;  %vm16701_vm13 = vcmask 1043459   ;;  %vm7805_vm14 = vcmask 1044484  }
  0x70   :  { %v352_v48 = vld [vmem:[#allocation2 + $0x368] sm:$0xff]  ;;  %v353_v49 = vld [vmem:[#allocation2 + $0x370] sm:$0xff]  ;;  %7645 = vst.msk [vmem:[#allocation3 + $0xa8] sm:$0xff] %vm2927_vm1, %v10602_v3  ;;  %7646 = vst.msk [vmem:[#allocation3 + $0xc0] sm:$0xff] %vm2927_vm1, %v10602_v3  ;;  %vm16693_vm15 = vcmask 1045509   ;;  %s10614_s21 = smov 56  }
  0x71   :  { %945 = vrot.lane.b32.xlu1 %v335_v31, %s10603_s26  ;;  %v354_v50 = vld [vmem:[#allocation2 + $0x388] sm:$0xff]  ;;  %v355_v51 = vld [vmem:[#allocation2 + $0x390] sm:$0xff]  ;;  %7647 = vst.msk [vmem:[#allocation3 + $0x108] sm:$0xff] %vm2927_vm1, %v10602_v3  ;;  %7648 = vst.msk [vmem:[#allocation3 + $0x120] sm:$0xff] %vm2927_vm1, %v10602_v3  ;;  %s10615_s22 = smov 64   ;;  %s10616_s13 = smov 80  }
  0x72   :  { %947 = vrot.lane.b32.xlu0 %v336_v32, %s10603_s26  ;;  %v356_v52 = vld [vmem:[#allocation2 + $0x3a8] sm:$0xff]  ;;  %v357_v53 = vld [vmem:[#allocation2 + $0x3b0] sm:$0xff]  ;;  %7649 = vst.msk [vmem:[#allocation3 + $0x138] sm:$0xff] %vm2927_vm1, %v10602_v3  ;;  %7650 = vst.msk [vmem:[#allocation3 + $0x150] sm:$0xff] %vm2927_vm1, %v10602_v3  ;;  %s10617_s16 = smov 96   ;;  %s10618_s27 = smov 112  }
  0x73   :  { %v358_v54 = vld [vmem:[#allocation2 + $0x3c8] sm:$0xff]  ;;  %v359_v55 = vld [vmem:[#allocation2 + $0x3d0] sm:$0xff]  ;;  %7651 = vst.msk [vmem:[#allocation3 + $0x168] sm:$0xff] %vm2927_vm1, %v10602_v3  ;;  %7652 = vst.msk [vmem:[#allocation3 + $0x180] sm:$0xff] %vm2927_vm1, %v10602_v3  ;;  %s10619_s28 = smov [#allocation4]  }
  0x74   :  { %v360_v56 = vld [vmem:[#allocation2 + $0x3e8] sm:$0xff]  ;;  %v361_v57 = vld [vmem:[#allocation2 + $0x3f0] sm:$0xff]  ;;  %7653 = vst.msk [vmem:[#allocation3 + $0x198] sm:$0xff] %vm2927_vm1, %v10602_v3  ;;  %7654 = vst.msk [vmem:[#allocation3 + $0x1b0] sm:$0xff] %vm2927_vm1, %v10602_v3 }
  0x75   :  { %949 = vrot.lane.b32.xlu1 %v337_v33, %s10603_s26  ;;  %7655 = vst.msk [vmem:[#allocation3 + $0x28] sm:$0xff] %vm2927_vm1, %v10602_v3  ;;  %7656 = vst.msk [vmem:[#allocation3 + $0x40] sm:$0xff] %vm2927_vm1, %v10602_v3  ;;  %v362_v60 = vld [vmem:[#allocation2 + $0x408] sm:$0xff]  ;;  %v363_v61 = vld [vmem:[#allocation2 + $0x410] sm:$0xff] }
  0x76   :  { %951 = vrot.lane.b32.xlu0 %v338_v34, %s10603_s26  ;;  %7657 = vst.msk [vmem:[#allocation3 + $0x58] sm:$0xff] %vm2927_vm1, %v10602_v3  ;;  %7658 = vst.msk [vmem:[#allocation3 + $0x70] sm:$0xff] %vm2927_vm1, %v10602_v3  ;;  %v364_v0 = vld [vmem:[#allocation2 + $0x428] sm:$0xff]  ;;  %v367_v5 = vld [vmem:[#allocation2 + $0x11] sm:$0xff] }
  0x77   :  { %7659 = vst.msk [vmem:[#allocation3 + $0x88] sm:$0xff] %vm2927_vm1, %v10602_v3  ;;  %7660 = vst.msk [vmem:[#allocation3 + $0xa0] sm:$0xff] %vm2927_vm1, %v10602_v3  ;;  %v366_v4 = vld [vmem:[#allocation2 + $0x9] sm:$0xff]  ;;  %v369_v9 = vld [vmem:[#allocation2 + $0x31] sm:$0xff] }
  0x78   :  { %7661 = vst.msk [vmem:[#allocation3 + $0xb8] sm:$0xff] %vm2927_vm1, %v10602_v3  ;;  %7662 = vst.msk [vmem:[#allocation3 + $0xd0] sm:$0xff] %vm2927_vm1, %v10602_v3  ;;  %v368_v8 = vld [vmem:[#allocation2 + $0x29] sm:$0xff]  ;;  %v371_v13 = vld [vmem:[#allocation2 + $0x51] sm:$0xff] }
  0x79   :  { %953 = vrot.lane.b32.xlu1 %v339_v35, %s10603_s26  ;;  %7663 = vst.msk [vmem:[#allocation3 + $0x118] sm:$0xff] %vm2927_vm1, %v10602_v3  ;;  %7664 = vst.msk [vmem:[#allocation3 + $0x130] sm:$0xff] %vm2927_vm1, %v10602_v3  ;;  %v370_v12 = vld [vmem:[#allocation2 + $0x49] sm:$0xff]  ;;  %v373_v17 = vld [vmem:[#allocation2 + $0x71] sm:$0xff] }
  0x7a   :  { %955 = vrot.lane.b32.xlu0 %v340_v36, %s10603_s26  ;;  %7665 = vst.msk [vmem:[#allocation3 + $0x148] sm:$0xff] %vm2927_vm1, %v10602_v3  ;;  %7666 = vst.msk [vmem:[#allocation3 + $0x160] sm:$0xff] %vm2927_vm1, %v10602_v3  ;;  %v372_v16 = vld [vmem:[#allocation2 + $0x69] sm:$0xff]  ;;  %v375_v21 = vld [vmem:[#allocation2 + $0x91] sm:$0xff] }
  0x7b   :  { %7667 = vst.msk [vmem:[#allocation3 + $0x178] sm:$0xff] %vm2927_vm1, %v10602_v3  ;;  %7668 = vst.msk [vmem:[#allocation3 + $0x190] sm:$0xff] %vm2927_vm1, %v10602_v3  ;;  %v374_v20 = vld [vmem:[#allocation2 + $0x89] sm:$0xff]  ;;  %v377_v25 = vld [vmem:[#allocation2 + $0xb1] sm:$0xff] }
  0x7c   :  { %7669 = vst.msk [vmem:[#allocation3 + $0x1a8] sm:$0xff] %vm2927_vm1, %v10602_v3  ;;  %7670 = vst.msk [vmem:[#allocation3 + $0x1c0] sm:$0xff] %vm2927_vm1, %v10602_v3  ;;  %v365_v3 = vld [vmem:[#allocation2 + $0x430] sm:$0xff] }
  0x7d   :  { %957 = vrot.lane.b32.xlu1 %v341_v37, %s10603_s26  ;;  %v376_v24 = vld [vmem:[#allocation2 + $0xa9] sm:$0xff]  ;;  %v379_v29 = vld [vmem:[#allocation2 + $0xd1] sm:$0xff] }
  0x7e   :  { %959 = vrot.lane.b32.xlu0 %v342_v38, %s10603_s26  ;;  %v378_v28 = vld [vmem:[#allocation2 + $0xc9] sm:$0xff]  ;;  %v381_v33 = vld [vmem:[#allocation2 + $0xf1] sm:$0xff] }
  0x7f   :  { %v11215_v58 = vpop.permute.xlu0 %879  ;;  %v380_v32 = vld [vmem:[#allocation2 + $0xe9] sm:$0xff]  ;;  %v383_v37 = vld [vmem:[#allocation2 + $0x111] sm:$0xff] }
  0x80   :  { %v382_v36 = vld [vmem:[#allocation2 + $0x109] sm:$0xff] }
  0x81   :  { %961 = vrot.lane.b32.xlu1 %v343_v39, %s10603_s26 }
  0x82   :  { %963 = vrot.lane.b32.xlu0 %v344_v40, %s10603_s26  ;;  %v384_v40 = vld [vmem:[#allocation2 + $0x129] sm:$0xff] }
  0x83   :  { %v11221_v62 = vpop.permute.xlu0 %881 }
  0x85   :  { %965 = vrot.lane.b32.xlu1 %v345_v41, %s10603_s26  ;;  %v385_v41 = vld [vmem:[#allocation2 + $0x131] sm:$0xff] }
  0x86   :  { %967 = vrot.lane.b32.xlu0 %v346_v42, %s10603_s26 }
  0x89   :  { %969 = vrot.lane.b32.xlu1 %v347_v43, %s10603_s26 }
  0x8a   :  { %971 = vrot.lane.b32.xlu0 %v348_v44, %s10603_s26  ;;  %v386_v44 = vld [vmem:[#allocation2 + $0x149] sm:$0xff] }
  0x8d   :  { %973 = vrot.lane.b32.xlu1 %v349_v45, %s10603_s26  ;;  %v387_v45 = vld [vmem:[#allocation2 + $0x151] sm:$0xff] }
  0x8e   :  { %975 = vrot.lane.b32.xlu0 %v350_v46, %s10603_s26 }
  0x91   :  { %977 = vrot.lane.b32.xlu1 %v351_v47, %s10603_s26 }
  0x92   :  { %979 = vrot.lane.b32.xlu0 %v352_v48, %s10603_s26  ;;  %v388_v48 = vld [vmem:[#allocation2 + $0x169] sm:$0xff] }
  0x95   :  { %981 = vrot.lane.b32.xlu1 %v353_v49, %s10603_s26  ;;  %v389_v49 = vld [vmem:[#allocation2 + $0x171] sm:$0xff] }
  0x96   :  { %983 = vrot.lane.b32.xlu0 %v354_v50, %s10603_s26 }
  0x99   :  { %985 = vrot.lane.b32.xlu1 %v355_v51, %s10603_s26 }
  0x9a   :  { %987 = vrot.lane.b32.xlu0 %v356_v52, %s10603_s26  ;;  %v390_v52 = vld [vmem:[#allocation2 + $0x189] sm:$0xff] }
  0x9d   :  { %989 = vrot.lane.b32.xlu1 %v357_v53, %s10603_s26  ;;  %v391_v53 = vld [vmem:[#allocation2 + $0x191] sm:$0xff] }
  0x9e   :  { %991 = vrot.lane.b32.xlu0 %v358_v54, %s10603_s26 }
  0xa1   :  { %993 = vrot.lane.b32.xlu1 %v359_v55, %s10603_s26 }
  0xa2   :  { %995 = vrot.lane.b32.xlu0 %v360_v56, %s10603_s26  ;;  %v392_v56 = vld [vmem:[#allocation2 + $0x1a9] sm:$0xff] }
  0xa3   :  { %v11217_v59 = vpop.permute.xlu1 %883 }
  0xa4   :  { %v11227_v1 = vpop.permute.xlu0 %887 }
  0xa5   :  { %997 = vrot.lane.b32.xlu1 %v361_v57, %s10603_s26  ;;  %v393_v57 = vld [vmem:[#allocation2 + $0x1b1] sm:$0xff] }
  0xa6   :  { %999 = vrot.lane.b32.xlu0 %v362_v60, %s10603_s26 }
  0xa7   :  { %v11223_v63 = vpop.permute.xlu1 %885 }
  0xa8   :  { %v11233_v6 = vpop.permute.xlu0 %891 }
  0xa9   :  { %1001 = vrot.lane.b32.xlu1 %v363_v61, %s10603_s26 }
  0xaa   :  { %1003 = vrot.lane.b32.xlu0 %v364_v0, %s10603_s26  ;;  %v57_v0 = vld [vmem:[%s16682_s0 + $0xf0] sm:$0xff] }
  0xab   :  { %v11229_v2 = vpop.permute.xlu1 %889  ;;  %204 = vst.msk [vmem:[#allocation2 + $0x208] sm:$0xff] %vm91_vm0, %v57_v0  ;;  %v408_v0 = vld [vmem:[#allocation2 + $0x2e9] sm:$0xff] }
  0xac   :  { %v11239_v10 = vpop.permute.xlu0 %895 }
  0xad   :  { %1005 = vrot.lane.b32.xlu1 %v365_v3, %s10603_s26  ;;  %v58_v3 = vld [vmem:[%s16682_s0 + $0xf8] sm:$0xff] }
  0xae   :  { %1135 = vrot.lane.b32.xlu0 %v366_v4, %s10604_s10  ;;  %205 = vst.msk [vmem:[#allocation2 + $0x210] sm:$0xff] %vm91_vm0, %v58_v3  ;;  %v394_v4 = vld [vmem:[#allocation2 + $0x1c9] sm:$0xff]  ;;  %v409_v3 = vld [vmem:[#allocation2 + $0x2f1] sm:$0xff] }
  0xaf   :  { %v11235_v7 = vpop.permute.xlu1 %893 }
  0xb0   :  { %v11245_v14 = vpop.permute.xlu0 %899 }
  0xb1   :  { %1137 = vrot.lane.b32.xlu1 %v367_v5, %s10604_s10  ;;  %v395_v5 = vld [vmem:[#allocation2 + $0x1d1] sm:$0xff] }
  0xb2   :  { %1139 = vrot.lane.b32.xlu0 %v368_v8, %s10604_s10 }
  0xb3   :  { %v11241_v11 = vpop.permute.xlu1 %897 }
  0xb4   :  { %v11251_v18 = vpop.permute.xlu0 %903 }
  0xb5   :  { %1141 = vrot.lane.b32.xlu1 %v369_v9, %s10604_s10 }
  0xb6   :  { %1143 = vrot.lane.b32.xlu0 %v370_v12, %s10604_s10  ;;  %v396_v12 = vld [vmem:[#allocation2 + $0x1e9] sm:$0xff] }
  0xb7   :  { %v11247_v15 = vpop.permute.xlu1 %901 }
  0xb8   :  { %v11257_v22 = vpop.permute.xlu0 %907 }
  0xb9   :  { %1145 = vrot.lane.b32.xlu1 %v371_v13, %s10604_s10  ;;  %16709 = vst [vmem:[#allocation7_spill] sm:$0xff] %v11257_v22  ;;  %v397_v13 = vld [vmem:[#allocation2 + $0x1f1] sm:$0xff] }
  0xba   :  { %1147 = vrot.lane.b32.xlu0 %v372_v16, %s10604_s10 }
  0xbb   :  { %v11253_v19 = vpop.permute.xlu1 %905 }
  0xbc   :  { %v11263_v26 = vpop.permute.xlu0 %911 }
  0xbd   :  { %1149 = vrot.lane.b32.xlu1 %v373_v17, %s10604_s10  ;;  %16711 = vst [vmem:[#allocation9_spill] sm:$0xff] %v11263_v26  ;;  %v635_v26 = vld [vmem:[#allocation2 + $0x107] sm:$0xff] }
  0xbe   :  { %1151 = vrot.lane.b32.xlu0 %v374_v20, %s10604_s10  ;;  %v398_v20 = vld [vmem:[#allocation2 + $0x249] sm:$0xff] }
  0xbf   :  { %v11259_v23 = vpop.permute.xlu1 %909 }
  0xc0   :  { %16710 = vst [vmem:[#allocation8_spill] sm:$0xff] %v11259_v23  ;;  %v11269_v30 = vpop.permute.xlu0 %915 }
  0xc1   :  { %1153 = vrot.lane.b32.xlu1 %v375_v21, %s10604_s10  ;;  %16713 = vst [vmem:[#allocation11_spill] sm:$0xff] %v11269_v30  ;;  %v399_v21 = vld [vmem:[#allocation2 + $0x251] sm:$0xff] }
  0xc2   :  { %1155 = vrot.lane.b32.xlu0 %v376_v24, %s10604_s10 }
  0xc3   :  { %v11265_v27 = vpop.permute.xlu1 %913 }
  0xc4   :  { %16712 = vst [vmem:[#allocation10_spill] sm:$0xff] %v11265_v27  ;;  %v11275_v34 = vpop.permute.xlu0 %919 }
  0xc5   :  { %1157 = vrot.lane.b32.xlu1 %v377_v25, %s10604_s10  ;;  %16715 = vst [vmem:[#allocation13_spill] sm:$0xff] %v11275_v34  ;;  %v626_v34 = vld [vmem:[#allocation2 + $0x6f] sm:$0xff] }
  0xc6   :  { %1159 = vrot.lane.b32.xlu0 %v378_v28, %s10604_s10  ;;  %v400_v28 = vld [vmem:[#allocation2 + $0x269] sm:$0xff] }
  0xc7   :  { %v11271_v31 = vpop.permute.xlu1 %917 }
  0xc8   :  { %16714 = vst [vmem:[#allocation12_spill] sm:$0xff] %v11271_v31  ;;  %v11281_v38 = vpop.permute.xlu0 %923 }
  0xc9   :  { %1161 = vrot.lane.b32.xlu1 %v379_v29, %s10604_s10  ;;  %16717 = vst [vmem:[#allocation15_spill] sm:$0xff] %v11281_v38  ;;  %v401_v29 = vld [vmem:[#allocation2 + $0x271] sm:$0xff] }
  0xca   :  { %1163 = vrot.lane.b32.xlu0 %v380_v32, %s10604_s10 }
  0xcb   :  { %v11277_v35 = vpop.permute.xlu1 %921 }
  0xcc   :  { %16716 = vst [vmem:[#allocation14_spill] sm:$0xff] %v11277_v35  ;;  %v11287_v42 = vpop.permute.xlu0 %927 }
  0xcd   :  { %1165 = vrot.lane.b32.xlu1 %v381_v33, %s10604_s10  ;;  %16719 = vst [vmem:[#allocation17_spill] sm:$0xff] %v11287_v42  ;;  %v752_v42 = vld [vmem:[#allocation2 + $0x51] sm:$0xff] }
  0xce   :  { %1167 = vrot.lane.b32.xlu0 %v382_v36, %s10604_s10  ;;  %v402_v36 = vld [vmem:[#allocation2 + $0x289] sm:$0xff] }
  0xcf   :  { %v11283_v39 = vpop.permute.xlu1 %925 }
  0xd0   :  { %16718 = vst [vmem:[#allocation16_spill] sm:$0xff] %v11283_v39  ;;  %v11293_v46 = vpop.permute.xlu0 %931 }
  0xd1   :  { %1169 = vrot.lane.b32.xlu1 %v383_v37, %s10604_s10  ;;  %16721 = vst [vmem:[#allocation19_spill] sm:$0xff] %v11293_v46  ;;  %v403_v37 = vld [vmem:[#allocation2 + $0x291] sm:$0xff] }
  0xd2   :  { %1171 = vrot.lane.b32.xlu0 %v384_v40, %s10604_s10 }
  0xd3   :  { %v11289_v43 = vpop.permute.xlu1 %929 }
  0xd4   :  { %16720 = vst [vmem:[#allocation18_spill] sm:$0xff] %v11289_v43  ;;  %v751_v43 = vld [vmem:[#allocation2 + $0x49] sm:$0xff] }
  0xd5   :  { %1173 = vrot.lane.b32.xlu1 %v385_v41, %s10604_s10 }
  0xd6   :  { %1175 = vrot.lane.b32.xlu0 %v386_v44, %s10604_s10  ;;  %v404_v44 = vld [vmem:[#allocation2 + $0x2a9] sm:$0xff] }
  0xd7   :  { %v11295_v47 = vpop.permute.xlu1 %933 }
  0xd8   :  { %16722 = vst [vmem:[#allocation20_spill] sm:$0xff] %v11295_v47  ;;  %v11299_v50 = vpop.permute.xlu0 %935 }
  0xd9   :  { %1177 = vrot.lane.b32.xlu1 %v387_v45, %s10604_s10  ;;  %16723 = vst [vmem:[#allocation21_spill] sm:$0xff] %v11299_v50  ;;  %v405_v45 = vld [vmem:[#allocation2 + $0x2b1] sm:$0xff]  ;;  %v687_v50 = vld [vmem:[#allocation2 + $0x48] sm:$0xff] }
  0xda   :  { %1179 = vrot.lane.b32.xlu0 %v388_v48, %s10604_s10 }
  0xdb   :  { %v11301_v51 = vpop.permute.xlu1 %937 }
  0xdc   :  { %16724 = vst [vmem:[#allocation22_spill] sm:$0xff] %v11301_v51  ;;  %v11305_v54 = vpop.permute.xlu0 %939 }
  0xdd   :  { %1181 = vrot.lane.b32.xlu1 %v389_v49, %s10604_s10  ;;  %16725 = vst [vmem:[#allocation23_spill] sm:$0xff] %v11305_v54  ;;  %v623_v54 = vld [vmem:[#allocation2 + $0x47] sm:$0xff] }
  0xde   :  { %1183 = vrot.lane.b32.xlu0 %v390_v52, %s10604_s10  ;;  %v406_v52 = vld [vmem:[#allocation2 + $0x2c9] sm:$0xff] }
  0xdf   :  { %v11307_v55 = vpop.permute.xlu1 %941 }
  0xe0   :  { %16726 = vst [vmem:[#allocation24_spill] sm:$0xff] %v11307_v55  ;;  %v11311_v60 = vpop.permute.xlu0 %943  ;;  %v255_v55 = vld [vmem:[#allocation2 + $0x10f] sm:$0xff] }
  0xe1   :  { %1185 = vrot.lane.b32.xlu1 %v391_v53, %s10604_s10  ;;  %16727 = vst [vmem:[#allocation25_spill] sm:$0xff] %v11311_v60  ;;  %v407_v53 = vld [vmem:[#allocation2 + $0x2d1] sm:$0xff]  ;;  %v254_v60 = vld [vmem:[#allocation2 + $0x107] sm:$0xff] }
  0xe2   :  { %1187 = vrot.lane.b32.xlu0 %v392_v56, %s10604_s10 }
  0xe3   :  { %v11313_v61 = vpop.permute.xlu1 %945 }
  0xe4   :  { %16728 = vst [vmem:[#allocation26_spill] sm:$0xff] %v11313_v61  ;;  %v11325_v8 = vpop.permute.xlu0 %947  ;;  %v253_v61 = vld [vmem:[#allocation2 + $0xef] sm:$0xff] }
  0xe5   :  { %1189 = vrot.lane.b32.xlu1 %v393_v57, %s10604_s10  ;;  %16729 = vst [vmem:[#allocation27_spill] sm:$0xff] %v11325_v8  ;;  %v252_v8 = vld [vmem:[#allocation2 + $0xe7] sm:$0xff] }
  0xe6   :  { %1191 = vrot.lane.b32.xlu0 %v394_v4, %s10604_s10 }
  0xe7   :  { %v11327_v9 = vpop.permute.xlu1 %949 }
  0xe8   :  { %16730 = vst [vmem:[#allocation28_spill] sm:$0xff] %v11327_v9  ;;  %v11331_v16 = vpop.permute.xlu0 %951  ;;  %v251_v9 = vld [vmem:[#allocation2 + $0xcf] sm:$0xff] }
  0xe9   :  { %1193 = vrot.lane.b32.xlu1 %v395_v5, %s10604_s10  ;;  %16731 = vst [vmem:[#allocation29_spill] sm:$0xff] %v11331_v16  ;;  %v250_v16 = vld [vmem:[#allocation2 + $0xc7] sm:$0xff] }
  0xea   :  { %1195 = vrot.lane.b32.xlu0 %v396_v12, %s10604_s10  ;;  %v410_v12 = vld [vmem:[#allocation2 + $0x309] sm:$0xff] }
  0xeb   :  { %v11333_v17 = vpop.permute.xlu1 %953 }
  0xec   :  { %16732 = vst [vmem:[#allocation30_spill] sm:$0xff] %v11333_v17  ;;  %v11337_v24 = vpop.permute.xlu0 %955 }
  0xed   :  { %1197 = vrot.lane.b32.xlu1 %v397_v13, %s10604_s10  ;;  %16733 = vst [vmem:[#allocation31_spill] sm:$0xff] %v11337_v24  ;;  %v411_v13 = vld [vmem:[#allocation2 + $0x311] sm:$0xff] }
  0xee   :  { %1199 = vrot.lane.b32.xlu0 %v398_v20, %s10604_s10  ;;  %v249_v24 = vld [vmem:[#allocation2 + $0xaf] sm:$0xff] }
  0xef   :  { %v11339_v25 = vpop.permute.xlu1 %957 }
  0xf0   :  { %16734 = vst [vmem:[#allocation32_spill] sm:$0xff] %v11339_v25  ;;  %v11343_v32 = vpop.permute.xlu0 %959  ;;  %v248_v25 = vld [vmem:[#allocation2 + $0xa7] sm:$0xff] }
  0xf1   :  { %1201 = vrot.lane.b32.xlu1 %v399_v21, %s10604_s10  ;;  %16735 = vst [vmem:[#allocation33_spill] sm:$0xff] %v11343_v32 }
  0xf2   :  { %1203 = vrot.lane.b32.xlu0 %v400_v28, %s10604_s10  ;;  %v412_v28 = vld [vmem:[#allocation2 + $0x329] sm:$0xff] }
  0xf3   :  { %v11345_v33 = vpop.permute.xlu1 %961 }
  0xf4   :  { %16736 = vst [vmem:[#allocation34_spill] sm:$0xff] %v11345_v33  ;;  %v11349_v40 = vpop.permute.xlu0 %963 }
  0xf5   :  { %1205 = vrot.lane.b32.xlu1 %v401_v29, %s10604_s10  ;;  %16737 = vst [vmem:[#allocation35_spill] sm:$0xff] %v11349_v40  ;;  %v413_v29 = vld [vmem:[#allocation2 + $0x331] sm:$0xff] }
  0xf6   :  { %1207 = vrot.lane.b32.xlu0 %v402_v36, %s10604_s10  ;;  %v247_v40 = vld [vmem:[#allocation2 + $0x8f] sm:$0xff] }
  0xf7   :  { %v11351_v41 = vpop.permute.xlu1 %965 }
  0xf8   :  { %16738 = vst [vmem:[#allocation36_spill] sm:$0xff] %v11351_v41  ;;  %v11355_v48 = vpop.permute.xlu0 %967  ;;  %v246_v41 = vld [vmem:[#allocation2 + $0x87] sm:$0xff] }
  0xf9   :  { %1209 = vrot.lane.b32.xlu1 %v403_v37, %s10604_s10  ;;  %16739 = vst [vmem:[#allocation37_spill] sm:$0xff] %v11355_v48 }
  0xfa   :  { %1211 = vrot.lane.b32.xlu0 %v404_v44, %s10604_s10  ;;  %v414_v44 = vld [vmem:[#allocation2 + $0x349] sm:$0xff] }
  0xfb   :  { %v11357_v49 = vpop.permute.xlu1 %969 }
  0xfc   :  { %16740 = vst [vmem:[#allocation38_spill] sm:$0xff] %v11357_v49  ;;  %v11361_v56 = vpop.permute.xlu0 %971 }
  0xfd   :  { %1213 = vrot.lane.b32.xlu1 %v405_v45, %s10604_s10  ;;  %16741 = vst [vmem:[#allocation39_spill] sm:$0xff] %v11361_v56  ;;  %v415_v45 = vld [vmem:[#allocation2 + $0x351] sm:$0xff] }
  0xfe   :  { %1215 = vrot.lane.b32.xlu0 %v406_v52, %s10604_s10  ;;  %v245_v56 = vld [vmem:[#allocation2 + $0x6f] sm:$0xff] }
  0xff   :  { %v11363_v57 = vpop.permute.xlu1 %973 }
 0x100   :  { %16742 = vst [vmem:[#allocation40_spill] sm:$0xff] %v11363_v57  ;;  %v11367_v4 = vpop.permute.xlu0 %975  ;;  %v11461_v57 = vld [vmem:[#allocation2 + $0x67] sm:$0xff] }
 0x101   :  { %1217 = vrot.lane.b32.xlu1 %v407_v53, %s10604_s10  ;;  %16743 = vst [vmem:[#allocation41_spill] sm:$0xff] %v11367_v4 }
 0x102   :  { %1219 = vrot.lane.b32.xlu0 %v408_v0, %s10604_s10  ;;  %v416_v0 = vld [vmem:[#allocation2 + $0x369] sm:$0xff] }
 0x103   :  { %v11369_v5 = vpop.permute.xlu1 %977 }
 0x104   :  { %16744 = vst [vmem:[#allocation42_spill] sm:$0xff] %v11369_v5  ;;  %v11373_v20 = vpop.permute.xlu0 %979 }
 0x105   :  { %1221 = vrot.lane.b32.xlu1 %v409_v3, %s10604_s10  ;;  %16745 = vst [vmem:[#allocation43_spill] sm:$0xff] %v11373_v20  ;;  %v417_v3 = vld [vmem:[#allocation2 + $0x371] sm:$0xff] }
 0x106   :  { %1223 = vrot.lane.b32.xlu0 %v410_v12, %s10604_s10  ;;  %v11439_v20 = vld [vmem:[#allocation2 + $0x2f] sm:$0xff] }
 0x107   :  { %v11375_v21 = vpop.permute.xlu1 %981 }
 0x108   :  { %16746 = vst [vmem:[#allocation44_spill] sm:$0xff] %v11375_v21  ;;  %v11379_v36 = vpop.permute.xlu0 %983  ;;  %v11437_v21 = vld [vmem:[#allocation2 + $0x27] sm:$0xff] }
 0x109   :  { %1225 = vrot.lane.b32.xlu1 %v411_v13, %s10604_s10  ;;  %16747 = vst [vmem:[#allocation45_spill] sm:$0xff] %v11379_v36 }
 0x10a   :  { %1227 = vrot.lane.b32.xlu0 %v412_v28, %s10604_s10  ;;  %v418_v28 = vld [vmem:[#allocation2 + $0x389] sm:$0xff] }
 0x10b   :  { %v11381_v37 = vpop.permute.xlu1 %985 }
 0x10c   :  { %16748 = vst [vmem:[#allocation46_spill] sm:$0xff] %v11381_v37  ;;  %v11385_v52 = vpop.permute.xlu0 %987 }
 0x10d   :  { %1229 = vrot.lane.b32.xlu1 %v413_v29, %s10604_s10  ;;  %16749 = vst [vmem:[#allocation47_spill] sm:$0xff] %v11385_v52  ;;  %v419_v29 = vld [vmem:[#allocation2 + $0x391] sm:$0xff] }
 0x10e   :  { %1231 = vrot.lane.b32.xlu0 %v414_v44, %s10604_s10  ;;  %v420_v44 = vld [vmem:[#allocation2 + $0x3a9] sm:$0xff] }
 0x10f   :  { %v11387_v53 = vpop.permute.xlu1 %989 }
 0x110   :  { %16750 = vst [vmem:[#allocation48_spill] sm:$0xff] %v11387_v53  ;;  %v11391_v12 = vpop.permute.xlu0 %991 }
 0x111   :  { %1233 = vrot.lane.b32.xlu1 %v415_v45, %s10604_s10  ;;  %16751 = vst [vmem:[#allocation49_spill] sm:$0xff] %v11391_v12  ;;  %v421_v45 = vld [vmem:[#allocation2 + $0x3b1] sm:$0xff] }
 0x112   :  { %1235 = vrot.lane.b32.xlu0 %v416_v0, %s10604_s10  ;;  %v422_v0 = vld [vmem:[#allocation2 + $0x3c9] sm:$0xff] }
 0x113   :  { %v11393_v13 = vpop.permute.xlu1 %993 }
 0x114   :  { %16752 = vst [vmem:[#allocation50_spill] sm:$0xff] %v11393_v13  ;;  %v11397_v37 = vpop.permute.xlu0 %995 }
 0x115   :  { %1237 = vrot.lane.b32.xlu1 %v417_v3, %s10604_s10  ;;  %16753 = vst [vmem:[#allocation51_spill] sm:$0xff] %v11397_v37  ;;  %v423_v3 = vld [vmem:[#allocation2 + $0x3d1] sm:$0xff] }
 0x116   :  { %1239 = vrot.lane.b32.xlu0 %v418_v28, %s10604_s10  ;;  %v424_v28 = vld [vmem:[#allocation2 + $0x3e9] sm:$0xff] }
 0x117   :  { %v11399_v52 = vpop.permute.xlu1 %997 }
 0x118   :  { %16754 = vst [vmem:[#allocation52_spill] sm:$0xff] %v11399_v52  ;;  %v11403_v53 = vpop.permute.xlu0 %999 }
 0x119   :  { %1241 = vrot.lane.b32.xlu1 %v419_v29, %s10604_s10  ;;  %16755 = vst [vmem:[#allocation53_spill] sm:$0xff] %v11403_v53  ;;  %v425_v29 = vld [vmem:[#allocation2 + $0x3f1] sm:$0xff] }
 0x11a   :  { %1243 = vrot.lane.b32.xlu0 %v420_v44, %s10604_s10  ;;  %v426_v44 = vld [vmem:[#allocation2 + $0x409] sm:$0xff] }
 0x11b   :  { %v11405_v12 = vpop.permute.xlu1 %1001 }
 0x11c   :  { %16756 = vst [vmem:[#allocation54_spill] sm:$0xff] %v11405_v12  ;;  %v11409_v13 = vpop.permute.xlu0 %1003 }
 0x11d   :  { %1245 = vrot.lane.b32.xlu1 %v421_v45, %s10604_s10  ;;  %16757 = vst [vmem:[#allocation55_spill] sm:$0xff] %v11409_v13  ;;  %v427_v45 = vld [vmem:[#allocation2 + $0x411] sm:$0xff] }
 0x11e   :  { %1247 = vrot.lane.b32.xlu0 %v422_v0, %s10604_s10  ;;  %v428_v0 = vld [vmem:[#allocation2 + $0x429] sm:$0xff] }
 0x11f   :  { %v11411_v37 = vpop.permute.xlu1 %1005 }
 0x120   :  { %16758 = vst [vmem:[#allocation56_spill] sm:$0xff] %v11411_v37  ;;  %v11415_v52 = vpop.permute.xlu0 %1135 }
 0x121   :  { %1249 = vrot.lane.b32.xlu1 %v423_v3, %s10604_s10  ;;  %v429_v3 = vld [vmem:[#allocation2 + $0x431] sm:$0xff] }
 0x122   :  { %1251 = vrot.lane.b32.xlu0 %v424_v28, %s10604_s10 }
 0x123   :  { %v11417_v53 = vpop.permute.xlu1 %1137 }
 0x124   :  { %v11421_v12 = vpop.permute.xlu0 %1139 }
 0x125   :  { %1253 = vrot.lane.b32.xlu1 %v425_v29, %s10604_s10 }
 0x126   :  { %1255 = vrot.lane.b32.xlu0 %v426_v44, %s10604_s10 }
 0x127   :  { %v11423_v13 = vpop.permute.xlu1 %1141 }
 0x128   :  { %v11427_v37 = vpop.permute.xlu0 %1143 }
 0x129   :  { %1257 = vrot.lane.b32.xlu1 %v427_v45, %s10604_s10 }
 0x12a   :  { %1259 = vrot.lane.b32.xlu0 %v428_v0, %s10604_s10  ;;  %v11449_v0 = vld [vmem:[#allocation2 + $0x47] sm:$0xff] }
 0x12b   :  { %v11429_v36 = vpop.permute.xlu1 %1145 }
 0x12c   :  { %v11433_v28 = vpop.permute.xlu0 %1147 }
 0x12d   :  { %1261 = vrot.lane.b32.xlu1 %v429_v3, %s10604_s10  ;;  %v11451_v3 = vld [vmem:[#allocation2 + $0x4f] sm:$0xff] }
 0x12e   :  { %1391 = vrot.lane.b32.xlu0 %v11437_v21, %s10605_s14 }
 0x12f   :  { %v11435_v29 = vpop.permute.xlu1 %1149 }
 0x130   :  { %v11445_v44 = vpop.permute.xlu0 %1151 }
 0x131   :  { %1393 = vrot.lane.b32.xlu1 %v11439_v20, %s10605_s14 }
 0x132   :  { %1395 = vrot.lane.b32.xlu0 %v11449_v0, %s10605_s14 }
 0x133   :  { %v11447_v45 = vpop.permute.xlu1 %1153 }
 0x134   :  { %v11457_v5 = vpop.permute.xlu0 %1155 }
 0x135   :  { %1397 = vrot.lane.b32.xlu1 %v11451_v3, %s10605_s14 }
 0x136   :  { %1399 = vrot.lane.b32.xlu0 %v11461_v57, %s10605_s14 }
 0x137   :  { %v11459_v4 = vpop.permute.xlu1 %1157 }
 0x138   :  { %v11466_v49 = vpop.permute.xlu0 %1159 }
 0x139   :  { %1401 = vrot.lane.b32.xlu1 %v245_v56, %s10605_s14 }
 0x13a   :  { %1403 = vrot.lane.b32.xlu0 %v246_v41, %s10605_s14 }
 0x13b   :  { %v11468_v48 = vpop.permute.xlu1 %1161 }
 0x13c   :  { %v11472_v33 = vpop.permute.xlu0 %1163 }
 0x13d   :  { %1405 = vrot.lane.b32.xlu1 %v247_v40, %s10605_s14  ;;  %16759 = vst [vmem:[#allocation57_spill] sm:$0xff] %v11472_v33 }
 0x13e   :  { %1407 = vrot.lane.b32.xlu0 %v248_v25, %s10605_s14 }
 0x13f   :  { %v11474_v32 = vpop.permute.xlu1 %1165 }
 0x140   :  { %16760 = vst [vmem:[#allocation58_spill] sm:$0xff] %v11474_v32  ;;  %v11478_v56 = vpop.permute.xlu0 %1167 }
 0x141   :  { %1409 = vrot.lane.b32.xlu1 %v249_v24, %s10605_s14  ;;  %16761 = vst [vmem:[#allocation59_spill] sm:$0xff] %v11478_v56 }
 0x142   :  { %1411 = vrot.lane.b32.xlu0 %v250_v16, %s10605_s14 }
 0x143   :  { %v11480_v17 = vpop.permute.xlu1 %1169 }
 0x144   :  { %16762 = vst [vmem:[#allocation60_spill] sm:$0xff] %v11480_v17  ;;  %v11484_v40 = vpop.permute.xlu0 %1171 }
 0x145   :  { %1413 = vrot.lane.b32.xlu1 %v251_v9, %s10605_s14  ;;  %16763 = vst [vmem:[#allocation61_spill] sm:$0xff] %v11484_v40  ;;  %v257_v40 = vld [vmem:[#allocation2 + $0x12f] sm:$0xff] }
 0x146   :  { %1415 = vrot.lane.b32.xlu0 %v252_v8, %s10605_s14 }
 0x147   :  { %v11486_v41 = vpop.permute.xlu1 %1173 }
 0x148   :  { %16764 = vst [vmem:[#allocation62_spill] sm:$0xff] %v11486_v41  ;;  %v11490_v24 = vpop.permute.xlu0 %1175  ;;  %v256_v41 = vld [vmem:[#allocation2 + $0x127] sm:$0xff] }
 0x149   :  { %1417 = vrot.lane.b32.xlu1 %v253_v61, %s10605_s14  ;;  %16765 = vst [vmem:[#allocation63_spill] sm:$0xff] %v11490_v24  ;;  %v259_v24 = vld [vmem:[#allocation2 + $0x14f] sm:$0xff] }
 0x14a   :  { %1419 = vrot.lane.b32.xlu0 %v254_v60, %s10605_s14 }
 0x14b   :  { %v11492_v25 = vpop.permute.xlu1 %1177 }
 0x14c   :  { %16766 = vst [vmem:[#allocation64_spill] sm:$0xff] %v11492_v25  ;;  %v11496_v9 = vpop.permute.xlu0 %1179  ;;  %v258_v25 = vld [vmem:[#allocation2 + $0x147] sm:$0xff] }
 0x14d   :  { %1421 = vrot.lane.b32.xlu1 %v255_v55, %s10605_s14  ;;  %16767 = vst [vmem:[#allocation65_spill] sm:$0xff] %v11496_v9  ;;  %v261_v9 = vld [vmem:[#allocation2 + $0x16f] sm:$0xff] }
 0x14e   :  { %1423 = vrot.lane.b32.xlu0 %v256_v41, %s10605_s14 }
 0x14f   :  { %v11498_v16 = vpop.permute.xlu1 %1181 }
 0x150   :  { %16768 = vst [vmem:[#allocation66_spill] sm:$0xff] %v11498_v16  ;;  %v11502_v61 = vpop.permute.xlu0 %1183  ;;  %v260_v16 = vld [vmem:[#allocation2 + $0x167] sm:$0xff] }
 0x151   :  { %1425 = vrot.lane.b32.xlu1 %v257_v40, %s10605_s14  ;;  %16769 = vst [vmem:[#allocation67_spill] sm:$0xff] %v11502_v61  ;;  %v263_v61 = vld [vmem:[#allocation2 + $0x18f] sm:$0xff] }
 0x152   :  { %1427 = vrot.lane.b32.xlu0 %v258_v25, %s10605_s14 }
 0x153   :  { %v11504_v8 = vpop.permute.xlu1 %1185 }
 0x154   :  { %16770 = vst [vmem:[#allocation68_spill] sm:$0xff] %v11504_v8  ;;  %v11508_v55 = vpop.permute.xlu0 %1187  ;;  %v262_v8 = vld [vmem:[#allocation2 + $0x187] sm:$0xff] }
 0x155   :  { %1429 = vrot.lane.b32.xlu1 %v259_v24, %s10605_s14  ;;  %16771 = vst [vmem:[#allocation69_spill] sm:$0xff] %v11508_v55  ;;  %v265_v55 = vld [vmem:[#allocation2 + $0x1af] sm:$0xff] }
 0x156   :  { %1431 = vrot.lane.b32.xlu0 %v260_v16, %s10605_s14 }
 0x157   :  { %v11510_v60 = vpop.permute.xlu1 %1189 }
 0x158   :  { %16772 = vst [vmem:[#allocation70_spill] sm:$0xff] %v11510_v60  ;;  %v11514_v40 = vpop.permute.xlu0 %1191  ;;  %v264_v60 = vld [vmem:[#allocation2 + $0x1a7] sm:$0xff] }
 0x159   :  { %1433 = vrot.lane.b32.xlu1 %v261_v9, %s10605_s14  ;;  %16773 = vst [vmem:[#allocation71_spill] sm:$0xff] %v11514_v40  ;;  %v267_v40 = vld [vmem:[#allocation2 + $0x1cf] sm:$0xff] }
 0x15a   :  { %1435 = vrot.lane.b32.xlu0 %v262_v8, %s10605_s14 }
 0x15b   :  { %v11516_v41 = vpop.permute.xlu1 %1193 }
 0x15c   :  { %16774 = vst [vmem:[#allocation72_spill] sm:$0xff] %v11516_v41  ;;  %v11520_v24 = vpop.permute.xlu0 %1195  ;;  %v266_v41 = vld [vmem:[#allocation2 + $0x1c7] sm:$0xff] }
 0x15d   :  { %1437 = vrot.lane.b32.xlu1 %v263_v61, %s10605_s14  ;;  %16775 = vst [vmem:[#allocation73_spill] sm:$0xff] %v11520_v24  ;;  %v269_v24 = vld [vmem:[#allocation2 + $0x1ef] sm:$0xff] }
 0x15e   :  { %1439 = vrot.lane.b32.xlu0 %v264_v60, %s10605_s14  ;;  %v461_v60 = vld [vmem:[#allocation2 + $0x20f] sm:$0xff] }
 0x15f   :  { %v11522_v25 = vpop.permute.xlu1 %1197 }
 0x160   :  { %16776 = vst [vmem:[#allocation74_spill] sm:$0xff] %v11522_v25  ;;  %v11526_v9 = vpop.permute.xlu0 %1199  ;;  %v268_v25 = vld [vmem:[#allocation2 + $0x1e7] sm:$0xff] }
 0x161   :  { %1441 = vrot.lane.b32.xlu1 %v265_v55, %s10605_s14  ;;  %16777 = vst [vmem:[#allocation75_spill] sm:$0xff] %v11526_v9  ;;  %v460_v55 = vld [vmem:[#allocation2 + $0x207] sm:$0xff] }
 0x162   :  { %1443 = vrot.lane.b32.xlu0 %v266_v41, %s10605_s14 }
 0x163   :  { %v11528_v16 = vpop.permute.xlu1 %1201 }
 0x164   :  { %16778 = vst [vmem:[#allocation76_spill] sm:$0xff] %v11528_v16  ;;  %v11532_v61 = vpop.permute.xlu0 %1203 }
 0x165   :  { %1445 = vrot.lane.b32.xlu1 %v267_v40, %s10605_s14  ;;  %16779 = vst [vmem:[#allocation77_spill] sm:$0xff] %v11532_v61  ;;  %v273_v61 = vld [vmem:[#allocation2 + $0x26f] sm:$0xff] }
 0x166   :  { %1447 = vrot.lane.b32.xlu0 %v268_v25, %s10605_s14 }
 0x167   :  { %v11534_v8 = vpop.permute.xlu1 %1205 }
 0x168   :  { %16780 = vst [vmem:[#allocation78_spill] sm:$0xff] %v11534_v8  ;;  %v11538_v9 = vpop.permute.xlu0 %1207  ;;  %v272_v8 = vld [vmem:[#allocation2 + $0x267] sm:$0xff] }
 0x169   :  { %1449 = vrot.lane.b32.xlu1 %v269_v24, %s10605_s14  ;;  %16781 = vst [vmem:[#allocation79_spill] sm:$0xff] %v11538_v9  ;;  %v274_v9 = vld [vmem:[#allocation2 + $0x287] sm:$0xff] }
 0x16a   :  { %1451 = vrot.lane.b32.xlu0 %v460_v55, %s10605_s14 }
 0x16b   :  { %v11540_v16 = vpop.permute.xlu1 %1209 }
 0x16c   :  { %16782 = vst [vmem:[#allocation80_spill] sm:$0xff] %v11540_v16  ;;  %v11544_v40 = vpop.permute.xlu0 %1211  ;;  %v275_v16 = vld [vmem:[#allocation2 + $0x28f] sm:$0xff] }
 0x16d   :  { %1453 = vrot.lane.b32.xlu1 %v461_v60, %s10605_s14  ;;  %16783 = vst [vmem:[#allocation81_spill] sm:$0xff] %v11544_v40  ;;  %v277_v40 = vld [vmem:[#allocation2 + $0x2af] sm:$0xff] }
 0x16e   :  { %1455 = vrot.lane.b32.xlu0 %v272_v8, %s10605_s14 }
 0x16f   :  { %v11546_v41 = vpop.permute.xlu1 %1213 }
 0x170   :  { %16784 = vst [vmem:[#allocation82_spill] sm:$0xff] %v11546_v41  ;;  %v11550_v24 = vpop.permute.xlu0 %1215  ;;  %v276_v41 = vld [vmem:[#allocation2 + $0x2a7] sm:$0xff] }
 0x171   :  { %1457 = vrot.lane.b32.xlu1 %v273_v61, %s10605_s14  ;;  %16785 = vst [vmem:[#allocation83_spill] sm:$0xff] %v11550_v24  ;;  %v279_v24 = vld [vmem:[#allocation2 + $0x2cf] sm:$0xff] }
 0x172   :  { %1459 = vrot.lane.b32.xlu0 %v274_v9, %s10605_s14 }
 0x173   :  { %v11552_v25 = vpop.permute.xlu1 %1217 }
 0x174   :  { %16786 = vst [vmem:[#allocation84_spill] sm:$0xff] %v11552_v25  ;;  %v11556_v55 = vpop.permute.xlu0 %1219  ;;  %v278_v25 = vld [vmem:[#allocation2 + $0x2c7] sm:$0xff] }
 0x175   :  { %1461 = vrot.lane.b32.xlu1 %v275_v16, %s10605_s14  ;;  %16787 = vst [vmem:[#allocation85_spill] sm:$0xff] %v11556_v55  ;;  %v281_v55 = vld [vmem:[#allocation2 + $0x2ef] sm:$0xff] }
 0x176   :  { %1463 = vrot.lane.b32.xlu0 %v276_v41, %s10605_s14 }
 0x177   :  { %v11558_v60 = vpop.permute.xlu1 %1221 }
 0x178   :  { %16788 = vst [vmem:[#allocation86_spill] sm:$0xff] %v11558_v60  ;;  %v11562_v61 = vpop.permute.xlu0 %1223  ;;  %v280_v60 = vld [vmem:[#allocation2 + $0x2e7] sm:$0xff] }
 0x179   :  { %1465 = vrot.lane.b32.xlu1 %v277_v40, %s10605_s14  ;;  %16789 = vst [vmem:[#allocation87_spill] sm:$0xff] %v11562_v61  ;;  %v283_v61 = vld [vmem:[#allocation2 + $0x30f] sm:$0xff] }
 0x17a   :  { %1467 = vrot.lane.b32.xlu0 %v278_v25, %s10605_s14 }
 0x17b   :  { %v11564_v8 = vpop.permute.xlu1 %1225 }
 0x17c   :  { %16790 = vst [vmem:[#allocation88_spill] sm:$0xff] %v11564_v8  ;;  %v11568_v9 = vpop.permute.xlu0 %1227  ;;  %v282_v8 = vld [vmem:[#allocation2 + $0x307] sm:$0xff] }
 0x17d   :  { %1469 = vrot.lane.b32.xlu1 %v279_v24, %s10605_s14  ;;  %16791 = vst [vmem:[#allocation89_spill] sm:$0xff] %v11568_v9  ;;  %v285_v9 = vld [vmem:[#allocation2 + $0x32f] sm:$0xff] }
 0x17e   :  { %1471 = vrot.lane.b32.xlu0 %v280_v60, %s10605_s14 }
 0x17f   :  { %v11570_v16 = vpop.permute.xlu1 %1229 }
 0x180   :  { %16792 = vst [vmem:[#allocation90_spill] sm:$0xff] %v11570_v16  ;;  %v11574_v40 = vpop.permute.xlu0 %1231  ;;  %v284_v16 = vld [vmem:[#allocation2 + $0x327] sm:$0xff] }
 0x181   :  { %1473 = vrot.lane.b32.xlu1 %v281_v55, %s10605_s14  ;;  %16793 = vst [vmem:[#allocation91_spill] sm:$0xff] %v11574_v40  ;;  %v287_v40 = vld [vmem:[#allocation2 + $0x34f] sm:$0xff] }
 0x182   :  { %1475 = vrot.lane.b32.xlu0 %v282_v8, %s10605_s14 }
 0x183   :  { %v11576_v41 = vpop.permute.xlu1 %1233 }
 0x184   :  { %16794 = vst [vmem:[#allocation92_spill] sm:$0xff] %v11576_v41  ;;  %v11580_v24 = vpop.permute.xlu0 %1235  ;;  %v286_v41 = vld [vmem:[#allocation2 + $0x347] sm:$0xff] }
 0x185   :  { %1477 = vrot.lane.b32.xlu1 %v283_v61, %s10605_s14  ;;  %16795 = vst [vmem:[#allocation93_spill] sm:$0xff] %v11580_v24  ;;  %v289_v24 = vld [vmem:[#allocation2 + $0x36f] sm:$0xff] }
 0x186   :  { %1479 = vrot.lane.b32.xlu0 %v284_v16, %s10605_s14 }
 0x187   :  { %v11582_v25 = vpop.permute.xlu1 %1237 }
 0x188   :  { %16796 = vst [vmem:[#allocation94_spill] sm:$0xff] %v11582_v25  ;;  %v11586_v55 = vpop.permute.xlu0 %1239  ;;  %v288_v25 = vld [vmem:[#allocation2 + $0x367] sm:$0xff] }
 0x189   :  { %1481 = vrot.lane.b32.xlu1 %v285_v9, %s10605_s14  ;;  %16797 = vst [vmem:[#allocation95_spill] sm:$0xff] %v11586_v55  ;;  %v291_v55 = vld [vmem:[#allocation2 + $0x38f] sm:$0xff] }
 0x18a   :  { %1483 = vrot.lane.b32.xlu0 %v286_v41, %s10605_s14 }
 0x18b   :  { %v11588_v60 = vpop.permute.xlu1 %1241 }
 0x18c   :  { %16798 = vst [vmem:[#allocation96_spill] sm:$0xff] %v11588_v60  ;;  %v11592_v61 = vpop.permute.xlu0 %1243  ;;  %v290_v60 = vld [vmem:[#allocation2 + $0x387] sm:$0xff] }
 0x18d   :  { %1485 = vrot.lane.b32.xlu1 %v287_v40, %s10605_s14  ;;  %16799 = vst [vmem:[#allocation97_spill] sm:$0xff] %v11592_v61  ;;  %v293_v61 = vld [vmem:[#allocation2 + $0x3af] sm:$0xff] }
 0x18e   :  { %1487 = vrot.lane.b32.xlu0 %v288_v25, %s10605_s14 }
 0x18f   :  { %v11594_v8 = vpop.permute.xlu1 %1245 }
 0x190   :  { %16800 = vst [vmem:[#allocation98_spill] sm:$0xff] %v11594_v8  ;;  %v11598_v9 = vpop.permute.xlu0 %1247  ;;  %v292_v8 = vld [vmem:[#allocation2 + $0x3a7] sm:$0xff] }
 0x191   :  { %1489 = vrot.lane.b32.xlu1 %v289_v24, %s10605_s14  ;;  %16801 = vst [vmem:[#allocation99_spill] sm:$0xff] %v11598_v9  ;;  %v295_v9 = vld [vmem:[#allocation2 + $0x3cf] sm:$0xff] }
 0x192   :  { %1491 = vrot.lane.b32.xlu0 %v290_v60, %s10605_s14 }
 0x193   :  { %v11600_v16 = vpop.permute.xlu1 %1249 }
 0x194   :  { %16802 = vst [vmem:[#allocation100_spill] sm:$0xff] %v11600_v16  ;;  %v11604_v40 = vpop.permute.xlu0 %1251  ;;  %v294_v16 = vld [vmem:[#allocation2 + $0x3c7] sm:$0xff] }
 0x195   :  { %1493 = vrot.lane.b32.xlu1 %v291_v55, %s10605_s14  ;;  %16803 = vst [vmem:[#allocation101_spill] sm:$0xff] %v11604_v40  ;;  %v297_v40 = vld [vmem:[#allocation2 + $0x3ef] sm:$0xff] }
 0x196   :  { %1495 = vrot.lane.b32.xlu0 %v292_v8, %s10605_s14 }
 0x197   :  { %v11606_v41 = vpop.permute.xlu1 %1253 }
 0x198   :  { %16804 = vst [vmem:[#allocation102_spill] sm:$0xff] %v11606_v41  ;;  %v11610_v24 = vpop.permute.xlu0 %1255  ;;  %v296_v41 = vld [vmem:[#allocation2 + $0x3e7] sm:$0xff] }
 0x199   :  { %1497 = vrot.lane.b32.xlu1 %v293_v61, %s10605_s14  ;;  %16805 = vst [vmem:[#allocation103_spill] sm:$0xff] %v11610_v24  ;;  %v494_v61 = vld [vmem:[#allocation2 + $0x28] sm:$0xff] }
 0x19a   :  { %1499 = vrot.lane.b32.xlu0 %v294_v16, %s10605_s14  ;;  %v298_v24 = vld [vmem:[#allocation2 + $0x407] sm:$0xff]  ;;  %v495_v16 = vld [vmem:[#allocation2 + $0x30] sm:$0xff] }
 0x19b   :  { %v11612_v25 = vpop.permute.xlu1 %1257 }
 0x19c   :  { %16806 = vst [vmem:[#allocation104_spill] sm:$0xff] %v11612_v25  ;;  %v11616_v55 = vpop.permute.xlu0 %1259 }
 0x19d   :  { %1501 = vrot.lane.b32.xlu1 %v295_v9, %s10605_s14  ;;  %16807 = vst [vmem:[#allocation105_spill] sm:$0xff] %v11616_v55  ;;  %v3386_v9 = vld [vmem:[%s16683_s1 + $0x20] sm:$0xf]  ;;  %v559_v55 = vld [vmem:[#allocation2 + $0x31] sm:$0xff] }
 0x19e   :  { %1503 = vrot.lane.b32.xlu0 %v296_v41, %s10605_s14  ;;  %v558_v41 = vld [vmem:[#allocation2 + $0x29] sm:$0xff]  ;;  %10309 = vmatprep.subr.msk.mxu0 %vm3587_vm2, %v3386_v9 }
 0x19f   :  { %v11618_v60 = vpop.permute.xlu1 %1261  ;;  %10457 = vmatprep.subr.msk.mxu1 %vm3587_vm2, %v3386_v9  ;;  %10310 = vmatpush3.msk.msra.mxu0 %vm3587_vm2, %v3386_v9 }
 0x1a0   :  { %16808 = vst [vmem:[#allocation106_spill] sm:$0xff] %v11618_v60  ;;  %v11622_v8 = vpop.permute.xlu0 %1391  ;;  %10462 = vmatpush3.msk.msra.mxu1 %vm3587_vm2, %v3386_v9  ;;  %vm16692_vm2 = vcmask 1046534  }
 0x1a1   :  { %1505 = vrot.lane.b32.xlu1 %v297_v40, %s10605_s14 }
 0x1a2   :  { %1507 = vrot.lane.b32.xlu0 %v298_v24, %s10605_s14  ;;  %v3385_v24 = vld [vmem:[%s16683_s1 + $0x18] sm:$0xff] }
 0x1a3   :  { %v11624_v25 = vpop.permute.xlu1 %1393  ;;  %10311 = vmatprep.subr.mxu0 %v3385_v24  ;;  %10458 = vmatprep.subr.mxu1 %v3385_v24 }
 0x1a4   :  { %v11631_v40 = vpop.permute.xlu0 %1395  ;;  %10312 = vmatpush3.msra.mxu0 %v3385_v24  ;;  %10463 = vmatpush3.msra.mxu1 %v3385_v24  ;;  %v3382_v24 = vld [vmem:[%s16683_s1] sm:$0xff] }
 0x1a5   :  { %1647 = vrot.lane.b32.xlu1 %v494_v61, %s10606_s15  ;;  %v3384_v61 = vld [vmem:[%s16683_s1 + $0x10] sm:$0xff] }
 0x1a6   :  { %1649 = vrot.lane.b32.xlu0 %v495_v16, %s10606_s15  ;;  %10313 = vmatprep.subr.mxu0 %v3384_v61  ;;  %v3383_v16 = vld [vmem:[%s16683_s1 + $0x8] sm:$0xff]  ;;  %s10610_s1 = smov 32  }
 0x1a7   :  { %v11633_v60 = vpop.permute.xlu1 %1397  ;;  %10459 = vmatprep.subr.mxu1 %v3384_v61  ;;  %10314 = vmatpush3.msra.mxu0 %v3384_v61 }
 0x1a8   :  { %v11643_v51 = vpop.permute.xlu0 %1399  ;;  %10464 = vmatpush3.msra.mxu1 %v3384_v61  ;;  %10315 = vmatprep.subr.mxu0 %v3383_v16 }
 0x1a9   :  { %1903 = vrot.lane.b32.xlu1 %v558_v41, %s10607_s20  ;;  %v624_v41 = vld [vmem:[#allocation2 + $0x4f] sm:$0xff]  ;;  %10460 = vmatprep.subr.mxu1 %v3383_v16 }
 0x1aa   :  { %1905 = vrot.lane.b32.xlu0 %v559_v55, %s10607_s20  ;;  %10316 = vmatpush3.msra.mxu0 %v3383_v16 }
 0x1ab   :  { %v11645_v9 = vpop.permute.xlu1 %1401  ;;  %10465 = vmatpush3.msra.mxu1 %v3383_v16  ;;  %10317 = vmatprep.subr.mxu0 %v3382_v24 }
 0x1ac   :  { %v11652_v47 = vpop.permute.xlu0 %1403  ;;  %10461 = vmatprep.subr.mxu1 %v3382_v24  ;;  %10318 = vmatpush3.msra.mxu0 %v3382_v24 }
 0x1ad   :  { %2159 = vrot.lane.b32.xlu1 %v623_v54, %s10608_s25  ;;  %v688_v54 = vld [vmem:[#allocation2 + $0x50] sm:$0xff]  ;;  %10466 = vmatpush3.msra.mxu1 %v3382_v24 }
 0x1ae   :  { %2161 = vrot.lane.b32.xlu0 %v624_v41, %s10608_s25 }
 0x1af   :  { %v11654_v46 = vpop.permute.xlu1 %1405 }
 0x1b0   :  { %v11661_v55 = vpop.permute.xlu0 %1407 }
 0x1b1   :  { %2415 = vrot.lane.b32.xlu1 %v687_v50, %s10609_s29 }
 0x1b2   :  { %1651 = vrot.lane.b32.xlu0 %v687_v50, %s10606_s15  ;;  %v625_v50 = vld [vmem:[#allocation2 + $0x67] sm:$0xff] }
 0x1b3   :  { %v11663_v61 = vpop.permute.xlu1 %1409 }
 0x1b4   :  { %v11667_v16 = vpop.permute.xlu0 %1411 }
 0x1b5   :  { %2417 = vrot.lane.b32.xlu1 %v688_v54, %s10609_s29 }
 0x1b6   :  { %2671 = vrot.lane.b32.xlu0 %v751_v43, %s10610_s1 }
 0x1b7   :  { %v11669_v41 = vpop.permute.xlu1 %1413 }
 0x1b8   :  { %v11673_v39 = vpop.permute.xlu0 %1415 }
 0x1b9   :  { %1653 = vrot.lane.b32.xlu1 %v688_v54, %s10606_s15  ;;  %v689_v54 = vld [vmem:[#allocation2 + $0x68] sm:$0xff] }
 0x1ba   :  { %1907 = vrot.lane.b32.xlu0 %v751_v43, %s10607_s20  ;;  %v690_v43 = vld [vmem:[#allocation2 + $0x70] sm:$0xff] }
 0x1bb   :  { %v11675_v38 = vpop.permute.xlu1 %1417 }
 0x1bc   :  { %16809 = vst [vmem:[#allocation107_spill] sm:$0xff] %v11675_v38  ;;  %v11679_v24 = vpop.permute.xlu0 %1419 }
 0x1bd   :  { %2673 = vrot.lane.b32.xlu1 %v752_v42, %s10610_s1  ;;  %16810 = vst [vmem:[#allocation108_spill] sm:$0xff] %v11679_v24  ;;  %v699_v24 = vld [vmem:[#allocation2 + $0x108] sm:$0xff] }
 0x1be   :  { %1909 = vrot.lane.b32.xlu0 %v752_v42, %s10607_s20  ;;  %v753_v42 = vld [vmem:[#allocation2 + $0x69] sm:$0xff] }
 0x1bf   :  { %v11681_v35 = vpop.permute.xlu1 %1421 }
 0x1c0   :  { %16811 = vst [vmem:[#allocation109_spill] sm:$0xff] %v11681_v35  ;;  %v11685_v31 = vpop.permute.xlu0 %1423 }
 0x1c1   :  { %2163 = vrot.lane.b32.xlu1 %v625_v50, %s10608_s25  ;;  %16812 = vst [vmem:[#allocation110_spill] sm:$0xff] %v11685_v31 }
 0x1c2   :  { %2165 = vrot.lane.b32.xlu0 %v626_v34, %s10608_s25  ;;  %v754_v34 = vld [vmem:[#allocation2 + $0x71] sm:$0xff] }
 0x1c3   :  { %v11687_v30 = vpop.permute.xlu1 %1425 }
 0x1c4   :  { %16813 = vst [vmem:[#allocation111_spill] sm:$0xff] %v11687_v30  ;;  %v11691_v17 = vpop.permute.xlu0 %1427 }
 0x1c5   :  { %2419 = vrot.lane.b32.xlu1 %v689_v54, %s10609_s29  ;;  %16814 = vst [vmem:[#allocation112_spill] sm:$0xff] %v11691_v17 }
 0x1c6   :  { %1655 = vrot.lane.b32.xlu0 %v689_v54, %s10606_s15  ;;  %v627_v54 = vld [vmem:[#allocation2 + $0x87] sm:$0xff] }
 0x1c7   :  { %v11693_v27 = vpop.permute.xlu1 %1429 }
 0x1c8   :  { %16815 = vst [vmem:[#allocation113_spill] sm:$0xff] %v11693_v27  ;;  %v11697_v50 = vpop.permute.xlu0 %1431 }
 0x1c9   :  { %2421 = vrot.lane.b32.xlu1 %v690_v43, %s10609_s29  ;;  %16816 = vst [vmem:[#allocation114_spill] sm:$0xff] %v11697_v50 }
 0x1ca   :  { %2675 = vrot.lane.b32.xlu0 %v753_v42, %s10610_s1 }
 0x1cb   :  { %v11699_v56 = vpop.permute.xlu1 %1433 }
 0x1cc   :  { %16817 = vst [vmem:[#allocation115_spill] sm:$0xff] %v11699_v56  ;;  %v11703_v30 = vpop.permute.xlu0 %1435  ;;  %v628_v56 = vld [vmem:[#allocation2 + $0x8f] sm:$0xff] }
 0x1cd   :  { %1657 = vrot.lane.b32.xlu1 %v690_v43, %s10606_s15  ;;  %16818 = vst [vmem:[#allocation116_spill] sm:$0xff] %v11703_v30  ;;  %v691_v43 = vld [vmem:[#allocation2 + $0x88] sm:$0xff] }
 0x1ce   :  { %1911 = vrot.lane.b32.xlu0 %v753_v42, %s10607_s20  ;;  %v692_v42 = vld [vmem:[#allocation2 + $0x90] sm:$0xff] }
 0x1cf   :  { %v11705_v31 = vpop.permute.xlu1 %1437 }
 0x1d0   :  { %16819 = vst [vmem:[#allocation117_spill] sm:$0xff] %v11705_v31  ;;  %v11709_v27 = vpop.permute.xlu0 %1439 }
 0x1d1   :  { %2677 = vrot.lane.b32.xlu1 %v754_v34, %s10610_s1  ;;  %16820 = vst [vmem:[#allocation118_spill] sm:$0xff] %v11709_v27 }
 0x1d2   :  { %1913 = vrot.lane.b32.xlu0 %v754_v34, %s10607_s20  ;;  %v755_v34 = vld [vmem:[#allocation2 + $0x89] sm:$0xff] }
 0x1d3   :  { %v11711_v17 = vpop.permute.xlu1 %1441 }
 0x1d4   :  { %16821 = vst [vmem:[#allocation119_spill] sm:$0xff] %v11711_v17  ;;  %v11715_v50 = vpop.permute.xlu0 %1443 }
 0x1d5   :  { %2167 = vrot.lane.b32.xlu1 %v627_v54, %s10608_s25  ;;  %16822 = vst [vmem:[#allocation120_spill] sm:$0xff] %v11715_v50 }
 0x1d6   :  { %2169 = vrot.lane.b32.xlu0 %v628_v56, %s10608_s25  ;;  %v756_v56 = vld [vmem:[#allocation2 + $0x91] sm:$0xff] }
 0x1d7   :  { %v11717_v30 = vpop.permute.xlu1 %1445 }
 0x1d8   :  { %16823 = vst [vmem:[#allocation121_spill] sm:$0xff] %v11717_v30  ;;  %v11721_v31 = vpop.permute.xlu0 %1447 }
 0x1d9   :  { %2423 = vrot.lane.b32.xlu1 %v691_v43, %s10609_s29  ;;  %16824 = vst [vmem:[#allocation122_spill] sm:$0xff] %v11721_v31 }
 0x1da   :  { %1659 = vrot.lane.b32.xlu0 %v691_v43, %s10606_s15  ;;  %v629_v43 = vld [vmem:[#allocation2 + $0xa7] sm:$0xff] }
 0x1db   :  { %v11723_v27 = vpop.permute.xlu1 %1449 }
 0x1dc   :  { %16825 = vst [vmem:[#allocation123_spill] sm:$0xff] %v11723_v27  ;;  %v11727_v54 = vpop.permute.xlu0 %1451 }
 0x1dd   :  { %2425 = vrot.lane.b32.xlu1 %v692_v42, %s10609_s29  ;;  %16826 = vst [vmem:[#allocation124_spill] sm:$0xff] %v11727_v54 }
 0x1de   :  { %2679 = vrot.lane.b32.xlu0 %v755_v34, %s10610_s1 }
 0x1df   :  { %v11729_v17 = vpop.permute.xlu1 %1453 }
 0x1e0   :  { %16827 = vst [vmem:[#allocation125_spill] sm:$0xff] %v11729_v17  ;;  %v11733_v30 = vpop.permute.xlu0 %1455  ;;  %v630_v17 = vld [vmem:[#allocation2 + $0xaf] sm:$0xff] }
 0x1e1   :  { %1661 = vrot.lane.b32.xlu1 %v692_v42, %s10606_s15  ;;  %16828 = vst [vmem:[#allocation126_spill] sm:$0xff] %v11733_v30  ;;  %v693_v42 = vld [vmem:[#allocation2 + $0xa8] sm:$0xff] }
 0x1e2   :  { %1915 = vrot.lane.b32.xlu0 %v755_v34, %s10607_s20  ;;  %v694_v34 = vld [vmem:[#allocation2 + $0xb0] sm:$0xff] }
 0x1e3   :  { %v11735_v50 = vpop.permute.xlu1 %1457 }
 0x1e4   :  { %16829 = vst [vmem:[#allocation127_spill] sm:$0xff] %v11735_v50  ;;  %v11739_v27 = vpop.permute.xlu0 %1459 }
 0x1e5   :  { %2681 = vrot.lane.b32.xlu1 %v756_v56, %s10610_s1  ;;  %16830 = vst [vmem:[#allocation128_spill] sm:$0xff] %v11739_v27 }
 0x1e6   :  { %1917 = vrot.lane.b32.xlu0 %v756_v56, %s10607_s20  ;;  %v757_v56 = vld [vmem:[#allocation2 + $0xa9] sm:$0xff] }
 0x1e7   :  { %v11741_v31 = vpop.permute.xlu1 %1461 }
 0x1e8   :  { %16831 = vst [vmem:[#allocation129_spill] sm:$0xff] %v11741_v31  ;;  %v11745_v54 = vpop.permute.xlu0 %1463 }
 0x1e9   :  { %2171 = vrot.lane.b32.xlu1 %v629_v43, %s10608_s25  ;;  %16832 = vst [vmem:[#allocation130_spill] sm:$0xff] %v11745_v54 }
 0x1ea   :  { %2173 = vrot.lane.b32.xlu0 %v630_v17, %s10608_s25  ;;  %v758_v17 = vld [vmem:[#allocation2 + $0xb1] sm:$0xff] }
 0x1eb   :  { %v11747_v30 = vpop.permute.xlu1 %1465 }
 0x1ec   :  { %16833 = vst [vmem:[#allocation131_spill] sm:$0xff] %v11747_v30  ;;  %v11751_v50 = vpop.permute.xlu0 %1467 }
 0x1ed   :  { %2427 = vrot.lane.b32.xlu1 %v693_v42, %s10609_s29  ;;  %16834 = vst [vmem:[#allocation132_spill] sm:$0xff] %v11751_v50 }
 0x1ee   :  { %1663 = vrot.lane.b32.xlu0 %v693_v42, %s10606_s15  ;;  %v631_v42 = vld [vmem:[#allocation2 + $0xc7] sm:$0xff] }
 0x1ef   :  { %v11753_v27 = vpop.permute.xlu1 %1469 }
 0x1f0   :  { %16835 = vst [vmem:[#allocation133_spill] sm:$0xff] %v11753_v27  ;;  %v11757_v43 = vpop.permute.xlu0 %1471 }
 0x1f1   :  { %2429 = vrot.lane.b32.xlu1 %v694_v34, %s10609_s29  ;;  %16836 = vst [vmem:[#allocation134_spill] sm:$0xff] %v11757_v43 }
 0x1f2   :  { %2683 = vrot.lane.b32.xlu0 %v757_v56, %s10610_s1 }
 0x1f3   :  { %v11759_v31 = vpop.permute.xlu1 %1473 }
 0x1f4   :  { %16837 = vst [vmem:[#allocation135_spill] sm:$0xff] %v11759_v31  ;;  %v11763_v30 = vpop.permute.xlu0 %1475  ;;  %v632_v31 = vld [vmem:[#allocation2 + $0xcf] sm:$0xff] }
 0x1f5   :  { %1665 = vrot.lane.b32.xlu1 %v694_v34, %s10606_s15  ;;  %16838 = vst [vmem:[#allocation136_spill] sm:$0xff] %v11763_v30  ;;  %v695_v34 = vld [vmem:[#allocation2 + $0xc8] sm:$0xff] }
 0x1f6   :  { %1919 = vrot.lane.b32.xlu0 %v757_v56, %s10607_s20  ;;  %v696_v56 = vld [vmem:[#allocation2 + $0xd0] sm:$0xff] }
 0x1f7   :  { %v11765_v54 = vpop.permute.xlu1 %1477 }
 0x1f8   :  { %16839 = vst [vmem:[#allocation137_spill] sm:$0xff] %v11765_v54  ;;  %v11769_v27 = vpop.permute.xlu0 %1479 }
 0x1f9   :  { %2685 = vrot.lane.b32.xlu1 %v758_v17, %s10610_s1  ;;  %16840 = vst [vmem:[#allocation138_spill] sm:$0xff] %v11769_v27 }
 0x1fa   :  { %1921 = vrot.lane.b32.xlu0 %v758_v17, %s10607_s20  ;;  %v759_v17 = vld [vmem:[#allocation2 + $0xc9] sm:$0xff] }
 0x1fb   :  { %v11771_v50 = vpop.permute.xlu1 %1481 }
 0x1fc   :  { %16841 = vst [vmem:[#allocation139_spill] sm:$0xff] %v11771_v50  ;;  %v11775_v43 = vpop.permute.xlu0 %1483 }
 0x1fd   :  { %2175 = vrot.lane.b32.xlu1 %v631_v42, %s10608_s25  ;;  %16842 = vst [vmem:[#allocation140_spill] sm:$0xff] %v11775_v43 }
 0x1fe   :  { %2177 = vrot.lane.b32.xlu0 %v632_v31, %s10608_s25  ;;  %v760_v31 = vld [vmem:[#allocation2 + $0xd1] sm:$0xff] }
 0x1ff   :  { %v11777_v30 = vpop.permute.xlu1 %1485 }
 0x200   :  { %16843 = vst [vmem:[#allocation141_spill] sm:$0xff] %v11777_v30  ;;  %v11781_v54 = vpop.permute.xlu0 %1487 }
 0x201   :  { %2431 = vrot.lane.b32.xlu1 %v695_v34, %s10609_s29  ;;  %16844 = vst [vmem:[#allocation142_spill] sm:$0xff] %v11781_v54 }
 0x202   :  { %1667 = vrot.lane.b32.xlu0 %v695_v34, %s10606_s15  ;;  %v633_v34 = vld [vmem:[#allocation2 + $0xe7] sm:$0xff] }
 0x203   :  { %v11783_v27 = vpop.permute.xlu1 %1489 }
 0x204   :  { %16845 = vst [vmem:[#allocation143_spill] sm:$0xff] %v11783_v27  ;;  %v11787_v42 = vpop.permute.xlu0 %1491 }
 0x205   :  { %2433 = vrot.lane.b32.xlu1 %v696_v56, %s10609_s29  ;;  %16846 = vst [vmem:[#allocation144_spill] sm:$0xff] %v11787_v42 }
 0x206   :  { %2687 = vrot.lane.b32.xlu0 %v759_v17, %s10610_s1 }
 0x207   :  { %v11789_v50 = vpop.permute.xlu1 %1493 }
 0x208   :  { %16847 = vst [vmem:[#allocation145_spill] sm:$0xff] %v11789_v50  ;;  %v11793_v30 = vpop.permute.xlu0 %1495  ;;  %v634_v50 = vld [vmem:[#allocation2 + $0xef] sm:$0xff] }
 0x209   :  { %1669 = vrot.lane.b32.xlu1 %v696_v56, %s10606_s15  ;;  %16848 = vst [vmem:[#allocation146_spill] sm:$0xff] %v11793_v30  ;;  %v697_v56 = vld [vmem:[#allocation2 + $0xe8] sm:$0xff] }
 0x20a   :  { %1923 = vrot.lane.b32.xlu0 %v759_v17, %s10607_s20  ;;  %v698_v17 = vld [vmem:[#allocation2 + $0xf0] sm:$0xff] }
 0x20b   :  { %v11795_v43 = vpop.permute.xlu1 %1497 }
 0x20c   :  { %16849 = vst [vmem:[#allocation147_spill] sm:$0xff] %v11795_v43  ;;  %v11799_v27 = vpop.permute.xlu0 %1499 }
 0x20d   :  { %2689 = vrot.lane.b32.xlu1 %v760_v31, %s10610_s1  ;;  %16850 = vst [vmem:[#allocation148_spill] sm:$0xff] %v11799_v27 }
 0x20e   :  { %1925 = vrot.lane.b32.xlu0 %v760_v31, %s10607_s20  ;;  %v761_v31 = vld [vmem:[#allocation2 + $0xe9] sm:$0xff] }
 0x20f   :  { %v11801_v54 = vpop.permute.xlu1 %1501 }
 0x210   :  { %16851 = vst [vmem:[#allocation149_spill] sm:$0xff] %v11801_v54  ;;  %v11805_v42 = vpop.permute.xlu0 %1503 }
 0x211   :  { %2179 = vrot.lane.b32.xlu1 %v633_v34, %s10608_s25  ;;  %16852 = vst [vmem:[#allocation150_spill] sm:$0xff] %v11805_v42 }
 0x212   :  { %2181 = vrot.lane.b32.xlu0 %v634_v50, %s10608_s25 }
 0x213   :  { %v11807_v30 = vpop.permute.xlu1 %1505 }
 0x214   :  { %16853 = vst [vmem:[#allocation151_spill] sm:$0xff] %v11807_v30  ;;  %v11811_v43 = vpop.permute.xlu0 %1507  ;;  %v762_v30 = vld [vmem:[#allocation2 + $0xf1] sm:$0xff] }
 0x215   :  { %2435 = vrot.lane.b32.xlu1 %v697_v56, %s10609_s29  ;;  %16854 = vst [vmem:[#allocation152_spill] sm:$0xff] %v11811_v43  ;;  %v238_v43 = vld [vmem:[#allocation2 + $0x7] sm:$0xff] }
 0x216   :  { %1671 = vrot.lane.b32.xlu0 %v697_v56, %s10606_s15  ;;  %v2863_v32 = vsel %vm91_vm0, %v238_v43, %v11215_v58 }
 0x217   :  { %v1648_v27 = vpop.permute.xlu1 %1647  ;;  %v2928_v23 = vsel %vm2927_vm1, %v2863_v32, %v11415_v52  ;;  %v700_v52 = vld [vmem:[#allocation2 + $0x110] sm:$0xff] }
 0x218   :  { %v1650_v34 = vpop.permute.xlu0 %1649  ;;  %v2993_v33 = vsel %vm16690_vm3, %v2928_v23, %v11622_v8 }
 0x219   :  { %2437 = vrot.lane.b32.xlu1 %v698_v17, %s10609_s29  ;;  %v3058_v58 = vsel %vm3057_vm4, %v2993_v33, %v1648_v27 }
 0x21a   :  { %2691 = vrot.lane.b32.xlu0 %v761_v31, %s10610_s1 }
 0x21b   :  { %v1904_v54 = vpop.permute.xlu1 %1903 }
 0x21c   :  { %v1906_v42 = vpop.permute.xlu0 %1905 }
 0x21d   :  { %1673 = vrot.lane.b32.xlu1 %v698_v17, %s10606_s15  ;;  %v239_v17 = vld [vmem:[#allocation2 + $0xf] sm:$0xff] }
 0x21e   :  { %1927 = vrot.lane.b32.xlu0 %v761_v31, %s10607_s20  ;;  %v636_v31 = vld [vmem:[#allocation2 + $0x10f] sm:$0xff] }
 0x21f   :  { %v2160_v50 = vpop.permute.xlu1 %2159 }
 0x220   :  { %v2162_v35 = vpop.permute.xlu0 %2161 }
 0x221   :  { %2693 = vrot.lane.b32.xlu1 %v762_v30, %s10610_s1 }
 0x222   :  { %1929 = vrot.lane.b32.xlu0 %v762_v30, %s10607_s20  ;;  %v2864_v30 = vsel %vm91_vm0, %v239_v17, %v11221_v62 }
 0x223   :  { %v2416_v56 = vpop.permute.xlu1 %2415  ;;  %v2929_v32 = vsel %vm2927_vm1, %v2864_v30, %v11417_v53 }
 0x224   :  { %v1652_v22 = vpop.permute.xlu0 %1651  ;;  %v2994_v27 = vsel %vm16690_vm3, %v2929_v32, %v11624_v25  ;;  %v763_v25 = vld [vmem:[#allocation2 + $0x109] sm:$0xff] }
 0x225   :  { %2183 = vrot.lane.b32.xlu1 %v635_v26, %s10608_s25  ;;  %v3123_v26 = vsel %vm3122_vm5, %v3058_v58, %v1904_v54  ;;  %v3059_v54 = vsel %vm3057_vm4, %v2994_v27, %v1650_v34 }
 0x226   :  { %2185 = vrot.lane.b32.xlu0 %v636_v31, %s10608_s25  ;;  %v3188_v23 = vsel %vm3187_vm6, %v3123_v26, %v2160_v50  ;;  %v3124_v17 = vsel %vm3122_vm5, %v3059_v54, %v1906_v42  ;;  %v2865_v26 = vsel %vm91_vm0, %v11437_v21, %v11217_v59  ;;  %v2866_v59 = vsel %vm91_vm0, %v11439_v20, %v11223_v63 }
 0x227   :  { %v2418_v38 = vpop.permute.xlu1 %2417  ;;  %v3253_v33 = vsel %vm3252_vm7, %v3188_v23, %v2416_v56  ;;  %v3189_v53 = vsel %vm3187_vm6, %v3124_v17, %v2162_v35  ;;  %v637_v35 = vld [vmem:[#allocation2 + $0x127] sm:$0xff]  ;;  %v2930_v32 = vsel %vm2927_vm1, %v2865_v26, %v11421_v12  ;;  %v638_v23 = vld [vmem:[#allocation2 + $0x12f] sm:$0xff]  ;;  %v2931_v12 = vsel %vm2927_vm1, %v2866_v59, %v11423_v13 }
 0x228   :  { %v2672_v8 = vpop.permute.xlu0 %2671  ;;  %v3254_v50 = vsel %vm3252_vm7, %v3189_v53, %v2418_v38  ;;  %v2995_v27 = vsel %vm16690_vm3, %v2930_v32, %v11631_v40  ;;  %v702_v40 = vld [vmem:[#allocation2 + $0x130] sm:$0xff]  ;;  %v2996_v17 = vsel %vm16690_vm3, %v2931_v12, %v11633_v60  ;;  %v2867_v26 = vsel %vm91_vm0, %v11449_v0, %v11227_v1 }
 0x229   :  { %2439 = vrot.lane.b32.xlu1 %v699_v24, %s10609_s29  ;;  %v3318_v43 = vsel %vm3317_vm8, %v3253_v33, %v2672_v8  ;;  %v3060_v54 = vsel %vm3057_vm4, %v2995_v27, %v1652_v22  ;;  %v2932_v32 = vsel %vm2927_vm1, %v2867_v26, %v11427_v37  ;;  %v2868_v1 = vsel %vm91_vm0, %v11451_v3, %v11229_v2  ;;  %v10520_v26 = vld [vmem:[#allocation2 + $0x6f] sm:$0xff] }
 0x22a   :  { %1675 = vrot.lane.b32.xlu0 %v699_v24, %s10606_s15  ;;  %10319 = vmatprep.mubr.msk.f32.mxu0 %vm3394_vm9, %v3318_v43  ;;  %v764_v24 = vld [vmem:[#allocation2 + $0x111] sm:$0xff]  ;;  %v2997_v27 = vsel %vm16690_vm3, %v2932_v32, %v11643_v51  ;;  %v2933_v37 = vsel %vm2927_vm1, %v2868_v1, %v11429_v36  ;;  %v769_v1 = vld [vmem:[#allocation2 + $0x169] sm:$0xff] }
 0x22b   :  { %v1654_v62 = vpop.permute.xlu1 %1653  ;;  %v704_v51 = vld [vmem:[#allocation2 + $0x150] sm:$0xff]  ;;  %v2998_v12 = vsel %vm16690_vm3, %v2933_v37, %v11645_v9 }
 0x22c   :  { %v1908_v56 = vpop.permute.xlu0 %1907  ;;  %v3061_v63 = vsel %vm3057_vm4, %v2996_v17, %v1654_v62  ;;  %v766_v62 = vld [vmem:[#allocation2 + $0x131] sm:$0xff] }
 0x22d   :  { %2441 = vrot.lane.b32.xlu1 %v700_v52, %s10609_s29  ;;  %v3125_v21 = vsel %vm3122_vm5, %v3060_v54, %v1908_v56  ;;  %v765_v56 = vld [vmem:[#allocation2 + $0x129] sm:$0xff] }
 0x22e   :  { %2695 = vrot.lane.b32.xlu0 %v763_v25, %s10610_s1 }
 0x22f   :  { %v2674_v31 = vpop.permute.xlu1 %2673 }
 0x230   :  { %v3319_v58 = vsel %vm3317_vm8, %v3254_v50, %v2674_v31  ;;  %v1910_v42 = vpop.permute.xlu0 %1909 }
 0x231   :  { %1677 = vrot.lane.b32.xlu1 %v700_v52, %s10606_s15  ;;  %10320 = vmatmul.mubr.msk.f32.vlgmr.msra.gmra.mxu0 %vm3394_vm9, %v3319_v58  ;;  %v701_v52 = vld [vmem:[#allocation2 + $0x128] sm:$0xff]  ;;  %v3126_v50 = vsel %vm3122_vm5, %v3061_v63, %v1910_v42 }
 0x232   :  { %1931 = vrot.lane.b32.xlu0 %v763_v25, %s10607_s20 }
 0x233   :  { %v2164_v34 = vpop.permute.xlu1 %2163 }
 0x234   :  { %v2166_v30 = vpop.permute.xlu0 %2165  ;;  %v3190_v43 = vsel %vm3187_vm6, %v3125_v21, %v2164_v34 }
 0x235   :  { %2697 = vrot.lane.b32.xlu1 %v764_v24, %s10610_s1  ;;  %v3191_v13 = vsel %vm3187_vm6, %v3126_v50, %v2166_v30 }
 0x236   :  { %1933 = vrot.lane.b32.xlu0 %v764_v24, %s10607_s20 }
 0x237   :  { %v2420_v38 = vpop.permute.xlu1 %2419 }
 0x238   :  { %v1656_v33 = vpop.permute.xlu0 %1655  ;;  %v3255_v22 = vsel %vm3252_vm7, %v3190_v43, %v2420_v38 }
 0x239   :  { %2187 = vrot.lane.b32.xlu1 %v637_v35, %s10608_s25  ;;  %v639_v35 = vld [vmem:[#allocation2 + $0x147] sm:$0xff]  ;;  %v3062_v59 = vsel %vm3057_vm4, %v2997_v27, %v1656_v33 }
 0x23a   :  { %2189 = vrot.lane.b32.xlu0 %v638_v23, %s10608_s25  ;;  %v640_v23 = vld [vmem:[#allocation2 + $0x14f] sm:$0xff] }
 0x23b   :  { %v2422_v8 = vpop.permute.xlu1 %2421 }
 0x23c   :  { %v2676_v53 = vpop.permute.xlu0 %2675  ;;  %v3256_v60 = vsel %vm3252_vm7, %v3191_v13, %v2422_v8 }
 0x23d   :  { %2443 = vrot.lane.b32.xlu1 %v701_v52, %s10609_s29  ;;  %v3320_v20 = vsel %vm3317_vm8, %v3255_v22, %v2676_v53  ;;  %v767_v22 = vld [vmem:[#allocation2 + $0x149] sm:$0xff] }
 0x23e   :  { %1679 = vrot.lane.b32.xlu0 %v701_v52, %s10606_s15  ;;  %10322 = vmatprep.mubr.msk.f32.mxu0 %vm3394_vm9, %v3320_v20  ;;  %v703_v52 = vld [vmem:[#allocation2 + $0x148] sm:$0xff] }
 0x23f   :  { %v1658_v25 = vpop.permute.xlu1 %1657 }
 0x240   :  { %v1912_v31 = vpop.permute.xlu0 %1911  ;;  %v3063_v2 = vsel %vm3057_vm4, %v2998_v12, %v1658_v25  ;;  %v768_v25 = vld [vmem:[#allocation2 + $0x151] sm:$0xff] }
 0x241   :  { %2445 = vrot.lane.b32.xlu1 %v702_v40, %s10609_s29  ;;  %v3127_v0 = vsel %vm3122_vm5, %v3062_v59, %v1912_v31 }
 0x242   :  { %2699 = vrot.lane.b32.xlu0 %v765_v56, %s10610_s1 }
 0x243   :  { %v2678_v58 = vpop.permute.xlu1 %2677 }
 0x244   :  { %v3321_v24 = vsel %vm3317_vm8, %v3256_v60, %v2678_v58  ;;  %v1914_v42 = vpop.permute.xlu0 %1913  ;;  %v2869_v58 = vsel %vm91_vm0, %v11461_v57, %v11233_v6  ;;  %v2870_v6 = vsel %vm91_vm0, %v10520_v26, %v11235_v7  ;;  %v772_v26 = vld [vmem:[#allocation2 + $0x191] sm:$0xff] }
 0x245   :  { %1681 = vrot.lane.b32.xlu1 %v702_v40, %s10606_s15  ;;  %10323 = vmatmul.mubr.msk.f32.gmra.mxu0 %vm3394_vm9, %v3321_v24  ;;  %v3128_v17 = vsel %vm3122_vm5, %v3063_v2, %v1914_v42  ;;  %v2934_v24 = vsel %vm2927_vm1, %v2869_v58, %v11433_v28  ;;  %v705_v42 = vld [vmem:[#allocation2 + $0x168] sm:$0xff]  ;;  %v2935_v28 = vsel %vm2927_vm1, %v2870_v6, %v11435_v29 }
 0x246   :  { %1935 = vrot.lane.b32.xlu0 %v765_v56, %s10607_s20  ;;  %v641_v56 = vld [vmem:[#allocation2 + $0x167] sm:$0xff] }
 0x247   :  { %v2168_v34 = vpop.permute.xlu1 %2167 }
 0x248   :  { %v2170_v30 = vpop.permute.xlu0 %2169  ;;  %v3192_v21 = vsel %vm3187_vm6, %v3127_v0, %v2168_v34  ;;  %v2999_v34 = vsel %vm16690_vm3, %v2934_v24, %v11652_v47  ;;  %v706_v47 = vld [vmem:[#allocation2 + $0x170] sm:$0xff] }
 0x249   :  { %2701 = vrot.lane.b32.xlu1 %v766_v62, %s10610_s1  ;;  %v3193_v36 = vsel %vm3187_vm6, %v3128_v17, %v2170_v30 }
 0x24a   :  { %1937 = vrot.lane.b32.xlu0 %v766_v62, %s10607_s20  ;;  %v642_v62 = vld [vmem:[#allocation2 + $0x16f] sm:$0xff] }
 0x24b   :  { %v2424_v38 = vpop.permute.xlu1 %2423 }
 0x24c   :  { %v1660_v8 = vpop.permute.xlu0 %1659  ;;  %v3257_v33 = vsel %vm3252_vm7, %v3192_v21, %v2424_v38 }
 0x24d   :  { %2191 = vrot.lane.b32.xlu1 %v639_v35, %s10608_s25  ;;  %v3064_v38 = vsel %vm3057_vm4, %v2999_v34, %v1660_v8  ;;  %v771_v34 = vld [vmem:[#allocation2 + $0x189] sm:$0xff] }
 0x24e   :  { %2193 = vrot.lane.b32.xlu0 %v640_v23, %s10608_s25  ;;  %v3000_v23 = vsel %vm16690_vm3, %v2935_v28, %v11654_v46  ;;  %v645_v28 = vld [vmem:[#allocation2 + $0x1a7] sm:$0xff] }
 0x24f   :  { %v2426_v54 = vpop.permute.xlu1 %2425 }
 0x250   :  { %v2680_v43 = vpop.permute.xlu0 %2679  ;;  %v3258_v9 = vsel %vm3252_vm7, %v3193_v36, %v2426_v54 }
 0x251   :  { %2447 = vrot.lane.b32.xlu1 %v703_v52, %s10609_s29  ;;  %v3322_v3 = vsel %vm3317_vm8, %v3257_v33, %v2680_v43  ;;  %v643_v43 = vld [vmem:[#allocation2 + $0x187] sm:$0xff] }
 0x252   :  { %1683 = vrot.lane.b32.xlu0 %v703_v52, %s10606_s15  ;;  %10325 = vmatprep.mubr.msk.f32.mxu0 %vm3394_vm9, %v3322_v3  ;;  %v10521_v3 = vld [vmem:[#allocation2 + $0x87] sm:$0xff] }
 0x253   :  { %v1662_v40 = vpop.permute.xlu1 %1661  ;;  %v2871_v17 = vsel %vm91_vm0, %v10521_v3, %v11239_v10 }
 0x254   :  { %v1916_v53 = vpop.permute.xlu0 %1915  ;;  %v3065_v7 = vsel %vm3057_vm4, %v3000_v23, %v1662_v40  ;;  %v2936_v36 = vsel %vm2927_vm1, %v2871_v17, %v11445_v44  ;;  %v10523_v23 = vld [vmem:[#allocation2 + $0xa7] sm:$0xff] }
 0x255   :  { %2449 = vrot.lane.b32.xlu1 %v704_v51, %s10609_s29  ;;  %v3129_v57 = vsel %vm3122_vm5, %v3064_v38, %v1916_v53  ;;  %v3001_v53 = vsel %vm16690_vm3, %v2936_v36, %v11661_v55  ;;  %v708_v55 = vld [vmem:[#allocation2 + $0x190] sm:$0xff] }
 0x256   :  { %2703 = vrot.lane.b32.xlu0 %v767_v22, %s10610_s1 }
 0x257   :  { %v2682_v63 = vpop.permute.xlu1 %2681 }
 0x258   :  { %v3323_v20 = vsel %vm3317_vm8, %v3258_v9, %v2682_v63  ;;  %v1918_v50 = vpop.permute.xlu0 %1917  ;;  %v707_v9 = vld [vmem:[#allocation2 + $0x188] sm:$0xff] }
 0x259   :  { %1685 = vrot.lane.b32.xlu1 %v704_v51, %s10606_s15  ;;  %10326 = vmatmul.mubr.msk.f32.gmra.mxu0 %vm3394_vm9, %v3323_v20  ;;  %v3130_v59 = vsel %vm3122_vm5, %v3065_v7, %v1918_v50  ;;  %v770_v51 = vld [vmem:[#allocation2 + $0x171] sm:$0xff]  ;;  %v709_v7 = vld [vmem:[#allocation2 + $0x1a8] sm:$0xff] }
 0x25a   :  { %1939 = vrot.lane.b32.xlu0 %v767_v22, %s10607_s20  ;;  %v644_v22 = vld [vmem:[#allocation2 + $0x18f] sm:$0xff] }
 0x25b   :  { %v2172_v13 = vpop.permute.xlu1 %2171  ;;  %v10522_v50 = vld [vmem:[#allocation2 + $0x8f] sm:$0xff] }
 0x25c   :  { %v2174_v60 = vpop.permute.xlu0 %2173  ;;  %v3194_v32 = vsel %vm3187_vm6, %v3129_v57, %v2172_v13  ;;  %v2872_v10 = vsel %vm91_vm0, %v10522_v50, %v11241_v11  ;;  %v10525_v50 = vld [vmem:[#allocation2 + $0xc7] sm:$0xff] }
 0x25d   :  { %2705 = vrot.lane.b32.xlu1 %v768_v25, %s10610_s1  ;;  %v3195_v29 = vsel %vm3187_vm6, %v3130_v59, %v2174_v60  ;;  %v2937_v44 = vsel %vm2927_vm1, %v2872_v10, %v11447_v45  ;;  %v2875_v10 = vsel %vm91_vm0, %v10525_v50, %v11251_v18 }
 0x25e   :  { %1941 = vrot.lane.b32.xlu0 %v768_v25, %s10607_s20  ;;  %v3002_v60 = vsel %vm16690_vm3, %v2937_v44, %v11663_v61  ;;  %v647_v44 = vld [vmem:[#allocation2 + $0x1c7] sm:$0xff] }
 0x25f   :  { %v2428_v31 = vpop.permute.xlu1 %2427 }
 0x260   :  { %v1664_v35 = vpop.permute.xlu0 %1663  ;;  %v3259_v52 = vsel %vm3252_vm7, %v3194_v32, %v2428_v31 }
 0x261   :  { %2195 = vrot.lane.b32.xlu1 %v641_v56, %s10608_s25  ;;  %v3066_v25 = vsel %vm3057_vm4, %v3001_v53, %v1664_v35 }
 0x262   :  { %2197 = vrot.lane.b32.xlu0 %v642_v62, %s10608_s25 }
 0x263   :  { %v2430_v30 = vpop.permute.xlu1 %2429 }
 0x264   :  { %v2684_v27 = vpop.permute.xlu0 %2683  ;;  %v3260_v46 = vsel %vm3252_vm7, %v3195_v29, %v2430_v30 }
 0x265   :  { %2451 = vrot.lane.b32.xlu1 %v705_v42, %s10609_s29  ;;  %v3324_v54 = vsel %vm3317_vm8, %v3259_v52, %v2684_v27  ;;  %v2873_v52 = vsel %vm91_vm0, %v10523_v23, %v11245_v14  ;;  %v601_v23 = vld [vmem:[#allocation2 + $0x311] sm:$0xff] }
 0x266   :  { %1687 = vrot.lane.b32.xlu0 %v705_v42, %s10606_s15  ;;  %10328 = vmatprep.mubr.msk.f32.mxu0 %vm3394_vm9, %v3324_v54  ;;  %v2938_v27 = vsel %vm2927_vm1, %v2873_v52, %v11457_v5  ;;  %v665_v52 = vld [vmem:[#allocation2 + $0x327] sm:$0xff] }
 0x267   :  { %v1666_v8 = vpop.permute.xlu1 %1665  ;;  %v3003_v54 = vsel %vm16690_vm3, %v2938_v27, %v11667_v16  ;;  %v710_v16 = vld [vmem:[#allocation2 + $0x1b0] sm:$0xff] }
 0x268   :  { %v1920_v0 = vpop.permute.xlu0 %1919  ;;  %v3067_v11 = vsel %vm3057_vm4, %v3002_v60, %v1666_v8  ;;  %v646_v8 = vld [vmem:[#allocation2 + $0x1af] sm:$0xff] }
 0x269   :  { %2453 = vrot.lane.b32.xlu1 %v706_v47, %s10609_s29  ;;  %v3131_v13 = vsel %vm3122_vm5, %v3066_v25, %v1920_v0 }
 0x26a   :  { %2707 = vrot.lane.b32.xlu0 %v769_v1, %s10610_s1 }
 0x26b   :  { %v2686_v37 = vpop.permute.xlu1 %2685 }
 0x26c   :  { %v3325_v21 = vsel %vm3317_vm8, %v3260_v46, %v2686_v37  ;;  %v1922_v12 = vpop.permute.xlu0 %1921  ;;  %v10524_v46 = vld [vmem:[#allocation2 + $0xaf] sm:$0xff] }
 0x26d   :  { %1689 = vrot.lane.b32.xlu1 %v706_v47, %s10606_s15  ;;  %10329 = vmatmul.mubr.msk.f32.gmra.mxu0 %vm3394_vm9, %v3325_v21  ;;  %v3132_v42 = vsel %vm3122_vm5, %v3067_v11, %v1922_v12  ;;  %v2874_v14 = vsel %vm91_vm0, %v10524_v46, %v11247_v15  ;;  %v16856_v46 = vld [vmem:[#allocation7_spill] sm:$0xff] }
 0x26e   :  { %1943 = vrot.lane.b32.xlu0 %v769_v1, %s10607_s20  ;;  %v2939_v5 = vsel %vm2927_vm1, %v2874_v14, %v11459_v4 }
 0x26f   :  { %v2176_v33 = vpop.permute.xlu1 %2175  ;;  %v3004_v21 = vsel %vm16690_vm3, %v2939_v5, %v11669_v41 }
 0x270   :  { %v2178_v40 = vpop.permute.xlu0 %2177  ;;  %v3196_v56 = vsel %vm3187_vm6, %v3131_v13, %v2176_v33  ;;  %v2940_v13 = vsel %vm2927_vm1, %v2875_v10, %v11466_v49 }
 0x271   :  { %2709 = vrot.lane.b32.xlu1 %v770_v51, %s10610_s1  ;;  %v3197_v45 = vsel %vm3187_vm6, %v3132_v42, %v2178_v40  ;;  %v648_v42 = vld [vmem:[#allocation2 + $0x1cf] sm:$0xff] }
 0x272   :  { %1945 = vrot.lane.b32.xlu0 %v770_v51, %s10607_s20 }
 0x273   :  { %v2432_v2 = vpop.permute.xlu1 %2431 }
 0x274   :  { %v1668_v63 = vpop.permute.xlu0 %1667  ;;  %v3261_v31 = vsel %vm3252_vm7, %v3196_v56, %v2432_v2  ;;  %v773_v2 = vld [vmem:[#allocation2 + $0x1a9] sm:$0xff] }
 0x275   :  { %2199 = vrot.lane.b32.xlu1 %v643_v43, %s10608_s25  ;;  %v3068_v1 = vsel %vm3057_vm4, %v3003_v54, %v1668_v63  ;;  %v536_v63 = vld [vmem:[#allocation2 + $0x308] sm:$0xff]  ;;  %v537_v56 = vld [vmem:[#allocation2 + $0x310] sm:$0xff] }
 0x276   :  { %2201 = vrot.lane.b32.xlu0 %v644_v22, %s10608_s25  ;;  %v774_v22 = vld [vmem:[#allocation2 + $0x1b1] sm:$0xff]  ;;  %v775_v54 = vld [vmem:[#allocation2 + $0x1c9] sm:$0xff] }
 0x277   :  { %v2434_v20 = vpop.permute.xlu1 %2433 }
 0x278   :  { %v2688_v58 = vpop.permute.xlu0 %2687  ;;  %v3262_v61 = vsel %vm3252_vm7, %v3197_v45, %v2434_v20  ;;  %v16855_v45 = vld [vmem:[#allocation107_spill] sm:$0xff] }
 0x279   :  { %2455 = vrot.lane.b32.xlu1 %v707_v9, %s10609_s29  ;;  %v3326_v62 = vsel %vm3317_vm8, %v3261_v31, %v2688_v58 }
 0x27a   :  { %1691 = vrot.lane.b32.xlu0 %v707_v9, %s10606_s15  ;;  %10331 = vmatprep.mubr.msk.f32.mxu0 %vm3394_vm9, %v3326_v62 }
 0x27b   :  { %v1670_v24 = vpop.permute.xlu1 %1669 }
 0x27c   :  { %v1924_v35 = vpop.permute.xlu0 %1923  ;;  %v3069_v15 = vsel %vm3057_vm4, %v3004_v21, %v1670_v24  ;;  %v10526_v24 = vld [vmem:[#allocation2 + $0xcf] sm:$0xff] }
 0x27d   :  { %2457 = vrot.lane.b32.xlu1 %v708_v55, %s10609_s29  ;;  %v3133_v0 = vsel %vm3122_vm5, %v3068_v1, %v1924_v35  ;;  %v2876_v18 = vsel %vm91_vm0, %v10526_v24, %v11253_v19  ;;  %v10527_v1 = vld [vmem:[#allocation2 + $0xe7] sm:$0xff] }
 0x27e   :  { %2711 = vrot.lane.b32.xlu0 %v771_v34, %s10610_s1  ;;  %v2941_v49 = vsel %vm2927_vm1, %v2876_v18, %v11468_v48  ;;  %v2877_v14 = vsel %vm91_vm0, %v10527_v1, %v16856_v46  ;;  %v730_v18 = vld [vmem:[#allocation2 + $0x330] sm:$0xff] }
 0x27f   :  { %v2690_v30 = vpop.permute.xlu1 %2689 }
 0x280   :  { %v3327_v38 = vsel %vm3317_vm8, %v3262_v61, %v2690_v30  ;;  %v1926_v6 = vpop.permute.xlu0 %1925 }
 0x281   :  { %1693 = vrot.lane.b32.xlu1 %v708_v55, %s10606_s15  ;;  %10332 = vmatmul.mubr.msk.f32.gmra.mxu0 %vm3394_vm9, %v3327_v38  ;;  %v3134_v40 = vsel %vm3122_vm5, %v3069_v15, %v1926_v6  ;;  %v3005_v55 = vsel %vm16690_vm3, %v2940_v13, %v11673_v39  ;;  %v600_v39 = vld [vmem:[#allocation2 + $0x309] sm:$0xff]  ;;  %v776_v13 = vld [vmem:[#allocation2 + $0x1d1] sm:$0xff] }
 0x282   :  { %1947 = vrot.lane.b32.xlu0 %v771_v34, %s10607_s20  ;;  %v3006_v34 = vsel %vm16690_vm3, %v2941_v49, %v16855_v45  ;;  %v711_v6 = vld [vmem:[#allocation2 + $0x1c8] sm:$0xff] }
 0x283   :  { %v2180_v57 = vpop.permute.xlu1 %2179  ;;  %v16859_v15 = vld [vmem:[#allocation8_spill] sm:$0xff] }
 0x284   :  { %v2182_v32 = vpop.permute.xlu0 %2181  ;;  %v3198_v37 = vsel %vm3187_vm6, %v3133_v0, %v2180_v57  ;;  %v16857_v0 = vld [vmem:[#allocation57_spill] sm:$0xff] }
 0x285   :  { %2713 = vrot.lane.b32.xlu1 %v772_v26, %s10610_s1  ;;  %v3199_v4 = vsel %vm3187_vm6, %v3134_v40, %v2182_v32  ;;  %v2942_v5 = vsel %vm2927_vm1, %v2877_v14, %v16857_v0 }
 0x286   :  { %1949 = vrot.lane.b32.xlu0 %v772_v26, %s10607_s20 }
 0x287   :  { %v2436_v47 = vpop.permute.xlu1 %2435 }
 0x288   :  { %v1672_v59 = vpop.permute.xlu0 %1671  ;;  %v3263_v51 = vsel %vm3252_vm7, %v3198_v37, %v2436_v47  ;;  %v16858_v37 = vld [vmem:[#allocation108_spill] sm:$0xff] }
 0x289   :  { %2203 = vrot.lane.b32.xlu1 %v645_v28, %s10608_s25  ;;  %v3070_v58 = vsel %vm3057_vm4, %v3005_v55, %v1672_v59 }
 0x28a   :  { %2205 = vrot.lane.b32.xlu0 %v646_v8, %s10608_s25 }
 0x28b   :  { %v2438_v29 = vpop.permute.xlu1 %2437 }
 0x28c   :  { %v2692_v12 = vpop.permute.xlu0 %2691  ;;  %v3264_v41 = vsel %vm3252_vm7, %v3199_v4, %v2438_v29  ;;  %v16860_v4 = vld [vmem:[#allocation58_spill] sm:$0xff] }
 0x28d   :  { %2459 = vrot.lane.b32.xlu1 %v709_v7, %s10609_s29  ;;  %v3328_v43 = vsel %vm3317_vm8, %v3263_v51, %v2692_v12 }
 0x28e   :  { %1695 = vrot.lane.b32.xlu0 %v709_v7, %s10606_s15  ;;  %10334 = vmatprep.mubr.msk.f32.mxu0 %vm3394_vm9, %v3328_v43  ;;  %v712_v7 = vld [vmem:[#allocation2 + $0x1d0] sm:$0xff] }
 0x28f   :  { %v1674_v33 = vpop.permute.xlu1 %1673 }
 0x290   :  { %v1928_v3 = vpop.permute.xlu0 %1927  ;;  %v3071_v30 = vsel %vm3057_vm4, %v3006_v34, %v1674_v33  ;;  %v10528_v33 = vld [vmem:[#allocation2 + $0xef] sm:$0xff]  ;;  %v16863_v34 = vld [vmem:[#allocation59_spill] sm:$0xff] }
 0x291   :  { %2461 = vrot.lane.b32.xlu1 %v710_v16, %s10609_s29  ;;  %v3135_v11 = vsel %vm3122_vm5, %v3070_v58, %v1928_v3  ;;  %v2878_v43 = vsel %vm91_vm0, %v10528_v33, %v16859_v15  ;;  %v666_v3 = vld [vmem:[#allocation2 + $0x32f] sm:$0xff] }
 0x292   :  { %2715 = vrot.lane.b32.xlu0 %v773_v2, %s10610_s1 }
 0x293   :  { %v2694_v17 = vpop.permute.xlu1 %2693 }
 0x294   :  { %v3329_v36 = vsel %vm3317_vm8, %v3264_v41, %v2694_v17  ;;  %v1930_v9 = vpop.permute.xlu0 %1929  ;;  %v729_v17 = vld [vmem:[#allocation2 + $0x328] sm:$0xff] }
 0x295   :  { %1697 = vrot.lane.b32.xlu1 %v710_v16, %s10606_s15  ;;  %10335 = vmatmul.mubr.msk.f32.gmra.mxu0 %vm3394_vm9, %v3329_v36  ;;  %v3136_v26 = vsel %vm3122_vm5, %v3071_v30, %v1930_v9  ;;  %v3007_v16 = vsel %vm16690_vm3, %v2942_v5, %v16858_v37  ;;  %v16861_v36 = vld [vmem:[#allocation109_spill] sm:$0xff] }
 0x296   :  { %1951 = vrot.lane.b32.xlu0 %v773_v2, %s10607_s20  ;;  %v2943_v2 = vsel %vm2927_vm1, %v2878_v43, %v16860_v4  ;;  %v794_v5 = vld [vmem:[#allocation2 + $0x331] sm:$0xff]  ;;  %v10531_v43 = vld [vmem:[#allocation2 + $0x127] sm:$0xff] }
 0x297   :  { %v2184_v53 = vpop.permute.xlu1 %2183 }
 0x298   :  { %v2186_v20 = vpop.permute.xlu0 %2185  ;;  %v3200_v62 = vsel %vm3187_vm6, %v3135_v11, %v2184_v53  ;;  %v793_v11 = vld [vmem:[#allocation2 + $0x329] sm:$0xff] }
 0x299   :  { %2717 = vrot.lane.b32.xlu1 %v774_v22, %s10610_s1  ;;  %v3201_v48 = vsel %vm3187_vm6, %v3136_v26, %v2186_v20 }
 0x29a   :  { %1731 = vrot.lane.b32.xlu0 %v536_v63, %s10606_s15 }
 0x29b   :  { %v2440_v25 = vpop.permute.xlu1 %2439 }
 0x29c   :  { %v1676_v60 = vpop.permute.xlu0 %1675  ;;  %v3265_v61 = vsel %vm3252_vm7, %v3200_v62, %v2440_v25 }
 0x29d   :  { %1953 = vrot.lane.b32.xlu1 %v774_v22, %s10607_s20  ;;  %v3072_v12 = vsel %vm3057_vm4, %v3007_v16, %v1676_v60  ;;  %v3008_v22 = vsel %vm16690_vm3, %v2943_v2, %v16861_v36  ;;  %v10532_v2 = vld [vmem:[#allocation2 + $0x12f] sm:$0xff] }
 0x29e   :  { %2207 = vrot.lane.b32.xlu0 %v647_v44, %s10608_s25  ;;  %v16870_v36 = vld [vmem:[#allocation13_spill] sm:$0xff] }
 0x29f   :  { %v2442_v31 = vpop.permute.xlu1 %2441 }
 0x2a0   :  { %v2696_v35 = vpop.permute.xlu0 %2695  ;;  %v3266_v57 = vsel %vm3252_vm7, %v3201_v48, %v2442_v31  ;;  %v649_v31 = vld [vmem:[#allocation2 + $0x1e7] sm:$0xff]  ;;  %v10530_v48 = vld [vmem:[#allocation2 + $0x10f] sm:$0xff] }
 0x2a1   :  { %1733 = vrot.lane.b32.xlu1 %v537_v56, %s10606_s15  ;;  %v3330_v38 = vsel %vm3317_vm8, %v3265_v61, %v2696_v35  ;;  %v16864_v35 = vld [vmem:[#allocation110_spill] sm:$0xff] }
 0x2a2   :  { %1987 = vrot.lane.b32.xlu0 %v600_v39, %s10607_s20  ;;  %10337 = vmatprep.mubr.msk.f32.mxu0 %vm3394_vm9, %v3330_v38  ;;  %v10529_v39 = vld [vmem:[#allocation2 + $0x107] sm:$0xff] }
 0x2a3   :  { %v1678_v19 = vpop.permute.xlu1 %1677 }
 0x2a4   :  { %v1932_v28 = vpop.permute.xlu0 %1931  ;;  %v3073_v20 = vsel %vm3057_vm4, %v3008_v22, %v1678_v19 }
 0x2a5   :  { %2209 = vrot.lane.b32.xlu1 %v648_v42, %s10608_s25  ;;  %v3137_v40 = vsel %vm3122_vm5, %v3072_v12, %v1932_v28  ;;  %v16862_v42 = vld [vmem:[#allocation9_spill] sm:$0xff]  ;;  %v667_v12 = vld [vmem:[#allocation2 + $0x347] sm:$0xff] }
 0x2a6   :  { %2463 = vrot.lane.b32.xlu0 %v711_v6, %s10609_s29  ;;  %v2879_v45 = vsel %vm91_vm0, %v10529_v39, %v16862_v42  ;;  %v10540_v42 = vld [vmem:[#allocation2 + $0x1af] sm:$0xff] }
 0x2a7   :  { %v2698_v32 = vpop.permute.xlu1 %2697  ;;  %v2944_v61 = vsel %vm2927_vm1, %v2879_v45, %v16863_v34  ;;  %v16877_v45 = vld [vmem:[#allocation20_spill] sm:$0xff] }
 0x2a8   :  { %v3331_v47 = vsel %vm3317_vm8, %v3266_v57, %v2698_v32  ;;  %v1934_v27 = vpop.permute.xlu0 %1933  ;;  %v3009_v19 = vsel %vm16690_vm3, %v2944_v61, %v16864_v35  ;;  %v16866_v32 = vld [vmem:[#allocation60_spill] sm:$0xff]  ;;  %v12176_v34 = vsel %vm91_vm0, %v10540_v42, %v16877_v45  ;;  %v16878_v35 = vld [vmem:[#allocation21_spill] sm:$0xff] }
 0x2a9   :  { %1699 = vrot.lane.b32.xlu1 %v711_v6, %s10606_s15  ;;  %10338 = vmatmul.mubr.msk.f32.gmra.mxu0 %vm3394_vm9, %v3331_v47  ;;  %v3138_v50 = vsel %vm3122_vm5, %v3073_v20, %v1934_v27  ;;  %v16865_v6 = vld [vmem:[#allocation10_spill] sm:$0xff]  ;;  %v713_v27 = vld [vmem:[#allocation2 + $0x1e8] sm:$0xff]  ;;  %v16893_v42 = vld [vmem:[#allocation61_spill] sm:$0xff] }
 0x2aa   :  { %1989 = vrot.lane.b32.xlu0 %v601_v23, %s10607_s20  ;;  %v2880_v57 = vsel %vm91_vm0, %v10530_v48, %v16865_v6  ;;  %v270_v20 = vld [vmem:[#allocation2 + $0x247] sm:$0xff]  ;;  %v10542_v48 = vld [vmem:[#allocation2 + $0x1cf] sm:$0xff]  ;;  %v16879_v6 = vld [vmem:[#allocation22_spill] sm:$0xff] }
 0x2ab   :  { %v2188_v8 = vpop.permute.xlu1 %2187  ;;  %v2945_v47 = vsel %vm2927_vm1, %v2880_v57, %v16866_v32  ;;  %v10541_v61 = vld [vmem:[#allocation2 + $0x1c7] sm:$0xff]  ;;  %v12184_v57 = vsel %vm91_vm0, %v10542_v48, %v16879_v6 }
 0x2ac   :  { %v2190_v59 = vpop.permute.xlu0 %2189  ;;  %v3202_v41 = vsel %vm3187_vm6, %v3137_v40, %v2188_v8  ;;  %v16867_v8 = vld [vmem:[#allocation111_spill] sm:$0xff] }
 0x2ad   :  { %2243 = vrot.lane.b32.xlu1 %v665_v52, %s10608_s25  ;;  %v3203_v10 = vsel %vm3187_vm6, %v3138_v50, %v2190_v59  ;;  %v650_v52 = vld [vmem:[#allocation2 + $0x1ef] sm:$0xff]  ;;  %v16868_v40 = vld [vmem:[#allocation11_spill] sm:$0xff] }
 0x2ae   :  { %2465 = vrot.lane.b32.xlu0 %v712_v7, %s10609_s29  ;;  %v2881_v4 = vsel %vm91_vm0, %v10531_v43, %v16868_v40  ;;  %v16872_v50 = vld [vmem:[#allocation15_spill] sm:$0xff]  ;;  %v16886_v43 = vld [vmem:[#allocation29_spill] sm:$0xff] }
 0x2af   :  { %v2444_v29 = vpop.permute.xlu1 %2443  ;;  %v16880_v32 = vld [vmem:[#allocation23_spill] sm:$0xff]  ;;  %v2946_v45 = vsel %vm2927_vm1, %v2881_v4, %v16893_v42 }
 0x2b0   :  { %v1680_v21 = vpop.permute.xlu0 %1679  ;;  %v3267_v9 = vsel %vm3252_vm7, %v3202_v41, %v2444_v29  ;;  %v16869_v41 = vld [vmem:[#allocation12_spill] sm:$0xff] }
 0x2b1   :  { %2719 = vrot.lane.b32.xlu1 %v775_v54, %s10610_s1  ;;  %v3074_v26 = vsel %vm3057_vm4, %v3009_v19, %v1680_v21  ;;  %v12180_v19 = vsel %vm91_vm0, %v10541_v61, %v16878_v35  ;;  %v10554_v61 = vld [vmem:[#allocation2 + $0x2ef] sm:$0xff]  ;;  %v10555_v6 = vld [vmem:[#allocation2 + $0x307] sm:$0xff] }
 0x2b2   :  { %1701 = vrot.lane.b32.xlu0 %v712_v7, %s10606_s15  ;;  %v3010_v7 = vsel %vm16690_vm3, %v2945_v47, %v16867_v8  ;;  %v16882_v8 = vld [vmem:[#allocation25_spill] sm:$0xff]  ;;  %v16894_v35 = vld [vmem:[#allocation36_spill] sm:$0xff] }
 0x2b3   :  { %v2446_v51 = vpop.permute.xlu1 %2445  ;;  %v12246_v48 = vsel %vm91_vm0, %v10554_v61, %v16894_v35  ;;  %v16903_v61 = vld [vmem:[#allocation44_spill] sm:$0xff] }
 0x2b4   :  { %v2700_v53 = vpop.permute.xlu0 %2699  ;;  %v3268_v44 = vsel %vm3252_vm7, %v3203_v10, %v2446_v51  ;;  %v10563_v35 = vld [vmem:[#allocation2 + $0x387] sm:$0xff] }
 0x2b5   :  { %1955 = vrot.lane.b32.xlu1 %v775_v54, %s10607_s20  ;;  %v3332_v25 = vsel %vm3317_vm8, %v3267_v9, %v2700_v53  ;;  %v10534_v9 = vld [vmem:[#allocation2 + $0x14f] sm:$0xff]  ;;  %v16871_v53 = vld [vmem:[#allocation14_spill] sm:$0xff] }
 0x2b6   :  { %2245 = vrot.lane.b32.xlu0 %v666_v3, %s10608_s25  ;;  %10340 = vmatprep.mubr.msk.f32.mxu0 %vm3394_vm9, %v3332_v25  ;;  %v12142_v3 = vsel %vm91_vm0, %v10532_v2, %v16869_v41  ;;  %v10535_v25 = vld [vmem:[#allocation2 + $0x167] sm:$0xff]  ;;  %v10548_v2 = vld [vmem:[#allocation2 + $0x28f] sm:$0xff]  ;;  %v16887_v41 = vld [vmem:[#allocation30_spill] sm:$0xff] }
 0x2b7   :  { %v1682_v63 = vpop.permute.xlu1 %1681  ;;  %v12154_v10 = vsel %vm91_vm0, %v10535_v25, %v16872_v50  ;;  %v16889_v25 = vld [vmem:[#allocation32_spill] sm:$0xff] }
 0x2b8   :  { %v1936_v56 = vpop.permute.xlu0 %1935  ;;  %v3075_v1 = vsel %vm3057_vm4, %v3010_v7, %v1682_v63  ;;  %v12150_v63 = vsel %vm91_vm0, %v10534_v9, %v16871_v53  ;;  %v12196_v7 = vsel %vm91_vm0, %v270_v20, %v16882_v8  ;;  %v16888_v9 = vld [vmem:[#allocation31_spill] sm:$0xff]  ;;  %v10550_v20 = vld [vmem:[#allocation2 + $0x2af] sm:$0xff] }
 0x2b9   :  { %2499 = vrot.lane.b32.xlu1 %v729_v17, %s10609_s29  ;;  %v3139_v28 = vsel %vm3122_vm5, %v3074_v26, %v1936_v56  ;;  %v777_v26 = vld [vmem:[#allocation2 + $0x1e9] sm:$0xff]  ;;  %v12226_v50 = vsel %vm91_vm0, %v10550_v20, %v16889_v25 }
 0x2ba   :  { %2721 = vrot.lane.b32.xlu0 %v776_v13, %s10610_s1 }
 0x2bb   :  { %v2702_v55 = vpop.permute.xlu1 %2701 }
 0x2bc   :  { %v3333_v60 = vsel %vm3317_vm8, %v3268_v44, %v2702_v55  ;;  %v1938_v58 = vpop.permute.xlu0 %1937  ;;  %v16873_v44 = vld [vmem:[#allocation16_spill] sm:$0xff] }
 0x2bd   :  { %1735 = vrot.lane.b32.xlu1 %v729_v17, %s10606_s15  ;;  %10341 = vmatmul.mubr.msk.f32.gmra.mxu0 %vm3394_vm9, %v3333_v60  ;;  %v3140_v14 = vsel %vm3122_vm5, %v3075_v1, %v1938_v58  ;;  %v10533_v17 = vld [vmem:[#allocation2 + $0x147] sm:$0xff]  ;;  %v16874_v60 = vld [vmem:[#allocation17_spill] sm:$0xff]  ;;  %v16883_v1 = vld [vmem:[#allocation26_spill] sm:$0xff] }
 0x2be   :  { %1957 = vrot.lane.b32.xlu0 %v776_v13, %s10607_s20  ;;  %v12146_v22 = vsel %vm91_vm0, %v10533_v17, %v16870_v36  ;;  %v10536_v13 = vld [vmem:[#allocation2 + $0x16f] sm:$0xff]  ;;  %v10537_v55 = vld [vmem:[#allocation2 + $0x187] sm:$0xff]  ;;  %v12218_v17 = vsel %vm91_vm0, %v10548_v2, %v16887_v41 }
 0x2bf   :  { %v2192_v24 = vpop.permute.xlu1 %2191  ;;  %v12158_v56 = vsel %vm91_vm0, %v10536_v13, %v16873_v44  ;;  %v271_v58 = vld [vmem:[#allocation2 + $0x24f] sm:$0xff]  ;;  %v10549_v36 = vld [vmem:[#allocation2 + $0x2a7] sm:$0xff] }
 0x2c0   :  { %v2194_v49 = vpop.permute.xlu0 %2193  ;;  %v3204_v23 = vsel %vm3187_vm6, %v3139_v28, %v2192_v24  ;;  %v10538_v24 = vld [vmem:[#allocation2 + $0x18f] sm:$0xff]  ;;  %v10543_v28 = vld [vmem:[#allocation2 + $0x1e7] sm:$0xff]  ;;  %v12222_v53 = vsel %vm91_vm0, %v10549_v36, %v16888_v9 }
 0x2c1   :  { %2211 = vrot.lane.b32.xlu1 %v649_v31, %s10608_s25  ;;  %v3205_v0 = vsel %vm3187_vm6, %v3140_v14, %v2194_v49  ;;  %v12162_v31 = vsel %vm91_vm0, %v10537_v55, %v16874_v60  ;;  %v10539_v49 = vld [vmem:[#allocation2 + $0x1a7] sm:$0xff]  ;;  %v12188_v47 = vsel %vm91_vm0, %v10543_v28, %v16880_v32  ;;  %v16890_v44 = vld [vmem:[#allocation33_spill] sm:$0xff] }
 0x2c2   :  { %2501 = vrot.lane.b32.xlu0 %v730_v18, %s10609_s29  ;;  %v10545_v14 = vld [vmem:[#allocation2 + $0x267] sm:$0xff]  ;;  %v10552_v60 = vld [vmem:[#allocation2 + $0x2cf] sm:$0xff] }
 0x2c3   :  { %v2448_v62 = vpop.permute.xlu1 %2447  ;;  %v10551_v13 = vld [vmem:[#allocation2 + $0x2c7] sm:$0xff]  ;;  %v16895_v28 = vld [vmem:[#allocation37_spill] sm:$0xff] }
 0x2c4   :  { %v12104_v30 = vpop.permute.xlu0 %1683  ;;  %v3269_v54 = vsel %vm3252_vm7, %v3204_v23, %v2448_v62  ;;  %v16876_v62 = vld [vmem:[#allocation19_spill] sm:$0xff]  ;;  %v10544_v23 = vld [vmem:[#allocation2 + $0x1ef] sm:$0xff]  ;;  %v12232_v55 = vsel %vm91_vm0, %v10551_v13, %v16890_v44  ;;  %v12250_v32 = vsel %vm91_vm0, %v10555_v6, %v16895_v28  ;;  %v16901_v44 = vld [vmem:[#allocation42_spill] sm:$0xff] }
 0x2c5   :  { %2755 = vrot.lane.b32.xlu1 %v793_v11, %s10610_s1  ;;  %v12172_v39 = vsel %vm91_vm0, %v10539_v49, %v16876_v62  ;;  %v16892_v49 = vld [vmem:[#allocation35_spill] sm:$0xff]  ;;  %v16899_v2 = vld [vmem:[#allocation40_spill] sm:$0xff]  ;;  %v16900_v9 = vld [vmem:[#allocation41_spill] sm:$0xff] }
 0x2c6   :  { %1737 = vrot.lane.b32.xlu0 %v730_v18, %s10606_s15  ;;  %v16875_v18 = vld [vmem:[#allocation18_spill] sm:$0xff]  ;;  %v10559_v36 = vld [vmem:[#allocation2 + $0x347] sm:$0xff]  ;;  %v10560_v13 = vld [vmem:[#allocation2 + $0x34f] sm:$0xff] }
 0x2c7   :  { %v2450_v38 = vpop.permute.xlu1 %2449  ;;  %v12270_v20 = vsel %vm91_vm0, %v10559_v36, %v16900_v9  ;;  %v16904_v6 = vld [vmem:[#allocation45_spill] sm:$0xff] }
 0x2c8   :  { %v2704_v59 = vpop.permute.xlu0 %2703  ;;  %v3270_v37 = vsel %vm3252_vm7, %v3205_v0, %v2450_v38  ;;  %v714_v38 = vld [vmem:[#allocation2 + $0x1f0] sm:$0xff]  ;;  %v16884_v0 = vld [vmem:[#allocation27_spill] sm:$0xff]  ;;  %v12292_v28 = vsel %vm91_vm0, %v10563_v35, %v16904_v6 }
 0x2c9   :  { %1991 = vrot.lane.b32.xlu1 %v793_v11, %s10607_s20  ;;  %v3334_v46 = vsel %vm3317_vm8, %v3269_v54, %v2704_v59  ;;  %v12168_v11 = vsel %vm91_vm0, %v10538_v24, %v16875_v18  ;;  %v10553_v18 = vld [vmem:[#allocation2 + $0x2e7] sm:$0xff]  ;;  %v299_v36 = vld [vmem:[#allocation2 + $0x40f] sm:$0xff] }
 0x2ca   :  { %2213 = vrot.lane.b32.xlu0 %v650_v52, %s10608_s25  ;;  %10343 = vmatprep.mubr.msk.f32.mxu0 %vm3394_vm9, %v3334_v46  ;;  %v16881_v52 = vld [vmem:[#allocation24_spill] sm:$0xff]  ;;  %v12202_v46 = vsel %vm91_vm0, %v271_v58, %v16883_v1  ;;  %v16891_v58 = vld [vmem:[#allocation34_spill] sm:$0xff]  ;;  %v12240_v62 = vsel %vm91_vm0, %v10553_v18, %v16892_v49  ;;  %v16902_v18 = vld [vmem:[#allocation43_spill] sm:$0xff] }
 0x2cb   :  { %v12118_v29 = vpop.permute.xlu1 %1685  ;;  %v12236_v24 = vsel %vm91_vm0, %v10552_v60, %v16891_v58  ;;  %v16897_v1 = vld [vmem:[#allocation112_spill] sm:$0xff]  ;;  %v12276_v60 = vsel %vm91_vm0, %v10560_v13, %v16901_v44  ;;  %v16908_v9 = vld [vmem:[#allocation113_spill] sm:$0xff] }
 0x2cc   :  { %v12128_v16 = vpop.permute.xlu0 %1939  ;;  %v10561_v58 = vld [vmem:[#allocation2 + $0x367] sm:$0xff]  ;;  %v10566_v44 = vld [vmem:[#allocation2 + $0x3af] sm:$0xff] }
 0x2cd   :  { %2467 = vrot.lane.b32.xlu1 %v713_v27, %s10609_s29  ;;  %v12280_v49 = vsel %vm91_vm0, %v10561_v58, %v16902_v18  ;;  %v16909_v58 = vld [vmem:[#allocation48_spill] sm:$0xff] }
 0x2ce   :  { %2757 = vrot.lane.b32.xlu0 %v794_v5, %s10610_s1  ;;  %v12314_v18 = vsel %vm91_vm0, %v10566_v44, %v16909_v58  ;;  %v300_v35 = vld [vmem:[#allocation2 + $0x427] sm:$0xff]  ;;  %v301_v6 = vld [vmem:[#allocation2 + $0x42f] sm:$0xff] }
 0x2cf   :  { %v2706_v21 = vpop.permute.xlu1 %2705  ;;  %v16914_v44 = vld [vmem:[#allocation53_spill] sm:$0xff] }
 0x2d0   :  { %v3335_v51 = vsel %vm3317_vm8, %v3270_v37, %v2706_v21  ;;  %v12134_v33 = vpop.permute.xlu0 %1941  ;;  %v10546_v37 = vld [vmem:[#allocation2 + $0x26f] sm:$0xff] }
 0x2d1   :  { %1703 = vrot.lane.b32.xlu1 %v713_v27, %s10606_s15  ;;  %10344 = vmatmul.mubr.msk.f32.gmra.mxu0 %vm3394_vm9, %v3335_v51  ;;  %v12192_v27 = vsel %vm91_vm0, %v10544_v23, %v16881_v52  ;;  %v16885_v21 = vld [vmem:[#allocation28_spill] sm:$0xff]  ;;  %v16896_v52 = vld [vmem:[#allocation38_spill] sm:$0xff] }
 0x2d2   :  { %1993 = vrot.lane.b32.xlu0 %v794_v5, %s10607_s20  ;;  %v12206_v5 = vsel %vm91_vm0, %v10545_v14, %v16884_v0  ;;  %v12210_v51 = vsel %vm91_vm0, %v10546_v37, %v16885_v21  ;;  %v10556_v23 = vld [vmem:[#allocation2 + $0x30f] sm:$0xff]  ;;  %v3011_v14 = vsel %vm16690_vm3, %v2946_v45, %v16897_v1  ;;  %v10557_v37 = vld [vmem:[#allocation2 + $0x327] sm:$0xff] }
 0x2d3   :  { %v12136_v15 = vpop.permute.xlu1 %2195  ;;  %v12254_v8 = vsel %vm91_vm0, %v10556_v23, %v16896_v52  ;;  %v16898_v21 = vld [vmem:[#allocation39_spill] sm:$0xff]  ;;  %v3076_v25 = vsel %vm3057_vm4, %v3011_v14, %v12104_v30  ;;  %v10562_v45 = vld [vmem:[#allocation2 + $0x36f] sm:$0xff]  ;;  %v16905_v23 = vld [vmem:[#allocation62_spill] sm:$0xff] }
 0x2d4   :  { %v12198_v54 = vpop.permute.xlu0 %2197  ;;  %v3141_v42 = vsel %vm3122_vm5, %v3076_v25, %v12128_v16  ;;  %v12288_v30 = vsel %vm91_vm0, %v10562_v45, %v16903_v61  ;;  %v2947_v52 = vsel %vm2927_vm1, %v12142_v3, %v16905_v23  ;;  %v731_v1 = vld [vmem:[#allocation2 + $0x348] sm:$0xff]  ;;  %v16906_v14 = vld [vmem:[#allocation46_spill] sm:$0xff]  ;;  %v16910_v45 = vld [vmem:[#allocation49_spill] sm:$0xff] }
 0x2d5   :  { %2247 = vrot.lane.b32.xlu1 %v667_v12, %s10608_s25  ;;  %v10547_v12 = vld [vmem:[#allocation2 + $0x287] sm:$0xff]  ;;  %v3206_v16 = vsel %vm3187_vm6, %v3141_v42, %v12136_v15  ;;  %v3012_v25 = vsel %vm16690_vm3, %v2947_v52, %v16908_v9  ;;  %v10568_v52 = vld [vmem:[#allocation2 + $0x3cf] sm:$0xff] }
 0x2d6   :  { %v12214_v40 = vsel %vm91_vm0, %v10547_v12, %v16886_v43  ;;  %2469 = vrot.lane.b32.xlu0 %v714_v38, %s10609_s29  ;;  %v12262_v12 = vsel %vm91_vm0, %v10557_v37, %v16898_v21  ;;  %v10558_v43 = vld [vmem:[#allocation2 + $0x32f] sm:$0xff]  ;;  %v10565_v21 = vld [vmem:[#allocation2 + $0x3a7] sm:$0xff]  ;;  %v3077_v23 = vsel %vm3057_vm4, %v3012_v25, %v12118_v29 }
 0x2d7   :  { %v2452_v59 = vpop.permute.xlu1 %2451  ;;  %v12266_v41 = vsel %vm91_vm0, %v10558_v43, %v16899_v2  ;;  %v16907_v43 = vld [vmem:[#allocation47_spill] sm:$0xff]  ;;  %v3142_v9 = vsel %vm3122_vm5, %v3077_v23, %v12134_v33  ;;  %v10570_v29 = vld [vmem:[#allocation2 + $0x3ef] sm:$0xff] }
 0x2d8   :  { %v12258_v0 = vpop.permute.xlu0 %1687  ;;  %v12305_v2 = vsel %vm91_vm0, %v10565_v21, %v16907_v43  ;;  %v3271_v3 = vsel %vm3252_vm7, %v3206_v16, %v2452_v59  ;;  %v10567_v42 = vld [vmem:[#allocation2 + $0x3c7] sm:$0xff]  ;;  %v16911_v16 = vld [vmem:[#allocation50_spill] sm:$0xff]  ;;  %v3207_v33 = vsel %vm3187_vm6, %v3142_v9, %v12198_v54 }
 0x2d9   :  { %2723 = vrot.lane.b32.xlu1 %v777_v26, %s10610_s1  ;;  %v12318_v61 = vsel %vm91_vm0, %v10567_v42, %v16910_v45  ;;  %v16912_v21 = vld [vmem:[#allocation51_spill] sm:$0xff]  ;;  %v16913_v25 = vld [vmem:[#allocation52_spill] sm:$0xff]  ;;  %v16915_v42 = vld [vmem:[#allocation54_spill] sm:$0xff] }
 0x2da   :  { %1705 = vrot.lane.b32.xlu0 %v714_v38, %s10606_s15  ;;  %v668_v38 = vld [vmem:[#allocation2 + $0x34f] sm:$0xff]  ;;  %v12345_v45 = vsel %vm91_vm0, %v299_v36, %v16915_v42  ;;  %v16916_v23 = vld [vmem:[#allocation55_spill] sm:$0xff] }
 0x2db   :  { %v2454_v4 = vpop.permute.xlu1 %2453  ;;  %v16919_v9 = vld [vmem:[#allocation64_spill] sm:$0xff] }
 0x2dc   :  { %v2708_v13 = vpop.permute.xlu0 %2707  ;;  %v3272_v36 = vsel %vm3252_vm7, %v3207_v33, %v2454_v4  ;;  %v16922_v4 = vld [vmem:[#allocation67_spill] sm:$0xff]  ;;  %v16923_v33 = vld [vmem:[#allocation68_spill] sm:$0xff] }
 0x2dd   :  { %1959 = vrot.lane.b32.xlu1 %v777_v26, %s10607_s20  ;;  %v10564_v26 = vld [vmem:[#allocation2 + $0x38f] sm:$0xff]  ;;  %v3336_v59 = vsel %vm3317_vm8, %v3271_v3, %v2708_v13  ;;  %v12337_v3 = vsel %vm91_vm0, %v10570_v29, %v16913_v25  ;;  %v10571_v13 = vld [vmem:[#allocation2 + $0x407] sm:$0xff]  ;;  %v12383_v42 = vsel %vm2927_vm1, %v12162_v31, %v16922_v4 }
 0x2de   :  { %v12301_v37 = vsel %vm91_vm0, %v10564_v26, %v16906_v14  ;;  %v12325_v26 = vsel %vm91_vm0, %v10568_v52, %v16911_v16  ;;  %v10569_v14 = vld [vmem:[#allocation2 + $0x3e7] sm:$0xff]  ;;  %2249 = vrot.lane.b32.xlu0 %v668_v38, %s10608_s25  ;;  %v12341_v58 = vsel %vm91_vm0, %v10571_v13, %v16914_v44  ;;  %10346 = vmatprep.mubr.msk.f32.mxu0 %vm3394_vm9, %v3336_v59  ;;  %v778_v38 = vld [vmem:[#allocation2 + $0x1f1] sm:$0xff] }
 0x2df   :  { %v12310_v15 = vpop.permute.xlu1 %1689  ;;  %v12329_v43 = vsel %vm91_vm0, %v10569_v14, %v16912_v21  ;;  %v12352_v52 = vsel %vm91_vm0, %v300_v35, %v16916_v23  ;;  %v16917_v16 = vld [vmem:[#allocation56_spill] sm:$0xff]  ;;  %v16918_v21 = vld [vmem:[#allocation63_spill] sm:$0xff]  ;;  %v12367_v59 = vsel %vm2927_vm1, %v12150_v63, %v16919_v9  ;;  %v16920_v35 = vld [vmem:[#allocation65_spill] sm:$0xff]  ;;  %v12388_v63 = vsel %vm2927_vm1, %v12168_v11, %v16923_v33 }
 0x2e0   :  { %v12356_v14 = vsel %vm91_vm0, %v301_v6, %v16917_v16  ;;  %v2948_v29 = vsel %vm2927_vm1, %v12146_v22, %v16918_v21  ;;  %v12362_v25 = vpop.permute.xlu0 %1943  ;;  %v12372_v13 = vsel %vm2927_vm1, %v12154_v10, %v16920_v35  ;;  %v16921_v6 = vld [vmem:[#allocation66_spill] sm:$0xff]  ;;  %v16924_v23 = vld [vmem:[#allocation69_spill] sm:$0xff]  ;;  %v16926_v31 = vld [vmem:[#allocation71_spill] sm:$0xff] }
 0x2e1   :  { %2503 = vrot.lane.b32.xlu1 %v731_v1, %s10609_s29  ;;  %v12377_v44 = vsel %vm2927_vm1, %v12158_v56, %v16921_v6  ;;  %v12393_v10 = vsel %vm2927_vm1, %v12172_v39, %v16924_v23  ;;  %v16925_v56 = vld [vmem:[#allocation70_spill] sm:$0xff]  ;;  %v12405_v21 = vsel %vm2927_vm1, %v12180_v19, %v16926_v31  ;;  %v16927_v11 = vld [vmem:[#allocation72_spill] sm:$0xff]  ;;  %v16928_v39 = vld [vmem:[#allocation73_spill] sm:$0xff] }
 0x2e2   :  { %2725 = vrot.lane.b32.xlu0 %v778_v38, %s10610_s1  ;;  %v12400_v16 = vsel %vm2927_vm1, %v12176_v34, %v16925_v56  ;;  %v16929_v34 = vld [vmem:[#allocation74_spill] sm:$0xff]  ;;  %v16930_v19 = vld [vmem:[#allocation75_spill] sm:$0xff] }
 0x2e3   :  { %v2710_v54 = vpop.permute.xlu1 %2709  ;;  %v12421_v9 = vsel %vm2927_vm1, %v12192_v27, %v16929_v34  ;;  %v12426_v35 = vsel %vm2927_vm1, %v12196_v7, %v16930_v19  ;;  %v16933_v27 = vld [vmem:[#allocation78_spill] sm:$0xff]  ;;  %v16934_v7 = vld [vmem:[#allocation79_spill] sm:$0xff] }
 0x2e4   :  { %v3337_v22 = vsel %vm3317_vm8, %v3272_v36, %v2710_v54  ;;  %v12410_v36 = vsel %vm2927_vm1, %v12184_v57, %v16927_v11  ;;  %v12415_v54 = vsel %vm2927_vm1, %v12188_v47, %v16928_v39  ;;  %v16931_v57 = vld [vmem:[#allocation76_spill] sm:$0xff]  ;;  %v16932_v47 = vld [vmem:[#allocation77_spill] sm:$0xff]  ;;  %v12438_v4 = vpop.permute.xlu0 %1945  ;;  %v12443_v23 = vsel %vm2927_vm1, %v12210_v51, %v16933_v27  ;;  %v16937_v39 = vld [vmem:[#allocation82_spill] sm:$0xff] }
 0x2e5   :  { %1739 = vrot.lane.b32.xlu1 %v731_v1, %s10606_s15  ;;  %10347 = vmatmul.mubr.msk.f32.gmra.mxu0 %vm3394_vm9, %v3337_v22  ;;  %v651_v1 = vld [vmem:[#allocation2 + $0x207] sm:$0xff]  ;;  %v12431_v6 = vsel %vm2927_vm1, %v12202_v46, %v16931_v57  ;;  %v12436_v22 = vsel %vm2927_vm1, %v12206_v5, %v16932_v47  ;;  %v12448_v56 = vsel %vm2927_vm1, %v12214_v40, %v16934_v7  ;;  %v16936_v5 = vld [vmem:[#allocation81_spill] sm:$0xff] }
 0x2e6   :  { %v16935_v46 = vld [vmem:[#allocation80_spill] sm:$0xff]  ;;  %v12458_v11 = vsel %vm2927_vm1, %v12222_v53, %v16936_v5  ;;  %v12463_v51 = vsel %vm2927_vm1, %v12226_v50, %v16937_v39  ;;  %v16939_v34 = vld [vmem:[#allocation83_spill] sm:$0xff]  ;;  %1961 = vrot.lane.b32.xlu0 %v778_v38, %s10607_s20  ;;  %v16943_v53 = vld [vmem:[#allocation85_spill] sm:$0xff]  ;;  %v10611_v39 = vmov 1983009808  }
 0x2e7   :  { %v2200_v33 = vpop.permute.xlu1 %2199  ;;  %v12453_v31 = vsel %vm2927_vm1, %v12218_v17, %v16935_v46  ;;  %16938 = vst [vmem:[#allocation107_spill] sm:$0xff] %v12463_v51  ;;  %v12468_v40 = vsel %vm2927_vm1, %v12232_v55, %v16939_v34  ;;  %v16941_v17 = vld [vmem:[#allocation84_spill] sm:$0xff]  ;;  %v12480_v57 = vsel %vm2927_vm1, %v12240_v62, %v16943_v53  ;;  %v16944_v50 = vld [vmem:[#allocation86_spill] sm:$0xff]  ;;  %v16945_v55 = vld [vmem:[#allocation87_spill] sm:$0xff]  ;;  %v4106_v34 = vunpack.c.l.s4 %v10611_v39 }
 0x2e8   :  { %16940 = vst [vmem:[#allocation7_spill] sm:$0xff] %v12468_v40  ;;  %v12475_v19 = vsel %vm2927_vm1, %v12236_v24, %v16941_v17  ;;  %v12485_v47 = vsel %vm2927_vm1, %v12246_v48, %v16944_v50  ;;  %v12490_v38 = vsel %vm2927_vm1, %v12250_v32, %v16945_v55  ;;  %v795_v27 = vld [vmem:[#allocation2 + $0x349] sm:$0xff]  ;;  %v16947_v46 = vld [vmem:[#allocation89_spill] sm:$0xff]  ;;  %v2202_v5 = vpop.permute.xlu0 %2201  ;;  %v4108_v17 = vlaneseq  ;;  %v16948_v53 = vld [vmem:[#allocation90_spill] sm:$0xff] }
 0x2e9   :  { %2215 = vrot.lane.b32.xlu1 %v651_v1, %s10608_s25  ;;  %16942 = vst [vmem:[#allocation57_spill] sm:$0xff] %v12475_v19  ;;  %v732_v1 = vld [vmem:[#allocation2 + $0x350] sm:$0xff]  ;;  %v12500_v62 = vsel %vm2927_vm1, %v12262_v12, %v16947_v46  ;;  %v12505_v32 = vsel %vm2927_vm1, %v12266_v41, %v16948_v53  ;;  %v16949_v50 = vld [vmem:[#allocation91_spill] sm:$0xff]  ;;  %v16952_v39 = vld [vmem:[#allocation94_spill] sm:$0xff] }
 0x2ea   :  { %v16946_v7 = vld [vmem:[#allocation88_spill] sm:$0xff]  ;;  %v12525_v41 = vsel %vm2927_vm1, %v12288_v30, %v16952_v39  ;;  %v16953_v53 = vld [vmem:[#allocation95_spill] sm:$0xff]  ;;  %2505 = vrot.lane.b32.xlu0 %v732_v1, %s10609_s29  ;;  %v16958_v30 = vld [vmem:[#allocation98_spill] sm:$0xff] }
 0x2eb   :  { %v12495_v24 = vsel %vm2927_vm1, %v12254_v8, %v16946_v7  ;;  %v2456_v48 = vpop.permute.xlu1 %2455  ;;  %v12510_v8 = vsel %vm2927_vm1, %v12270_v20, %v16949_v50  ;;  %v16950_v55 = vld [vmem:[#allocation92_spill] sm:$0xff]  ;;  %v16951_v7 = vld [vmem:[#allocation93_spill] sm:$0xff]  ;;  %v12530_v20 = vsel %vm2927_vm1, %v12292_v28, %v16953_v53  ;;  %v16960_v28 = vld [vmem:[#allocation99_spill] sm:$0xff] }
 0x2ec   :  { %v12515_v12 = vsel %vm2927_vm1, %v12276_v60, %v16950_v55  ;;  %v12520_v46 = vsel %vm2927_vm1, %v12280_v49, %v16951_v7  ;;  %v16954_v50 = vld [vmem:[#allocation96_spill] sm:$0xff]  ;;  %v16956_v49 = vld [vmem:[#allocation97_spill] sm:$0xff]  ;;  %v12547_v7 = vsel %vm2927_vm1, %v12314_v18, %v16958_v30  ;;  %v12552_v39 = vsel %vm2927_vm1, %v12318_v61, %v16960_v28  ;;  %v12566_v18 = vpop.permute.xlu0 %1691  ;;  %v16967_v61 = vld [vmem:[#allocation102_spill] sm:$0xff] }
 0x2ed   :  { %v12535_v60 = vsel %vm2927_vm1, %v12301_v37, %v16954_v50  ;;  %2759 = vrot.lane.b32.xlu1 %v795_v27, %s10610_s1  ;;  %v12542_v55 = vsel %vm2927_vm1, %v12305_v2, %v16956_v49  ;;  %16959 = vst [vmem:[#allocation58_spill] sm:$0xff] %v12547_v7  ;;  %16961 = vst [vmem:[#allocation109_spill] sm:$0xff] %v12552_v39  ;;  %v16962_v37 = vld [vmem:[#allocation100_spill] sm:$0xff]  ;;  %v16964_v50 = vld [vmem:[#allocation101_spill] sm:$0xff]  ;;  %v4107_v7 = vunpack.c.0.s8 %v4106_v34 }
 0x2ee   :  { %16955 = vst [vmem:[#allocation108_spill] sm:$0xff] %v12535_v60  ;;  %16957 = vst [vmem:[#allocation8_spill] sm:$0xff] %v12542_v55  ;;  %v12557_v53 = vsel %vm2927_vm1, %v12325_v26, %v16962_v37  ;;  %v12562_v2 = vsel %vm2927_vm1, %v12329_v43, %v16964_v50  ;;  %v16966_v49 = vld [vmem:[#allocation114_spill] sm:$0xff]  ;;  %v4109_v60 = vshrl.u32 %v4108_v17, 7  ;;  %v12571_v28 = vsel %vm2927_vm1, %v12337_v3, %v16967_v61  ;;  %v16969_v26 = vld [vmem:[#allocation103_spill] sm:$0xff] }
 0x2ef   :  { %16963 = vst [vmem:[#allocation9_spill] sm:$0xff] %v12557_v53  ;;  %16965 = vst [vmem:[#allocation59_spill] sm:$0xff] %v12562_v2  ;;  %v3013_v55 = vsel %vm16690_vm3, %v2948_v29, %v16966_v49  ;;  %v2458_v30 = vpop.permute.xlu1 %2457  ;;  %v12576_v37 = vsel %vm2927_vm1, %v12341_v58, %v16969_v26  ;;  %v16971_v43 = vld [vmem:[#allocation104_spill] sm:$0xff]  ;;  %v12588_v34 = vld [vmem:[%s16684_s2] ss:$0 sm:$0xff]  ;;  %1741 = vrot.lane.b32.xlu0 %v732_v1, %s10606_s15 }
 0x2f0   :  { %16968 = vst [vmem:[#allocation110_spill] sm:$0xff] %v12571_v28  ;;  %16970 = vst [vmem:[#allocation10_spill] sm:$0xff] %v12576_v37  ;;  %v12581_v50 = vsel %vm2927_vm1, %v12345_v45, %v16971_v43  ;;  %v3078_v29 = vsel %vm3057_vm4, %v3013_v55, %v12258_v0  ;;  %v16973_v3 = vld [vmem:[#allocation105_spill] sm:$0xff]  ;;  %v16975_v58 = vld [vmem:[#allocation106_spill] sm:$0xff] }
 0x2f1   :  { %16972 = vst [vmem:[#allocation60_spill] sm:$0xff] %v12581_v50  ;;  %v12593_v17 = vsel %vm2927_vm1, %v12352_v52, %v16973_v3  ;;  %v12598_v49 = vsel %vm2927_vm1, %v12356_v14, %v16975_v58  ;;  %v3143_v45 = vsel %vm3122_vm5, %v3078_v29, %v12362_v25  ;;  %1995 = vrot.lane.b32.xlu1 %v795_v27, %s10607_s20  ;;  %v16977_v0 = vld [vmem:[#allocation115_spill] sm:$0xff]  ;;  %v16978_v61 = vld [vmem:[#allocation116_spill] sm:$0xff]  ;;  %v16979_v26 = vld [vmem:[#allocation117_spill] sm:$0xff]  ;;  %v10321_v43 = vpop.f32.mrf.mxu0 }
 0x2f2   :  { %16974 = vst [vmem:[#allocation111_spill] sm:$0xff] %v12593_v17  ;;  %16976 = vst [vmem:[#allocation11_spill] sm:$0xff] %v12598_v49  ;;  %v3014_v55 = vsel %vm16690_vm3, %v12367_v59, %v16977_v0  ;;  %v12610_v52 = vsel %vm16690_vm3, %v12372_v13, %v16978_v61  ;;  %v12615_v14 = vsel %vm16690_vm3, %v12377_v44, %v16979_v26  ;;  %v652_v1 = vld [vmem:[#allocation2 + $0x20f] sm:$0xff]  ;;  %v16980_v27 = vld [vmem:[#allocation118_spill] sm:$0xff]  ;;  %v2712_v0 = vpop.permute.xlu0 %2711 }
 0x2f3   :  { %v3208_v25 = vsel %vm3187_vm6, %v3143_v45, %v2200_v33  ;;  %v715_v29 = vld [vmem:[#allocation2 + $0x208] sm:$0xff]  ;;  %v12621_v3 = vsel %vm16690_vm3, %v12383_v42, %v16980_v27  ;;  %v3663_v13 = vadd.f32 %v10321_v43, %v12588_v34  ;;  %v12625_v58 = vsub.s32 %v4107_v7, %v4109_v60  ;;  %v12627_v61 = vpop.permute.xlu1 %1693  ;;  %v3657_v60 = vpop.f32.mrf.mxu0  ;;  %v16983_v7 = vld [vmem:[#allocation121_spill] sm:$0xff]  ;;  %2217 = vrot.lane.b32.xlu0 %v652_v1, %s10608_s25 }
 0x2f4   :  { %v3273_v59 = vsel %vm3252_vm7, %v3208_v25, %v2456_v48  ;;  %v16981_v44 = vld [vmem:[#allocation119_spill] sm:$0xff]  ;;  %v16982_v45 = vld [vmem:[#allocation120_spill] sm:$0xff]  ;;  %v3079_v42 = vsel %vm3057_vm4, %v3014_v55, %v12310_v15  ;;  %v12645_v25 = vsel %vm16690_vm3, %v12400_v16, %v16983_v7  ;;  %v3658_v27 = vadd.f32 %v12588_v34, %v3657_v60  ;;  %v16987_v60 = vld [vmem:[#allocation125_spill] sm:$0xff] }
 0x2f5   :  { %v12632_v33 = vsel %vm16690_vm3, %v12388_v63, %v16981_v44  ;;  %v12637_v26 = vsel %vm16690_vm3, %v12393_v10, %v16982_v45  ;;  %v3338_v48 = vsel %vm3317_vm8, %v3273_v59, %v2712_v0  ;;  %v3144_v63 = vsel %vm3122_vm5, %v3079_v42, %v12438_v4  ;;  %2471 = vrot.lane.b32.xlu1 %v715_v29, %s10609_s29  ;;  %v16984_v10 = vld [vmem:[#allocation122_spill] sm:$0xff]  ;;  %v16985_v55 = vld [vmem:[#allocation123_spill] sm:$0xff]  ;;  %v796_v4 = vld [vmem:[#allocation2 + $0x351] sm:$0xff] }
 0x2f6   :  { %v3977_v43 = vmax.f32 %v3663_v13, 0.0  ;;  %v12655_v15 = vsel %vm16690_vm3, %v12405_v21, %v16984_v10  ;;  %v12660_v16 = vsel %vm16690_vm3, %v12410_v36, %v16985_v55  ;;  %v3209_v59 = vsel %vm3187_vm6, %v3144_v63, %v2202_v5  ;;  %10349 = vmatprep.mubr.msk.f32.mxu0 %vm3394_vm9, %v3338_v48  ;;  %v12666_v45 = vpop.permute.xlu0 %1947  ;;  %v16986_v42 = vld [vmem:[#allocation124_spill] sm:$0xff]  ;;  %v16988_v48 = vld [vmem:[#allocation126_spill] sm:$0xff] }
 0x2f7   :  { %v3274_v1 = vsel %vm3252_vm7, %v3209_v59, %v2458_v30  ;;  %v3976_v44 = vmax.f32 %v3658_v27, 0.0  ;;  %v2714_v21 = vpop.permute.xlu1 %2713  ;;  %v12671_v36 = vsel %vm16690_vm3, %v12415_v54, %v16986_v42  ;;  %v12676_v5 = vsel %vm16690_vm3, %v12421_v9, %v16987_v60  ;;  %2761 = vrot.lane.b32.xlu0 %v796_v4, %s10610_s1  ;;  %v16990_v54 = vld [vmem:[#allocation127_spill] sm:$0xff]  ;;  %v16992_v55 = vld [vmem:[#allocation128_spill] sm:$0xff] }
 0x2f8   :  { %v4121_v13 = vcombine.high %v3977_v43, %v3977_v43  ;;  %v4128_v0 = vrot.slane %v3977_v43, %v12625_v58  ;;  %v12681_v30 = vsel %vm16690_vm3, %v12426_v35, %v16988_v48  ;;  %v3339_v7 = vsel %vm3317_vm8, %v3274_v1, %v2714_v21  ;;  %v716_v37 = vld [vmem:[#allocation2 + $0x210] sm:$0xff] }
 0x2f9   :  { %16989 = vst [vmem:[#allocation12_spill] sm:$0xff] %v12681_v30  ;;  %v4104_v10 = vcombine.high %v3976_v44, %v3976_v44  ;;  %1707 = vrot.lane.b32.xlu1 %v715_v29, %s10606_s15  ;;  %v12691_v9 = vsel %vm16690_vm3, %v12431_v6, %v16990_v54  ;;  %v12696_v35 = vsel %vm16690_vm3, %v12436_v22, %v16992_v55 }
 0x2fa   :  { %v4135_v63 = vrot.slane %v4121_v13, %v12625_v58  ;;  %v4136_v43 = vcombine.high %v4128_v0, %v4128_v0  ;;  %v5477_v27 = vsel %vm5448_vm10, %v4128_v0, -inf  ;;  %16991 = vst [vmem:[#allocation13_spill] sm:$0xff] %v12691_v9  ;;  %16993 = vst [vmem:[#allocation14_spill] sm:$0xff] %v12696_v35  ;;  %v4111_v1 = vrot.slane %v3976_v44, %v12625_v58  ;;  %v669_v13 = vld [vmem:[#allocation2 + $0x367] sm:$0xff]  ;;  %v12703_v6 = vpop.permute.xlu0 %1949 }
 0x2fb   :  { %v5478_v59 = vrot.slane %v5477_v27, 4  ;;  %10350 = vmatmul.mubr.msk.f32.gmra.mxu0 %vm3394_vm9, %v3339_v7  ;;  %v4118_v42 = vrot.slane %v4104_v10, %v12625_v58  ;;  %v12705_v60 = vpop.permute.xlu1 %2203  ;;  %1997 = vrot.lane.b32.xlu0 %v796_v4, %s10607_s20 }
 0x2fc   :  { %v4137_v0 = vcombine.high %v4135_v63, %v4135_v63  ;;  %v5484_v21 = vsel %vm5448_vm10, %v4136_v43, -inf  ;;  %v5491_v29 = vsel %vm5448_vm10, %v4135_v63, -inf  ;;  %v4119_v55 = vcombine.high %v4111_v1, %v4111_v1 }
 0x2fd   :  { %v5479_v48 = vmax.f32 %v5477_v27, %v5478_v59  ;;  %v5485_v22 = vrot.slane %v5484_v21, 4  ;;  %v5492_v54 = vrot.slane %v5491_v29, 4  ;;  %v4120_v49 = vcombine.high %v4118_v42, %v4118_v42  ;;  %2251 = vrot.lane.b32.xlu1 %v669_v13, %s10608_s25  ;;  %v779_v27 = vld [vmem:[#allocation2 + $0x209] sm:$0xff] }
 0x2fe   :  { %v5498_v44 = vsel %vm5448_vm10, %v4137_v0, -inf  ;;  %v5449_v7 = vsel %vm5448_vm10, %v4111_v1, -inf  ;;  %v5463_v17 = vsel %vm5448_vm10, %v4118_v42, -inf  ;;  %v5456_v28 = vsel %vm5448_vm10, %v4119_v55, -inf  ;;  %v12714_v53 = vpop.permute.xlu0 %2205  ;;  %v16994_v42 = vld [vmem:[#allocation129_spill] sm:$0xff] }
 0x2ff   :  { %v5480_v63 = vrot.slane %v5479_v48, 2  ;;  %v5486_v43 = vmax.f32 %v5484_v21, %v5485_v22  ;;  %v5493_v10 = vmax.f32 %v5491_v29, %v5492_v54  ;;  %v5499_v50 = vrot.slane %v5498_v44, 4  ;;  %v12716_v1 = vpop.permute.xlu1 %2459  ;;  %v16996_v22 = vld [vmem:[#allocation130_spill] sm:$0xff]  ;;  %2473 = vrot.lane.b32.xlu0 %v716_v37, %s10609_s29 }
 0x300   :  { %v5450_v59 = vrot.slane %v5449_v7, 4  ;;  %v5464_v2 = vrot.slane %v5463_v17, 4  ;;  %v5470_v0 = vsel %vm5448_vm10, %v4120_v49, -inf  ;;  %v12721_v4 = vsel %vm16690_vm3, %v12443_v23, %v16994_v42  ;;  %v16998_v42 = vld [vmem:[#allocation131_spill] sm:$0xff] }
 0x301   :  { %16995 = vst [vmem:[#allocation15_spill] sm:$0xff] %v12721_v4  ;;  %v5487_v13 = vrot.slane %v5486_v43, 2  ;;  %v5494_v21 = vrot.slane %v5493_v10, 2  ;;  %v5500_v29 = vmax.f32 %v5498_v44, %v5499_v50  ;;  %v12726_v54 = vsel %vm16690_vm3, %v12448_v56, %v16996_v22  ;;  %2727 = vrot.lane.b32.xlu1 %v779_v27, %s10610_s1  ;;  %v17000_v44 = vld [vmem:[#allocation132_spill] sm:$0xff] }
 0x302   :  { %16997 = vst [vmem:[#allocation16_spill] sm:$0xff] %v12726_v54  ;;  %v5451_v55 = vmax.f32 %v5449_v7, %v5450_v59  ;;  %v5457_v39 = vrot.slane %v5456_v28, 4  ;;  %v5465_v49 = vmax.f32 %v5463_v17, %v5464_v2  ;;  %v5481_v19 = vmax.f32 %v5479_v48, %v5480_v63  ;;  %v12740_v17 = vpop.permute.xlu0 %1695  ;;  %v17002_v22 = vld [vmem:[#allocation136_spill] sm:$0xff]  ;;  %v17003_v63 = vld [vmem:[#allocation137_spill] sm:$0xff] }
 0x303   :  { %v5488_v40 = vmax.f32 %v5486_v43, %v5487_v13  ;;  %v5495_v51 = vmax.f32 %v5493_v10, %v5494_v21  ;;  %v5471_v23 = vrot.slane %v5470_v0, 4  ;;  %v12733_v50 = vsel %vm16690_vm3, %v12453_v31, %v16998_v42  ;;  %v2462_v59 = vpop.permute.xlu1 %2461  ;;  %v17004_v43 = vld [vmem:[#allocation138_spill] sm:$0xff]  ;;  %v17005_v13 = vld [vmem:[#allocation139_spill] sm:$0xff]  ;;  %v17006_v42 = vld [vmem:[#allocation140_spill] sm:$0xff]  ;;  %1709 = vrot.lane.b32.xlu0 %v716_v37, %s10606_s15 }
 0x304   :  { %16999 = vst [vmem:[#allocation17_spill] sm:$0xff] %v12733_v50  ;;  %v12738_v56 = vsel %vm16690_vm3, %v12458_v11, %v17000_v44  ;;  %v5501_v7 = vrot.slane %v5500_v29, 2  ;;  %v5452_v2 = vrot.slane %v5451_v55, 2  ;;  %v12745_v48 = vsel %vm16690_vm3, %v12480_v57, %v17002_v22  ;;  %v17007_v44 = vld [vmem:[#allocation141_spill] sm:$0xff]  ;;  %v17012_v54 = vld [vmem:[#allocation144_spill] sm:$0xff] }
 0x305   :  { %17001 = vst [vmem:[#allocation18_spill] sm:$0xff] %v12738_v56  ;;  %v12750_v31 = vsel %vm16690_vm3, %v12485_v47, %v17003_v63  ;;  %v12755_v11 = vsel %vm16690_vm3, %v12490_v38, %v17004_v43  ;;  %v5458_v10 = vmax.f32 %v5456_v28, %v5457_v39  ;;  %v12760_v21 = vsel %vm16690_vm3, %v12495_v24, %v17005_v13  ;;  %v10324_v63 = vpop.f32.mrf.mxu0  ;;  %v670_v43 = vld [vmem:[#allocation2 + $0x36f] sm:$0xff]  ;;  %v17008_v56 = vld [vmem:[#allocation142_spill] sm:$0xff] }
 0x306   :  { %v12765_v57 = vsel %vm16690_vm3, %v12500_v62, %v17006_v42  ;;  %v12770_v47 = vsel %vm16690_vm3, %v12505_v32, %v17007_v44  ;;  %v5466_v22 = vrot.slane %v5465_v49, 2  ;;  %1963 = vrot.lane.b32.xlu1 %v779_v27, %s10607_s20  ;;  %v5482_v38 = vrot.slane %v5481_v19, 1  ;;  %v733_v13 = vld [vmem:[#allocation2 + $0x368] sm:$0xff]  ;;  %v2716_v27 = vpop.permute.xlu0 %2715 }
 0x307   :  { %v5489_v39 = vrot.slane %v5488_v40, 1  ;;  %v5496_v28 = vrot.slane %v5495_v51, 1  ;;  %v5472_v24 = vmax.f32 %v5470_v0, %v5471_v23  ;;  %v12777_v62 = vsel %vm16690_vm3, %v12510_v8, %v17008_v56  ;;  %v17010_v42 = vld [vmem:[#allocation143_spill] sm:$0xff]  ;;  %v12784_v50 = vpop.permute.xlu1 %1697  ;;  %v17014_v23 = vld [vmem:[#allocation145_spill] sm:$0xff]  ;;  %2253 = vrot.lane.b32.xlu0 %v670_v43, %s10608_s25 }
 0x308   :  { %17009 = vst [vmem:[#allocation19_spill] sm:$0xff] %v12777_v62  ;;  %v12782_v32 = vsel %vm16690_vm3, %v12515_v12, %v17010_v42  ;;  %v5502_v37 = vmax.f32 %v5500_v29, %v5501_v7  ;;  %v5453_v44 = vmax.f32 %v5451_v55, %v5452_v2  ;;  %v12789_v0 = vsel %vm16690_vm3, %v12520_v46, %v17012_v54  ;;  %v3667_v42 = vpop.f32.mrf.mxu0 }
 0x309   :  { %17011 = vst [vmem:[#allocation20_spill] sm:$0xff] %v12782_v32  ;;  %17013 = vst [vmem:[#allocation21_spill] sm:$0xff] %v12789_v0  ;;  %v12794_v8 = vsel %vm16690_vm3, %v12525_v41, %v17014_v23  ;;  %v3080_v12 = vsel %vm3057_vm4, %v12610_v52, %v12566_v18  ;;  %v5459_v56 = vrot.slane %v5458_v10, 2  ;;  %v5467_v29 = vmax.f32 %v5465_v49, %v5466_v22  ;;  %v780_v23 = vld [vmem:[#allocation2 + $0x211] sm:$0xff] }
 0x30a   :  { %17015 = vst [vmem:[#allocation22_spill] sm:$0xff] %v12794_v8  ;;  %v3081_v55 = vsel %vm3057_vm4, %v12615_v14, %v12627_v61  ;;  %v3145_v7 = vsel %vm3122_vm5, %v3080_v12, %v12666_v45  ;;  %2507 = vrot.lane.b32.xlu1 %v733_v13, %s10609_s29  ;;  %v5483_v46 = vmax.f32 %v5481_v19, %v5482_v38  ;;  %v5473_v2 = vrot.slane %v5472_v24, 2  ;;  %v12810_v61 = vpop.permute.xlu0 %1951 }
 0x30b   :  { %v5490_v41 = vmax.f32 %v5488_v40, %v5489_v39  ;;  %v5497_v54 = vmax.f32 %v5495_v51, %v5496_v28  ;;  %v5503_v18 = vrot.slane %v5502_v37, 1  ;;  %v5454_v52 = vrot.slane %v5453_v44, 1  ;;  %v2718_v45 = vpop.permute.xlu1 %2717  ;;  %2729 = vrot.lane.b32.xlu0 %v780_v23, %s10610_s1 }
 0x30c   :  { %v3146_v49 = vsel %vm3122_vm5, %v3081_v55, %v12703_v6  ;;  %v3210_v14 = vsel %vm3187_vm6, %v3145_v7, %v12705_v60  ;;  %v12812_v22 = vmax.f32 %v5458_v10, %v5459_v56  ;;  %v3673_v19 = vadd.f32 %v10324_v63, %v12588_v34  ;;  %v17016_v10 = vld [vmem:[#allocation146_spill] sm:$0xff]  ;;  %v653_v63 = vld [vmem:[#allocation2 + $0x227] sm:$0xff] }
 0x30d   :  { %v3211_v40 = vsel %vm3187_vm6, %v3146_v49, %v12714_v53  ;;  %v3275_v51 = vsel %vm3252_vm7, %v3210_v14, %v12716_v1  ;;  %v5468_v38 = vrot.slane %v5467_v29, 1  ;;  %v3668_v60 = vadd.f32 %v12588_v34, %v3667_v42  ;;  %v734_v49 = vld [vmem:[#allocation2 + $0x370] sm:$0xff] }
 0x30e   :  { %v3276_v39 = vsel %vm3252_vm7, %v3211_v40, %v2462_v59  ;;  %v3340_v6 = vsel %vm3317_vm8, %v3275_v51, %v2716_v27  ;;  %1743 = vrot.lane.b32.xlu1 %v733_v13, %s10606_s15  ;;  %v12827_v53 = vsel %vm16690_vm3, %v12530_v20, %v17016_v10  ;;  %v12829_v28 = vmax.f32 %v5472_v24, %v5473_v2  ;;  %v12842_v20 = vpop.permute.xlu0 %1731  ;;  %v797_v14 = vld [vmem:[#allocation2 + $0x369] sm:$0xff] }
 0x30f   :  { %17017 = vst [vmem:[#allocation23_spill] sm:$0xff] %v12827_v53  ;;  %v3979_v1 = vmax.f32 %v3673_v19, 0.0  ;;  %10352 = vmatprep.mubr.msk.f32.mxu0 %vm3394_vm9, %v3340_v6  ;;  %v3341_v59 = vsel %vm3317_vm8, %v3276_v39, %v2718_v45  ;;  %v12833_v43 = vmax.f32 %v5502_v37, %v5503_v18  ;;  %v12836_v27 = vsel %vm2927_vm1, %v5483_v46, -inf  ;;  %v12844_v24 = vpop.permute.xlu1 %1953  ;;  %1965 = vrot.lane.b32.xlu0 %v780_v23, %s10607_s20 }
 0x310   :  { %v12839_v13 = vsel %vm2927_vm1, %v5490_v41, -inf  ;;  %v3978_v12 = vmax.f32 %v3668_v60, 0.0  ;;  %10353 = vmatmul.mubr.msk.f32.gmra.mxu0 %vm3394_vm9, %v3341_v59  ;;  %v12847_v56 = vsel %vm2927_vm1, %v5497_v54, -inf  ;;  %v12849_v55 = vmax.f32 %v5453_v44, %v5454_v52 }
 0x311   :  { %v4155_v37 = vcombine.high %v3979_v1, %v3979_v1  ;;  %v4162_v7 = vrot.slane %v3979_v1, %v12625_v58  ;;  %v12853_v2 = vmax.f32 %v5467_v29, %v5468_v38  ;;  %vm16691_vm3 = vcmask 1047559  }
 0x312   :  { %v4138_v41 = vcombine.high %v3978_v12, %v3978_v12  ;;  %v4145_v42 = vrot.slane %v3978_v12, %v12625_v58  ;;  %2219 = vrot.lane.b32.xlu1 %v653_v63, %s10608_s25  ;;  %v12863_v19 = vpop.permute.xlu0 %2207 }
 0x313   :  { %v4169_v54 = vrot.slane %v4155_v37, %v12625_v58  ;;  %v4170_v44 = vcombine.high %v4162_v7, %v4162_v7  ;;  %v5533_v52 = vsel %vm5448_vm10, %v4162_v7, -inf  ;;  %v12865_v23 = vpop.permute.xlu1 %1733  ;;  %2509 = vrot.lane.b32.xlu0 %v734_v49, %s10609_s29 }
 0x314   :  { %v5534_v45 = vrot.slane %v5533_v52, 4  ;;  %v4152_v29 = vrot.slane %v4138_v41, %v12625_v58  ;;  %v4153_v40 = vcombine.high %v4145_v42, %v4145_v42  ;;  %v5505_v51 = vsel %vm5448_vm10, %v4145_v42, -inf }
 0x315   :  { %v4171_v38 = vcombine.high %v4169_v54, %v4169_v54  ;;  %v5540_v39 = vsel %vm5448_vm10, %v4170_v44, -inf  ;;  %v5547_v6 = vsel %vm5448_vm10, %v4169_v54, -inf  ;;  %v5506_v60 = vrot.slane %v5505_v51, 4 }
 0x316   :  { %v5535_v10 = vmax.f32 %v5533_v52, %v5534_v45  ;;  %v5541_v1 = vrot.slane %v5540_v39, 4  ;;  %v5548_v59 = vrot.slane %v5547_v6, 4  ;;  %v4154_v63 = vcombine.high %v4152_v29, %v4152_v29  ;;  %2763 = vrot.lane.b32.xlu1 %v797_v14, %s10610_s1  ;;  %v12874_v46 = vpop.permute.xlu0 %1987 }
 0x317   :  { %v5554_v12 = vsel %vm5448_vm10, %v4171_v38, -inf  ;;  %v5507_v37 = vmax.f32 %v5505_v51, %v5506_v60  ;;  %v5512_v7 = vsel %vm5448_vm10, %v4153_v40, -inf  ;;  %v5519_v41 = vsel %vm5448_vm10, %v4152_v29, -inf  ;;  %v12876_v52 = vpop.permute.xlu1 %2209  ;;  %1745 = vrot.lane.b32.xlu0 %v734_v49, %s10606_s15 }
 0x318   :  { %v5536_v42 = vrot.slane %v5535_v10, 2  ;;  %v5542_v44 = vmax.f32 %v5540_v39, %v5541_v1  ;;  %v5549_v18 = vmax.f32 %v5547_v6, %v5548_v59  ;;  %v5555_v54 = vrot.slane %v5554_v12, 4  ;;  %v654_v1 = vld [vmem:[#allocation2 + $0x22f] sm:$0xff] }
 0x319   :  { %v5508_v45 = vrot.slane %v5507_v37, 2  ;;  %v5513_v53 = vrot.slane %v5512_v7, 4  ;;  %v5520_v4 = vrot.slane %v5519_v41, 4  ;;  %v5526_v35 = vsel %vm5448_vm10, %v4154_v63, -inf  ;;  %v717_v59 = vld [vmem:[#allocation2 + $0x228] sm:$0xff] }
 0x31a   :  { %v5537_v8 = vmax.f32 %v5535_v10, %v5536_v42  ;;  %v5543_v38 = vrot.slane %v5542_v44, 2  ;;  %v5550_v51 = vrot.slane %v5549_v18, 2  ;;  %v5556_v60 = vmax.f32 %v5554_v12, %v5555_v54  ;;  %1999 = vrot.lane.b32.xlu1 %v797_v14, %s10607_s20  ;;  %v12881_v62 = vpop.permute.xlu0 %2463  ;;  %v798_v54 = vld [vmem:[#allocation2 + $0x371] sm:$0xff] }
 0x31b   :  { %v5509_v29 = vmax.f32 %v5507_v37, %v5508_v45  ;;  %v5514_v40 = vmax.f32 %v5512_v7, %v5513_v53  ;;  %v5521_v39 = vmax.f32 %v5519_v41, %v5520_v4  ;;  %v5527_v6 = vrot.slane %v5526_v35, 4  ;;  %v12883_v10 = vpop.permute.xlu1 %1699  ;;  %2221 = vrot.lane.b32.xlu0 %v654_v1, %s10608_s25  ;;  %v526_v45 = vld [vmem:[#allocation2 + $0x268] sm:$0xff] }
 0x31c   :  { %v5538_v0 = vrot.slane %v5537_v8, 1  ;;  %v5544_v9 = vmax.f32 %v5542_v44, %v5543_v38  ;;  %v5551_v30 = vmax.f32 %v5549_v18, %v5550_v51  ;;  %v5557_v32 = vrot.slane %v5556_v60, 2 }
 0x31d   :  { %v5510_v63 = vrot.slane %v5509_v29, 1  ;;  %v5515_v12 = vrot.slane %v5514_v40, 2  ;;  %v5522_v42 = vrot.slane %v5521_v39, 2  ;;  %v5528_v49 = vmax.f32 %v5526_v35, %v5527_v6 }
 0x31e   :  { %v12887_v53 = vsel %vm2927_vm1, %v12833_v43, -inf  ;;  %v5545_v4 = vrot.slane %v5544_v9, 1  ;;  %v5552_v14 = vrot.slane %v5551_v30, 1  ;;  %v5558_v37 = vmax.f32 %v5556_v60, %v5557_v32  ;;  %2475 = vrot.lane.b32.xlu1 %v717_v59, %s10609_s29 }
 0x31f   :  { %v5511_v18 = vmax.f32 %v5509_v29, %v5510_v63  ;;  %v5516_v7 = vmax.f32 %v5514_v40, %v5515_v12  ;;  %v5523_v41 = vmax.f32 %v5521_v39, %v5522_v42  ;;  %v5529_v44 = vrot.slane %v5528_v49, 2  ;;  %v12900_v29 = vpop.permute.xlu0 %1989  ;;  %v12902_v40 = vpop.permute.xlu1 %2243  ;;  %2765 = vrot.lane.b32.xlu0 %v798_v54, %s10610_s1 }
 0x320   :  { %v17018_v35 = vrot.slane %v12812_v22, 1  ;;  %v17019_v43 = vrot.slane %v12829_v28, 1  ;;  %v3082_v32 = vsel %vm3057_vm4, %v12621_v3, %v12740_v17  ;;  %v5559_v60 = vrot.slane %v5558_v37, 1 }
 0x321   :  { %v5539_v39 = vmax.f32 %v5537_v8, %v5538_v0  ;;  %v5517_v6 = vrot.slane %v5516_v7, 1  ;;  %v5524_v1 = vrot.slane %v5523_v41, 1  ;;  %v5530_v59 = vmax.f32 %v5528_v49, %v5529_v44 }
 0x322   :  { %v5462_v38 = vmax.f32 %v12812_v22, %v17018_v35  ;;  %v5476_v51 = vmax.f32 %v12829_v28, %v17019_v43  ;;  %v10327_v22 = vpop.f32.mrf.mxu0  ;;  %v7241_v63 = vsel %vm2927_vm1, %v12849_v55, -inf  ;;  %v7247_v28 = vsel %vm2927_vm1, %v12853_v2, -inf  ;;  %1711 = vrot.lane.b32.xlu1 %v526_v45, %s10606_s15 }
 0x323   :  { %v5546_v12 = vmax.f32 %v5544_v9, %v5545_v4  ;;  %v5553_v3 = vmax.f32 %v5551_v30, %v5552_v14  ;;  %v5560_v17 = vmax.f32 %v5558_v37, %v5559_v60  ;;  %v5518_v0 = vmax.f32 %v5516_v7, %v5517_v6  ;;  %v12918_v2 = vpop.permute.xlu0 %2465  ;;  %v2720_v4 = vpop.permute.xlu1 %2719  ;;  %v671_v14 = vld [vmem:[#allocation2 + $0x387] sm:$0xff]  ;;  %2001 = vrot.lane.b32.xlu0 %v798_v54, %s10607_s20 }
 0x324   :  { %v5525_v8 = vmax.f32 %v5523_v41, %v5524_v1  ;;  %v7242_v42 = vsel %vm2927_vm1, %v5511_v18, -inf  ;;  %v7244_v49 = vsel %vm2927_vm1, %v5462_v38, -inf  ;;  %v7250_v55 = vsel %vm2927_vm1, %v5476_v51, -inf  ;;  %v3677_v44 = vpop.f32.mrf.mxu0 }
 0x325   :  { %v12916_v9 = vsel %vm3057_vm4, %v12632_v33, %v12784_v50  ;;  %v5531_v30 = vrot.slane %v5530_v59, 1  ;;  %v7254_v37 = vsel %vm2927_vm1, %v5539_v39, -inf  ;;  %v7245_v18 = vsel %vm2927_vm1, %v5518_v0, -inf  ;;  %v718_v39 = vld [vmem:[#allocation2 + $0x230] sm:$0xff] }
 0x326   :  { %v7248_v7 = vsel %vm2927_vm1, %v5525_v8, -inf  ;;  %v3147_v41 = vsel %vm3122_vm5, %v3082_v32, %v12810_v61  ;;  %v7243_v35 = vmax.f32 %v7241_v63, %v7242_v42  ;;  %v7246_v33 = vmax.f32 %v7244_v49, %v7245_v18  ;;  %2255 = vrot.lane.b32.xlu1 %v671_v14, %s10608_s25 }
 0x327   :  { %v5532_v45 = vmax.f32 %v5530_v59, %v5531_v30  ;;  %v7249_v50 = vmax.f32 %v7247_v28, %v7248_v7  ;;  %v7257_v38 = vsel %vm2927_vm1, %v5546_v12, -inf  ;;  %v7260_v43 = vsel %vm2927_vm1, %v5553_v3, -inf  ;;  %v12936_v1 = vpop.permute.xlu0 %1701  ;;  %v12938_v59 = vpop.permute.xlu1 %1955  ;;  %v781_v3 = vld [vmem:[#allocation2 + $0x229] sm:$0xff]  ;;  %2477 = vrot.lane.b32.xlu0 %v718_v39, %s10609_s29 }
 0x328   :  { %v7263_v51 = vsel %vm2927_vm1, %v5560_v17, -inf  ;;  %v3683_v60 = vadd.f32 %v10327_v22, %v12588_v34  ;;  %v7800_v32 = vsel %vm7799_vm11, %v7246_v33, %v7243_v35  ;;  %v3212_v6 = vsel %vm3187_vm6, %v3147_v41, %v12863_v19  ;;  %v672_v39 = vld [vmem:[#allocation2 + $0x38f] sm:$0xff] }
 0x329   :  { %v7251_v61 = vsel %vm2927_vm1, %v5532_v45, -inf  ;;  %v3678_v54 = vadd.f32 %v12588_v34, %v3677_v44  ;;  %v7802_v28 = vsel %vm7801_vm12, %v7249_v50, %v7800_v32  ;;  %v3277_v12 = vsel %vm3252_vm7, %v3212_v6, %v12881_v62  ;;  %v527_v62 = vld [vmem:[#allocation2 + $0x270] sm:$0xff] }
 0x32a   :  { %v7252_v63 = vmax.f32 %v7250_v55, %v7251_v61  ;;  %v3981_v22 = vmax.f32 %v3683_v60, 0.0  ;;  %v7255_v17 = vmax.f32 %v12836_v27, %v7254_v37  ;;  %v7258_v0 = vmax.f32 %v12839_v13, %v7257_v38  ;;  %2731 = vrot.lane.b32.xlu1 %v781_v3, %s10610_s1  ;;  %v590_v45 = vld [vmem:[#allocation2 + $0x269] sm:$0xff] }
 0x32b   :  { %v3980_v8 = vmax.f32 %v3678_v54, 0.0  ;;  %v3342_v19 = vsel %vm3317_vm8, %v3277_v12, %v2720_v4  ;;  %v7261_v42 = vmax.f32 %v12847_v56, %v7260_v43  ;;  %v7264_v14 = vmax.f32 %v12887_v53, %v7263_v51  ;;  %v12955_v4 = vpop.permute.xlu0 %2245  ;;  %v12957_v56 = vpop.permute.xlu1 %2499  ;;  %1713 = vrot.lane.b32.xlu0 %v527_v62, %s10606_s15 }
 0x32c   :  { %v7804_v49 = vsel %vm16701_vm13, %v7252_v63, %v7802_v28  ;;  %v4189_v55 = vcombine.high %v3981_v22, %v3981_v22  ;;  %v4196_v30 = vrot.slane %v3981_v22, %v12625_v58  ;;  %10355 = vmatprep.mubr.msk.f32.mxu0 %vm3394_vm9, %v3342_v19 }
 0x32d   :  { %v7806_v27 = vsel %vm7805_vm14, %v7255_v17, %v7804_v49  ;;  %v4172_v13 = vcombine.high %v3980_v8, %v3980_v8  ;;  %v4179_v37 = vrot.slane %v3980_v8, %v12625_v58 }
 0x32e   :  { %v7808_v18 = vsel %vm16693_vm15, %v7258_v0, %v7806_v27  ;;  %v4203_v7 = vrot.slane %v4189_v55, %v12625_v58  ;;  %v4204_v41 = vcombine.high %v4196_v30, %v4196_v30  ;;  %v5589_v44 = vsel %vm5448_vm10, %v4196_v30, -inf  ;;  %1967 = vrot.lane.b32.xlu1 %v590_v45, %s10607_s20  ;;  %v735_v0 = vld [vmem:[#allocation2 + $0x388] sm:$0xff]  ;;  %v782_v27 = vld [vmem:[#allocation2 + $0x231] sm:$0xff] }
 0x32f   :  { %v7810_v53 = vsel %vm16692_vm2, %v7261_v42, %v7808_v18  ;;  %v5590_v35 = vrot.slane %v5589_v44, 4  ;;  %v4186_v33 = vrot.slane %v4172_v13, %v12625_v58  ;;  %v4187_v50 = vcombine.high %v4179_v37, %v4179_v37  ;;  %v12970_v63 = vpop.permute.xlu0 %2721  ;;  %v12972_v28 = vpop.permute.xlu1 %1735  ;;  %2257 = vrot.lane.b32.xlu0 %v672_v39, %s10608_s25 }
 0x330   :  { %v7812_v38 = vsel %vm16691_vm3, %v7264_v14, %v7810_v53  ;;  %v4205_v43 = vcombine.high %v4203_v7, %v4203_v7  ;;  %v5596_v51 = vsel %vm5448_vm10, %v4204_v41, -inf  ;;  %v5603_v60 = vsel %vm5448_vm10, %v4203_v7, -inf }
 0x331   :  { %7934 = vst.msk [vmem:[#allocation3 + $0x20] sm:$0xff] %vm2927_vm1, %v7812_v38  ;;  %v5591_v61 = vmax.f32 %v5589_v44, %v5590_v35  ;;  %v5597_v32 = vrot.slane %v5596_v51, 4  ;;  %v5604_v6 = vrot.slane %v5603_v60, 4  ;;  %v4188_v54 = vcombine.high %v4186_v33, %v4186_v33 }
 0x332   :  { %v5610_v22 = vsel %vm5448_vm10, %v4205_v43, -inf  ;;  %v5561_v12 = vsel %vm5448_vm10, %v4179_v37, -inf  ;;  %v5568_v3 = vsel %vm5448_vm10, %v4187_v50, -inf  ;;  %v5575_v17 = vsel %vm5448_vm10, %v4186_v33, -inf  ;;  %2511 = vrot.lane.b32.xlu1 %v735_v0, %s10609_s29 }
 0x333   :  { %v5592_v8 = vrot.slane %v5591_v61, 2  ;;  %v5598_v19 = vmax.f32 %v5596_v51, %v5597_v32  ;;  %v5605_v42 = vmax.f32 %v5603_v60, %v5604_v6  ;;  %v5611_v49 = vrot.slane %v5610_v22, 4  ;;  %v12981_v41 = vpop.permute.xlu0 %1957  ;;  %v12983_v44 = vpop.permute.xlu1 %2211  ;;  %2733 = vrot.lane.b32.xlu0 %v782_v27, %s10610_s1  ;;  %v591_v6 = vld [vmem:[#allocation2 + $0x271] sm:$0xff] }
 0x334   :  { %v5562_v55 = vrot.slane %v5561_v12, 4  ;;  %v5569_v30 = vrot.slane %v5568_v3, 4  ;;  %v5576_v62 = vrot.slane %v5575_v17, 4  ;;  %v5582_v14 = vsel %vm5448_vm10, %v4188_v54, -inf }
 0x335   :  { %v5593_v13 = vmax.f32 %v5591_v61, %v5592_v8  ;;  %v5599_v18 = vrot.slane %v5598_v19, 2  ;;  %v5606_v37 = vrot.slane %v5605_v42, 2  ;;  %v5612_v7 = vmax.f32 %v5610_v22, %v5611_v49 }
 0x336   :  { %v5563_v45 = vmax.f32 %v5561_v12, %v5562_v55  ;;  %v5570_v53 = vmax.f32 %v5568_v3, %v5569_v30  ;;  %v5577_v35 = vmax.f32 %v5575_v17, %v5576_v62  ;;  %v5583_v33 = vrot.slane %v5582_v14, 4  ;;  %1747 = vrot.lane.b32.xlu1 %v735_v0, %s10606_s15  ;;  %v10330_v30 = vpop.f32.mrf.mxu0  ;;  %v655_v62 = vld [vmem:[#allocation2 + $0x287] sm:$0xff] }
 0x337   :  { %v5594_v50 = vrot.slane %v5593_v13, 1  ;;  %v5600_v38 = vmax.f32 %v5598_v19, %v5599_v18  ;;  %v5607_v43 = vmax.f32 %v5605_v42, %v5606_v37  ;;  %v5613_v51 = vrot.slane %v5612_v7, 2  ;;  %v2502_v17 = vpop.permute.xlu0 %2501  ;;  %v2756_v8 = vpop.permute.xlu1 %2755  ;;  %1969 = vrot.lane.b32.xlu0 %v591_v6, %s10607_s20 }
 0x338   :  { %v5564_v60 = vrot.slane %v5563_v45, 2  ;;  %v5571_v39 = vrot.slane %v5570_v53, 2  ;;  %v5578_v61 = vrot.slane %v5577_v35, 2  ;;  %v5584_v32 = vmax.f32 %v5582_v14, %v5583_v33 }
 0x339   :  { %v3100_v54 = vsel %vm3057_vm4, %v12745_v48, %v12842_v20  ;;  %v5601_v22 = vrot.slane %v5600_v38, 1  ;;  %v5608_v12 = vrot.slane %v5607_v43, 1  ;;  %v5614_v3 = vmax.f32 %v5612_v7, %v5613_v51 }
 0x33a   :  { %v5565_v19 = vmax.f32 %v5563_v45, %v5564_v60  ;;  %v5572_v42 = vmax.f32 %v5570_v53, %v5571_v39  ;;  %v5579_v49 = vmax.f32 %v5577_v35, %v5578_v61  ;;  %v5585_v55 = vrot.slane %v5584_v32, 2  ;;  %v736_v45 = vld [vmem:[#allocation2 + $0x390] sm:$0xff]  ;;  %2223 = vrot.lane.b32.xlu1 %v655_v62, %s10608_s25 }
 0x33b   :  { %v3148_v14 = vsel %vm3122_vm5, %v12916_v9, %v12844_v24  ;;  %v3101_v48 = vsel %vm3057_vm4, %v12750_v31, %v12865_v23  ;;  %v3165_v20 = vsel %vm3122_vm5, %v3100_v54, %v12874_v46  ;;  %v5615_v0 = vrot.slane %v5614_v3, 1  ;;  %v13009_v46 = vpop.permute.xlu0 %1737  ;;  %v13011_v23 = vpop.permute.xlu1 %1991  ;;  %2513 = vrot.lane.b32.xlu0 %v736_v45, %s10609_s29  ;;  %v656_v62 = vld [vmem:[#allocation2 + $0x28f] sm:$0xff] }
 0x33c   :  { %v5595_v27 = vmax.f32 %v5593_v13, %v5594_v50  ;;  %v5566_v18 = vrot.slane %v5565_v19, 1  ;;  %v5573_v37 = vrot.slane %v5572_v42, 1  ;;  %v5586_v7 = vmax.f32 %v5584_v32, %v5585_v55  ;;  %v3687_v50 = vpop.f32.mrf.mxu0 }
 0x33d   :  { %v3213_v53 = vsel %vm3187_vm6, %v3148_v14, %v12876_v52  ;;  %v5602_v35 = vmax.f32 %v5600_v38, %v5601_v22  ;;  %v13004_v24 = vsel %vm3057_vm4, %v12637_v26, %v12883_v10  ;;  %v3166_v31 = vsel %vm3122_vm5, %v3101_v48, %v12900_v29  ;;  %v799_v26 = vld [vmem:[#allocation2 + $0x389] sm:$0xff] }
 0x33e   :  { %v5609_v9 = vmax.f32 %v5607_v43, %v5608_v12  ;;  %v5580_v13 = vrot.slane %v5579_v49, 1  ;;  %v3230_v52 = vsel %vm3187_vm6, %v3165_v20, %v12902_v40  ;;  %v3278_v33 = vsel %vm3252_vm7, %v3213_v53, %v12918_v2  ;;  %2767 = vrot.lane.b32.xlu1 %v799_v26, %s10610_s1  ;;  %v719_v53 = vld [vmem:[#allocation2 + $0x288] sm:$0xff] }
 0x33f   :  { %v5616_v10 = vmax.f32 %v5614_v3, %v5615_v0  ;;  %v13020_v29 = vsel %vm3057_vm4, %v12645_v25, %v12936_v1  ;;  %v3693_v38 = vadd.f32 %v10330_v30, %v12588_v34  ;;  %v3343_v43 = vsel %vm3317_vm8, %v3278_v33, %v12970_v63  ;;  %v13037_v63 = vpop.permute.xlu0 %2213  ;;  %v13039_v32 = vpop.permute.xlu1 %2467  ;;  %1749 = vrot.lane.b32.xlu0 %v736_v45, %s10606_s15 }
 0x340   :  { %v13027_v40 = vsel %vm2927_vm1, %v5595_v27, -inf  ;;  %v5567_v51 = vmax.f32 %v5565_v19, %v5566_v18  ;;  %v5574_v2 = vmax.f32 %v5572_v42, %v5573_v37  ;;  %v5587_v60 = vrot.slane %v5586_v7, 1  ;;  %10356 = vmatmul.mubr.msk.f32.gmra.mxu0 %vm3394_vm9, %v3343_v43 }
 0x341   :  { %v13031_v39 = vsel %vm2927_vm1, %v5602_v35, -inf  ;;  %v3295_v25 = vsel %vm3252_vm7, %v3230_v52, %v12957_v56  ;;  %v3983_v1 = vmax.f32 %v3693_v38, 0.0  ;;  %v3688_v61 = vadd.f32 %v12588_v34, %v3687_v50  ;;  %v10333_v30 = vpop.f32.mrf.mxu0 }
 0x342   :  { %v13042_v6 = vsel %vm2927_vm1, %v5609_v9, -inf  ;;  %v13044_v54 = vmax.f32 %v5579_v49, %v5580_v13  ;;  %v3231_v22 = vsel %vm3187_vm6, %v3166_v31, %v12955_v4  ;;  %v3360_v12 = vsel %vm3317_vm8, %v3295_v25, %v2756_v8  ;;  %2003 = vrot.lane.b32.xlu1 %v799_v26, %s10607_s20 }
 0x343   :  { %v13050_v56 = vsel %vm2927_vm1, %v5616_v10, -inf  ;;  %v4223_v3 = vcombine.high %v3983_v1, %v3983_v1  ;;  %v4230_v19 = vrot.slane %v3983_v1, %v12625_v58  ;;  %v3982_v42 = vmax.f32 %v3688_v61, 0.0  ;;  %10382 = vmatprep.mubr.msk.f32.mxu1 %vm3394_vm9, %v3360_v12  ;;  %v2758_v27 = vpop.permute.xlu0 %2757  ;;  %v13067_v18 = vpop.permute.xlu1 %1703  ;;  %2225 = vrot.lane.b32.xlu0 %v656_v62, %s10608_s25 }
 0x344   :  { %v13055_v55 = vmax.f32 %v5586_v7, %v5587_v60  ;;  %v13058_v49 = vsel %vm2927_vm1, %v5567_v51, -inf  ;;  %v13061_v4 = vsel %vm2927_vm1, %v5574_v2, -inf  ;;  %v3296_v8 = vsel %vm3252_vm7, %v3231_v22, %v2502_v17 }
 0x345   :  { %v4237_v14 = vrot.slane %v4223_v3, %v12625_v58  ;;  %v4238_v48 = vcombine.high %v4230_v19, %v4230_v19  ;;  %v5645_v20 = vsel %vm5448_vm10, %v4230_v19, -inf  ;;  %v4206_v0 = vcombine.high %v3982_v42, %v3982_v42 }
 0x346   :  { %v5646_v37 = vrot.slane %v5645_v20, 4  ;;  %v4213_v7 = vrot.slane %v3982_v42, %v12625_v58  ;;  %v13071_v45 = vadd.f32 %v10333_v30, %v12588_v34  ;;  %v3361_v17 = vsel %vm3317_vm8, %v3296_v8, %v2758_v27  ;;  %v800_v34 = vld [vmem:[#allocation2 + $0x391] sm:$0xff]  ;;  %2479 = vrot.lane.b32.xlu1 %v719_v53, %s10609_s29 }
 0x347   :  { %v4239_v35 = vcombine.high %v4237_v14, %v4237_v14  ;;  %v5652_v31 = vsel %vm5448_vm10, %v4238_v48, -inf  ;;  %v5659_v9 = vsel %vm5448_vm10, %v4237_v14, -inf  ;;  %v4220_v13 = vrot.slane %v4206_v0, %v12625_v58  ;;  %10383 = vmatmul.mubr.msk.f32.vlgmr.msra.gmra.mxu1 %vm3394_vm9, %v3361_v17  ;;  %v13083_v2 = vpop.permute.xlu0 %1993  ;;  %v13085_v60 = vpop.permute.xlu1 %2247  ;;  %2769 = vrot.lane.b32.xlu0 %v800_v34, %s10610_s1 }
 0x348   :  { %v5647_v52 = vmax.f32 %v5645_v20, %v5646_v37  ;;  %v5653_v33 = vrot.slane %v5652_v31, 4  ;;  %v5660_v50 = vrot.slane %v5659_v9, 4  ;;  %v4221_v26 = vcombine.high %v4213_v7, %v4213_v7 }
 0x349   :  { %v5666_v10 = vsel %vm5448_vm10, %v4239_v35, -inf  ;;  %v4222_v38 = vcombine.high %v4220_v13, %v4220_v13  ;;  %v5617_v43 = vsel %vm5448_vm10, %v4213_v7, -inf  ;;  %v5631_v51 = vsel %vm5448_vm10, %v4220_v13, -inf  ;;  %v673_v13 = vld [vmem:[#allocation2 + $0x3a7] sm:$0xff] }
 0x34a   :  { %v5648_v25 = vrot.slane %v5647_v52, 2  ;;  %v5654_v1 = vmax.f32 %v5652_v31, %v5653_v33  ;;  %v5661_v61 = vmax.f32 %v5659_v9, %v5660_v50  ;;  %v5667_v22 = vrot.slane %v5666_v10, 4  ;;  %1715 = vrot.lane.b32.xlu1 %v719_v53, %s10606_s15  ;;  %v720_v53 = vld [vmem:[#allocation2 + $0x290] sm:$0xff] }
 0x34b   :  { %v5618_v12 = vrot.slane %v5617_v43, 4  ;;  %v5624_v3 = vsel %vm5448_vm10, %v4221_v26, -inf  ;;  %v5632_v19 = vrot.slane %v5631_v51, 4  ;;  %v5638_v42 = vsel %vm5448_vm10, %v4222_v38, -inf  ;;  %v13091_v37 = vpop.permute.xlu0 %2469  ;;  %v13093_v7 = vpop.permute.xlu1 %2723  ;;  %2005 = vrot.lane.b32.xlu0 %v800_v34, %s10607_s20 }
 0x34c   :  { %v5649_v8 = vmax.f32 %v5647_v52, %v5648_v25  ;;  %v5655_v30 = vrot.slane %v5654_v1, 2  ;;  %v5662_v62 = vrot.slane %v5661_v61, 2  ;;  %v5668_v14 = vmax.f32 %v5666_v10, %v5667_v22 }
 0x34d   :  { %v5619_v48 = vmax.f32 %v5617_v43, %v5618_v12  ;;  %v5625_v20 = vrot.slane %v5624_v3, 4  ;;  %v5633_v0 = vmax.f32 %v5631_v51, %v5632_v19  ;;  %v5639_v27 = vrot.slane %v5638_v42, 4 }
 0x34e   :  { %v5650_v17 = vrot.slane %v5649_v8, 1  ;;  %v5656_v35 = vmax.f32 %v5654_v1, %v5655_v30  ;;  %v5663_v31 = vmax.f32 %v5661_v61, %v5662_v62  ;;  %v5669_v9 = vrot.slane %v5668_v14, 2  ;;  %2259 = vrot.lane.b32.xlu1 %v673_v13, %s10608_s25 }
 0x34f   :  { %v5620_v33 = vrot.slane %v5619_v48, 2  ;;  %v5626_v52 = vmax.f32 %v5624_v3, %v5625_v20  ;;  %v5634_v50 = vrot.slane %v5633_v0, 2  ;;  %v5640_v26 = vmax.f32 %v5638_v42, %v5639_v27  ;;  %v13097_v1 = vpop.permute.xlu0 %1705  ;;  %v13099_v61 = vpop.permute.xlu1 %1959  ;;  %2481 = vrot.lane.b32.xlu0 %v720_v53, %s10609_s29 }
 0x350   :  { %v5651_v10 = vmax.f32 %v5649_v8, %v5650_v17  ;;  %v5657_v38 = vrot.slane %v5656_v35, 1  ;;  %v5664_v43 = vrot.slane %v5663_v31, 1  ;;  %v5670_v51 = vmax.f32 %v5668_v14, %v5669_v9  ;;  %v783_v8 = vld [vmem:[#allocation2 + $0x289] sm:$0xff] }
 0x351   :  { %v5621_v25 = vmax.f32 %v5619_v48, %v5620_v33  ;;  %v5627_v22 = vrot.slane %v5626_v52, 2  ;;  %v5635_v12 = vmax.f32 %v5633_v0, %v5634_v50  ;;  %v5641_v19 = vrot.slane %v5640_v26, 2 }
 0x352   :  { %v5658_v3 = vmax.f32 %v5656_v35, %v5657_v38  ;;  %v5665_v30 = vmax.f32 %v5663_v31, %v5664_v43  ;;  %v5671_v42 = vrot.slane %v5670_v51, 1  ;;  %v13102_v34 = vsel %vm2927_vm1, %v5651_v10, -inf  ;;  %2735 = vrot.lane.b32.xlu1 %v783_v8, %s10610_s1  ;;  %v3697_v43 = vpop.f32.mrf.mxu0 }
 0x353   :  { %v7271_v62 = vsel %vm2927_vm1, %v13044_v54, -inf  ;;  %v5622_v14 = vrot.slane %v5621_v25, 1  ;;  %v5628_v48 = vmax.f32 %v5626_v52, %v5627_v22  ;;  %v5636_v20 = vrot.slane %v5635_v12, 1  ;;  %v13118_v33 = vpop.permute.xlu0 %2249  ;;  %v13120_v52 = vpop.permute.xlu1 %2503  ;;  %1717 = vrot.lane.b32.xlu0 %v720_v53, %s10606_s15 }
 0x354   :  { %v5672_v0 = vmax.f32 %v5670_v51, %v5671_v42  ;;  %v13108_v27 = vsel %vm2927_vm1, %v5658_v3, -inf  ;;  %v13111_v17 = vsel %vm2927_vm1, %v5665_v30, -inf  ;;  %v5642_v35 = vmax.f32 %v5640_v26, %v5641_v19 }
 0x355   :  { %v7274_v31 = vsel %vm2927_vm1, %v13055_v55, -inf  ;;  %v7279_v9 = vmax.f32 %v13027_v40, %v13102_v34  ;;  %v5623_v54 = vmax.f32 %v5621_v25, %v5622_v14  ;;  %v5629_v13 = vrot.slane %v5628_v48, 1 }
 0x356   :  { %v13123_v50 = vsel %vm2927_vm1, %v5672_v0, -inf  ;;  %v5637_v10 = vmax.f32 %v5635_v12, %v5636_v20  ;;  %v5643_v38 = vrot.slane %v5642_v35, 1  ;;  %v3985_v26 = vmax.f32 %v13071_v45, 0.0  ;;  %v674_v45 = vld [vmem:[#allocation2 + $0x3af] sm:$0xff]  ;;  %1971 = vrot.lane.b32.xlu1 %v783_v8, %s10607_s20 }
 0x357   :  { %v7282_v55 = vmax.f32 %v13031_v39, %v13108_v27  ;;  %v7285_v40 = vmax.f32 %v13042_v6, %v13111_v17  ;;  %v5630_v51 = vmax.f32 %v5628_v48, %v5629_v13  ;;  %v7266_v25 = vsel %vm2927_vm1, %v5623_v54, -inf  ;;  %v13140_v6 = vld [vmem:[%s16684_s2] ss:$0 sm:$0xff]  ;;  %v13146_v34 = vpop.permute.xlu1 %1739  ;;  %v737_v0 = vld [vmem:[#allocation2 + $0x3a8] sm:$0xff]  ;;  %2261 = vrot.lane.b32.xlu0 %v674_v45, %s10608_s25 }
 0x358   :  { %v7288_v22 = vmax.f32 %v13050_v56, %v13123_v50  ;;  %v5644_v19 = vmax.f32 %v5642_v35, %v5643_v38  ;;  %v7272_v12 = vsel %vm2927_vm1, %v5637_v10, -inf  ;;  %v4257_v3 = vcombine.high %v3985_v26, %v3985_v26  ;;  %v13144_v56 = vpop.permute.xlu0 %2725  ;;  %v784_v10 = vld [vmem:[#allocation2 + $0x291] sm:$0xff] }
 0x359   :  { %v7269_v30 = vsel %vm2927_vm1, %v5630_v51, -inf  ;;  %v7273_v42 = vmax.f32 %v7271_v62, %v7272_v12  ;;  %v4264_v39 = vrot.slane %v3985_v26, %v12625_v58  ;;  %v3698_v53 = vadd.f32 %v13140_v6, %v3697_v43 }
 0x35a   :  { %v7267_v14 = vmax.f32 %v13058_v49, %v7266_v25  ;;  %v7270_v48 = vmax.f32 %v13061_v4, %v7269_v30  ;;  %v7275_v62 = vsel %vm2927_vm1, %v5644_v19, -inf  ;;  %v4271_v20 = vrot.slane %v4257_v3, %v12625_v58  ;;  %2515 = vrot.lane.b32.xlu1 %v737_v0, %s10609_s29 }
 0x35b   :  { %v7276_v27 = vmax.f32 %v7274_v31, %v7275_v62  ;;  %v4272_v17 = vcombine.high %v4264_v39, %v4264_v39  ;;  %v5701_v35 = vsel %vm5448_vm10, %v4264_v39, -inf  ;;  %v3984_v54 = vmax.f32 %v3698_v53, 0.0  ;;  %v13161_v51 = vpop.permute.xlu1 %2215  ;;  %2737 = vrot.lane.b32.xlu0 %v784_v10, %s10610_s1 }
 0x35c   :  { %v7813_v8 = vsel %vm7799_vm11, %v7270_v48, %v7267_v14  ;;  %v4273_v13 = vcombine.high %v4271_v20, %v4271_v20  ;;  %v5702_v50 = vrot.slane %v5701_v35, 4  ;;  %v5715_v49 = vsel %vm5448_vm10, %v4271_v20, -inf  ;;  %v13159_v31 = vpop.permute.xlu0 %1961 }
 0x35d   :  { %v7814_v4 = vsel %vm7801_vm12, %v7273_v42, %v7813_v8  ;;  %v5708_v38 = vsel %vm5448_vm10, %v4272_v17, -inf  ;;  %v5716_v26 = vrot.slane %v5715_v49, 4  ;;  %v4240_v43 = vcombine.high %v3984_v54, %v3984_v54 }
 0x35e   :  { %v7815_v25 = vsel %vm16701_vm13, %v7276_v27, %v7814_v4  ;;  %v5703_v19 = vmax.f32 %v5701_v35, %v5702_v50  ;;  %v5709_v12 = vrot.slane %v5708_v38, 4  ;;  %v5722_v3 = vsel %vm5448_vm10, %v4273_v13, -inf  ;;  %1751 = vrot.lane.b32.xlu1 %v737_v0, %s10606_s15 }
 0x35f   :  { %v7816_v45 = vsel %vm7805_vm14, %v7279_v9, %v7815_v25  ;;  %v5717_v30 = vmax.f32 %v5715_v49, %v5716_v26  ;;  %v5723_v42 = vrot.slane %v5722_v3, 4  ;;  %v4247_v39 = vrot.slane %v3984_v54, %v12625_v58  ;;  %v13174_v8 = vpop.permute.xlu1 %2759  ;;  %v657_v49 = vld [vmem:[#allocation2 + $0x2a7] sm:$0xff]  ;;  %1973 = vrot.lane.b32.xlu0 %v784_v10, %s10607_s20 }
 0x360   :  { %v7817_v53 = vsel %vm16693_vm15, %v7282_v55, %v7816_v45  ;;  %v5704_v14 = vrot.slane %v5703_v19, 2  ;;  %v5710_v48 = vmax.f32 %v5708_v38, %v5709_v12  ;;  %v4254_v62 = vrot.slane %v4240_v43, %v12625_v58  ;;  %v13172_v9 = vpop.permute.xlu0 %2505 }
 0x361   :  { %v7818_v20 = vsel %vm16692_vm2, %v7285_v40, %v7817_v53  ;;  %v5718_v27 = vrot.slane %v5717_v30, 2  ;;  %v5724_v17 = vmax.f32 %v5722_v3, %v5723_v42  ;;  %v4255_v35 = vcombine.high %v4247_v39, %v4247_v39 }
 0x362   :  { %v7819_v54 = vsel %vm16691_vm3, %v7288_v22, %v7818_v20  ;;  %v5705_v13 = vmax.f32 %v5703_v19, %v5704_v14  ;;  %v5711_v50 = vrot.slane %v5710_v48, 2  ;;  %v4256_v55 = vcombine.high %v4254_v62, %v4254_v62  ;;  %v738_v19 = vld [vmem:[#allocation2 + $0x3b0] sm:$0xff]  ;;  %2227 = vrot.lane.b32.xlu1 %v657_v49, %s10608_s25 }
 0x363   :  { %7935 = vst.msk [vmem:[#allocation3 + $0x38] sm:$0xff] %vm2927_vm1, %v7819_v54  ;;  %v5719_v4 = vmax.f32 %v5717_v30, %v5718_v27  ;;  %v5725_v38 = vrot.slane %v5724_v17, 2  ;;  %v5673_v40 = vsel %vm5448_vm10, %v4247_v39, -inf  ;;  %v5680_v26 = vsel %vm5448_vm10, %v4255_v35, -inf  ;;  %v13192_v42 = vpop.permute.xlu1 %1995  ;;  %v801_v14 = vld [vmem:[#allocation2 + $0x3a9] sm:$0xff]  ;;  %2517 = vrot.lane.b32.xlu0 %v738_v19, %s10609_s29 }
 0x364   :  { %v3149_v0 = vsel %vm3122_vm5, %v13004_v24, %v12938_v59  ;;  %v5712_v43 = vmax.f32 %v5710_v48, %v5711_v50  ;;  %v5674_v22 = vrot.slane %v5673_v40, 4  ;;  %v5681_v25 = vrot.slane %v5680_v26, 4  ;;  %v13190_v10 = vpop.permute.xlu0 %1741 }
 0x365   :  { %v3102_v12 = vsel %vm3057_vm4, %v12755_v11, %v12972_v28  ;;  %v5726_v3 = vmax.f32 %v5724_v17, %v5725_v38  ;;  %v5687_v45 = vsel %vm5448_vm10, %v4254_v62, -inf  ;;  %v5694_v30 = vsel %vm5448_vm10, %v4256_v55, -inf }
 0x366   :  { %v3150_v59 = vsel %vm3122_vm5, %v13020_v29, %v12981_v41  ;;  %v5706_v24 = vrot.slane %v5705_v13, 1  ;;  %v5675_v39 = vmax.f32 %v5673_v40, %v5674_v22  ;;  %v5682_v53 = vmax.f32 %v5680_v26, %v5681_v25  ;;  %v10336_v41 = vpop.f32.mrf.mxu0  ;;  %2771 = vrot.lane.b32.xlu1 %v801_v14, %s10610_s1 }
 0x367   :  { %v3214_v11 = vsel %vm3187_vm6, %v3149_v0, %v12983_v44  ;;  %v5720_v28 = vrot.slane %v5719_v4, 1  ;;  %v5688_v48 = vrot.slane %v5687_v45, 4  ;;  %v5695_v62 = vrot.slane %v5694_v30, 4  ;;  %v13208_v49 = vpop.permute.xlu1 %2471  ;;  %1753 = vrot.lane.b32.xlu0 %v738_v19, %s10606_s15 }
 0x368   :  { %v3103_v20 = vsel %vm3057_vm4, %v12760_v21, %v13009_v46  ;;  %v5713_v27 = vrot.slane %v5712_v43, 1  ;;  %v5676_v17 = vrot.slane %v5675_v39, 2  ;;  %v5683_v35 = vrot.slane %v5682_v53, 2  ;;  %v13206_v44 = vpop.permute.xlu0 %2217 }
 0x369   :  { %v3167_v29 = vsel %vm3122_vm5, %v3102_v12, %v13011_v23  ;;  %v5727_v54 = vrot.slane %v5726_v3, 1  ;;  %v5689_v50 = vmax.f32 %v5687_v45, %v5688_v48  ;;  %v5696_v55 = vmax.f32 %v5694_v30, %v5695_v62  ;;  %v3707_v48 = vpop.f32.mrf.mxu0  ;;  %v658_v62 = vld [vmem:[#allocation2 + $0x2af] sm:$0xff] }
 0x36a   :  { %v3215_v38 = vsel %vm3187_vm6, %v3150_v59, %v13037_v63  ;;  %v5707_v21 = vmax.f32 %v5705_v13, %v5706_v24  ;;  %v5677_v46 = vmax.f32 %v5675_v39, %v5676_v17  ;;  %v5684_v40 = vmax.f32 %v5682_v53, %v5683_v35  ;;  %2007 = vrot.lane.b32.xlu1 %v801_v14, %s10607_s20 }
 0x36b   :  { %v3279_v26 = vsel %vm3252_vm7, %v3214_v11, %v13039_v32  ;;  %v5721_v0 = vmax.f32 %v5719_v4, %v5720_v28  ;;  %v5690_v23 = vrot.slane %v5689_v50, 2  ;;  %v5697_v22 = vrot.slane %v5696_v55, 2  ;;  %v13223_v19 = vpop.permute.xlu1 %1707  ;;  %2229 = vrot.lane.b32.xlu0 %v658_v62, %s10608_s25  ;;  %v721_v11 = vld [vmem:[#allocation2 + $0x2a8] sm:$0xff] }
 0x36c   :  { %v5714_v25 = vmax.f32 %v5712_v43, %v5713_v27  ;;  %v5678_v12 = vrot.slane %v5677_v46, 1  ;;  %v5685_v45 = vrot.slane %v5684_v40, 1  ;;  %v3344_v30 = vsel %vm3317_vm8, %v3279_v26, %v13093_v7  ;;  %v13221_v4 = vpop.permute.xlu0 %2761 }
 0x36d   :  { %v5728_v63 = vmax.f32 %v5726_v3, %v5727_v54  ;;  %v3086_v13 = vsel %vm3057_vm4, %v12655_v15, %v13067_v18  ;;  %v5691_v59 = vmax.f32 %v5689_v50, %v5690_v23  ;;  %v5698_v32 = vmax.f32 %v5696_v55, %v5697_v22  ;;  %10358 = vmatprep.mubr.msk.f32.mxu0 %vm3394_vm9, %v3344_v30 }
 0x36e   :  { %v13226_v43 = vsel %vm2927_vm1, %v5707_v21, -inf  ;;  %v3168_v7 = vsel %vm3122_vm5, %v3103_v20, %v13083_v2  ;;  %v3280_v3 = vsel %vm3252_vm7, %v3215_v38, %v13091_v37  ;;  %v3713_v24 = vadd.f32 %v13140_v6, %v10336_v41  ;;  %v802_v20 = vld [vmem:[#allocation2 + $0x3b1] sm:$0xff]  ;;  %2483 = vrot.lane.b32.xlu1 %v721_v11, %s10609_s29 }
 0x36f   :  { %v13235_v15 = vsel %vm2927_vm1, %v5721_v0, -inf  ;;  %v5679_v18 = vmax.f32 %v5677_v46, %v5678_v12  ;;  %v5686_v39 = vmax.f32 %v5684_v40, %v5685_v45  ;;  %v3345_v53 = vsel %vm3317_vm8, %v3280_v3, %v13144_v56  ;;  %v13256_v54 = vpop.permute.xlu1 %2251  ;;  %2773 = vrot.lane.b32.xlu0 %v802_v20, %s10610_s1 }
 0x370   :  { %v13241_v2 = vsel %vm2927_vm1, %v5714_v25, -inf  ;;  %v3232_v37 = vsel %vm3187_vm6, %v3167_v29, %v13085_v60  ;;  %v3987_v28 = vmax.f32 %v3713_v24, 0.0  ;;  %v3708_v14 = vadd.f32 %v13140_v6, %v3707_v48  ;;  %10359 = vmatmul.mubr.msk.f32.gmra.mxu0 %vm3394_vm9, %v3345_v53  ;;  %v13254_v41 = vpop.permute.xlu0 %1997  ;;  %v722_v53 = vld [vmem:[#allocation2 + $0x2b0] sm:$0xff] }
 0x371   :  { %v13248_v27 = vsel %vm2927_vm1, %v5728_v63, -inf  ;;  %v5692_v17 = vrot.slane %v5691_v59, 1  ;;  %v5699_v56 = vrot.slane %v5698_v32, 1  ;;  %v13252_v35 = vsel %vm3122_vm5, %v3086_v13, %v13099_v61 }
 0x372   :  { %v3297_v60 = vsel %vm3252_vm7, %v3232_v37, %v13120_v52  ;;  %v4291_v29 = vcombine.high %v3987_v28, %v3987_v28  ;;  %v4298_v50 = vrot.slane %v3987_v28, %v12625_v58  ;;  %v3986_v55 = vmax.f32 %v3708_v14, 0.0  ;;  %1719 = vrot.lane.b32.xlu1 %v721_v11, %s10606_s15 }
 0x373   :  { %v13263_v38 = vsel %vm2927_vm1, %v5679_v18, -inf  ;;  %v13266_v21 = vsel %vm2927_vm1, %v5686_v39, -inf  ;;  %v13270_v61 = vsel %vm3187_vm6, %v3168_v7, %v13118_v33  ;;  %v3362_v46 = vsel %vm3317_vm8, %v3297_v60, %v13174_v8  ;;  %v13285_v8 = vpop.permute.xlu1 %2727  ;;  %2009 = vrot.lane.b32.xlu0 %v802_v20, %s10607_s20  ;;  %v675_v7 = vld [vmem:[#allocation2 + $0x3c7] sm:$0xff] }
 0x374   :  { %v4305_v52 = vrot.slane %v4291_v29, %v12625_v58  ;;  %v4306_v40 = vcombine.high %v4298_v50, %v4298_v50  ;;  %v5757_v26 = vsel %vm5448_vm10, %v4298_v50, -inf  ;;  %v4274_v0 = vcombine.high %v3986_v55, %v3986_v55  ;;  %10385 = vmatprep.mubr.msk.f32.mxu1 %vm3394_vm9, %v3362_v46  ;;  %v13283_v12 = vpop.permute.xlu0 %2473 }
 0x375   :  { %v13278_v23 = vmax.f32 %v5691_v59, %v5692_v17  ;;  %v13280_v22 = vmax.f32 %v5698_v32, %v5699_v56  ;;  %v5758_v25 = vrot.slane %v5757_v26, 4  ;;  %v4281_v33 = vrot.slane %v3986_v55, %v12625_v58 }
 0x376   :  { %v4307_v45 = vcombine.high %v4305_v52, %v4305_v52  ;;  %v5764_v30 = vsel %vm5448_vm10, %v4306_v40, -inf  ;;  %v5771_v48 = vsel %vm5448_vm10, %v4305_v52, -inf  ;;  %v4288_v62 = vrot.slane %v4274_v0, %v12625_v58  ;;  %2263 = vrot.lane.b32.xlu1 %v675_v7, %s10608_s25 }
 0x377   :  { %v5759_v63 = vmax.f32 %v5757_v26, %v5758_v25  ;;  %v5765_v13 = vrot.slane %v5764_v30, 4  ;;  %v5772_v59 = vrot.slane %v5771_v48, 4  ;;  %v4289_v32 = vcombine.high %v4281_v33, %v4281_v33  ;;  %2485 = vrot.lane.b32.xlu0 %v722_v53, %s10609_s29  ;;  %v785_v26 = vld [vmem:[#allocation2 + $0x2a9] sm:$0xff] }
 0x378   :  { %v5778_v3 = vsel %vm5448_vm10, %v4307_v45, -inf  ;;  %v4290_v24 = vcombine.high %v4288_v62, %v4288_v62  ;;  %v5729_v18 = vsel %vm5448_vm10, %v4281_v33, -inf  ;;  %v5743_v39 = vsel %vm5448_vm10, %v4288_v62, -inf  ;;  %v13295_v11 = vpop.permute.xlu0 %1709  ;;  %v13297_v56 = vpop.permute.xlu1 %1963 }
 0x379   :  { %v5760_v37 = vrot.slane %v5759_v63, 2  ;;  %v5766_v28 = vmax.f32 %v5764_v30, %v5765_v13  ;;  %v5773_v14 = vmax.f32 %v5771_v48, %v5772_v59  ;;  %v5779_v17 = vrot.slane %v5778_v3, 4 }
 0x37a   :  { %v5730_v60 = vrot.slane %v5729_v18, 4  ;;  %v5736_v20 = vsel %vm5448_vm10, %v4289_v32, -inf  ;;  %v5744_v29 = vrot.slane %v5743_v39, 4  ;;  %v5750_v50 = vsel %vm5448_vm10, %v4290_v24, -inf  ;;  %2739 = vrot.lane.b32.xlu1 %v785_v26, %s10610_s1 }
 0x37b   :  { %v5761_v55 = vmax.f32 %v5759_v63, %v5760_v37  ;;  %v5767_v46 = vrot.slane %v5766_v28, 2  ;;  %v5774_v52 = vrot.slane %v5773_v14, 2  ;;  %v5780_v40 = vmax.f32 %v5778_v3, %v5779_v17  ;;  %1721 = vrot.lane.b32.xlu0 %v722_v53, %s10606_s15 }
 0x37c   :  { %v5731_v0 = vmax.f32 %v5729_v18, %v5730_v60  ;;  %v5737_v25 = vrot.slane %v5736_v20, 4  ;;  %v5745_v33 = vmax.f32 %v5743_v39, %v5744_v29  ;;  %v5751_v45 = vrot.slane %v5750_v50, 4  ;;  %v13303_v59 = vpop.permute.xlu0 %2253  ;;  %v13305_v32 = vpop.permute.xlu1 %2507 }
 0x37d   :  { %v5762_v30 = vrot.slane %v5761_v55, 1  ;;  %v5768_v48 = vmax.f32 %v5766_v28, %v5767_v46  ;;  %v5775_v62 = vmax.f32 %v5773_v14, %v5774_v52  ;;  %v5781_v13 = vrot.slane %v5780_v40, 2  ;;  %17020 = vst [vmem:[#allocation24_spill] sm:$0xff] %v13303_v59  ;;  %17021 = vst [vmem:[#allocation25_spill] sm:$0xff] %v13305_v32  ;;  %v676_v46 = vld [vmem:[#allocation2 + $0x3cf] sm:$0xff] }
 0x37e   :  { %v5732_v7 = vrot.slane %v5731_v0, 2  ;;  %v5738_v63 = vmax.f32 %v5736_v20, %v5737_v25  ;;  %v5746_v24 = vrot.slane %v5745_v33, 2  ;;  %v5752_v37 = vmax.f32 %v5750_v50, %v5751_v45  ;;  %1975 = vrot.lane.b32.xlu1 %v785_v26, %s10607_s20 }
 0x37f   :  { %v5763_v3 = vmax.f32 %v5761_v55, %v5762_v30  ;;  %v5769_v17 = vrot.slane %v5768_v48, 1  ;;  %v5776_v18 = vrot.slane %v5775_v62, 1  ;;  %v5782_v60 = vmax.f32 %v5780_v40, %v5781_v13  ;;  %2265 = vrot.lane.b32.xlu0 %v676_v46, %s10608_s25 }
 0x380   :  { %v5733_v39 = vmax.f32 %v5731_v0, %v5732_v7  ;;  %v5739_v28 = vrot.slane %v5738_v63, 2  ;;  %v5747_v14 = vmax.f32 %v5745_v33, %v5746_v24  ;;  %v5753_v29 = vrot.slane %v5752_v37, 2  ;;  %v13312_v50 = vpop.permute.xlu0 %2729  ;;  %v13314_v55 = vpop.permute.xlu1 %1743 }
 0x381   :  { %v5770_v52 = vmax.f32 %v5768_v48, %v5769_v17  ;;  %v5777_v59 = vmax.f32 %v5775_v62, %v5776_v18  ;;  %v5783_v32 = vrot.slane %v5782_v60, 1  ;;  %v3216_v20 = vsel %vm3187_vm6, %v13252_v35, %v13161_v51  ;;  %v10339_v33 = vpop.f32.mrf.mxu0  ;;  %v739_v48 = vld [vmem:[#allocation2 + $0x3c8] sm:$0xff] }
 0x382   :  { %v13317_v40 = vsel %vm2927_vm1, %v5763_v3, -inf  ;;  %v5734_v53 = vrot.slane %v5733_v39, 1  ;;  %v5740_v0 = vmax.f32 %v5738_v63, %v5739_v28  ;;  %v5748_v25 = vrot.slane %v5747_v14, 1  ;;  %v786_v63 = vld [vmem:[#allocation2 + $0x2b1] sm:$0xff]  ;;  %2519 = vrot.lane.b32.xlu1 %v739_v48, %s10609_s29 }
 0x383   :  { %v7295_v45 = vsel %vm2927_vm1, %v13278_v23, -inf  ;;  %v13323_v30 = vsel %vm2927_vm1, %v5770_v52, -inf  ;;  %v5754_v51 = vmax.f32 %v5752_v37, %v5753_v29  ;;  %v3298_v35 = vsel %vm3252_vm7, %v13270_v61, %v13172_v9  ;;  %2741 = vrot.lane.b32.xlu0 %v786_v63, %s10610_s1 }
 0x384   :  { %v5784_v62 = vmax.f32 %v5782_v60, %v5783_v32  ;;  %v13330_v13 = vsel %vm2927_vm1, %v5777_v59, -inf  ;;  %v5735_v7 = vmax.f32 %v5733_v39, %v5734_v53  ;;  %v5741_v26 = vrot.slane %v5740_v0, 1  ;;  %v13336_v17 = vpop.permute.xlu0 %1965  ;;  %v13338_v9 = vpop.permute.xlu1 %2219 }
 0x385   :  { %v7298_v23 = vsel %vm2927_vm1, %v13280_v22, -inf  ;;  %v7303_v24 = vmax.f32 %v13226_v43, %v13317_v40  ;;  %v5749_v37 = vmax.f32 %v5747_v14, %v5748_v25  ;;  %v5755_v3 = vrot.slane %v5754_v51, 1  ;;  %v3717_v60 = vpop.f32.mrf.mxu0 }
 0x386   :  { %v7306_v61 = vmax.f32 %v13241_v2, %v13323_v30  ;;  %v5742_v59 = vmax.f32 %v5740_v0, %v5741_v26  ;;  %v7290_v32 = vsel %vm2927_vm1, %v5735_v7, -inf  ;;  %v3723_v18 = vadd.f32 %v13140_v6, %v10339_v33  ;;  %1755 = vrot.lane.b32.xlu1 %v739_v48, %s10606_s15  ;;  %v740_v48 = vld [vmem:[#allocation2 + $0x3d0] sm:$0xff] }
 0x387   :  { %v7309_v43 = vmax.f32 %v13235_v15, %v13330_v13  ;;  %v5756_v22 = vmax.f32 %v5754_v51, %v5755_v3  ;;  %v7296_v39 = vsel %vm2927_vm1, %v5749_v37, -inf  ;;  %v3363_v28 = vsel %vm3317_vm8, %v3298_v35, %v13221_v4  ;;  %1977 = vrot.lane.b32.xlu0 %v786_v63, %s10607_s20 }
 0x388   :  { %v7311_v2 = vsel %vm2927_vm1, %v5784_v62, -inf  ;;  %v7293_v14 = vsel %vm2927_vm1, %v5742_v59, -inf  ;;  %v7297_v29 = vmax.f32 %v7295_v45, %v7296_v39  ;;  %v3989_v46 = vmax.f32 %v3723_v18, 0.0  ;;  %10386 = vmatmul.mubr.msk.f32.gmra.mxu1 %vm3394_vm9, %v3363_v28  ;;  %v13358_v0 = vpop.permute.xlu0 %2509  ;;  %v13360_v4 = vpop.permute.xlu1 %2763  ;;  %v659_v62 = vld [vmem:[#allocation2 + $0x2c7] sm:$0xff] }
 0x389   :  { %v7291_v52 = vmax.f32 %v13263_v38, %v7290_v32  ;;  %v7294_v15 = vmax.f32 %v13266_v21, %v7293_v14  ;;  %v7299_v40 = vsel %vm2927_vm1, %v5756_v22, -inf  ;;  %v3718_v53 = vadd.f32 %v13140_v6, %v3717_v60 }
 0x38a   :  { %v7300_v25 = vmax.f32 %v7298_v23, %v7299_v40  ;;  %v3281_v33 = vsel %vm3252_vm7, %v3216_v20, %v13208_v49  ;;  %v4325_v45 = vcombine.high %v3989_v46, %v3989_v46  ;;  %v4332_v30 = vrot.slane %v3989_v46, %v12625_v58  ;;  %2231 = vrot.lane.b32.xlu1 %v659_v62, %s10608_s25 }
 0x38b   :  { %v7312_v38 = vmax.f32 %v13248_v27, %v7311_v2  ;;  %v7820_v21 = vsel %vm7799_vm11, %v7294_v15, %v7291_v52  ;;  %v3988_v51 = vmax.f32 %v3718_v53, 0.0  ;;  %v3346_v35 = vsel %vm3317_vm8, %v3281_v33, %v13285_v8  ;;  %2521 = vrot.lane.b32.xlu0 %v740_v48, %s10609_s29  ;;  %v803_v2 = vld [vmem:[#allocation2 + $0x3c9] sm:$0xff] }
 0x38c   :  { %v7821_v13 = vsel %vm7801_vm12, %v7297_v29, %v7820_v21  ;;  %v4339_v49 = vrot.slane %v4325_v45, %v12625_v58  ;;  %v4340_v20 = vcombine.high %v4332_v30, %v4332_v30  ;;  %v5813_v7 = vsel %vm5448_vm10, %v4332_v30, -inf  ;;  %10361 = vmatprep.mubr.msk.f32.mxu0 %vm3394_vm9, %v3346_v35  ;;  %v13377_v8 = vpop.permute.xlu0 %1745  ;;  %v13379_v63 = vpop.permute.xlu1 %1999 }
 0x38d   :  { %v7822_v27 = vsel %vm16701_vm13, %v7300_v25, %v7821_v13  ;;  %v5814_v26 = vrot.slane %v5813_v7, 4  ;;  %v4308_v23 = vcombine.high %v3988_v51, %v3988_v51  ;;  %v4315_v37 = vrot.slane %v3988_v51, %v12625_v58 }
 0x38e   :  { %v7823_v3 = vsel %vm7805_vm14, %v7303_v24, %v7822_v27  ;;  %v4341_v59 = vcombine.high %v4339_v49, %v4339_v49  ;;  %v5820_v32 = vsel %vm5448_vm10, %v4340_v20, -inf  ;;  %v5827_v18 = vsel %vm5448_vm10, %v4339_v49, -inf  ;;  %2775 = vrot.lane.b32.xlu1 %v803_v2, %s10610_s1 }
 0x38f   :  { %v7824_v60 = vsel %vm16693_vm15, %v7306_v61, %v7823_v3  ;;  %v5815_v22 = vmax.f32 %v5813_v7, %v5814_v26  ;;  %v5821_v39 = vrot.slane %v5820_v32, 4  ;;  %v5828_v28 = vrot.slane %v5827_v18, 4  ;;  %1757 = vrot.lane.b32.xlu0 %v740_v48, %s10606_s15  ;;  %v660_v7 = vld [vmem:[#allocation2 + $0x2cf] sm:$0xff] }
 0x390   :  { %v7825_v14 = vsel %vm16692_vm2, %v7309_v43, %v7824_v60  ;;  %v5834_v29 = vsel %vm5448_vm10, %v4341_v59, -inf  ;;  %v4322_v24 = vrot.slane %v4308_v23, %v12625_v58  ;;  %v4323_v46 = vcombine.high %v4315_v37, %v4315_v37  ;;  %v13391_v25 = vpop.permute.xlu0 %2221  ;;  %v13393_v61 = vpop.permute.xlu1 %2475 }
 0x391   :  { %v7826_v52 = vsel %vm16691_vm3, %v7312_v38, %v7825_v14  ;;  %v5816_v15 = vrot.slane %v5815_v22, 2  ;;  %v5822_v40 = vmax.f32 %v5820_v32, %v5821_v39  ;;  %v5829_v53 = vmax.f32 %v5827_v18, %v5828_v28 }
 0x392   :  { %7936 = vst.msk [vmem:[#allocation3 + $0x50] sm:$0xff] %vm2927_vm1, %v7826_v52  ;;  %v5835_v33 = vrot.slane %v5834_v29, 4  ;;  %v4324_v45 = vcombine.high %v4322_v24, %v4322_v24  ;;  %v5785_v43 = vsel %vm5448_vm10, %v4315_v37, -inf  ;;  %v5792_v30 = vsel %vm5448_vm10, %v4323_v46, -inf  ;;  %2011 = vrot.lane.b32.xlu1 %v803_v2, %s10607_s20 }
 0x393   :  { %v5817_v21 = vmax.f32 %v5815_v22, %v5816_v15  ;;  %v5823_v51 = vrot.slane %v5822_v40, 2  ;;  %v5830_v38 = vrot.slane %v5829_v53, 2  ;;  %v5786_v35 = vrot.slane %v5785_v43, 4  ;;  %2233 = vrot.lane.b32.xlu0 %v660_v7, %s10608_s25 }
 0x394   :  { %v5836_v62 = vmax.f32 %v5834_v29, %v5835_v33  ;;  %v5793_v13 = vrot.slane %v5792_v30, 4  ;;  %v5799_v49 = vsel %vm5448_vm10, %v4322_v24, -inf  ;;  %v5806_v20 = vsel %vm5448_vm10, %v4324_v45, -inf  ;;  %v13402_v3 = vpop.permute.xlu0 %2765  ;;  %v13404_v59 = vpop.permute.xlu1 %1711  ;;  %v723_v29 = vld [vmem:[#allocation2 + $0x2c8] sm:$0xff] }
 0x395   :  { %v5818_v27 = vrot.slane %v5817_v21, 1  ;;  %v5824_v26 = vmax.f32 %v5822_v40, %v5823_v51  ;;  %v5831_v23 = vmax.f32 %v5829_v53, %v5830_v38  ;;  %v5787_v37 = vmax.f32 %v5785_v43, %v5786_v35  ;;  %v804_v40 = vld [vmem:[#allocation2 + $0x3d1] sm:$0xff]  ;;  %v10342_v43 = vpop.f32.mrf.mxu0 }
 0x396   :  { %v5837_v32 = vrot.slane %v5836_v62, 2  ;;  %v5794_v18 = vmax.f32 %v5792_v30, %v5793_v13  ;;  %v5800_v60 = vrot.slane %v5799_v49, 4  ;;  %v5807_v22 = vrot.slane %v5806_v20, 4  ;;  %2487 = vrot.lane.b32.xlu1 %v723_v29, %s10609_s29 }
 0x397   :  { %v3087_v48 = vsel %vm3057_vm4, %v12660_v16, %v13097_v1  ;;  %v5825_v39 = vrot.slane %v5824_v26, 1  ;;  %v5832_v28 = vrot.slane %v5831_v23, 1  ;;  %v5788_v14 = vrot.slane %v5787_v37, 2  ;;  %2777 = vrot.lane.b32.xlu0 %v804_v40, %s10610_s1 }
 0x398   :  { %v5838_v24 = vmax.f32 %v5836_v62, %v5837_v32  ;;  %v5795_v46 = vrot.slane %v5794_v18, 2  ;;  %v5801_v52 = vmax.f32 %v5799_v49, %v5800_v60  ;;  %v5808_v15 = vmax.f32 %v5806_v20, %v5807_v22  ;;  %v13414_v16 = vpop.permute.xlu0 %2001  ;;  %v13417_v35 = vpop.permute.xlu1 %2255 }
 0x399   :  { %v3104_v53 = vsel %vm3057_vm4, %v12765_v57, %v13146_v34  ;;  %v5819_v2 = vmax.f32 %v5817_v21, %v5818_v27  ;;  %v5826_v33 = vmax.f32 %v5824_v26, %v5825_v39  ;;  %v5789_v45 = vmax.f32 %v5787_v37, %v5788_v14  ;;  %v3727_v26 = vpop.f32.mrf.mxu0 }
 0x39a   :  { %v5839_v1 = vrot.slane %v5838_v24, 1  ;;  %v5796_v30 = vmax.f32 %v5794_v18, %v5795_v46  ;;  %v5802_v51 = vrot.slane %v5801_v52, 2  ;;  %v5809_v38 = vrot.slane %v5808_v15, 2  ;;  %1723 = vrot.lane.b32.xlu1 %v723_v29, %s10606_s15  ;;  %v677_v18 = vld [vmem:[#allocation2 + $0x3e7] sm:$0xff]  ;;  %v17023_v29 = vld [vmem:[#allocation25_spill] sm:$0xff] }
 0x39b   :  { %v3152_v62 = vsel %vm3122_vm5, %v3087_v48, %v13159_v31  ;;  %v3105_v57 = vsel %vm3057_vm4, %v12770_v47, %v13190_v10  ;;  %v5833_v34 = vmax.f32 %v5831_v23, %v5832_v28  ;;  %v5790_v21 = vrot.slane %v5789_v45, 1  ;;  %2013 = vrot.lane.b32.xlu0 %v804_v40, %s10607_s20 }
 0x39c   :  { %v3169_v13 = vsel %vm3122_vm5, %v3104_v53, %v13192_v42  ;;  %v3217_v49 = vsel %vm3187_vm6, %v3152_v62, %v13206_v44  ;;  %v5803_v20 = vmax.f32 %v5801_v52, %v5802_v51  ;;  %v5810_v7 = vmax.f32 %v5808_v15, %v5809_v38  ;;  %v13438_v42 = vpop.permute.xlu0 %2477  ;;  %v13453_v32 = vpop.permute.xlu1 %2731  ;;  %v787_v51 = vld [vmem:[#allocation2 + $0x2c9] sm:$0xff] }
 0x39d   :  { %v3088_v31 = vsel %vm3057_vm4, %v12671_v36, %v13223_v19  ;;  %v3170_v27 = vsel %vm3122_vm5, %v3105_v57, %v13254_v41  ;;  %v3234_v47 = vsel %vm3187_vm6, %v3169_v13, %v13256_v54  ;;  %v3282_v10 = vsel %vm3252_vm7, %v3217_v49, %v13283_v12  ;;  %v10345_v53 = vpop.f32.mrf.mxu0 }
 0x39e   :  { %v5840_v23 = vmax.f32 %v5838_v24, %v5839_v1  ;;  %v13441_v44 = vsel %vm2927_vm1, %v5819_v2, -inf  ;;  %v13444_v37 = vsel %vm2927_vm1, %v5826_v33, -inf  ;;  %v5797_v36 = vrot.slane %v5796_v30, 1  ;;  %2267 = vrot.lane.b32.xlu1 %v677_v18, %s10608_s25 }
 0x39f   :  { %v13448_v19 = vsel %vm2927_vm1, %v5833_v34, -inf  ;;  %v5791_v41 = vmax.f32 %v5789_v45, %v5790_v21  ;;  %v3733_v54 = vadd.f32 %v13140_v6, %v10342_v43  ;;  %v3347_v12 = vsel %vm3317_vm8, %v3282_v10, %v13312_v50  ;;  %v17022_v50 = vld [vmem:[#allocation24_spill] sm:$0xff]  ;;  %v17024_v43 = vld [vmem:[#allocation19_spill] sm:$0xff] }
 0x3a0   :  { %v5804_v60 = vrot.slane %v5803_v20, 1  ;;  %v5811_v22 = vrot.slane %v5810_v7, 1  ;;  %v13459_v48 = vsel %vm3057_vm4, %v12676_v5, %v13295_v11  ;;  %v3728_v39 = vadd.f32 %v13140_v6, %v3727_v26  ;;  %10362 = vmatmul.mubr.msk.f32.gmra.mxu0 %vm3394_vm9, %v3347_v12  ;;  %v13473_v52 = vpop.permute.xlu0 %1713  ;;  %v724_v5 = vld [vmem:[#allocation2 + $0x2d0] sm:$0xff] }
 0x3a1   :  { %v13465_v28 = vsel %vm3122_vm5, %v3088_v31, %v13297_v56  ;;  %v13469_v14 = vsel %vm3187_vm6, %v3170_v27, %v17022_v50  ;;  %v3299_v24 = vsel %vm3252_vm7, %v3234_v47, %v17023_v29  ;;  %v3991_v46 = vmax.f32 %v3733_v54, 0.0  ;;  %2489 = vrot.lane.b32.xlu0 %v724_v5, %s10609_s29  ;;  %v678_v29 = vld [vmem:[#allocation2 + $0x3ef] sm:$0xff] }
 0x3a2   :  { %v13476_v11 = vsel %vm2927_vm1, %v5840_v23, -inf  ;;  %v13478_v15 = vmax.f32 %v5796_v30, %v5797_v36  ;;  %v3990_v40 = vmax.f32 %v3728_v39, 0.0  ;;  %v3364_v56 = vsel %vm3317_vm8, %v3299_v24, %v13360_v4  ;;  %v13493_v30 = vpop.permute.xlu1 %1967  ;;  %2743 = vrot.lane.b32.xlu1 %v787_v51, %s10610_s1 }
 0x3a3   :  { %v13484_v2 = vsel %vm2927_vm1, %v5791_v41, -inf  ;;  %v4359_v33 = vcombine.high %v3991_v46, %v3991_v46  ;;  %v4366_v45 = vrot.slane %v3991_v46, %v12625_v58  ;;  %v13490_v1 = vsel %vm3057_vm4, %v17024_v43, %v13314_v55  ;;  %10388 = vmatprep.mubr.msk.f32.mxu1 %vm3394_vm9, %v3364_v56 }
 0x3a4   :  { %v13495_v4 = vmax.f32 %v5803_v20, %v5804_v60  ;;  %v13497_v38 = vmax.f32 %v5810_v7, %v5811_v22  ;;  %v4342_v62 = vcombine.high %v3990_v40, %v3990_v40  ;;  %v4349_v57 = vrot.slane %v3990_v40, %v12625_v58  ;;  %v13506_v49 = vpop.permute.xlu0 %2257 }
 0x3a5   :  { %v4373_v34 = vrot.slane %v4359_v33, %v12625_v58  ;;  %v4374_v21 = vcombine.high %v4366_v45, %v4366_v45  ;;  %v5869_v55 = vsel %vm5448_vm10, %v4366_v45, -inf  ;;  %v13504_v13 = vadd.f32 %v13140_v6, %v10345_v53  ;;  %1725 = vrot.lane.b32.xlu0 %v724_v5, %s10606_s15 }
 0x3a6   :  { %v5870_v31 = vrot.slane %v5869_v55, 4  ;;  %v4356_v20 = vrot.slane %v4342_v62, %v12625_v58  ;;  %v4357_v7 = vcombine.high %v4349_v57, %v4349_v57  ;;  %v5841_v27 = vsel %vm5448_vm10, %v4349_v57, -inf  ;;  %v13513_v36 = vpop.permute.xlu1 %2511  ;;  %1979 = vrot.lane.b32.xlu1 %v787_v51, %s10607_s20  ;;  %v741_v62 = vld [vmem:[#allocation2 + $0x3e8] sm:$0xff]  ;;  %v788_v51 = vld [vmem:[#allocation2 + $0x2d1] sm:$0xff] }
 0x3a7   :  { %v4375_v47 = vcombine.high %v4373_v34, %v4373_v34  ;;  %v5876_v10 = vsel %vm5448_vm10, %v4374_v21, -inf  ;;  %v5883_v26 = vsel %vm5448_vm10, %v4373_v34, -inf  ;;  %v5842_v23 = vrot.slane %v5841_v27, 4 }
 0x3a8   :  { %v5871_v6 = vmax.f32 %v5869_v55, %v5870_v31  ;;  %v5877_v41 = vrot.slane %v5876_v10, 4  ;;  %v5884_v54 = vrot.slane %v5883_v26, 4  ;;  %v4358_v12 = vcombine.high %v4356_v20, %v4356_v20  ;;  %v13519_v50 = vpop.permute.xlu0 %2733 }
 0x3a9   :  { %v5890_v18 = vsel %vm5448_vm10, %v4375_v47, -inf  ;;  %v5843_v60 = vmax.f32 %v5841_v27, %v5842_v23  ;;  %v5848_v22 = vsel %vm5448_vm10, %v4357_v7, -inf  ;;  %v5855_v39 = vsel %vm5448_vm10, %v4356_v20, -inf  ;;  %2269 = vrot.lane.b32.xlu0 %v678_v29, %s10608_s25 }
 0x3aa   :  { %v5872_v24 = vrot.slane %v5871_v6, 2  ;;  %v5878_v46 = vmax.f32 %v5876_v10, %v5877_v41  ;;  %v5885_v40 = vmax.f32 %v5883_v26, %v5884_v54  ;;  %v5891_v56 = vrot.slane %v5890_v18, 4  ;;  %v13523_v43 = vpop.permute.xlu1 %1747  ;;  %2523 = vrot.lane.b32.xlu1 %v741_v62, %s10609_s29 }
 0x3ab   :  { %v5844_v53 = vrot.slane %v5843_v60, 2  ;;  %v5849_v33 = vrot.slane %v5848_v22, 4  ;;  %v5856_v45 = vrot.slane %v5855_v39, 4  ;;  %v5862_v5 = vsel %vm5448_vm10, %v4358_v12, -inf }
 0x3ac   :  { %v5873_v57 = vmax.f32 %v5871_v6, %v5872_v24  ;;  %v5879_v34 = vrot.slane %v5878_v46, 2  ;;  %v5886_v21 = vrot.slane %v5885_v40, 2  ;;  %v5892_v55 = vmax.f32 %v5890_v18, %v5891_v56  ;;  %v13526_v47 = vpop.permute.xlu0 %1969 }
 0x3ad   :  { %v5845_v31 = vmax.f32 %v5843_v60, %v5844_v53  ;;  %v5850_v20 = vmax.f32 %v5848_v22, %v5849_v33  ;;  %v5857_v7 = vmax.f32 %v5855_v39, %v5856_v45  ;;  %v5863_v27 = vrot.slane %v5862_v5, 4  ;;  %17025 = vst [vmem:[#allocation26_spill] sm:$0xff] %v13526_v47  ;;  %2745 = vrot.lane.b32.xlu0 %v788_v51, %s10610_s1 }
 0x3ae   :  { %v5874_v10 = vrot.slane %v5873_v57, 1  ;;  %v5880_v26 = vmax.f32 %v5878_v46, %v5879_v34  ;;  %v5887_v23 = vmax.f32 %v5885_v40, %v5886_v21  ;;  %v5893_v41 = vrot.slane %v5892_v55, 2  ;;  %v13529_v18 = vpop.permute.xlu1 %2223  ;;  %1759 = vrot.lane.b32.xlu1 %v741_v62, %s10606_s15 }
 0x3af   :  { %v5846_v54 = vrot.slane %v5845_v31, 1  ;;  %v5851_v6 = vrot.slane %v5850_v20, 2  ;;  %v5858_v12 = vrot.slane %v5857_v7, 2  ;;  %v5864_v24 = vmax.f32 %v5862_v5, %v5863_v27 }
 0x3b0   :  { %v5875_v29 = vmax.f32 %v5873_v57, %v5874_v10  ;;  %v5881_v60 = vrot.slane %v5880_v26, 1  ;;  %v5888_v22 = vrot.slane %v5887_v23, 1  ;;  %v5894_v39 = vmax.f32 %v5892_v55, %v5893_v41  ;;  %v13532_v40 = vpop.permute.xlu0 %2513 }
 0x3b1   :  { %v5847_v56 = vmax.f32 %v5845_v31, %v5846_v54  ;;  %v5852_v53 = vmax.f32 %v5850_v20, %v5851_v6  ;;  %v5859_v33 = vmax.f32 %v5857_v7, %v5858_v12  ;;  %v5865_v46 = vrot.slane %v5864_v24, 2  ;;  %v661_v20 = vld [vmem:[#allocation2 + $0x2e7] sm:$0xff]  ;;  %1981 = vrot.lane.b32.xlu0 %v788_v51, %s10607_s20 }
 0x3b2   :  { %v5882_v45 = vmax.f32 %v5880_v26, %v5881_v60  ;;  %v5889_v34 = vmax.f32 %v5887_v23, %v5888_v22  ;;  %v5895_v21 = vrot.slane %v5894_v39, 1  ;;  %v13535_v47 = vsel %vm2927_vm1, %v5875_v29, -inf  ;;  %v13540_v31 = vpop.permute.xlu1 %2767  ;;  %v3737_v29 = vpop.f32.mrf.mxu0  ;;  %2235 = vrot.lane.b32.xlu1 %v661_v20, %s10608_s25  ;;  %v805_v22 = vld [vmem:[#allocation2 + $0x3e9] sm:$0xff] }
 0x3b3   :  { %v7316_v5 = vsel %vm2927_vm1, %v13478_v15, -inf  ;;  %v5853_v57 = vrot.slane %v5852_v53, 1  ;;  %v5860_v55 = vrot.slane %v5859_v33, 1  ;;  %v5866_v27 = vmax.f32 %v5864_v24, %v5865_v46 }
 0x3b4   :  { %v7319_v7 = vsel %vm2927_vm1, %v13495_v4, -inf  ;;  %v7322_v10 = vsel %vm2927_vm1, %v13497_v38, -inf  ;;  %v7314_v26 = vsel %vm2927_vm1, %v5847_v56, -inf  ;;  %v3300_v62 = vsel %vm3252_vm7, %v13469_v14, %v13358_v0  ;;  %v13553_v6 = vpop.permute.xlu0 %1749  ;;  %v742_v0 = vld [vmem:[#allocation2 + $0x3f0] sm:$0xff] }
 0x3b5   :  { %v5896_v15 = vmax.f32 %v5894_v39, %v5895_v21  ;;  %v7327_v23 = vmax.f32 %v13441_v44, %v13535_v47  ;;  %v5854_v41 = vmax.f32 %v5852_v53, %v5853_v57  ;;  %v5861_v54 = vmax.f32 %v5859_v33, %v5860_v55  ;;  %2525 = vrot.lane.b32.xlu0 %v742_v0, %s10609_s29 }
 0x3b6   :  { %v7329_v4 = vsel %vm2927_vm1, %v5882_v45, -inf  ;;  %v7332_v38 = vsel %vm2927_vm1, %v5889_v34, -inf  ;;  %v5867_v12 = vrot.slane %v5866_v27, 1  ;;  %v3993_v24 = vmax.f32 %v13504_v13, 0.0  ;;  %v13564_v60 = vpop.permute.xlu1 %2003  ;;  %v89_v13 = vld [vmem:[%s16682_s0 + $0x1f0] sm:$0xff]  ;;  %2779 = vrot.lane.b32.xlu1 %v805_v22, %s10610_s1 }
 0x3b7   :  { %v7315_v14 = vmax.f32 %v13484_v2, %v7314_v26  ;;  %v7317_v51 = vsel %vm2927_vm1, %v5854_v41, -inf  ;;  %v7320_v44 = vsel %vm2927_vm1, %v5861_v54, -inf  ;;  %v3365_v47 = vsel %vm3317_vm8, %v3300_v62, %v13402_v3  ;;  %236 = vst.msk [vmem:[#allocation2 + $0x448] sm:$0xff] %vm91_vm0, %v89_v13  ;;  %v13577_v45 = vld [vmem:[%s16684_s2] ss:$0 sm:$0xff]  ;;  %v90_v62 = vld [vmem:[%s16682_s0 + $0x1f8] sm:$0xff] }
 0x3b8   :  { %v5868_v39 = vmax.f32 %v5866_v27, %v5867_v12  ;;  %v7318_v56 = vmax.f32 %v7316_v5, %v7317_v51  ;;  %v7321_v53 = vmax.f32 %v7319_v7, %v7320_v44  ;;  %v4393_v33 = vcombine.high %v3993_v24, %v3993_v24  ;;  %10389 = vmatmul.mubr.msk.f32.gmra.mxu1 %vm3394_vm9, %v3365_v47  ;;  %v13581_v21 = vpop.permute.xlu0 %2225  ;;  %v662_v13 = vld [vmem:[#allocation2 + $0x2ef] sm:$0xff] }
 0x3b9   :  { %v7330_v2 = vmax.f32 %v13444_v37, %v7329_v4  ;;  %v7333_v46 = vmax.f32 %v13448_v19, %v7332_v38  ;;  %v4400_v3 = vrot.slane %v3993_v24, %v12625_v58  ;;  %v3738_v34 = vadd.f32 %v13577_v45, %v3737_v29  ;;  %237 = vst.msk [vmem:[#allocation2 + $0x450] sm:$0xff] %vm91_vm0, %v90_v62 }
 0x3ba   :  { %v7335_v5 = vsel %vm2927_vm1, %v5896_v15, -inf  ;;  %v7323_v57 = vsel %vm2927_vm1, %v5868_v39, -inf  ;;  %v7827_v37 = vsel %vm7799_vm11, %v7318_v56, %v7315_v14  ;;  %v4407_v19 = vrot.slane %v4393_v33, %v12625_v58  ;;  %v13590_v26 = vpop.permute.xlu1 %2479  ;;  %1761 = vrot.lane.b32.xlu0 %v742_v0, %s10606_s15  ;;  %2015 = vrot.lane.b32.xlu1 %v805_v22, %s10607_s20 }
 0x3bb   :  { %v7324_v55 = vmax.f32 %v7322_v10, %v7323_v57  ;;  %v7828_v27 = vsel %vm7801_vm12, %v7321_v53, %v7827_v37  ;;  %v4408_v20 = vcombine.high %v4400_v3, %v4400_v3  ;;  %v5925_v7 = vsel %vm5448_vm10, %v4400_v3, -inf  ;;  %v725_v3 = vld [vmem:[#allocation2 + $0x2e8] sm:$0xff] }
 0x3bc   :  { %v4409_v15 = vcombine.high %v4407_v19, %v4407_v19  ;;  %v5926_v41 = vrot.slane %v5925_v7, 4  ;;  %v5939_v54 = vsel %vm5448_vm10, %v4407_v19, -inf  ;;  %v3992_v4 = vmax.f32 %v3738_v34, 0.0  ;;  %v13601_v29 = vpop.permute.xlu0 %2769 }
 0x3bd   :  { %v7336_v10 = vmax.f32 %v13476_v11, %v7335_v5  ;;  %v7829_v38 = vsel %vm16701_vm13, %v7324_v55, %v7828_v27  ;;  %v5932_v12 = vsel %vm5448_vm10, %v4408_v20, -inf  ;;  %v5940_v24 = vrot.slane %v5939_v54, 4 }
 0x3be   :  { %v7830_v14 = vsel %vm7805_vm14, %v7327_v23, %v7829_v38  ;;  %v5927_v51 = vmax.f32 %v5925_v7, %v5926_v41  ;;  %v5933_v44 = vrot.slane %v5932_v12, 4  ;;  %v5946_v47 = vsel %vm5448_vm10, %v4409_v15, -inf  ;;  %v13607_v33 = vpop.permute.xlu1 %1715  ;;  %2237 = vrot.lane.b32.xlu0 %v662_v13, %s10608_s25  ;;  %2491 = vrot.lane.b32.xlu1 %v725_v3, %s10609_s29  ;;  %v806_v7 = vld [vmem:[#allocation2 + $0x3f1] sm:$0xff] }
 0x3bf   :  { %v7831_v11 = vsel %vm16693_vm15, %v7330_v2, %v7830_v14  ;;  %v5941_v39 = vmax.f32 %v5939_v54, %v5940_v24  ;;  %v5947_v56 = vrot.slane %v5946_v47, 4  ;;  %v4376_v53 = vcombine.high %v3992_v4, %v3992_v4 }
 0x3c0   :  { %v7832_v0 = vsel %vm16692_vm2, %v7333_v46, %v7831_v11  ;;  %v5928_v34 = vrot.slane %v5927_v51, 2  ;;  %v5934_v5 = vmax.f32 %v5932_v12, %v5933_v44  ;;  %v4383_v23 = vrot.slane %v3992_v4, %v12625_v58  ;;  %v13614_v2 = vpop.permute.xlu0 %2005 }
 0x3c1   :  { %v7833_v57 = vsel %vm16691_vm3, %v7336_v10, %v7832_v0  ;;  %v5942_v37 = vrot.slane %v5941_v39, 2  ;;  %v5948_v19 = vmax.f32 %v5946_v47, %v5947_v56  ;;  %v4390_v22 = vrot.slane %v4376_v53, %v12625_v58 }
 0x3c2   :  { %7937 = vst.msk [vmem:[#allocation3 + $0x68] sm:$0xff] %vm2927_vm1, %v7833_v57  ;;  %v5929_v55 = vmax.f32 %v5927_v51, %v5928_v34  ;;  %v5935_v27 = vrot.slane %v5934_v5, 2  ;;  %v4391_v20 = vcombine.high %v4383_v23, %v4383_v23  ;;  %v5897_v46 = vsel %vm5448_vm10, %v4383_v23, -inf  ;;  %v13619_v4 = vpop.permute.xlu1 %2259  ;;  %2781 = vrot.lane.b32.xlu0 %v806_v7, %s10610_s1  ;;  %1727 = vrot.lane.b32.xlu1 %v725_v3, %s10606_s15 }
 0x3c3   :  { %v5943_v62 = vmax.f32 %v5941_v39, %v5942_v37  ;;  %v5949_v15 = vrot.slane %v5948_v19, 2  ;;  %v4392_v41 = vcombine.high %v4390_v22, %v4390_v22  ;;  %v5898_v54 = vrot.slane %v5897_v46, 4  ;;  %v679_v37 = vld [vmem:[#allocation2 + $0x407] sm:$0xff] }
 0x3c4   :  { %v5930_v10 = vrot.slane %v5929_v55, 1  ;;  %v5936_v38 = vmax.f32 %v5934_v5, %v5935_v27  ;;  %v5904_v12 = vsel %vm5448_vm10, %v4391_v20, -inf  ;;  %v5911_v24 = vsel %vm5448_vm10, %v4390_v22, -inf  ;;  %v13624_v13 = vpop.permute.xlu0 %2481  ;;  %v10348_v22 = vpop.f32.mrf.mxu0 }
 0x3c5   :  { %v5944_v14 = vrot.slane %v5943_v62, 1  ;;  %v5950_v51 = vmax.f32 %v5948_v19, %v5949_v15  ;;  %v5899_v44 = vmax.f32 %v5897_v46, %v5898_v54  ;;  %v5905_v47 = vrot.slane %v5904_v12, 4  ;;  %v17026_v19 = vld [vmem:[#allocation20_spill] sm:$0xff] }
 0x3c6   :  { %v3154_v11 = vsel %vm3122_vm5, %v13459_v48, %v13336_v17  ;;  %v3218_v39 = vsel %vm3187_vm6, %v13465_v28, %v13338_v9  ;;  %v5912_v56 = vrot.slane %v5911_v24, 4  ;;  %v5918_v53 = vsel %vm5448_vm10, %v4392_v41, -inf  ;;  %v13634_v57 = vpop.permute.xlu1 %2735  ;;  %2017 = vrot.lane.b32.xlu0 %v806_v7, %s10607_s20  ;;  %2271 = vrot.lane.b32.xlu1 %v679_v37, %s10608_s25 }
 0x3c7   :  { %v5937_v0 = vrot.slane %v5936_v38, 1  ;;  %v5951_v34 = vrot.slane %v5950_v51, 1  ;;  %v5900_v5 = vrot.slane %v5899_v44, 2  ;;  %v5906_v23 = vmax.f32 %v5904_v12, %v5905_v47 }
 0x3c8   :  { %v3107_v17 = vsel %vm3057_vm4, %v17026_v19, %v13377_v8  ;;  %v3171_v9 = vsel %vm3122_vm5, %v13490_v1, %v13379_v63  ;;  %v5913_v48 = vmax.f32 %v5911_v24, %v5912_v56  ;;  %v5919_v28 = vrot.slane %v5918_v53, 4  ;;  %v13645_v15 = vpop.permute.xlu0 %1717  ;;  %v726_v63 = vld [vmem:[#allocation2 + $0x2f0] sm:$0xff] }
 0x3c9   :  { %v3283_v3 = vsel %vm3252_vm7, %v3218_v39, %v13393_v61  ;;  %v5931_v27 = vmax.f32 %v5929_v55, %v5930_v10  ;;  %v5945_v20 = vmax.f32 %v5943_v62, %v5944_v14  ;;  %v5907_v46 = vrot.slane %v5906_v23, 2  ;;  %v789_v10 = vld [vmem:[#allocation2 + $0x2e9] sm:$0xff]  ;;  %v3747_v39 = vpop.f32.mrf.mxu0 }
 0x3ca   :  { %v5901_v41 = vmax.f32 %v5899_v44, %v5900_v5  ;;  %v5914_v54 = vrot.slane %v5913_v48, 2  ;;  %v5920_v8 = vmax.f32 %v5918_v53, %v5919_v28  ;;  %v3348_v12 = vsel %vm3317_vm8, %v3283_v3, %v13453_v32  ;;  %v13653_v7 = vpop.permute.xlu1 %1971  ;;  %v17027_v24 = vld [vmem:[#allocation12_spill] sm:$0xff]  ;;  %2493 = vrot.lane.b32.xlu0 %v726_v63, %s10609_s29  ;;  %2747 = vrot.lane.b32.xlu1 %v789_v10, %s10610_s1 }
 0x3cb   :  { %v3219_v1 = vsel %vm3187_vm6, %v3154_v11, %v13391_v25  ;;  %v5938_v61 = vmax.f32 %v5936_v38, %v5937_v0  ;;  %v5952_v55 = vmax.f32 %v5950_v51, %v5951_v34  ;;  %v5908_v62 = vmax.f32 %v5906_v23, %v5907_v46  ;;  %10364 = vmatprep.mubr.msk.f32.mxu0 %vm3394_vm9, %v3348_v12 }
 0x3cc   :  { %v3090_v14 = vsel %vm3057_vm4, %v17027_v24, %v13404_v59  ;;  %v5915_v44 = vmax.f32 %v5913_v48, %v5914_v54  ;;  %v5921_v32 = vrot.slane %v5920_v8, 2  ;;  %v3172_v47 = vsel %vm3122_vm5, %v3107_v17, %v13414_v16  ;;  %v13669_v59 = vpop.permute.xlu0 %2261 }
 0x3cd   :  { %v13661_v25 = vsel %vm2927_vm1, %v5931_v27, -inf  ;;  %v3236_v38 = vsel %vm3187_vm6, %v3171_v9, %v13417_v35  ;;  %v3284_v51 = vsel %vm3252_vm7, %v3219_v1, %v13438_v42  ;;  %v3753_v11 = vadd.f32 %v13577_v45, %v10348_v22  ;;  %v743_v1 = vld [vmem:[#allocation2 + $0x408] sm:$0xff] }
 0x3ce   :  { %v13672_v56 = vsel %vm2927_vm1, %v5945_v20, -inf  ;;  %v5902_v16 = vrot.slane %v5901_v41, 1  ;;  %v5909_v53 = vrot.slane %v5908_v62, 1  ;;  %v3349_v0 = vsel %vm3317_vm8, %v3284_v51, %v13519_v50  ;;  %v13685_v23 = vpop.permute.xlu1 %2515  ;;  %v17028_v50 = vld [vmem:[#allocation13_spill] sm:$0xff]  ;;  %1729 = vrot.lane.b32.xlu0 %v726_v63, %s10606_s15  ;;  %1983 = vrot.lane.b32.xlu1 %v789_v10, %s10607_s20 }
 0x3cf   :  { %v13678_v35 = vsel %vm2927_vm1, %v5938_v61, -inf  ;;  %v13681_v42 = vsel %vm2927_vm1, %v5952_v55, -inf  ;;  %v3995_v34 = vmax.f32 %v3753_v11, 0.0  ;;  %v3748_v5 = vadd.f32 %v13577_v45, %v3747_v39  ;;  %10365 = vmatmul.mubr.msk.f32.gmra.mxu0 %vm3394_vm9, %v3349_v0  ;;  %v790_v51 = vld [vmem:[#allocation2 + $0x2f1] sm:$0xff] }
 0x3d0   :  { %v5916_v37 = vrot.slane %v5915_v44, 1  ;;  %v13687_v19 = vmax.f32 %v5920_v8, %v5921_v32  ;;  %v13692_v17 = vsel %vm3057_vm4, %v17028_v50, %v13473_v52  ;;  %v13696_v9 = vsel %vm3122_vm5, %v3090_v14, %v13493_v30  ;;  %v13702_v27 = vpop.permute.xlu0 %2737 }
 0x3d1   :  { %v3301_v48 = vsel %vm3252_vm7, %v3236_v38, %v13513_v36  ;;  %v4427_v28 = vcombine.high %v3995_v34, %v3995_v34  ;;  %v4434_v22 = vrot.slane %v3995_v34, %v12625_v58  ;;  %v3994_v3 = vmax.f32 %v3748_v5, 0.0  ;;  %v680_v36 = vld [vmem:[#allocation2 + $0x40f] sm:$0xff] }
 0x3d2   :  { %v13704_v20 = vmax.f32 %v5901_v41, %v5902_v16  ;;  %v13706_v46 = vmax.f32 %v5908_v62, %v5909_v53  ;;  %v13710_v52 = vsel %vm3187_vm6, %v3172_v47, %v13506_v49  ;;  %v3366_v30 = vsel %vm3317_vm8, %v3301_v48, %v13540_v31  ;;  %v13718_v41 = vpop.permute.xlu1 %1751  ;;  %2273 = vrot.lane.b32.xlu0 %v680_v36, %s10608_s25 }
 0x3d3   :  { %v4441_v54 = vrot.slane %v4427_v28, %v12625_v58  ;;  %v4442_v8 = vcombine.high %v4434_v22, %v4434_v22  ;;  %v5981_v12 = vsel %vm5448_vm10, %v4434_v22, -inf  ;;  %v4410_v63 = vcombine.high %v3994_v3, %v3994_v3  ;;  %10391 = vmatprep.mubr.msk.f32.mxu1 %vm3394_vm9, %v3366_v30  ;;  %17029 = vst [vmem:[#allocation27_spill] sm:$0xff] %v13718_v41 }
 0x3d4   :  { %v13720_v61 = vmax.f32 %v5915_v44, %v5916_v37  ;;  %v5923_v49 = vrot.slane %v13687_v19, 1  ;;  %v5982_v55 = vrot.slane %v5981_v12, 4  ;;  %v4417_v31 = vrot.slane %v3994_v3, %v12625_v58  ;;  %v13728_v32 = vpop.permute.xlu0 %1973  ;;  %2527 = vrot.lane.b32.xlu1 %v743_v1, %s10609_s29 }
 0x3d5   :  { %v4443_v62 = vcombine.high %v4441_v54, %v4441_v54  ;;  %v5988_v10 = vsel %vm5448_vm10, %v4442_v8, -inf  ;;  %v5995_v24 = vsel %vm5448_vm10, %v4441_v54, -inf  ;;  %v4424_v14 = vrot.slane %v4410_v63, %v12625_v58  ;;  %17030 = vst [vmem:[#allocation28_spill] sm:$0xff] %v13728_v32 }
 0x3d6   :  { %v5983_v47 = vmax.f32 %v5981_v12, %v5982_v55  ;;  %v5989_v39 = vrot.slane %v5988_v10, 4  ;;  %v5996_v44 = vrot.slane %v5995_v24, 4  ;;  %v4425_v38 = vcombine.high %v4417_v31, %v4417_v31  ;;  %v13734_v34 = vpop.permute.xlu1 %2227  ;;  %2749 = vrot.lane.b32.xlu0 %v790_v51, %s10610_s1 }
 0x3d7   :  { %v6002_v11 = vsel %vm5448_vm10, %v4443_v62, -inf  ;;  %v4426_v16 = vcombine.high %v4424_v14, %v4424_v14  ;;  %v5953_v53 = vsel %vm5448_vm10, %v4417_v31, -inf  ;;  %v5967_v0 = vsel %vm5448_vm10, %v4424_v14, -inf  ;;  %17031 = vst [vmem:[#allocation29_spill] sm:$0xff] %v13734_v34 }
 0x3d8   :  { %v5984_v5 = vrot.slane %v5983_v47, 2  ;;  %v5990_v37 = vmax.f32 %v5988_v10, %v5989_v39  ;;  %v5997_v50 = vmax.f32 %v5995_v24, %v5996_v44  ;;  %v6003_v48 = vrot.slane %v6002_v11, 4  ;;  %v13739_v54 = vpop.permute.xlu0 %2517  ;;  %1509 = vrot.lane.b32.xlu1 %v680_v36, %s10605_s14 }
 0x3d9   :  { %v5954_v28 = vrot.slane %v5953_v53, 4  ;;  %v5960_v22 = vsel %vm5448_vm10, %v4425_v38, -inf  ;;  %v5968_v3 = vrot.slane %v5967_v0, 4  ;;  %v5974_v30 = vsel %vm5448_vm10, %v4426_v16, -inf  ;;  %17032 = vst [vmem:[#allocation30_spill] sm:$0xff] %v13739_v54 }
 0x3da   :  { %v5985_v8 = vmax.f32 %v5983_v47, %v5984_v5  ;;  %v5991_v12 = vrot.slane %v5990_v37, 2  ;;  %v5998_v63 = vrot.slane %v5997_v50, 2  ;;  %v6004_v55 = vmax.f32 %v6002_v11, %v6003_v48  ;;  %v13742_v14 = vpop.permute.xlu1 %2771  ;;  %1763 = vrot.lane.b32.xlu0 %v743_v1, %s10606_s15  ;;  %v17033_v1 = vld [vmem:[#allocation21_spill] sm:$0xff] }
 0x3db   :  { %v5955_v31 = vmax.f32 %v5953_v53, %v5954_v28  ;;  %v5961_v62 = vrot.slane %v5960_v22, 4  ;;  %v5969_v10 = vmax.f32 %v5967_v0, %v5968_v3  ;;  %v5975_v24 = vrot.slane %v5974_v30, 4  ;;  %v663_v0 = vld [vmem:[#allocation2 + $0x307] sm:$0xff]  ;;  %v744_v3 = vld [vmem:[#allocation2 + $0x410] sm:$0xff] }
 0x3dc   :  { %v5986_v39 = vrot.slane %v5985_v8, 1  ;;  %v5992_v44 = vmax.f32 %v5990_v37, %v5991_v12  ;;  %v5999_v38 = vmax.f32 %v5997_v50, %v5998_v63  ;;  %v6005_v16 = vrot.slane %v6004_v55, 2  ;;  %v13745_v47 = vpop.permute.xlu0 %1753  ;;  %1985 = vrot.lane.b32.xlu1 %v790_v51, %s10607_s20 }
 0x3dd   :  { %v5956_v34 = vrot.slane %v5955_v31, 2  ;;  %v5962_v32 = vmax.f32 %v5960_v22, %v5961_v62  ;;  %v5970_v41 = vrot.slane %v5969_v10, 2  ;;  %v5976_v54 = vmax.f32 %v5974_v30, %v5975_v24 }
 0x3de   :  { %v5987_v11 = vmax.f32 %v5985_v8, %v5986_v39  ;;  %v5993_v36 = vrot.slane %v5992_v44, 1  ;;  %v6000_v53 = vrot.slane %v5999_v38, 1  ;;  %v6006_v5 = vmax.f32 %v6004_v55, %v6005_v16  ;;  %v13759_v12 = vpop.permute.xlu1 %2007  ;;  %2239 = vrot.lane.b32.xlu0 %v663_v0, %s10608_s25 }
 0x3df   :  { %v5957_v48 = vmax.f32 %v5955_v31, %v5956_v34  ;;  %v5963_v28 = vrot.slane %v5962_v32, 2  ;;  %v5971_v37 = vmax.f32 %v5969_v10, %v5970_v41  ;;  %v5977_v50 = vrot.slane %v5976_v54, 2  ;;  %v10351_v31 = vpop.f32.mrf.mxu0  ;;  %v807_v10 = vld [vmem:[#allocation2 + $0x409] sm:$0xff] }
 0x3e0   :  { %v5924_v22 = vmax.f32 %v13687_v19, %v5923_v49  ;;  %v7337_v30 = vsel %vm2927_vm1, %v13704_v20, -inf  ;;  %v13754_v8 = vsel %vm3057_vm4, %v17033_v1, %v13523_v43  ;;  %v3220_v51 = vsel %vm3187_vm6, %v13696_v9, %v13529_v18  ;;  %v13762_v19 = vpop.permute.xlu0 %2229  ;;  %2529 = vrot.lane.b32.xlu1 %v744_v3, %s10609_s29 }
 0x3e1   :  { %v6007_v34 = vrot.slane %v6006_v5, 1  ;;  %v5958_v41 = vrot.slane %v5957_v48, 1  ;;  %v5964_v63 = vmax.f32 %v5962_v32, %v5963_v28  ;;  %v5972_v55 = vrot.slane %v5971_v37, 1 }
 0x3e2   :  { %v5994_v20 = vmax.f32 %v5992_v44, %v5993_v36  ;;  %v6001_v49 = vmax.f32 %v5999_v38, %v6000_v53  ;;  %v7350_v43 = vsel %vm2927_vm1, %v5987_v11, -inf  ;;  %v5978_v62 = vmax.f32 %v5976_v54, %v5977_v50  ;;  %v13774_v54 = vpop.permute.xlu1 %2483  ;;  %v3757_v53 = vpop.f32.mrf.mxu0  ;;  %2783 = vrot.lane.b32.xlu0 %v807_v10, %s10610_s1 }
 0x3e3   :  { %v7340_v18 = vsel %vm2927_vm1, %v13706_v46, -inf  ;;  %v7343_v9 = vsel %vm2927_vm1, %v13720_v61, -inf  ;;  %v5959_v32 = vmax.f32 %v5957_v48, %v5958_v41  ;;  %v5965_v24 = vrot.slane %v5964_v63, 1 }
 0x3e4   :  { %v7346_v39 = vsel %vm2927_vm1, %v5924_v22, -inf  ;;  %v5973_v16 = vmax.f32 %v5971_v37, %v5972_v55  ;;  %v5979_v0 = vrot.slane %v5978_v62, 1  ;;  %v3302_v44 = vsel %vm3252_vm7, %v13710_v52, %v13532_v40  ;;  %v13779_v61 = vpop.permute.xlu0 %2773  ;;  %1765 = vrot.lane.b32.xlu1 %v744_v3, %s10606_s15  ;;  %v664_v22 = vld [vmem:[#allocation2 + $0x30f] sm:$0xff] }
 0x3e5   :  { %v6008_v38 = vmax.f32 %v6006_v5, %v6007_v34  ;;  %v7351_v11 = vmax.f32 %v13661_v25, %v7350_v43  ;;  %v5966_v36 = vmax.f32 %v5964_v63, %v5965_v24  ;;  %v7338_v46 = vsel %vm2927_vm1, %v5959_v32, -inf  ;;  %v808_v24 = vld [vmem:[#allocation2 + $0x411] sm:$0xff] }
 0x3e6   :  { %v7353_v48 = vsel %vm2927_vm1, %v5994_v20, -inf  ;;  %v7356_v28 = vsel %vm2927_vm1, %v6001_v49, -inf  ;;  %v5980_v37 = vmax.f32 %v5978_v62, %v5979_v0  ;;  %v7344_v40 = vsel %vm2927_vm1, %v5973_v16, -inf  ;;  %v13792_v55 = vpop.permute.xlu1 %1719  ;;  %2019 = vrot.lane.b32.xlu0 %v807_v10, %s10607_s20 }
 0x3e7   :  { %v7341_v52 = vsel %vm2927_vm1, %v5966_v36, -inf  ;;  %v7345_v25 = vmax.f32 %v7343_v9, %v7344_v40  ;;  %v3763_v5 = vadd.f32 %v13577_v45, %v10351_v31  ;;  %v3367_v50 = vsel %vm3317_vm8, %v3302_v44, %v13601_v29  ;;  %v727_v9 = vld [vmem:[#allocation2 + $0x308] sm:$0xff] }
 0x3e8   :  { %v7339_v1 = vmax.f32 %v7337_v30, %v7338_v46  ;;  %v7342_v34 = vmax.f32 %v7340_v18, %v7341_v52  ;;  %v7347_v41 = vsel %vm2927_vm1, %v5980_v37, -inf  ;;  %v3758_v63 = vadd.f32 %v13577_v45, %v3757_v53  ;;  %10392 = vmatmul.mubr.msk.f32.gmra.mxu1 %vm3394_vm9, %v3367_v50  ;;  %v13798_v29 = vpop.permute.xlu0 %2009  ;;  %2241 = vrot.lane.b32.xlu1 %v664_v22, %s10608_s25 }
 0x3e9   :  { %v7359_v3 = vsel %vm2927_vm1, %v6008_v38, -inf  ;;  %v7348_v20 = vmax.f32 %v7346_v39, %v7347_v41  ;;  %v3285_v31 = vsel %vm3252_vm7, %v3220_v51, %v13590_v26  ;;  %v3997_v49 = vmax.f32 %v3763_v5, 0.0 }
 0x3ea   :  { %v7354_v30 = vmax.f32 %v13678_v35, %v7353_v48  ;;  %v7834_v43 = vsel %vm7799_vm11, %v7342_v34, %v7339_v1  ;;  %v3996_v62 = vmax.f32 %v3758_v63, 0.0  ;;  %v3350_v18 = vsel %vm3317_vm8, %v3285_v31, %v13634_v57  ;;  %v13812_v0 = vpop.permute.xlu1 %2263  ;;  %2495 = vrot.lane.b32.xlu0 %v727_v9, %s10609_s29 }
 0x3eb   :  { %v7357_v32 = vmax.f32 %v13672_v56, %v7356_v28  ;;  %v7835_v26 = vsel %vm7801_vm12, %v7345_v25, %v7834_v43  ;;  %v4461_v51 = vcombine.high %v3997_v49, %v3997_v49  ;;  %v4468_v10 = vrot.slane %v3997_v49, %v12625_v58  ;;  %10367 = vmatprep.mubr.msk.f32.mxu0 %vm3394_vm9, %v3350_v18  ;;  %v681_v25 = vld [vmem:[#allocation2 + $0x427] sm:$0xff]  ;;  %v728_v18 = vld [vmem:[#allocation2 + $0x310] sm:$0xff] }
 0x3ec   :  { %v7360_v35 = vmax.f32 %v13681_v42, %v7359_v3  ;;  %v7836_v39 = vsel %vm16701_vm13, %v7348_v20, %v7835_v26  ;;  %v4444_v16 = vcombine.high %v3996_v62, %v3996_v62  ;;  %v4451_v57 = vrot.slane %v3996_v62, %v12625_v58  ;;  %v13818_v46 = vpop.permute.xlu0 %2485  ;;  %2785 = vrot.lane.b32.xlu1 %v808_v24, %s10610_s1 }
 0x3ed   :  { %v7837_v44 = vsel %vm7805_vm14, %v7351_v11, %v7836_v39  ;;  %v4475_v56 = vrot.slane %v4461_v51, %v12625_v58  ;;  %v4476_v38 = vcombine.high %v4468_v10, %v4468_v10  ;;  %v6037_v36 = vsel %vm5448_vm10, %v4468_v10, -inf  ;;  %v791_v10 = vld [vmem:[#allocation2 + $0x309] sm:$0xff] }
 0x3ee   :  { %v7838_v42 = vsel %vm16693_vm15, %v7354_v30, %v7837_v44  ;;  %v6038_v53 = vrot.slane %v6037_v36, 4  ;;  %v4458_v48 = vrot.slane %v4444_v16, %v12625_v58  ;;  %v4459_v28 = vcombine.high %v4451_v57, %v4451_v57  ;;  %v13827_v34 = vpop.permute.xlu1 %2739  ;;  %2021 = vrot.lane.b32.xlu0 %v808_v24, %s10607_s20 }
 0x3ef   :  { %v7839_v37 = vsel %vm16692_vm2, %v7357_v32, %v7838_v42  ;;  %v4477_v11 = vcombine.high %v4475_v56, %v4475_v56  ;;  %v6044_v40 = vsel %vm5448_vm10, %v4476_v38, -inf  ;;  %v6051_v52 = vsel %vm5448_vm10, %v4475_v56, -inf }
 0x3f0   :  { %v7840_v5 = vsel %vm16691_vm3, %v7360_v35, %v7839_v37  ;;  %v6039_v50 = vmax.f32 %v6037_v36, %v6038_v53  ;;  %v6045_v22 = vrot.slane %v6044_v40, 4  ;;  %v6052_v1 = vrot.slane %v6051_v52, 4  ;;  %v13834_v31 = vpop.permute.xlu0 %1721  ;;  %2275 = vrot.lane.b32.xlu1 %v681_v25, %s10608_s25 }
 0x3f1   :  { %7938 = vst.msk [vmem:[#allocation3 + $0x80] sm:$0xff] %vm2927_vm1, %v7840_v5  ;;  %v6058_v41 = vsel %vm5448_vm10, %v4477_v11, -inf  ;;  %v4460_v63 = vcombine.high %v4458_v48, %v4458_v48  ;;  %v6009_v3 = vsel %vm5448_vm10, %v4451_v57, -inf  ;;  %v6016_v20 = vsel %vm5448_vm10, %v4459_v28, -inf }
 0x3f2   :  { %v6040_v49 = vrot.slane %v6039_v50, 2  ;;  %v6046_v30 = vmax.f32 %v6044_v40, %v6045_v22  ;;  %v6053_v43 = vmax.f32 %v6051_v52, %v6052_v1  ;;  %v6059_v62 = vrot.slane %v6058_v41, 4  ;;  %v13839_v57 = vpop.permute.xlu1 %1975  ;;  %2497 = vrot.lane.b32.xlu0 %v728_v18, %s10609_s29  ;;  %v17034_v22 = vld [vmem:[#allocation26_spill] sm:$0xff]  ;;  %v10354_v18 = vpop.f32.mrf.mxu0 }
 0x3f3   :  { %v6010_v9 = vrot.slane %v6009_v3, 4  ;;  %v6017_v32 = vrot.slane %v6016_v20, 4  ;;  %v6023_v26 = vsel %vm5448_vm10, %v4458_v48, -inf  ;;  %v6030_v51 = vsel %vm5448_vm10, %v4460_v63, -inf }
 0x3f4   :  { %v6041_v35 = vmax.f32 %v6039_v50, %v6040_v49  ;;  %v6047_v39 = vrot.slane %v6046_v30, 2  ;;  %v6054_v16 = vrot.slane %v6053_v43, 2  ;;  %v6060_v24 = vmax.f32 %v6058_v41, %v6059_v62  ;;  %v13842_v42 = vpop.permute.xlu0 %2265  ;;  %2751 = vrot.lane.b32.xlu1 %v791_v10, %s10610_s1  ;;  %v682_v50 = vld [vmem:[#allocation2 + $0x42f] sm:$0xff] }
 0x3f5   :  { %v6011_v44 = vmax.f32 %v6009_v3, %v6010_v9  ;;  %v6018_v56 = vmax.f32 %v6016_v20, %v6017_v32  ;;  %v6024_v38 = vrot.slane %v6023_v26, 4  ;;  %v6031_v36 = vrot.slane %v6030_v51, 4  ;;  %v17035_v32 = vld [vmem:[#allocation22_spill] sm:$0xff] }
 0x3f6   :  { %v6042_v53 = vrot.slane %v6041_v35, 1  ;;  %v6048_v28 = vmax.f32 %v6046_v30, %v6047_v39  ;;  %v6055_v48 = vmax.f32 %v6053_v43, %v6054_v16  ;;  %v6061_v37 = vrot.slane %v6060_v24, 2  ;;  %v13848_v20 = vpop.permute.xlu1 %2519  ;;  %1511 = vrot.lane.b32.xlu0 %v681_v25, %s10605_s14  ;;  %v745_v39 = vld [vmem:[#allocation2 + $0x428] sm:$0xff] }
 0x3f7   :  { %v6012_v11 = vrot.slane %v6011_v44, 2  ;;  %v6019_v40 = vrot.slane %v6018_v56, 2  ;;  %v6025_v52 = vmax.f32 %v6023_v26, %v6024_v38  ;;  %v6032_v5 = vmax.f32 %v6030_v51, %v6031_v36 }
 0x3f8   :  { %v3156_v1 = vsel %vm3122_vm5, %v13692_v17, %v17034_v22  ;;  %v6049_v41 = vrot.slane %v6048_v28, 1  ;;  %v6056_v63 = vrot.slane %v6055_v48, 1  ;;  %v6062_v3 = vmax.f32 %v6060_v24, %v6061_v37  ;;  %v13851_v9 = vpop.permute.xlu0 %2741  ;;  %2277 = vrot.lane.b32.xlu1 %v682_v50, %s10608_s25 }
 0x3f9   :  { %v6013_v49 = vmax.f32 %v6011_v44, %v6012_v11  ;;  %v6020_v30 = vmax.f32 %v6018_v56, %v6019_v40  ;;  %v6026_v43 = vrot.slane %v6025_v52, 2  ;;  %v6033_v62 = vrot.slane %v6032_v5, 2  ;;  %v792_v56 = vld [vmem:[#allocation2 + $0x311] sm:$0xff]  ;;  %v3767_v40 = vpop.f32.mrf.mxu0 }
 0x3fa   :  { %v3109_v26 = vsel %vm3057_vm4, %v17035_v32, %v13553_v6  ;;  %v3173_v17 = vsel %vm3122_vm5, %v13754_v8, %v13564_v60  ;;  %v3221_v51 = vsel %vm3187_vm6, %v3156_v1, %v13581_v21  ;;  %v6063_v10 = vrot.slane %v6062_v3, 1  ;;  %v17036_v6 = vld [vmem:[#allocation14_spill] sm:$0xff]  ;;  %v13867_v8 = vpop.permute.xlu1 %1755  ;;  %2531 = vrot.lane.b32.xlu0 %v745_v39, %s10609_s29 }
 0x3fb   :  { %v6043_v16 = vmax.f32 %v6041_v35, %v6042_v53  ;;  %v6014_v24 = vrot.slane %v6013_v49, 1  ;;  %v6027_v25 = vmax.f32 %v6025_v52, %v6026_v43  ;;  %v6034_v44 = vmax.f32 %v6032_v5, %v6033_v62 }
 0x3fc   :  { %v6050_v38 = vmax.f32 %v6048_v28, %v6049_v41  ;;  %v6057_v36 = vmax.f32 %v6055_v48, %v6056_v63  ;;  %v3092_v37 = vsel %vm3057_vm4, %v17036_v6, %v13607_v33  ;;  %v3174_v60 = vsel %vm3122_vm5, %v3109_v26, %v13614_v2  ;;  %v13874_v28 = vpop.permute.xlu0 %1977  ;;  %v17037_v33 = vld [vmem:[#allocation15_spill] sm:$0xff]  ;;  %2753 = vrot.lane.b32.xlu1 %v792_v56, %s10610_s1 }
 0x3fd   :  { %v6064_v21 = vmax.f32 %v6062_v3, %v6063_v10  ;;  %v6021_v11 = vrot.slane %v6020_v30, 1  ;;  %v3238_v35 = vsel %vm3187_vm6, %v3173_v17, %v13619_v4  ;;  %v3286_v53 = vsel %vm3252_vm7, %v3221_v51, %v13624_v13 }
 0x3fe   :  { %v13879_v48 = vsel %vm3057_vm4, %v17037_v33, %v13645_v15  ;;  %v13883_v2 = vsel %vm3122_vm5, %v3092_v37, %v13653_v7  ;;  %v3773_v52 = vadd.f32 %v13577_v45, %v10354_v18  ;;  %v3351_v4 = vsel %vm3317_vm8, %v3286_v53, %v13702_v27  ;;  %v13900_v27 = vpop.permute.xlu1 %2231  ;;  %1513 = vrot.lane.b32.xlu0 %v682_v50, %s10605_s14  ;;  %v17038_v50 = vld [vmem:[#allocation30_spill] sm:$0xff] }
 0x3ff   :  { %v13890_v13 = vsel %vm2927_vm1, %v6043_v16, -inf  ;;  %v6015_v5 = vmax.f32 %v6013_v49, %v6014_v24  ;;  %v6028_v22 = vrot.slane %v6027_v25, 1  ;;  %v6035_v1 = vrot.slane %v6034_v44, 1  ;;  %10368 = vmatmul.mubr.msk.f32.gmra.mxu0 %vm3394_vm9, %v3351_v4  ;;  %v809_v16 = vld [vmem:[#allocation2 + $0x429] sm:$0xff] }
 0x400   :  { %v13894_v15 = vsel %vm2927_vm1, %v6050_v38, -inf  ;;  %v13897_v7 = vsel %vm2927_vm1, %v6057_v36, -inf  ;;  %v3999_v41 = vmax.f32 %v3773_v52, 0.0  ;;  %v3768_v63 = vadd.f32 %v13577_v45, %v3767_v40  ;;  %v13910_v18 = vpop.permute.xlu0 %2521  ;;  %1767 = vrot.lane.b32.xlu1 %v745_v39, %s10606_s15 }
 0x401   :  { %v13903_v3 = vsel %vm2927_vm1, %v6064_v21, -inf  ;;  %v6022_v43 = vmax.f32 %v6020_v30, %v6021_v11  ;;  %v3239_v49 = vsel %vm3187_vm6, %v3174_v60, %v13669_v59  ;;  %v3303_v62 = vsel %vm3252_vm7, %v3238_v35, %v13685_v23  ;;  %v746_v30 = vld [vmem:[#allocation2 + $0x430] sm:$0xff] }
 0x402   :  { %v4495_v32 = vcombine.high %v3999_v41, %v3999_v41  ;;  %v4502_v26 = vrot.slane %v3999_v41, %v12625_v58  ;;  %v3998_v45 = vmax.f32 %v3768_v63, 0.0  ;;  %v3368_v17 = vsel %vm3317_vm8, %v3303_v62, %v13742_v14  ;;  %v13928_v38 = vpop.permute.xlu1 %2775  ;;  %2533 = vrot.lane.b32.xlu0 %v746_v30, %s10609_s29 }
 0x403   :  { %v13916_v51 = vmax.f32 %v6027_v25, %v6028_v22  ;;  %v13918_v59 = vmax.f32 %v6034_v44, %v6035_v1  ;;  %v13921_v23 = vsel %vm2927_vm1, %v6015_v5, -inf  ;;  %v3304_v10 = vsel %vm3252_vm7, %v3239_v49, %v17038_v50  ;;  %10394 = vmatprep.mubr.msk.f32.mxu1 %vm3394_vm9, %v3368_v17  ;;  %v810_v50 = vld [vmem:[#allocation2 + $0x431] sm:$0xff] }
 0x404   :  { %v4509_v24 = vrot.slane %v4495_v32, %v12625_v58  ;;  %v4510_v56 = vcombine.high %v4502_v26, %v4502_v26  ;;  %v6093_v14 = vsel %vm5448_vm10, %v4502_v26, -inf  ;;  %v4478_v39 = vcombine.high %v3998_v45, %v3998_v45  ;;  %v13937_v37 = vpop.permute.xlu0 %1757  ;;  %2787 = vrot.lane.b32.xlu1 %v809_v16, %s10610_s1 }
 0x405   :  { %v13931_v25 = vsel %vm2927_vm1, %v6022_v43, -inf  ;;  %v6094_v44 = vrot.slane %v6093_v14, 4  ;;  %v4485_v36 = vrot.slane %v3998_v45, %v12625_v58  ;;  %v3369_v6 = vsel %vm3317_vm8, %v3304_v10, %v13779_v61 }
 0x406   :  { %v4511_v60 = vcombine.high %v4509_v24, %v4509_v24  ;;  %v6100_v21 = vsel %vm5448_vm10, %v4510_v56, -inf  ;;  %v6107_v11 = vsel %vm5448_vm10, %v4509_v24, -inf  ;;  %v4492_v35 = vrot.slane %v4478_v39, %v12625_v58  ;;  %10395 = vmatmul.mubr.msk.f32.gmra.mxu1 %vm3394_vm9, %v3369_v6  ;;  %v13947_v1 = vpop.permute.xlu1 %2011  ;;  %1769 = vrot.lane.b32.xlu0 %v746_v30, %s10606_s15 }
 0x407   :  { %v6095_v53 = vmax.f32 %v6093_v14, %v6094_v44  ;;  %v6101_v40 = vrot.slane %v6100_v21, 4  ;;  %v6108_v33 = vrot.slane %v6107_v11, 4  ;;  %v4493_v52 = vcombine.high %v4485_v36, %v4485_v36  ;;  %17039 = vst [vmem:[#allocation31_spill] sm:$0xff] %v13947_v1 }
 0x408   :  { %v6114_v61 = vsel %vm5448_vm10, %v4511_v60, -inf  ;;  %v4494_v4 = vcombine.high %v4492_v35, %v4492_v35  ;;  %v6065_v5 = vsel %vm5448_vm10, %v4485_v36, -inf  ;;  %v6079_v22 = vsel %vm5448_vm10, %v4492_v35, -inf  ;;  %v13950_v62 = vpop.permute.xlu0 %2233  ;;  %2023 = vrot.lane.b32.xlu1 %v809_v16, %s10607_s20 }
 0x409   :  { %v6096_v41 = vrot.slane %v6095_v53, 2  ;;  %v6102_v63 = vmax.f32 %v6100_v21, %v6101_v40  ;;  %v6109_v43 = vmax.f32 %v6107_v11, %v6108_v33  ;;  %v6115_v49 = vrot.slane %v6114_v61, 4  ;;  %17040 = vst [vmem:[#allocation32_spill] sm:$0xff] %v13950_v62  ;;  %v17046_v62 = vld [vmem:[#allocation29_spill] sm:$0xff] }
 0x40a   :  { %v6066_v32 = vrot.slane %v6065_v5, 4  ;;  %v6072_v26 = vsel %vm5448_vm10, %v4493_v52, -inf  ;;  %v6080_v45 = vrot.slane %v6079_v22, 4  ;;  %v6086_v17 = vsel %vm5448_vm10, %v4494_v4, -inf  ;;  %v13955_v30 = vpop.permute.xlu1 %2487  ;;  %2789 = vrot.lane.b32.xlu0 %v810_v50, %s10610_s1 }
 0x40b   :  { %v6097_v10 = vmax.f32 %v6095_v53, %v6096_v41  ;;  %v6103_v24 = vrot.slane %v6102_v63, 2  ;;  %v6110_v56 = vrot.slane %v6109_v43, 2  ;;  %v6116_v14 = vmax.f32 %v6114_v61, %v6115_v49  ;;  %v683_v61 = vld [vmem:[#allocation2 + $0x447] sm:$0xff] }
 0x40c   :  { %v6067_v39 = vmax.f32 %v6065_v5, %v6066_v32  ;;  %v6073_v44 = vrot.slane %v6072_v26, 4  ;;  %v6081_v36 = vmax.f32 %v6079_v22, %v6080_v45  ;;  %v6087_v6 = vrot.slane %v6086_v17, 4  ;;  %v13958_v40 = vpop.permute.xlu0 %2777  ;;  %2025 = vrot.lane.b32.xlu1 %v810_v50, %s10607_s20 }
 0x40d   :  { %v6098_v60 = vrot.slane %v6097_v10, 1  ;;  %v6104_v21 = vmax.f32 %v6102_v63, %v6103_v24  ;;  %v6111_v11 = vmax.f32 %v6109_v43, %v6110_v56  ;;  %v6117_v35 = vrot.slane %v6116_v14, 2  ;;  %v17042_v56 = vld [vmem:[#allocation27_spill] sm:$0xff] }
 0x40e   :  { %v6068_v16 = vrot.slane %v6067_v39, 2  ;;  %v6074_v33 = vmax.f32 %v6072_v26, %v6073_v44  ;;  %v6082_v53 = vrot.slane %v6081_v36, 2  ;;  %v6088_v52 = vmax.f32 %v6086_v17, %v6087_v6  ;;  %v13961_v45 = vpop.permute.xlu1 %1723  ;;  %v17043_v17 = vld [vmem:[#allocation23_spill] sm:$0xff]  ;;  %v17044_v44 = vld [vmem:[#allocation28_spill] sm:$0xff]  ;;  %2279 = vrot.lane.b32.xlu0 %v683_v61, %s10608_s25 }
 0x40f   :  { %v6099_v4 = vmax.f32 %v6097_v10, %v6098_v60  ;;  %v6105_v5 = vrot.slane %v6104_v21, 1  ;;  %v6112_v22 = vrot.slane %v6111_v11, 1  ;;  %v6118_v41 = vmax.f32 %v6116_v14, %v6117_v35  ;;  %17041 = vst [vmem:[#allocation33_spill] sm:$0xff] %v13961_v45  ;;  %v684_v60 = vld [vmem:[#allocation2 + $0x44f] sm:$0xff] }
 0x410   :  { %v6069_v49 = vmax.f32 %v6067_v39, %v6068_v16  ;;  %v6075_v32 = vrot.slane %v6074_v33, 2  ;;  %v6083_v63 = vmax.f32 %v6081_v36, %v6082_v53  ;;  %v6089_v43 = vrot.slane %v6088_v52, 2  ;;  %v13974_v14 = vpop.permute.xlu0 %2013  ;;  %1515 = vrot.lane.b32.xlu1 %v683_v61, %s10605_s14 }
 0x411   :  { %v13965_v24 = vsel %vm2927_vm1, %v13916_v51, -inf  ;;  %v6119_v26 = vrot.slane %v6118_v41, 1  ;;  %v3110_v50 = vsel %vm3057_vm4, %v17043_v17, %v17042_v56  ;;  %v3158_v10 = vsel %vm3122_vm5, %v13879_v48, %v17044_v44  ;;  %17045 = vst [vmem:[#allocation34_spill] sm:$0xff] %v13974_v14  ;;  %v10357_v48 = vpop.f32.mrf.mxu0  ;;  %v747_v17 = vld [vmem:[#allocation2 + $0x448] sm:$0xff] }
 0x412   :  { %v13978_v39 = vsel %vm2927_vm1, %v13918_v59, -inf  ;;  %v6070_v36 = vrot.slane %v6069_v49, 1  ;;  %v6076_v51 = vmax.f32 %v6074_v33, %v6075_v32  ;;  %v6084_v6 = vrot.slane %v6083_v63, 1  ;;  %v13985_v1 = vpop.permute.xlu1 %2267  ;;  %2281 = vrot.lane.b32.xlu0 %v684_v60, %s10608_s25 }
 0x413   :  { %v6106_v35 = vmax.f32 %v6104_v21, %v6105_v5  ;;  %v6113_v16 = vmax.f32 %v6111_v11, %v6112_v22  ;;  %v7374_v53 = vsel %vm2927_vm1, %v6099_v4, -inf  ;;  %v6090_v56 = vmax.f32 %v6088_v52, %v6089_v43 }
 0x414   :  { %v6120_v44 = vmax.f32 %v6118_v41, %v6119_v26  ;;  %v6071_v45 = vmax.f32 %v6069_v49, %v6070_v36  ;;  %v6077_v14 = vrot.slane %v6076_v51, 1  ;;  %v3222_v59 = vsel %vm3187_vm6, %v13883_v2, %v17046_v62  ;;  %2535 = vrot.lane.b32.xlu1 %v747_v17, %s10609_s29  ;;  %v13997_v62 = vpop.permute.xlu0 %2489  ;;  %v3777_v41 = vpop.f32.mrf.mxu0 }
 0x415   :  { %v6085_v33 = vmax.f32 %v6083_v63, %v6084_v6  ;;  %v6091_v32 = vrot.slane %v6090_v56, 1  ;;  %v3175_v21 = vsel %vm3122_vm5, %v3110_v50, %v13759_v12  ;;  %v3223_v11 = vsel %vm3187_vm6, %v3158_v10, %v13762_v19  ;;  %v14016_v10 = vld [vmem:[%s16684_s2] ss:$0 sm:$0xff] }
 0x416   :  { %v7375_v52 = vmax.f32 %v13890_v13, %v7374_v53  ;;  %v6078_v61 = vmax.f32 %v6076_v51, %v6077_v14  ;;  %v7362_v4 = vsel %vm2927_vm1, %v6071_v45, -inf  ;;  %v3287_v2 = vsel %vm3252_vm7, %v3222_v59, %v13774_v54  ;;  %v14007_v43 = vpop.permute.xlu1 %2743  ;;  %1517 = vrot.lane.b32.xlu0 %v684_v60, %s10605_s14  ;;  %v748_v51 = vld [vmem:[#allocation2 + $0x450] sm:$0xff]  ;;  %s10612_s14 = smov 40  }
 0x417   :  { %v7377_v5 = vsel %vm2927_vm1, %v6106_v35, -inf  ;;  %v7380_v12 = vsel %vm2927_vm1, %v6113_v16, -inf  ;;  %v6092_v22 = vmax.f32 %v6090_v56, %v6091_v32  ;;  %v7368_v19 = vsel %vm2927_vm1, %v6085_v33, -inf  ;;  %v811_v60 = vld [vmem:[#allocation2 + $0x449] sm:$0xff] }
 0x418   :  { %v7383_v13 = vsel %vm2927_vm1, %v6120_v44, -inf  ;;  %v7365_v49 = vsel %vm2927_vm1, %v6078_v61, -inf  ;;  %v7369_v63 = vmax.f32 %v13965_v24, %v7368_v19  ;;  %v3352_v54 = vsel %vm3317_vm8, %v3287_v2, %v13827_v34  ;;  %1771 = vrot.lane.b32.xlu1 %v747_v17, %s10606_s15  ;;  %v14026_v36 = vpop.permute.xlu0 %1725 }
 0x419   :  { %v7363_v45 = vmax.f32 %v13921_v23, %v7362_v4  ;;  %v7366_v26 = vmax.f32 %v13931_v25, %v7365_v49  ;;  %v7371_v50 = vsel %vm2927_vm1, %v6092_v22, -inf  ;;  %10370 = vmatprep.mubr.msk.f32.mxu0 %vm3394_vm9, %v3352_v54  ;;  %v3783_v24 = vadd.f32 %v14016_v10, %v10357_v48 }
 0x41a   :  { %v7378_v34 = vmax.f32 %v13894_v15, %v7377_v5  ;;  %v7372_v14 = vmax.f32 %v13978_v39, %v7371_v50  ;;  %v3288_v23 = vsel %vm3252_vm7, %v3223_v11, %v13818_v46  ;;  %v3778_v25 = vadd.f32 %v14016_v10, %v3777_v41  ;;  %v14037_v48 = vpop.permute.xlu1 %1979  ;;  %2537 = vrot.lane.b32.xlu0 %v748_v51, %s10609_s29 }
 0x41b   :  { %v7381_v6 = vmax.f32 %v13897_v7, %v7380_v12  ;;  %v7841_v35 = vsel %vm7799_vm11, %v7366_v26, %v7363_v45  ;;  %v4001_v16 = vmax.f32 %v3783_v24, 0.0  ;;  %v3353_v15 = vsel %vm3317_vm8, %v3288_v23, %v13851_v9  ;;  %v812_v26 = vld [vmem:[#allocation2 + $0x451] sm:$0xff] }
 0x41c   :  { %v7384_v39 = vmax.f32 %v13903_v3, %v7383_v13  ;;  %v7842_v46 = vsel %vm7801_vm12, %v7369_v63, %v7841_v35  ;;  %v3240_v53 = vsel %vm3187_vm6, %v3175_v21, %v13812_v0  ;;  %v4000_v56 = vmax.f32 %v3778_v25, 0.0  ;;  %10371 = vmatmul.mubr.msk.f32.gmra.mxu0 %vm3394_vm9, %v3353_v15  ;;  %2791 = vrot.lane.b32.xlu1 %v811_v60, %s10610_s1  ;;  %v14049_v32 = vpop.permute.xlu0 %2269 }
 0x41d   :  { %v7843_v7 = vsel %vm16701_vm13, %v7372_v14, %v7842_v46  ;;  %v4529_v17 = vcombine.high %v4001_v16, %v4001_v16  ;;  %v4536_v44 = vrot.slane %v4001_v16, %v12625_v58  ;;  %v3305_v9 = vsel %vm3252_vm7, %v3240_v53, %v13848_v20 }
 0x41e   :  { %v7844_v3 = vsel %vm7805_vm14, %v7375_v52, %v7843_v7  ;;  %v4512_v59 = vcombine.high %v4000_v56, %v4000_v56  ;;  %v4519_v0 = vrot.slane %v4000_v56, %v12625_v58  ;;  %v3370_v33 = vsel %vm3317_vm8, %v3305_v9, %v13928_v38  ;;  %v14057_v38 = vpop.permute.xlu1 %2523  ;;  %1773 = vrot.lane.b32.xlu0 %v748_v51, %s10606_s15 }
 0x41f   :  { %v7845_v21 = vsel %vm16693_vm15, %v7378_v34, %v7844_v3  ;;  %v4543_v11 = vrot.slane %v4529_v17, %v12625_v58  ;;  %v4544_v61 = vcombine.high %v4536_v44, %v4536_v44  ;;  %v6149_v20 = vsel %vm5448_vm10, %v4536_v44, -inf  ;;  %10397 = vmatprep.mubr.msk.f32.mxu1 %vm3394_vm9, %v3370_v33  ;;  %v685_v44 = vld [vmem:[#allocation2 + $0x467] sm:$0xff]  ;;  %v686_v33 = vld [vmem:[#allocation2 + $0x46f] sm:$0xff] }
 0x420   :  { %v7846_v52 = vsel %vm16692_vm2, %v7381_v6, %v7845_v21  ;;  %v6150_v4 = vrot.slane %v6149_v20, 4  ;;  %v4526_v2 = vrot.slane %v4512_v59, %v12625_v58  ;;  %v4527_v5 = vcombine.high %v4519_v0, %v4519_v0  ;;  %2027 = vrot.lane.b32.xlu1 %v811_v60, %s10607_s20  ;;  %v14065_v45 = vpop.permute.xlu0 %2745  ;;  %v17047_v21 = vld [vmem:[#allocation133_spill] sm:$0xff] }
 0x421   :  { %v7847_v12 = vsel %vm16691_vm3, %v7384_v39, %v7846_v52  ;;  %v4545_v22 = vcombine.high %v4543_v11, %v4543_v11  ;;  %v6156_v19 = vsel %vm5448_vm10, %v4544_v61, -inf  ;;  %v6163_v41 = vsel %vm5448_vm10, %v4543_v11, -inf  ;;  %v17048_v11 = vld [vmem:[#allocation107_spill] sm:$0xff] }
 0x422   :  { %7939 = vst.msk [vmem:[#allocation3 + $0x98] sm:$0xff] %vm2927_vm1, %v7847_v12  ;;  %v6151_v13 = vmax.f32 %v6149_v20, %v6150_v4  ;;  %v6157_v49 = vrot.slane %v6156_v19, 4  ;;  %v6164_v63 = vrot.slane %v6163_v41, 4  ;;  %v4528_v54 = vcombine.high %v4526_v2, %v4526_v2  ;;  %v14071_v35 = vpop.permute.xlu1 %1759  ;;  %2793 = vrot.lane.b32.xlu0 %v812_v26, %s10610_s1  ;;  %v17050_v20 = vld [vmem:[#allocation134_spill] sm:$0xff]  ;;  %v17051_v52 = vld [vmem:[#allocation7_spill] sm:$0xff] }
 0x423   :  { %v6170_v50 = vsel %vm5448_vm10, %v4545_v22, -inf  ;;  %v6121_v24 = vsel %vm5448_vm10, %v4519_v0, -inf  ;;  %v6128_v34 = vsel %vm5448_vm10, %v4527_v5, -inf  ;;  %v6135_v14 = vsel %vm5448_vm10, %v4526_v2, -inf  ;;  %v17054_v2 = vld [vmem:[#allocation135_spill] sm:$0xff]  ;;  %v17055_v5 = vld [vmem:[#allocation57_spill] sm:$0xff] }
 0x424   :  { %v6152_v23 = vrot.slane %v6151_v13, 2  ;;  %v6158_v25 = vmax.f32 %v6156_v19, %v6157_v49  ;;  %v6165_v51 = vmax.f32 %v6163_v41, %v6164_v63  ;;  %v6171_v6 = vrot.slane %v6170_v50, 4  ;;  %2029 = vrot.lane.b32.xlu1 %v812_v26, %s10607_s20  ;;  %v14076_v17 = vpop.permute.xlu0 %1981  ;;  %v17058_v41 = vld [vmem:[#allocation147_spill] sm:$0xff]  ;;  %s10613_s20 = smov 48  }
 0x425   :  { %v6122_v16 = vrot.slane %v6121_v24, 4  ;;  %v6129_v15 = vrot.slane %v6128_v34, 4  ;;  %v6136_v60 = vrot.slane %v6135_v14, 4  ;;  %v6142_v39 = vsel %vm5448_vm10, %v4528_v54, -inf }
 0x426   :  { %v6153_v46 = vmax.f32 %v6151_v13, %v6152_v23  ;;  %v6159_v53 = vrot.slane %v6158_v25, 2  ;;  %v6166_v56 = vrot.slane %v6165_v51, 2  ;;  %v6172_v7 = vmax.f32 %v6170_v50, %v6171_v6  ;;  %v14093_v19 = vpop.permute.xlu1 %2235  ;;  %v17059_v13 = vld [vmem:[#allocation108_spill] sm:$0xff]  ;;  %2283 = vrot.lane.b32.xlu0 %v685_v44, %s10608_s25  ;;  %v17065_v23 = vld [vmem:[#allocation58_spill] sm:$0xff] }
 0x427   :  { %v6123_v9 = vmax.f32 %v6121_v24, %v6122_v16  ;;  %v6130_v3 = vmax.f32 %v6128_v34, %v6129_v15  ;;  %v6137_v59 = vmax.f32 %v6135_v14, %v6136_v60  ;;  %v6143_v0 = vrot.slane %v6142_v39, 4  ;;  %v17061_v50 = vld [vmem:[#allocation148_spill] sm:$0xff]  ;;  %v17064_v14 = vld [vmem:[#allocation149_spill] sm:$0xff]  ;;  %v17067_v16 = vld [vmem:[#allocation150_spill] sm:$0xff] }
 0x428   :  { %vm17049_vm0 = vcmask 97280   ;;  %v6173_v22 = vrot.slane %v6172_v7, 2  ;;  %v6154_v63 = vrot.slane %v6153_v46, 1  ;;  %v6160_v54 = vmax.f32 %v6158_v25, %v6159_v53  ;;  %v17062_v24 = vld [vmem:[#allocation8_spill] sm:$0xff]  ;;  %v17068_v15 = vld [vmem:[#allocation109_spill] sm:$0xff]  ;;  %2285 = vrot.lane.b32.xlu1 %v686_v33, %s10608_s25 }
 0x429   :  { %v14081_v61 = vsel %vm17049_vm0, %v17048_v11, %v17047_v21  ;;  %vm17052_vm3 = vmmov %vm17049_vm0  ;;  %v6167_v26 = vmax.f32 %v6165_v51, %v6166_v56  ;;  %v14110_v60 = vsel %vm17049_vm0, %v17068_v15, %v17067_v16  ;;  %v6124_v21 = vrot.slane %v6123_v9, 2  ;;  %v749_v25 = vld [vmem:[#allocation2 + $0x468] sm:$0xff]  ;;  %v10384_v11 = vpop.f32.mrf.mxu1  ;;  %v17077_v15 = vld [vmem:[#allocation17_spill] sm:$0xff] }
 0x42a   :  { %v14086_v4 = vsel %vm17052_vm3, %v17051_v52, %v17050_v20  ;;  %vm17056_vm2 = vmmov %vm17049_vm0  ;;  %v6174_v51 = vmax.f32 %v6172_v7, %v6173_v22  ;;  %v6131_v53 = vrot.slane %v6130_v3, 2  ;;  %v6138_v56 = vrot.slane %v6137_v59, 2  ;;  %v14113_v20 = vpop.permute.xlu0 %2525  ;;  %v750_v52 = vld [vmem:[#allocation2 + $0x470] sm:$0xff]  ;;  %2539 = vrot.lane.b32.xlu0 %v749_v25, %s10609_s29 }
 0x42b   :  { %17053 = vst [vmem:[#allocation35_spill] sm:$0xff] %v14086_v4  ;;  %v14091_v12 = vsel %vm17056_vm2, %v17055_v5, %v17054_v2  ;;  %vm17060_vm15 = vmmov %vm17049_vm0  ;;  %v6144_v44 = vmax.f32 %v6142_v39, %v6143_v0  ;;  %v17069_v2 = vld [vmem:[#allocation151_spill] sm:$0xff]  ;;  %v17070_v5 = vld [vmem:[#allocation9_spill] sm:$0xff]  ;;  %v14130_v0 = vpop.permute.xlu1 %2779  ;;  %v6168_v16 = vrot.slane %v6167_v26, 1 }
 0x42c   :  { %17057 = vst [vmem:[#allocation61_spill] sm:$0xff] %v14091_v12  ;;  %v3046_v49 = vsel %vm17060_vm15, %v17059_v13, %v17058_v41  ;;  %vm17063_vm3 = vmmov %vm17049_vm0  ;;  %v17072_v13 = vld [vmem:[#allocation152_spill] sm:$0xff]  ;;  %2541 = vrot.lane.b32.xlu1 %v750_v52, %s10609_s29  ;;  %s10088_s29 = sshll.u32 %s10619_s28, 4  ;;  %s10089_s29 = int_to_ptr.vmem [resolvable:$true] %s10088_s29 }
 0x42d   :  { %v3047_v34 = vsel %vm17063_vm3, %v17062_v24, %v17061_v50  ;;  %vm17066_vm2 = vmmov %vm17049_vm0  ;;  %v17073_v50 = vld [vmem:[#allocation59_spill] sm:$0xff]  ;;  %v3111_v7 = vsel %vm3057_vm4, %v3046_v49, %v13745_v47  ;;  %v17076_v33 = vld [vmem:[#allocation16_spill] sm:$0xff]  ;;  %v6125_v49 = vmax.f32 %v6123_v9, %v6124_v21  ;;  %v6145_v25 = vrot.slane %v6144_v44, 2  ;;  %s10580_s30 = scalar_lea.vmem %s10089_s29, 32  ;;  %p10585_p1 = scmp.lt.s32.totalorder %s10089_s29, %s10089_s29 }
 0x42e   :  { %v14105_v6 = vsel %vm17066_vm2, %v17065_v23, %v17064_v14  ;;  %vm17071_vm15 = vmmov %vm17049_vm0  ;;  %v3094_v39 = vsel %vm3057_vm4, %v17076_v33, %v13792_v55  ;;  %v3176_v22 = vsel %vm3122_vm5, %v3111_v7, %v13798_v29  ;;  %v6155_v14 = vmax.f32 %v6153_v46, %v6154_v63  ;;  %p10581_p0 = scmp.ne.s32.totalorder %s10089_s29, %s10580_s30  ;;  %p10586_p2 = scmp.lt.s32.totalorder %s10580_s30, %s10580_s30 }
 0x42f   :  { %v14118_v41 = vsel %vm17071_vm15, %v17070_v5, %v17069_v2  ;;  %vm17074_vm3 = vmmov %vm17049_vm0  ;;  %v6161_v23 = vrot.slane %v6160_v54, 1  ;;  %v3095_v2 = vsel %vm3057_vm4, %v17077_v15, %v13834_v31  ;;  %v3159_v47 = vsel %vm3122_vm5, %v3094_v39, %v13839_v57  ;;  %v813_v5 = vld [vmem:[#allocation2 + $0x469] sm:$0xff]  ;;  %v814_v31 = vld [vmem:[#allocation2 + $0x471] sm:$0xff] }
 0x430   :  { %v14123_v24 = vsel %vm17074_vm3, %v17073_v50, %v17072_v13  ;;  %v3241_v55 = vsel %vm3187_vm6, %v3176_v22, %v13842_v42  ;;  %v6175_v29 = vrot.slane %v6174_v51, 1  ;;  %v14143_v46 = vmax.f32 %v6130_v3, %v6131_v53  ;;  %v3867_v13 = vpop.f32.mrf.mxu1  ;;  %v14147_v50 = vpop.permute.xlu0 %1761  ;;  %2795 = vrot.lane.b32.xlu0 %v813_v5, %s10610_s1  ;;  %2797 = vrot.lane.b32.xlu1 %v814_v31, %s10610_s1  ;;  %p10587_p3 = por %p10586_p2, %p10585_p1 }
 0x431   :  { %17075 = vst [vmem:[#allocation36_spill] sm:$0xff] %v14123_v24  ;;  %v14145_v63 = vmax.f32 %v6137_v59, %v6138_v56  ;;  %v14151_v57 = vsel %vm3057_vm4, %v3047_v34, %v13867_v8  ;;  %v14155_v42 = vsel %vm3122_vm5, %v3095_v2, %v13874_v28  ;;  %v3224_v9 = vsel %vm3187_vm6, %v3159_v47, %v13900_v27  ;;  %v14160_v59 = vpop.permute.xlu1 %2015  ;;  %v14198_v2 = vld [vmem:[#allocation3 + $0x20] sm:$0xff] }
 0x432   :  { %v3873_v3 = vadd.f32 %v14016_v10, %v10384_v11  ;;  %v6162_v21 = vmax.f32 %v6160_v54, %v6161_v23  ;;  %v6169_v53 = vmax.f32 %v6167_v26, %v6168_v16  ;;  %v14163_v56 = vsel %vm2927_vm1, %v6155_v14, -inf  ;;  %v7966_v11 = vld [vmem:[#allocation3 + $0x8] sm:$0xff]  ;;  %p10588_p4 = pnand %p10587_p3, %p10581_p0 }
 0x433   :  { %v3306_v8 = vsel %vm3252_vm7, %v3241_v55, %v13910_v18  ;;  %v6126_v34 = vrot.slane %v6125_v49, 1  ;;  %v3868_v52 = vadd.f32 %v14016_v10, %v3867_v13  ;;  %v14172_v54 = vmax.f32 %v6174_v51, %v6175_v29 }
 0x434   :  { %v4019_v28 = vmax.f32 %v3873_v3, 0.0  ;;  %v3371_v27 = vsel %vm3317_vm8, %v3306_v8, %v13958_v40  ;;  %v6133_v26 = vrot.slane %v14143_v46, 1  ;;  %v6140_v7 = vrot.slane %v14145_v63, 1  ;;  %v14177_v18 = vpop.permute.xlu0 %2237  ;;  %8111 = vrot.lane.b32.xlu0 %v7966_v11, %s10604_s10  ;;  %8113 = vrot.lane.b32.xlu1 %v14198_v2, %s10604_s10 }
 0x435   :  { %v6146_v33 = vmax.f32 %v6144_v44, %v6145_v25  ;;  %10398 = vmatmul.mubr.msk.f32.gmra.mxu1 %vm3394_vm9, %v3371_v27  ;;  %v4018_v14 = vmax.f32 %v3868_v52, 0.0  ;;  %v3289_v40 = vsel %vm3252_vm7, %v3224_v9, %v13955_v30  ;;  %v14182_v23 = vpop.permute.xlu1 %2491  ;;  %v14185_v51 = vsel %vm2927_vm1, %v6162_v21, -inf }
 0x436   :  { %v4835_v39 = vcombine.high %v4019_v28, %v4019_v28  ;;  %v4842_v22 = vrot.slane %v4019_v28, %v12625_v58  ;;  %v14188_v16 = vsel %vm2927_vm1, %v6169_v53, -inf  ;;  %v14193_v44 = vsel %vm3057_vm4, %v14105_v6, %v13937_v37  ;;  %v7982_v37 = vld [vmem:[#allocation3 + $0x9] sm:$0xff] }
 0x437   :  { %v3354_v15 = vsel %vm3317_vm8, %v3289_v40, %v14007_v43  ;;  %v4818_v5 = vcombine.high %v4018_v14, %v4018_v14  ;;  %v6127_v6 = vmax.f32 %v6125_v49, %v6126_v34  ;;  %v6147_v29 = vrot.slane %v6146_v33, 1  ;;  %v14214_v49 = vld [vmem:[#allocation3 + $0x21] sm:$0xff] }
 0x438   :  { %v4849_v30 = vrot.slane %v4835_v39, %v12625_v58  ;;  %v4850_v47 = vcombine.high %v4842_v22, %v4842_v22  ;;  %v6653_v55 = vsel %vm5448_vm10, %v4842_v22, -inf  ;;  %10373 = vmatprep.mubr.msk.f32.mxu0 %vm3394_vm9, %v3354_v15  ;;  %v4825_v43 = vrot.slane %v4018_v14, %v12625_v58  ;;  %v14206_v13 = vpop.permute.xlu0 %2781  ;;  %8175 = vrot.lane.b32.xlu0 %v7982_v37, %s10606_s15  ;;  %v10360_v14 = vpop.f32.mrf.mxu0 }
 0x439   :  { %v6654_v25 = vrot.slane %v6653_v55, 4  ;;  %v4832_v21 = vrot.slane %v4818_v5, %v12625_v58  ;;  %v14211_v53 = vpop.permute.xlu1 %1727  ;;  %8177 = vrot.lane.b32.xlu1 %v14214_v49, %s10606_s15  ;;  %v6134_v5 = vmax.f32 %v14143_v46, %v6133_v26  ;;  %v6148_v46 = vmax.f32 %v6146_v33, %v6147_v29 }
 0x43a   :  { %v4851_v31 = vcombine.high %v4849_v30, %v4849_v30  ;;  %v6660_v9 = vsel %vm5448_vm10, %v4850_v47, -inf  ;;  %v6667_v3 = vsel %vm5448_vm10, %v4849_v30, -inf  ;;  %17078 = vst [vmem:[#allocation37_spill] sm:$0xff] %v14211_v53  ;;  %v4833_v27 = vcombine.high %v4825_v43, %v4825_v43 }
 0x43b   :  { %v6655_v8 = vmax.f32 %v6653_v55, %v6654_v25  ;;  %v6661_v28 = vrot.slane %v6660_v9, 4  ;;  %v6668_v52 = vrot.slane %v6667_v3, 4  ;;  %v4834_v11 = vcombine.high %v4832_v21, %v4832_v21 }
 0x43c   :  { %v6674_v34 = vsel %vm5448_vm10, %v4851_v31, -inf  ;;  %v6625_v39 = vsel %vm5448_vm10, %v4825_v43, -inf  ;;  %v6639_v22 = vsel %vm5448_vm10, %v4832_v21, -inf  ;;  %v14221_v55 = vpop.permute.xlu0 %2017  ;;  %v6632_v25 = vsel %vm5448_vm10, %v4833_v27, -inf  ;;  %v7998_v43 = vld [vmem:[#allocation3 + $0x1f] sm:$0xff] }
 0x43d   :  { %v6656_v40 = vrot.slane %v6655_v8, 2  ;;  %v6662_v15 = vmax.f32 %v6660_v9, %v6661_v28  ;;  %v6669_v30 = vmax.f32 %v6667_v3, %v6668_v52  ;;  %v6675_v47 = vrot.slane %v6674_v34, 4  ;;  %17079 = vst [vmem:[#allocation38_spill] sm:$0xff] %v14221_v55  ;;  %v14225_v24 = vpop.permute.xlu1 %2271  ;;  %8239 = vrot.lane.b32.xlu0 %v7998_v43, %s10608_s25  ;;  %v14230_v9 = vld [vmem:[#allocation3 + $0x37] sm:$0xff]  ;;  %v17081_v27 = vld [vmem:[#allocation31_spill] sm:$0xff] }
 0x43e   :  { %v6626_v37 = vrot.slane %v6625_v39, 4  ;;  %v6640_v31 = vrot.slane %v6639_v22, 4  ;;  %17080 = vst [vmem:[#allocation112_spill] sm:$0xff] %v14225_v24  ;;  %v6646_v4 = vsel %vm5448_vm10, %v4834_v11, -inf  ;;  %v3793_v53 = vadd.f32 %v14016_v10, %v10360_v14  ;;  %8241 = vrot.lane.b32.xlu1 %v14230_v9, %s10608_s25 }
 0x43f   :  { %v6663_v21 = vrot.slane %v6662_v15, 2  ;;  %v6670_v12 = vrot.slane %v6669_v30, 2  ;;  %v6141_v3 = vmax.f32 %v14145_v63, %v6140_v7  ;;  %v6657_v26 = vmax.f32 %v6655_v8, %v6656_v40  ;;  %v14257_v40 = vld [vmem:[#allocation3 + $0x38] sm:$0xff] }
 0x440   :  { %v6676_v28 = vmax.f32 %v6674_v34, %v6675_v47  ;;  %v14237_v52 = vsel %vm2927_vm1, %v14172_v54, -inf  ;;  %v3177_v11 = vsel %vm3122_vm5, %v14151_v57, %v17081_v27  ;;  %v6627_v14 = vmax.f32 %v6625_v39, %v6626_v37  ;;  %v14242_v24 = vpop.permute.xlu0 %2493  ;;  %v17082_v34 = vld [vmem:[#allocation32_spill] sm:$0xff] }
 0x441   :  { %v6633_v43 = vrot.slane %v6632_v25, 4  ;;  %v6664_v55 = vmax.f32 %v6662_v15, %v6663_v21  ;;  %v6671_v63 = vmax.f32 %v6669_v30, %v6670_v12  ;;  %v6641_v7 = vmax.f32 %v6639_v22, %v6640_v31  ;;  %v14244_v29 = vpop.permute.xlu1 %2747  ;;  %8303 = vrot.lane.b32.xlu0 %v14198_v2, %s10610_s1  ;;  %v17085_v2 = vld [vmem:[#allocation34_spill] sm:$0xff] }
 0x442   :  { %v6647_v33 = vrot.slane %v6646_v4, 4  ;;  %v14247_v8 = vsel %vm2927_vm1, %v6127_v6, -inf  ;;  %v14250_v54 = vsel %vm2927_vm1, %v6134_v5, -inf  ;;  %v3225_v57 = vsel %vm3187_vm6, %v14155_v42, %v17082_v34  ;;  %8115 = vrot.lane.b32.xlu1 %v14257_v40, %s10604_s10  ;;  %v17083_v42 = vld [vmem:[#allocation33_spill] sm:$0xff] }
 0x443   :  { %v4003_v39 = vmax.f32 %v3793_v53, 0.0  ;;  %v14260_v12 = vsel %vm2927_vm1, %v6141_v3, -inf  ;;  %v14263_v22 = vsel %vm2927_vm1, %v6148_v46, -inf  ;;  %v6658_v6 = vrot.slane %v6657_v26, 1  ;;  %v17084_v53 = vld [vmem:[#allocation18_spill] sm:$0xff] }
 0x444   :  { %v6677_v15 = vrot.slane %v6676_v28, 2  ;;  %v6628_v30 = vrot.slane %v6627_v14, 2  ;;  %v6634_v47 = vmax.f32 %v6632_v25, %v6633_v43  ;;  %v3096_v5 = vsel %vm3057_vm4, %v17084_v53, %v17083_v42  ;;  %v14273_v31 = vpop.permute.xlu0 %1729 }
 0x445   :  { %v3178_v37 = vsel %vm3122_vm5, %v14193_v44, %v17085_v2  ;;  %v6665_v21 = vrot.slane %v6664_v55, 1  ;;  %v6672_v3 = vrot.slane %v6671_v63, 1  ;;  %v6642_v46 = vrot.slane %v6641_v7, 2  ;;  %v14277_v34 = vpop.permute.xlu1 %1983  ;;  %8305 = vrot.lane.b32.xlu0 %v14257_v40, %s10610_s1 }
 0x446   :  { %v14275_v27 = vmax.f32 %v6646_v4, %v6647_v33  ;;  %v3242_v25 = vsel %vm3187_vm6, %v3177_v11, %v13985_v1  ;;  %v3290_v43 = vsel %vm3252_vm7, %v3225_v57, %v13997_v62  ;;  %v14286_v42 = vsel %vm3057_vm4, %v14081_v61, %v14026_v36  ;;  %8367 = vrot.lane.b32.xlu1 %v14214_v49, %s10612_s14  ;;  %v14317_v49 = vld [vmem:[#allocation3 + $0x50] sm:$0xff] }
 0x447   :  { %v4563_v44 = vcombine.high %v4003_v39, %v4003_v39  ;;  %v6659_v53 = vmax.f32 %v6657_v26, %v6658_v6  ;;  %v14290_v4 = vmax.f32 %v6676_v28, %v6677_v15  ;;  %v14294_v33 = vsel %vm3122_vm5, %v3096_v5, %v14037_v48  ;;  %v3787_v6 = vpop.f32.mrf.mxu0 }
 0x448   :  { %v14298_v1 = vsel %vm3187_vm6, %v3178_v37, %v14049_v32  ;;  %v14302_v62 = vmax.f32 %v6627_v14, %v6628_v30  ;;  %v6635_v36 = vrot.slane %v6634_v47, 2  ;;  %v4570_v61 = vrot.slane %v4003_v39, %v12625_v58  ;;  %v14306_v28 = vpop.permute.xlu0 %2273 }
 0x449   :  { %v4577_v26 = vrot.slane %v4563_v44, %v12625_v58  ;;  %17086 = vst [vmem:[#allocation39_spill] sm:$0xff] %v14306_v28  ;;  %v14308_v11 = vmax.f32 %v6664_v55, %v6665_v21  ;;  %v14310_v48 = vmax.f32 %v6671_v63, %v6672_v3  ;;  %v14312_v57 = vmax.f32 %v6641_v7, %v6642_v46  ;;  %v14315_v15 = vpop.permute.xlu1 %2527  ;;  %v14323_v55 = vld [vmem:[#allocation3 + $0x39] sm:$0xff] }
 0x44a   :  { %v6649_v32 = vrot.slane %v14275_v27, 2  ;;  %17088 = vst [vmem:[#allocation41_spill] sm:$0xff] %v14315_v15  ;;  %v4578_v14 = vcombine.high %v4570_v61, %v4570_v61  ;;  %v6205_v39 = vsel %vm5448_vm10, %v4570_v61, -inf  ;;  %8117 = vrot.lane.b32.xlu0 %v14317_v49, %s10604_s10  ;;  %v14327_v7 = vsel %vm2927_vm1, %v6659_v53, -inf  ;;  %8179 = vrot.lane.b32.xlu1 %v14323_v55, %s10606_s15 }
 0x44b   :  { %17087 = vst [vmem:[#allocation40_spill] sm:$0xff] %v14312_v57  ;;  %v4579_v30 = vcombine.high %v4577_v26, %v4577_v26  ;;  %v6219_v5 = vsel %vm5448_vm10, %v4577_v26, -inf  ;;  %17089 = vst [vmem:[#allocation42_spill] sm:$0xff] %v14327_v7  ;;  %v6206_v2 = vrot.slane %v6205_v39, 4  ;;  %v3788_v46 = vadd.f32 %v14016_v10, %v3787_v6 }
 0x44c   :  { %v6220_v37 = vrot.slane %v6219_v5, 4  ;;  %v6212_v21 = vsel %vm5448_vm10, %v4578_v14, -inf  ;;  %v3355_v44 = vsel %vm3317_vm8, %v3290_v43, %v14065_v45  ;;  %v14336_v61 = vpop.permute.xlu0 %2749  ;;  %v14342_v14 = vmax.f32 %v6634_v47, %v6635_v36 }
 0x44d   :  { %v6226_v3 = vsel %vm5448_vm10, %v4579_v30, -inf  ;;  %v6207_v26 = vmax.f32 %v6205_v39, %v6206_v2  ;;  %v6213_v63 = vrot.slane %v6212_v21, 4  ;;  %10374 = vmatmul.mubr.msk.f32.gmra.mxu0 %vm3394_vm9, %v3355_v44  ;;  %v14339_v15 = vpop.permute.xlu1 %1509  ;;  %v3307_v6 = vsel %vm3252_vm7, %v3242_v25, %v14057_v38 }
 0x44e   :  { %v6221_v53 = vmax.f32 %v6219_v5, %v6220_v37  ;;  %v6227_v7 = vrot.slane %v6226_v3, 4  ;;  %17090 = vst [vmem:[#allocation43_spill] sm:$0xff] %v14342_v14  ;;  %v4002_v30 = vmax.f32 %v3788_v46, 0.0  ;;  %8369 = vrot.lane.b32.xlu0 %v14323_v55, %s10612_s14  ;;  %8431 = vrot.lane.b32.xlu1 %v14230_v9, %s10613_s20  ;;  %v3372_v38 = vsel %vm3317_vm8, %v3307_v6, %v14130_v0  ;;  %v10387_v14 = vpop.f32.mrf.mxu1 }
 0x44f   :  { %v6208_v45 = vrot.slane %v6207_v26, 2  ;;  %v6214_v43 = vmax.f32 %v6212_v21, %v6213_v63  ;;  %10400 = vmatprep.mubr.msk.f32.mxu1 %vm3394_vm9, %v3372_v38  ;;  %v14359_v21 = vld [vmem:[#allocation3 + $0x51] sm:$0xff]  ;;  %v14362_v9 = vmax.f32 %v14275_v27, %v6649_v32  ;;  %vm17100_vm2 = vcmask 1045509  }
 0x450   :  { %v6222_v39 = vrot.slane %v6221_v53, 2  ;;  %v6228_v5 = vmax.f32 %v6226_v3, %v6227_v7  ;;  %v4546_v37 = vcombine.high %v4002_v30, %v4002_v30  ;;  %v4553_v47 = vrot.slane %v4002_v30, %v12625_v58  ;;  %v14354_v25 = vpop.permute.xlu0 %1763 }
 0x451   :  { %v6209_v36 = vmax.f32 %v6207_v26, %v6208_v45  ;;  %v6215_v46 = vrot.slane %v6214_v43, 2  ;;  %v14357_v7 = vpop.permute.xlu1 %1985  ;;  %17092 = vst [vmem:[#allocation45_spill] sm:$0xff] %v14362_v9  ;;  %v8000_v26 = vld [vmem:[#allocation3 + $0x4f] sm:$0xff]  ;;  %vm17102_vm0 = vcmask 1046534   ;;  %vm17104_vm15 = vcmask 1047559  }
 0x452   :  { %v6223_v44 = vmax.f32 %v6221_v53, %v6222_v39  ;;  %v6229_v63 = vrot.slane %v6228_v5, 2  ;;  %17091 = vst [vmem:[#allocation44_spill] sm:$0xff] %v14357_v7  ;;  %v4560_v3 = vrot.slane %v4546_v37, %v12625_v58  ;;  %v4561_v30 = vcombine.high %v4553_v47, %v4553_v47  ;;  %8181 = vrot.lane.b32.xlu0 %v14359_v21, %s10606_s15 }
 0x453   :  { %v6177_v0 = vsel %vm5448_vm10, %v4553_v47, -inf  ;;  %v6210_v53 = vrot.slane %v6209_v36, 1  ;;  %v6216_v6 = vmax.f32 %v6214_v43, %v6215_v46  ;;  %8243 = vrot.lane.b32.xlu1 %v8000_v26, %s10608_s25 }
 0x454   :  { %v6224_v45 = vrot.slane %v6223_v44, 1  ;;  %v6230_v39 = vmax.f32 %v6228_v5, %v6229_v63  ;;  %v4562_v38 = vcombine.high %v4560_v3, %v4560_v3  ;;  %v6178_v2 = vrot.slane %v6177_v0, 4  ;;  %v14371_v37 = vpop.permute.xlu0 %2239 }
 0x455   :  { %v6184_v27 = vsel %vm5448_vm10, %v4561_v30, -inf  ;;  %v6191_v32 = vsel %vm5448_vm10, %v4560_v3, -inf  ;;  %17093 = vst [vmem:[#allocation62_spill] sm:$0xff] %v14371_v37  ;;  %v6211_v28 = vmax.f32 %v6209_v36, %v6210_v53  ;;  %v6217_v47 = vrot.slane %v6216_v6, 1  ;;  %v14373_v7 = vpop.permute.xlu1 %2529 }
 0x456   :  { %v6225_v57 = vmax.f32 %v6223_v44, %v6224_v45  ;;  %v6231_v9 = vrot.slane %v6230_v39, 1  ;;  %v6179_v43 = vmax.f32 %v6177_v0, %v6178_v2  ;;  %v6185_v46 = vrot.slane %v6184_v27, 4  ;;  %8433 = vrot.lane.b32.xlu0 %v8000_v26, %s10613_s20  ;;  %v3877_v45 = vpop.f32.mrf.mxu1 }
 0x457   :  { %v6192_v5 = vrot.slane %v6191_v32, 4  ;;  %v6198_v63 = vsel %vm5448_vm10, %v4562_v38, -inf  ;;  %v17094_v30 = vrot.slane %v14290_v4, 1  ;;  %v6218_v37 = vmax.f32 %v6216_v6, %v6217_v47  ;;  %8495 = vrot.lane.b32.xlu1 %v14257_v40, %s10614_s21 }
 0x458   :  { %v6232_v36 = vmax.f32 %v6230_v39, %v6231_v9  ;;  %v14383_v44 = vsel %vm2927_vm1, %v6211_v28, -inf  ;;  %v14389_v2 = vsel %vm2927_vm1, %v14308_v11, -inf  ;;  %v14392_v0 = vsel %vm2927_vm1, %v6225_v57, -inf  ;;  %v14404_v11 = vld [vmem:[#allocation3 + $0x67] sm:$0xff] }
 0x459   :  { %v14380_v3 = vmax.f32 %v14290_v4, %v17094_v30  ;;  %17096 = vst [vmem:[#allocation47_spill] sm:$0xff] %v14389_v2  ;;  %v6180_v26 = vrot.slane %v6179_v43, 2  ;;  %v6186_v53 = vmax.f32 %v6184_v27, %v6185_v46  ;;  %v14394_v4 = vpop.permute.xlu0 %2783  ;;  %v14397_v9 = vsel %vm2927_vm1, %v6218_v37, -inf  ;;  %v14402_v39 = vpop.permute.xlu1 %1765 }
 0x45a   :  { %v6193_v28 = vmax.f32 %v6191_v32, %v6192_v5  ;;  %v6199_v6 = vrot.slane %v6198_v63, 4  ;;  %v3308_v40 = vsel %vm3252_vm7, %v14298_v1, %v14113_v20  ;;  %v14409_v38 = vsel %vm2927_vm1, %v6232_v36, -inf  ;;  %8245 = vrot.lane.b32.xlu0 %v14404_v11, %s10608_s25 }
 0x45b   :  { %17095 = vst [vmem:[#allocation46_spill] sm:$0xff] %v14380_v3  ;;  %v6181_v27 = vmax.f32 %v6179_v43, %v6180_v26  ;;  %v6187_v37 = vrot.slane %v6186_v53, 2  ;;  %v3883_v47 = vadd.f32 %v14016_v10, %v10387_v14  ;;  %8307 = vrot.lane.b32.xlu1 %v14317_v49, %s10610_s1  ;;  %v3878_v43 = vadd.f32 %v14016_v10, %v3877_v45 }
 0x45c   :  { %v6194_v20 = vrot.slane %v6193_v28, 2  ;;  %v6200_v1 = vmax.f32 %v6198_v63, %v6199_v6  ;;  %v3373_v46 = vsel %vm3317_vm8, %v3308_v40, %v14206_v13 }
 0x45d   :  { %v6182_v5 = vrot.slane %v6181_v27, 1  ;;  %v6188_v30 = vmax.f32 %v6186_v53, %v6187_v37  ;;  %v14421_v36 = vpop.permute.xlu0 %2019  ;;  %v4021_v63 = vmax.f32 %v3883_v47, 0.0  ;;  %v14425_v6 = vpop.permute.xlu1 %2241  ;;  %v4020_v3 = vmax.f32 %v3878_v43, 0.0  ;;  %10401 = vmatmul.mubr.msk.f32.gmra.mxu1 %vm3394_vm9, %v3373_v46  ;;  %v14443_v46 = vld [vmem:[#allocation3 + $0x68] sm:$0xff] }
 0x45e   :  { %17097 = vst [vmem:[#allocation113_spill] sm:$0xff] %v14421_v36  ;;  %v6195_v32 = vmax.f32 %v6193_v28, %v6194_v20  ;;  %v6201_v57 = vrot.slane %v6200_v1, 2  ;;  %8497 = vrot.lane.b32.xlu0 %v14317_v49, %s10614_s21 }
 0x45f   :  { %v6183_v14 = vmax.f32 %v6181_v27, %v6182_v5  ;;  %v6189_v2 = vrot.slane %v6188_v30, 1  ;;  %v4869_v37 = vcombine.high %v4021_v63, %v4021_v63  ;;  %v4876_v36 = vrot.slane %v4021_v63, %v12625_v58  ;;  %8559 = vrot.lane.b32.xlu1 %v14323_v55, %s10615_s22 }
 0x460   :  { %v6196_v53 = vrot.slane %v6195_v32, 1  ;;  %v6202_v45 = vmax.f32 %v6200_v1, %v6201_v57  ;;  %v4852_v20 = vcombine.high %v4020_v3, %v4020_v3  ;;  %v4859_v13 = vrot.slane %v4020_v3, %v12625_v58 }
 0x461   :  { %v6190_v28 = vmax.f32 %v6188_v30, %v6189_v2  ;;  %v7386_v27 = vsel %vm2927_vm1, %v6183_v14, -inf  ;;  %v14437_v40 = vpop.permute.xlu0 %2495  ;;  %v4883_v1 = vrot.slane %v4869_v37, %v12625_v58  ;;  %v14441_v5 = vpop.permute.xlu1 %2785  ;;  %v4884_v2 = vcombine.high %v4876_v36, %v4876_v36 }
 0x462   :  { %v6197_v49 = vmax.f32 %v6195_v32, %v6196_v53  ;;  %v6203_v47 = vrot.slane %v6202_v45, 1  ;;  %v7387_v57 = vmax.f32 %v14247_v8, %v7386_v27  ;;  %v6709_v30 = vsel %vm5448_vm10, %v4876_v36, -inf  ;;  %8119 = vrot.lane.b32.xlu0 %v14443_v46, %s10604_s10 }
 0x463   :  { %v7389_v55 = vsel %vm2927_vm1, %v6190_v28, -inf  ;;  %v14448_v43 = vrot.slane %v4852_v20, %v12625_v58  ;;  %v4885_v63 = vcombine.high %v4883_v1, %v4883_v1  ;;  %8309 = vrot.lane.b32.xlu1 %v14443_v46, %s10610_s1  ;;  %v6710_v53 = vrot.slane %v6709_v30, 4 }
 0x464   :  { %v6204_v3 = vmax.f32 %v6202_v45, %v6203_v47  ;;  %v7390_v8 = vmax.f32 %v14250_v54, %v7389_v55  ;;  %v7392_v32 = vsel %vm2927_vm1, %v6197_v49, -inf  ;;  %v6716_v36 = vsel %vm5448_vm10, %v4884_v2, -inf }
 0x465   :  { %v7393_v14 = vmax.f32 %v14260_v12, %v7392_v32  ;;  %v6723_v37 = vsel %vm5448_vm10, %v4883_v1, -inf  ;;  %v14459_v28 = vpop.permute.xlu0 %2021  ;;  %v6717_v54 = vrot.slane %v6716_v36, 4  ;;  %v14463_v49 = vpop.permute.xlu1 %2275  ;;  %v6711_v12 = vmax.f32 %v6709_v30, %v6710_v53 }
 0x466   :  { %v7395_v27 = vsel %vm2927_vm1, %v6204_v3, -inf  ;;  %v7848_v45 = vsel %vm7799_vm11, %v7390_v8, %v7387_v57  ;;  %v6724_v20 = vrot.slane %v6723_v37, 4  ;;  %v6730_v32 = vsel %vm5448_vm10, %v4885_v63, -inf  ;;  %8371 = vrot.lane.b32.xlu0 %v14359_v21, %s10612_s14 }
 0x467   :  { %v7396_v47 = vmax.f32 %v14263_v22, %v7395_v27  ;;  %v7849_v55 = vsel %vm7801_vm12, %v7393_v14, %v7848_v45  ;;  %v6718_v1 = vmax.f32 %v6716_v36, %v6717_v54  ;;  %v6731_v26 = vrot.slane %v6730_v32, 4  ;;  %8561 = vrot.lane.b32.xlu1 %v14359_v21, %s10615_s22  ;;  %v14484_v21 = vld [vmem:[#allocation3 + $0x80] sm:$0xff] }
 0x468   :  { %v6725_v2 = vmax.f32 %v6723_v37, %v6724_v20  ;;  %v4867_v3 = vcombine.high %v4859_v13, %v4859_v13  ;;  %v6712_v8 = vrot.slane %v6711_v12, 2  ;;  %v4868_v22 = vcombine.high %v14448_v43, %v14448_v43 }
 0x469   :  { %v7850_v57 = vsel %vm16701_vm13, %v7396_v47, %v7849_v55  ;;  %v6681_v30 = vsel %vm5448_vm10, %v4859_v13, -inf  ;;  %v17098_v63 = vmax.f32 %v14163_v56, %v14383_v44  ;;  %v6719_v53 = vrot.slane %v6718_v1, 2  ;;  %v14480_v27 = vpop.permute.xlu0 %2497  ;;  %v14482_v45 = vpop.permute.xlu1 %2751  ;;  %v14493_v44 = vld [vmem:[#allocation3 + $0x69] sm:$0xff] }
 0x46a   :  { %v6726_v36 = vrot.slane %v6725_v2, 2  ;;  %v6732_v37 = vmax.f32 %v6730_v32, %v6731_v26  ;;  %v17099_v54 = vmax.f32 %v14185_v51, %v14397_v9  ;;  %v6713_v13 = vmax.f32 %v6711_v12, %v6712_v8  ;;  %8121 = vrot.lane.b32.xlu0 %v14484_v21, %s10604_s10 }
 0x46b   :  { %v7851_v14 = vsel %vm7805_vm14, %v17098_v63, %v7850_v57  ;;  %v6682_v47 = vrot.slane %v6681_v30, 4  ;;  %v6688_v56 = vsel %vm5448_vm10, %v4867_v3, -inf  ;;  %v17101_v26 = vmax.f32 %v14188_v16, %v14392_v0  ;;  %8183 = vrot.lane.b32.xlu1 %v14493_v44, %s10606_s15 }
 0x46c   :  { %v7852_v20 = vsel %vm17100_vm2, %v17099_v54, %v7851_v14  ;;  %v6720_v32 = vmax.f32 %v6718_v1, %v6719_v53  ;;  %v6727_v57 = vmax.f32 %v6725_v2, %v6726_v36  ;;  %v6733_v63 = vrot.slane %v6732_v37, 2 }
 0x46d   :  { %v7853_v55 = vsel %vm17102_vm0, %v17101_v26, %v7852_v20  ;;  %v17103_v51 = vmax.f32 %v14237_v52, %v14409_v38  ;;  %v6714_v12 = vrot.slane %v6713_v13, 1  ;;  %v6683_v3 = vmax.f32 %v6681_v30, %v6682_v47  ;;  %v14508_v2 = vpop.permute.xlu1 %2277 }
 0x46e   :  { %v6689_v8 = vrot.slane %v6688_v56, 4  ;;  %v6721_v14 = vrot.slane %v6720_v32, 1  ;;  %v6728_v16 = vrot.slane %v6727_v57, 1  ;;  %v6734_v0 = vmax.f32 %v6732_v37, %v6733_v63  ;;  %8373 = vrot.lane.b32.xlu0 %v14493_v44, %s10612_s14  ;;  %v10363_v63 = vpop.f32.mrf.mxu0 }
 0x46f   :  { %v7854_v9 = vsel %vm17104_vm15, %v17103_v51, %v7853_v55  ;;  %v6695_v1 = vsel %vm5448_vm10, %v14448_v43, -inf  ;;  %v14512_v53 = vsel %vm2927_vm1, %v14310_v48, -inf  ;;  %v6684_v52 = vrot.slane %v6683_v3, 2  ;;  %v14525_v48 = vpop.permute.xlu0 %1511  ;;  %8435 = vrot.lane.b32.xlu1 %v14404_v11, %s10613_s20 }
 0x470   :  { %7940 = vst.msk [vmem:[#allocation3 + $0xb0] sm:$0xff] %vm2927_vm1, %v7854_v9  ;;  %17105 = vst [vmem:[#allocation48_spill] sm:$0xff] %v14512_v53  ;;  %v6690_v38 = vmax.f32 %v6688_v56, %v6689_v8  ;;  %v6696_v36 = vrot.slane %v6695_v1, 4  ;;  %v17106_v30 = vrot.slane %v14302_v62, 1  ;;  %v3114_v43 = vsel %vm3057_vm4, %v14110_v60, %v14071_v35  ;;  %v8002_v8 = vld [vmem:[#allocation3 + $0x7f] sm:$0xff] }
 0x471   :  { %v6735_v37 = vrot.slane %v6734_v0, 1  ;;  %v6702_v20 = vsel %vm5448_vm10, %v4868_v22, -inf  ;;  %v6715_v47 = vmax.f32 %v6713_v13, %v6714_v12  ;;  %v6685_v56 = vmax.f32 %v6683_v3, %v6684_v52  ;;  %v14532_v60 = vpop.permute.xlu1 %2753  ;;  %v14534_v22 = vld [vmem:[#allocation3 + $0x81] sm:$0xff] }
 0x472   :  { %v14519_v54 = vmax.f32 %v14302_v62, %v17106_v30  ;;  %v6691_v26 = vrot.slane %v6690_v38, 2  ;;  %v6697_v55 = vmax.f32 %v6695_v1, %v6696_v36  ;;  %v3162_v62 = vsel %vm3122_vm5, %v14286_v42, %v14076_v17  ;;  %8185 = vrot.lane.b32.xlu0 %v14534_v22, %s10606_s15  ;;  %v3797_v1 = vpop.f32.mrf.mxu0  ;;  %v17109_v30 = vld [vmem:[#allocation35_spill] sm:$0xff] }
 0x473   :  { %v6722_v51 = vmax.f32 %v6720_v32, %v6721_v14  ;;  %v6729_v9 = vmax.f32 %v6727_v57, %v6728_v16  ;;  %v6703_v35 = vrot.slane %v6702_v20, 4  ;;  %v3226_v11 = vsel %vm3187_vm6, %v14294_v33, %v14093_v19  ;;  %8247 = vrot.lane.b32.xlu1 %v8002_v8, %s10608_s25  ;;  %v14562_v52 = vpop.permute.xlu0 %2531 }
 0x474   :  { %17107 = vst [vmem:[#allocation49_spill] sm:$0xff] %v14519_v54  ;;  %v6686_v13 = vrot.slane %v6685_v56, 1  ;;  %v6692_v12 = vmax.f32 %v6690_v38, %v6691_v26  ;;  %v6698_v3 = vrot.slane %v6697_v55, 2  ;;  %v3115_v17 = vsel %vm3057_vm4, %v14118_v41, %v14147_v50  ;;  %v14582_v26 = vld [vmem:[%s16684_s2] ss:$0 sm:$0xff] }
 0x475   :  { %v3179_v42 = vsel %vm3122_vm5, %v3114_v43, %v14160_v59  ;;  %v6736_v32 = vmax.f32 %v6734_v0, %v6735_v37  ;;  %v6704_v57 = vmax.f32 %v6702_v20, %v6703_v35  ;;  %v14548_v19 = vsel %vm2927_vm1, %v6715_v47, -inf  ;;  %v14569_v37 = vpop.permute.xlu1 %1767 }
 0x476   :  { %v3227_v33 = vsel %vm3187_vm6, %v3162_v62, %v14177_v18  ;;  %v6699_v14 = vmax.f32 %v6697_v55, %v6698_v3  ;;  %v3291_v16 = vsel %vm3252_vm7, %v3226_v11, %v14182_v23  ;;  %v14555_v41 = vsel %vm2927_vm1, %v6722_v51, -inf  ;;  %v17108_v18 = vld [vmem:[#allocation37_spill] sm:$0xff]  ;;  %8437 = vrot.lane.b32.xlu0 %v8002_v8, %s10613_s20 }
 0x477   :  { %v14558_v50 = vsel %vm2927_vm1, %v6729_v9, -inf  ;;  %v6705_v59 = vrot.slane %v6704_v57, 2  ;;  %v3356_v0 = vsel %vm3317_vm8, %v3291_v16, %v14244_v29  ;;  %v6687_v38 = vmax.f32 %v6685_v56, %v6686_v13  ;;  %v17110_v29 = vld [vmem:[#allocation38_spill] sm:$0xff]  ;;  %8499 = vrot.lane.b32.xlu1 %v14443_v46, %s10614_s21  ;;  %v14622_v16 = vpop.permute.xlu0 %1513 }
 0x478   :  { %v6693_v36 = vrot.slane %v6692_v12, 1  ;;  %v3098_v43 = vsel %vm3057_vm4, %v17109_v30, %v17108_v18  ;;  %10376 = vmatprep.mubr.msk.f32.mxu0 %vm3394_vm9, %v3356_v0  ;;  %v3803_v23 = vadd.f32 %v14016_v10, %v10363_v63  ;;  %v14573_v20 = vsel %vm2927_vm1, %v6736_v32, -inf  ;;  %v17111_v63 = vld [vmem:[#allocation112_spill] sm:$0xff]  ;;  %v14603_v3 = vld [vmem:[#allocation3 + $0x97] sm:$0xff] }
 0x479   :  { %v3180_v47 = vsel %vm3122_vm5, %v3115_v17, %v17110_v29  ;;  %v3292_v56 = vsel %vm3252_vm7, %v3227_v33, %v14242_v24  ;;  %v3798_v10 = vadd.f32 %v14582_v26, %v3797_v1  ;;  %v6700_v55 = vrot.slane %v6699_v14, 1  ;;  %v17112_v24 = vld [vmem:[#allocation61_spill] sm:$0xff] }
 0x47a   :  { %v3244_v62 = vsel %vm3187_vm6, %v3179_v42, %v17111_v63  ;;  %v4005_v51 = vmax.f32 %v3803_v23, 0.0  ;;  %v3357_v9 = vsel %vm3317_vm8, %v3292_v56, %v14336_v61  ;;  %v14591_v35 = vmax.f32 %v6704_v57, %v6705_v59  ;;  %8249 = vrot.lane.b32.xlu0 %v14603_v3, %s10608_s25  ;;  %v17114_v32 = vld [vmem:[#allocation41_spill] sm:$0xff] }
 0x47b   :  { %v14596_v11 = vsel %vm3057_vm4, %v17112_v24, %v14273_v31  ;;  %v14600_v13 = vsel %vm3122_vm5, %v3098_v43, %v14277_v34  ;;  %v4004_v46 = vmax.f32 %v3798_v10, 0.0  ;;  %10377 = vmatmul.mubr.msk.f32.gmra.mxu0 %vm3394_vm9, %v3357_v9  ;;  %v14605_v8 = vmax.f32 %v6692_v12, %v6693_v36  ;;  %v17113_v31 = vld [vmem:[#allocation39_spill] sm:$0xff]  ;;  %8311 = vrot.lane.b32.xlu1 %v14484_v21, %s10610_s1  ;;  %v14630_v36 = vpop.permute.xlu1 %2787 }
 0x47c   :  { %v14608_v61 = vsel %vm2927_vm1, %v6687_v38, -inf  ;;  %v4597_v17 = vcombine.high %v4005_v51, %v4005_v51  ;;  %v4604_v42 = vrot.slane %v4005_v51, %v12625_v58  ;;  %v14615_v34 = vsel %vm3187_vm6, %v3180_v47, %v17113_v31  ;;  %17115 = vst [vmem:[#allocation50_spill] sm:$0xff] %v14630_v36 }
 0x47d   :  { %v14619_v57 = vsel %vm3252_vm7, %v3244_v62, %v17114_v32  ;;  %v4580_v33 = vcombine.high %v4004_v46, %v4004_v46  ;;  %v4587_v12 = vrot.slane %v4004_v46, %v12625_v58  ;;  %v14626_v1 = vmax.f32 %v6699_v14, %v6700_v55 }
 0x47e   :  { %v4611_v59 = vrot.slane %v4597_v17, %v12625_v58  ;;  %v4612_v0 = vcombine.high %v4604_v42, %v4604_v42  ;;  %v6261_v38 = vsel %vm5448_vm10, %v4604_v42, -inf  ;;  %v6707_v18 = vrot.slane %v14591_v35, 1  ;;  %8501 = vrot.lane.b32.xlu0 %v14484_v21, %s10614_s21  ;;  %v14646_v21 = vld [vmem:[#allocation3 + $0x98] sm:$0xff] }
 0x47f   :  { %v6262_v30 = vrot.slane %v6261_v38, 4  ;;  %v4594_v43 = vrot.slane %v4580_v33, %v12625_v58  ;;  %v4595_v23 = vcombine.high %v4587_v12, %v4587_v12  ;;  %v6233_v14 = vsel %vm5448_vm10, %v4587_v12, -inf  ;;  %8563 = vrot.lane.b32.xlu1 %v14493_v44, %s10615_s22  ;;  %v14644_v33 = vpop.permute.xlu0 %2533 }
 0x480   :  { %v4613_v29 = vcombine.high %v4611_v59, %v4611_v59  ;;  %v6268_v47 = vsel %vm5448_vm10, %v4612_v0, -inf  ;;  %v6275_v56 = vsel %vm5448_vm10, %v4611_v59, -inf  ;;  %v6234_v9 = vrot.slane %v6233_v14, 4  ;;  %17116 = vst [vmem:[#allocation51_spill] sm:$0xff] %v14644_v33 }
 0x481   :  { %v6263_v10 = vmax.f32 %v6261_v38, %v6262_v30  ;;  %v6269_v55 = vrot.slane %v6268_v47, 4  ;;  %v6276_v63 = vrot.slane %v6275_v56, 4  ;;  %v4596_v62 = vcombine.high %v4594_v43, %v4594_v43  ;;  %v14649_v38 = vpop.permute.xlu1 %2023 }
 0x482   :  { %v6282_v51 = vsel %vm5448_vm10, %v4613_v29, -inf  ;;  %v6240_v24 = vsel %vm5448_vm10, %v4595_v23, -inf  ;;  %v6247_v46 = vsel %vm5448_vm10, %v4594_v43, -inf  ;;  %v6235_v12 = vmax.f32 %v6233_v14, %v6234_v9  ;;  %17117 = vst [vmem:[#allocation52_spill] sm:$0xff] %v14649_v38  ;;  %8123 = vrot.lane.b32.xlu0 %v14646_v21, %s10604_s10 }
 0x483   :  { %v6264_v17 = vrot.slane %v6263_v10, 2  ;;  %v6270_v42 = vmax.f32 %v6268_v47, %v6269_v55  ;;  %v6277_v31 = vmax.f32 %v6275_v56, %v6276_v63  ;;  %v6283_v32 = vrot.slane %v6282_v51, 4  ;;  %8313 = vrot.lane.b32.xlu1 %v14646_v21, %s10610_s1 }
 0x484   :  { %v6241_v59 = vrot.slane %v6240_v24, 4  ;;  %v6248_v0 = vrot.slane %v6247_v46, 4  ;;  %v6254_v44 = vsel %vm5448_vm10, %v4596_v62, -inf  ;;  %v6236_v47 = vrot.slane %v6235_v12, 2 }
 0x485   :  { %v6265_v30 = vmax.f32 %v6263_v10, %v6264_v17  ;;  %v6271_v43 = vrot.slane %v6270_v42, 2  ;;  %v6278_v23 = vrot.slane %v6277_v31, 2  ;;  %v6284_v29 = vmax.f32 %v6282_v51, %v6283_v32  ;;  %v14661_v32 = vpop.permute.xlu0 %1769 }
 0x486   :  { %v6242_v56 = vmax.f32 %v6240_v24, %v6241_v59  ;;  %v6249_v55 = vmax.f32 %v6247_v46, %v6248_v0  ;;  %v6255_v14 = vrot.slane %v6254_v44, 4  ;;  %v6237_v54 = vmax.f32 %v6235_v12, %v6236_v47  ;;  %8375 = vrot.lane.b32.xlu0 %v14534_v22, %s10612_s14  ;;  %v10390_v46 = vpop.f32.mrf.mxu1  ;;  %17118 = vst [vmem:[#allocation53_spill] sm:$0xff] %v14661_v32  ;;  %v14665_v0 = vpop.permute.xlu1 %2025  ;;  %v14671_v47 = vld [vmem:[#allocation3 + $0xb0] sm:$0xff] }
 0x487   :  { %v6266_v63 = vrot.slane %v6265_v30, 1  ;;  %v6272_v9 = vmax.f32 %v6270_v42, %v6271_v43  ;;  %v6279_v53 = vmax.f32 %v6277_v31, %v6278_v23  ;;  %v6285_v62 = vrot.slane %v6284_v29, 2  ;;  %8565 = vrot.lane.b32.xlu1 %v14534_v22, %s10615_s22  ;;  %17119 = vst [vmem:[#allocation54_spill] sm:$0xff] %v14665_v0  ;;  %v17120_v23 = vld [vmem:[#allocation110_spill] sm:$0xff]  ;;  %v17121_v22 = vld [vmem:[#allocation36_spill] sm:$0xff] }
 0x488   :  { %v6243_v38 = vrot.slane %v6242_v56, 2  ;;  %v6250_v33 = vrot.slane %v6249_v55, 2  ;;  %v6256_v36 = vmax.f32 %v6254_v44, %v6255_v14  ;;  %v14659_v10 = vsel %vm2927_vm1, %v14605_v8, -inf }
 0x489   :  { %v6273_v51 = vrot.slane %v6272_v9, 1  ;;  %v6280_v17 = vrot.slane %v6279_v53, 1  ;;  %v6286_v24 = vmax.f32 %v6284_v29, %v6285_v62  ;;  %v6238_v42 = vrot.slane %v6237_v54, 1 }
 0x48a   :  { %v6244_v31 = vmax.f32 %v6242_v56, %v6243_v38  ;;  %v6251_v12 = vmax.f32 %v6249_v55, %v6250_v33  ;;  %v6257_v59 = vrot.slane %v6256_v36, 2  ;;  %v6708_v44 = vmax.f32 %v14591_v35, %v6707_v18  ;;  %8125 = vrot.lane.b32.xlu0 %v14671_v47, %s10604_s10  ;;  %v14678_v38 = vld [vmem:[#allocation3 + $0x99] sm:$0xff]  ;;  %v17122_v56 = vld [vmem:[#allocation44_spill] sm:$0xff] }
 0x48b   :  { %v6267_v43 = vmax.f32 %v6265_v30, %v6266_v63  ;;  %v6287_v8 = vrot.slane %v6286_v24, 1  ;;  %v3052_v29 = vsel %vm17074_vm3, %v17120_v23, %v14339_v15  ;;  %v6274_v14 = vmax.f32 %v6272_v9, %v6273_v51  ;;  %8187 = vrot.lane.b32.xlu1 %v14678_v38, %s10606_s15  ;;  %v17123_v63 = vld [vmem:[#allocation62_spill] sm:$0xff] }
 0x48c   :  { %v6281_v62 = vmax.f32 %v6279_v53, %v6280_v17  ;;  %v6258_v32 = vmax.f32 %v6256_v36, %v6257_v59  ;;  %v3116_v33 = vsel %vm3057_vm4, %v17121_v22, %v14354_v25  ;;  %v14682_v35 = vsel %vm2927_vm1, %v14626_v1, -inf  ;;  %v3887_v36 = vpop.f32.mrf.mxu1 }
 0x48d   :  { %v6245_v18 = vrot.slane %v6244_v31, 1  ;;  %v6252_v15 = vrot.slane %v6251_v12, 1  ;;  %v3374_v53 = vsel %vm3317_vm8, %v14619_v57, %v14394_v4  ;;  %v6288_v25 = vmax.f32 %v6286_v24, %v6287_v8 }
 0x48e   :  { %v6239_v30 = vmax.f32 %v6237_v54, %v6238_v42  ;;  %v14692_v55 = vsel %vm3122_vm5, %v14596_v11, %v17122_v56  ;;  %v3228_v1 = vsel %vm3187_vm6, %v14600_v13, %v17123_v63  ;;  %10403 = vmatprep.mubr.msk.f32.mxu1 %vm3394_vm9, %v3374_v53  ;;  %v14699_v9 = vsel %vm2927_vm1, %v6708_v44, -inf  ;;  %v14708_v11 = vpop.permute.xlu0 %2789  ;;  %v14717_v42 = vpop.permute.xlu1 %1515  ;;  %8377 = vrot.lane.b32.xlu0 %v14678_v38, %s10612_s14  ;;  %v8004_v53 = vld [vmem:[#allocation3 + $0xaf] sm:$0xff] }
 0x48f   :  { %v14702_v4 = vsel %vm2927_vm1, %v6267_v43, -inf  ;;  %v3310_v54 = vsel %vm3252_vm7, %v14615_v34, %v14373_v7  ;;  %v3893_v57 = vadd.f32 %v14582_v26, %v10390_v46  ;;  %v14711_v51 = vsel %vm2927_vm1, %v6274_v14, -inf  ;;  %17124 = vst [vmem:[#allocation55_spill] sm:$0xff] %v14717_v42  ;;  %8439 = vrot.lane.b32.xlu1 %v14603_v3, %s10613_s20 }
 0x490   :  { %v14714_v13 = vsel %vm2927_vm1, %v6281_v62, -inf  ;;  %v6259_v17 = vrot.slane %v6258_v32, 1  ;;  %v3888_v24 = vadd.f32 %v14582_v26, %v3887_v36  ;;  %v14721_v59 = vmax.f32 %v6244_v31, %v6245_v18  ;;  %v8747_v62 = vld [vmem:[%s16685_s3 + $0x40] sm:$0xff] }
 0x491   :  { %v14723_v7 = vmax.f32 %v6251_v12, %v6252_v15  ;;  %v4023_v34 = vmax.f32 %v3893_v57, 0.0  ;;  %v3375_v46 = vsel %vm3317_vm8, %v3310_v54, %v14441_v5  ;;  %v14730_v44 = vsel %vm2927_vm1, %v6288_v25, -inf  ;;  %v10366_v12 = vpop.f32.mrf.mxu0  ;;  %10415 = vmatprep.subr.mxu1 %v8747_v62 }
 0x492   :  { %v14733_v43 = vsel %vm2927_vm1, %v6239_v30, -inf  ;;  %v4022_v8 = vmax.f32 %v3888_v24, 0.0  ;;  %v3293_v31 = vsel %vm3252_vm7, %v3228_v1, %v14437_v40  ;;  %10404 = vmatmul.mubr.msk.f32.gmra.mxu1 %vm3394_vm9, %v3375_v46  ;;  %v14740_v23 = vsel %vm3057_vm4, %v3052_v29, %v14402_v39  ;;  %v17125_v40 = vld [vmem:[#allocation113_spill] sm:$0xff]  ;;  %v14763_v30 = vpop.permute.xlu0 %2279  ;;  %v14773_v57 = vpop.permute.xlu1 %2535 }
 0x493   :  { %v4903_v5 = vcombine.high %v4023_v34, %v4023_v34  ;;  %v4910_v3 = vrot.slane %v4023_v34, %v12625_v58  ;;  %v3358_v14 = vsel %vm3317_vm8, %v3293_v31, %v14482_v45  ;;  %v14748_v22 = vmax.f32 %v6258_v32, %v6259_v17  ;;  %v14756_v29 = vld [vmem:[#allocation3 + $0xb1] sm:$0xff]  ;;  %17127 = vst [vmem:[#allocation63_spill] sm:$0xff] %v14763_v30 }
 0x494   :  { %v14752_v18 = vsel %vm3122_vm5, %v3116_v33, %v17125_v40  ;;  %v4886_v15 = vcombine.high %v4022_v8, %v4022_v8  ;;  %v4893_v39 = vrot.slane %v4022_v8, %v12625_v58  ;;  %10379 = vmatprep.mubr.msk.f32.mxu0 %vm3394_vm9, %v3358_v14  ;;  %17126 = vst [vmem:[#allocation56_spill] sm:$0xff] %v14756_v29  ;;  %v8746_v33 = vld [vmem:[%s16685_s3 + $0x38] sm:$0xff]  ;;  %17128 = vst [vmem:[#allocation64_spill] sm:$0xff] %v14773_v57 }
 0x495   :  { %v4917_v45 = vrot.slane %v4903_v5, %v12625_v58  ;;  %v4918_v36 = vcombine.high %v4910_v3, %v4910_v3  ;;  %v6765_v25 = vsel %vm5448_vm10, %v4910_v3, -inf  ;;  %v14761_v32 = vadd.f32 %v14582_v26, %v10366_v12  ;;  %8189 = vrot.lane.b32.xlu0 %v14756_v29, %s10606_s15  ;;  %8251 = vrot.lane.b32.xlu1 %v8004_v53, %s10608_s25  ;;  %v8745_v3 = vld [vmem:[%s16685_s3 + $0x30] sm:$0xff] }
 0x496   :  { %v6766_v56 = vrot.slane %v6765_v25, 4  ;;  %v4900_v63 = vrot.slane %v4886_v15, %v12625_v58  ;;  %v4901_v1 = vcombine.high %v4893_v39, %v4893_v39  ;;  %v6737_v54 = vsel %vm5448_vm10, %v4893_v39, -inf  ;;  %10416 = vmatpush3.msra.mxu1 %v8747_v62  ;;  %v14789_v42 = vpop.permute.xlu1 %1771 }
 0x497   :  { %v4919_v17 = vcombine.high %v4917_v45, %v4917_v45  ;;  %v6772_v24 = vsel %vm5448_vm10, %v4918_v36, -inf  ;;  %v6779_v34 = vsel %vm5448_vm10, %v4917_v45, -inf  ;;  %v6738_v46 = vrot.slane %v6737_v54, 4  ;;  %10417 = vmatprep.subr.mxu1 %v8746_v33 }
 0x498   :  { %v6767_v8 = vmax.f32 %v6765_v25, %v6766_v56  ;;  %v6773_v31 = vrot.slane %v6772_v24, 4  ;;  %v6780_v12 = vrot.slane %v6779_v34, 4  ;;  %v4902_v5 = vcombine.high %v4900_v63, %v4900_v63  ;;  %10418 = vmatpush3.msra.mxu1 %v8746_v33 }
 0x499   :  { %v6786_v14 = vsel %vm5448_vm10, %v4919_v17, -inf  ;;  %v6739_v40 = vmax.f32 %v6737_v54, %v6738_v46  ;;  %v6744_v15 = vsel %vm5448_vm10, %v4901_v1, -inf  ;;  %v6751_v39 = vsel %vm5448_vm10, %v4900_v63, -inf  ;;  %8441 = vrot.lane.b32.xlu0 %v8004_v53, %s10613_s20  ;;  %8503 = vrot.lane.b32.xlu1 %v14646_v21, %s10614_s21  ;;  %v14787_v54 = vpop.permute.xlu0 %2281 }
 0x49a   :  { %v6768_v62 = vrot.slane %v6767_v8, 2  ;;  %v6774_v45 = vmax.f32 %v6772_v24, %v6773_v31  ;;  %v6781_v36 = vmax.f32 %v6779_v34, %v6780_v12  ;;  %v6787_v25 = vrot.slane %v6786_v14, 4  ;;  %17129 = vst [vmem:[#allocation65_spill] sm:$0xff] %v14787_v54  ;;  %10419 = vmatprep.subr.mxu1 %v8745_v3 }
 0x49b   :  { %v6740_v56 = vrot.slane %v6739_v40, 2  ;;  %v6745_v29 = vrot.slane %v6744_v15, 4  ;;  %v6752_v57 = vrot.slane %v6751_v39, 4  ;;  %v6758_v17 = vsel %vm5448_vm10, %v4902_v5, -inf  ;;  %10420 = vmatpush3.msra.mxu1 %v8745_v3 }
 0x49c   :  { %v6769_v1 = vmax.f32 %v6767_v8, %v6768_v62  ;;  %v6775_v63 = vrot.slane %v6774_v45, 2  ;;  %v6782_v46 = vrot.slane %v6781_v36, 2  ;;  %v6788_v53 = vmax.f32 %v6786_v14, %v6787_v25  ;;  %v8744_v14 = vld [vmem:[%s16685_s3 + $0x28] sm:$0xff] }
 0x49d   :  { %v6741_v21 = vmax.f32 %v6739_v40, %v6740_v56  ;;  %v6746_v24 = vmax.f32 %v6744_v15, %v6745_v29  ;;  %v6753_v34 = vmax.f32 %v6751_v39, %v6752_v57  ;;  %v6759_v31 = vrot.slane %v6758_v17, 4  ;;  %8315 = vrot.lane.b32.xlu1 %v14671_v47, %s10610_s1  ;;  %10421 = vmatprep.subr.mxu1 %v8744_v14 }
 0x49e   :  { %v6770_v33 = vrot.slane %v6769_v1, 1  ;;  %v6776_v12 = vmax.f32 %v6774_v45, %v6775_v63  ;;  %v6783_v5 = vmax.f32 %v6781_v36, %v6782_v46  ;;  %v6789_v30 = vrot.slane %v6788_v53, 2  ;;  %v14796_v45 = vpop.permute.xlu0 %1517  ;;  %10422 = vmatpush3.msra.mxu1 %v8744_v14  ;;  %v8743_v36 = vld [vmem:[%s16685_s3 + $0x20] sm:$0xff] }
 0x49f   :  { %v6742_v54 = vrot.slane %v6741_v21, 1  ;;  %v6747_v0 = vrot.slane %v6746_v24, 2  ;;  %v6754_v8 = vrot.slane %v6753_v34, 2  ;;  %v6760_v62 = vmax.f32 %v6758_v17, %v6759_v31  ;;  %10423 = vmatprep.subr.mxu1 %v8743_v36 }
 0x4a0   :  { %v6771_v3 = vmax.f32 %v6769_v1, %v6770_v33  ;;  %v6777_v40 = vrot.slane %v6776_v12, 1  ;;  %v6784_v29 = vrot.slane %v6783_v5, 1  ;;  %v6790_v57 = vmax.f32 %v6788_v53, %v6789_v30  ;;  %10424 = vmatpush3.msra.mxu1 %v8743_v36 }
 0x4a1   :  { %v6743_v15 = vmax.f32 %v6741_v21, %v6742_v54  ;;  %v6748_v39 = vmax.f32 %v6746_v24, %v6747_v0  ;;  %v6755_v25 = vmax.f32 %v6753_v34, %v6754_v8  ;;  %v6761_v56 = vrot.slane %v6760_v62, 2  ;;  %8567 = vrot.lane.b32.xlu1 %v14678_v38, %s10615_s22  ;;  %v14806_v54 = vpop.permute.xlu1 %2791  ;;  %v8742_v21 = vld [vmem:[%s16685_s3 + $0x18] sm:$0xff] }
 0x4a2   :  { %v6778_v17 = vmax.f32 %v6776_v12, %v6777_v40  ;;  %v6785_v1 = vmax.f32 %v6783_v5, %v6784_v29  ;;  %v6791_v63 = vrot.slane %v6790_v57, 1  ;;  %v14804_v30 = vsel %vm2927_vm1, %v6771_v3, -inf  ;;  %10425 = vmatprep.subr.mxu1 %v8742_v21 }
 0x4a3   :  { %v14810_v0 = vsel %vm2927_vm1, %v14721_v59, -inf  ;;  %v6749_v46 = vrot.slane %v6748_v39, 1  ;;  %v6756_v38 = vrot.slane %v6755_v25, 1  ;;  %v6762_v53 = vmax.f32 %v6760_v62, %v6761_v56  ;;  %10426 = vmatpush3.msra.mxu1 %v8742_v21 }
 0x4a4   :  { %v14817_v24 = vsel %vm2927_vm1, %v14723_v7, -inf  ;;  %v7521_v34 = vsel %vm2927_vm1, %v6778_v17, -inf  ;;  %v7506_v31 = vsel %vm2927_vm1, %v6743_v15, -inf  ;;  %v3229_v59 = vsel %vm3187_vm6, %v14692_v55, %v14425_v6  ;;  %v8741_v7 = vld [vmem:[%s16685_s3 + $0x10] sm:$0xff]  ;;  %v3807_v55 = vpop.f32.mrf.mxu0  ;;  %v14837_v15 = vpop.permute.xlu0 %2537 }
 0x4a5   :  { %v7519_v33 = vmax.f32 %v14548_v19, %v14804_v30  ;;  %v6750_v12 = vmax.f32 %v6748_v39, %v6749_v46  ;;  %v6757_v5 = vmax.f32 %v6755_v25, %v6756_v38  ;;  %v3294_v8 = vsel %vm3252_vm7, %v3229_v59, %v14480_v27  ;;  %10427 = vmatprep.subr.mxu1 %v8741_v7 }
 0x4a6   :  { %v6792_v62 = vmax.f32 %v6790_v57, %v6791_v63  ;;  %v7524_v14 = vsel %vm2927_vm1, %v6785_v1, -inf  ;;  %v6763_v3 = vrot.slane %v6762_v53, 1  ;;  %v4007_v6 = vmax.f32 %v14761_v32, 0.0  ;;  %10428 = vmatpush3.msra.mxu1 %v8741_v7  ;;  %v8740_v57 = vld [vmem:[%s16685_s3 + $0x8] sm:$0xff] }
 0x4a7   :  { %v7522_v19 = vmax.f32 %v14555_v41, %v7521_v34  ;;  %v7507_v40 = vmax.f32 %v14608_v61, %v7506_v31  ;;  %v7509_v29 = vsel %vm2927_vm1, %v6750_v12, -inf  ;;  %v7512_v27 = vsel %vm2927_vm1, %v6757_v5, -inf  ;;  %v14844_v41 = vpop.permute.xlu1 %2027  ;;  %10429 = vmatprep.subr.mxu1 %v8740_v57 }
 0x4a8   :  { %v6764_v39 = vmax.f32 %v6762_v53, %v6763_v3  ;;  %v7510_v32 = vmax.f32 %v14659_v10, %v7509_v29  ;;  %v7513_v25 = vmax.f32 %v14682_v35, %v7512_v27  ;;  %v4631_v56 = vcombine.high %v4007_v6, %v4007_v6  ;;  %10430 = vmatpush3.msra.mxu1 %v8740_v57  ;;  %v8739_v10 = vld [vmem:[%s16685_s3] sm:$0xff] }
 0x4a9   :  { %v7525_v61 = vmax.f32 %v14558_v50, %v7524_v14  ;;  %v4638_v36 = vrot.slane %v4007_v6, %v12625_v58  ;;  %v3359_v17 = vsel %vm3317_vm8, %v3294_v8, %v14532_v60  ;;  %v3808_v1 = vadd.f32 %v14582_v26, %v3807_v55  ;;  %10431 = vmatprep.subr.mxu1 %v8739_v10 }
 0x4aa   :  { %v7527_v35 = vsel %vm2927_vm1, %v6792_v62, -inf  ;;  %v7515_v63 = vsel %vm2927_vm1, %v6764_v39, -inf  ;;  %v7883_v30 = vsel %vm7799_vm11, %v7510_v32, %v7507_v40  ;;  %v4645_v50 = vrot.slane %v4631_v56, %v12625_v58  ;;  %10380 = vmatmul.mubr.msk.f32.gmra.mxu0 %vm3394_vm9, %v3359_v17  ;;  %10432 = vmatpush3.msra.mxu1 %v8739_v10  ;;  %v14866_v62 = vpop.permute.xlu0 %1773 }
 0x4ab   :  { %v7516_v60 = vmax.f32 %v14699_v9, %v7515_v63  ;;  %v7884_v46 = vsel %vm7801_vm12, %v7513_v25, %v7883_v30  ;;  %v4646_v38 = vcombine.high %v4638_v36, %v4638_v36  ;;  %v6317_v53 = vsel %vm5448_vm10, %v4638_v36, -inf  ;;  %v14870_v55 = vpop.permute.xlu1 %2029 }
 0x4ac   :  { %v4647_v21 = vcombine.high %v4645_v50, %v4645_v50  ;;  %v6318_v34 = vrot.slane %v6317_v53, 4  ;;  %v6331_v31 = vsel %vm5448_vm10, %v4645_v50, -inf  ;;  %v4006_v59 = vmax.f32 %v3808_v1, 0.0 }
 0x4ad   :  { %v7528_v12 = vmax.f32 %v14573_v20, %v7527_v35  ;;  %v7885_v5 = vsel %vm16701_vm13, %v7516_v60, %v7884_v46  ;;  %v6324_v8 = vsel %vm5448_vm10, %v4646_v38, -inf  ;;  %v6332_v7 = vrot.slane %v6331_v31, 4 }
 0x4ae   :  { %v7886_v9 = vsel %vm7805_vm14, %v7519_v33, %v7885_v5  ;;  %v6319_v14 = vmax.f32 %v6317_v53, %v6318_v34  ;;  %v6325_v3 = vrot.slane %v6324_v8, 4  ;;  %v6338_v6 = vsel %vm5448_vm10, %v4647_v21, -inf  ;;  %v14879_v60 = vpop.permute.xlu0 %2793 }
 0x4af   :  { %v7887_v40 = vsel %vm17100_vm2, %v7522_v19, %v7886_v9  ;;  %v6333_v29 = vmax.f32 %v6331_v31, %v6332_v7  ;;  %v6339_v27 = vrot.slane %v6338_v6, 4  ;;  %v4614_v20 = vcombine.high %v4006_v59, %v4006_v59  ;;  %v14883_v34 = vpop.permute.xlu1 %2285  ;;  %vm17132_vm2 = vmmov %vm17074_vm3 }
 0x4b0   :  { %v7888_v57 = vsel %vm17102_vm0, %v7525_v61, %v7887_v40  ;;  %v6320_v39 = vrot.slane %v6319_v14, 2  ;;  %v6326_v32 = vmax.f32 %v6324_v8, %v6325_v3  ;;  %v4621_v25 = vrot.slane %v4006_v59, %v12625_v58 }
 0x4b1   :  { %v7889_v56 = vsel %vm17104_vm15, %v7528_v12, %v7888_v57  ;;  %v6334_v33 = vrot.slane %v6333_v29, 2  ;;  %v6340_v36 = vmax.f32 %v6338_v6, %v6339_v27  ;;  %v4628_v17 = vrot.slane %v4614_v20, %v12625_v58 }
 0x4b2   :  { %7945 = vst.msk [vmem:[#allocation3 + $0x158] sm:$0xff] %vm2927_vm1, %v7889_v56  ;;  %v6321_v1 = vmax.f32 %v6319_v14, %v6320_v39  ;;  %v6327_v10 = vrot.slane %v6326_v32, 2  ;;  %v4629_v19 = vcombine.high %v4621_v25, %v4621_v25  ;;  %v6289_v35 = vsel %vm5448_vm10, %v4621_v25, -inf  ;;  %v10393_v56 = vpop.f32.mrf.mxu1 }
 0x4b3   :  { %v6335_v63 = vmax.f32 %v6333_v29, %v6334_v33  ;;  %v6341_v30 = vrot.slane %v6340_v36, 2  ;;  %v4630_v61 = vcombine.high %v4628_v17, %v4628_v17  ;;  %v6290_v50 = vrot.slane %v6289_v35, 4 }
 0x4b4   :  { %v6322_v46 = vrot.slane %v6321_v1, 1  ;;  %v6328_v38 = vmax.f32 %v6326_v32, %v6327_v10  ;;  %v6296_v53 = vsel %vm5448_vm10, %v4629_v19, -inf  ;;  %v6303_v21 = vsel %vm5448_vm10, %v4628_v17, -inf  ;;  %v17131_v17 = vld [vmem:[#allocation60_spill] sm:$0xff] }
 0x4b5   :  { %v14887_v31 = vsel %vm2927_vm1, %v14748_v22, -inf  ;;  %v6342_v59 = vmax.f32 %v6340_v36, %v6341_v30  ;;  %v6291_v12 = vmax.f32 %v6289_v35, %v6290_v50  ;;  %v6297_v5 = vrot.slane %v6296_v53, 4  ;;  %v17130_v22 = vld [vmem:[#allocation10_spill] sm:$0xff] }
 0x4b6   :  { %v3182_v8 = vsel %vm3122_vm5, %v14740_v23, %v14459_v28  ;;  %v6336_v7 = vrot.slane %v6335_v63, 1  ;;  %v6304_v9 = vrot.slane %v6303_v21, 4  ;;  %v6310_v14 = vsel %vm5448_vm10, %v4630_v61, -inf  ;;  %v17133_v61 = vld [vmem:[#allocation50_spill] sm:$0xff] }
 0x4b7   :  { %v3246_v3 = vsel %vm3187_vm6, %v14752_v18, %v14463_v49  ;;  %v6329_v6 = vrot.slane %v6328_v38, 1  ;;  %v6292_v40 = vrot.slane %v6291_v12, 2  ;;  %v6298_v29 = vmax.f32 %v6296_v53, %v6297_v5  ;;  %v14903_v49 = vpop.permute.xlu0 %2283 }
 0x4b8   :  { %v3053_v27 = vsel %vm17074_vm3, %v17130_v22, %v14525_v48  ;;  %v6323_v20 = vmax.f32 %v6321_v1, %v6322_v46  ;;  %v6305_v57 = vmax.f32 %v6303_v21, %v6304_v9  ;;  %v6311_v39 = vrot.slane %v6310_v14, 4  ;;  %v14910_v1 = vpop.permute.xlu1 %2541  ;;  %v17134_v21 = vld [vmem:[#allocation51_spill] sm:$0xff] }
 0x4b9   :  { %v3247_v28 = vsel %vm3187_vm6, %v3182_v8, %v14508_v2  ;;  %v6343_v23 = vrot.slane %v6342_v59, 1  ;;  %v3311_v32 = vsel %vm3252_vm7, %v3246_v3, %v14562_v52  ;;  %v6293_v25 = vmax.f32 %v6291_v12, %v6292_v40 }
 0x4ba   :  { %v6337_v18 = vmax.f32 %v6335_v63, %v6336_v7  ;;  %v6299_v33 = vrot.slane %v6298_v29, 2  ;;  %v6306_v36 = vrot.slane %v6305_v57, 2  ;;  %v14908_v48 = vsel %vm17132_vm2, %v17131_v17, %v14622_v16 }
 0x4bb   :  { %v6330_v10 = vmax.f32 %v6328_v38, %v6329_v6  ;;  %v6294_v2 = vrot.slane %v6293_v25, 1  ;;  %v6312_v19 = vmax.f32 %v6310_v14, %v6311_v39  ;;  %v14914_v52 = vsel %vm3057_vm4, %v3053_v27, %v14569_v37  ;;  %v3897_v38 = vpop.f32.mrf.mxu1  ;;  %v14929_v6 = vpop.permute.xlu0 %2539 }
 0x4bc   :  { %v7422_v35 = vsel %vm2927_vm1, %v6323_v20, -inf  ;;  %v6300_v30 = vmax.f32 %v6298_v29, %v6299_v33  ;;  %v6307_v63 = vmax.f32 %v6305_v57, %v6306_v36  ;;  %v3376_v50 = vsel %vm3317_vm8, %v3311_v32, %v17133_v61  ;;  %v14933_v20 = vpop.permute.xlu1 %2797 }
 0x4bd   :  { %v6344_v46 = vmax.f32 %v6342_v59, %v6343_v23  ;;  %v6295_v53 = vmax.f32 %v6293_v25, %v6294_v2  ;;  %v6313_v16 = vrot.slane %v6312_v19, 2  ;;  %v3312_v12 = vsel %vm3252_vm7, %v3247_v28, %v17134_v21  ;;  %10406 = vmatprep.mubr.msk.f32.mxu1 %vm3394_vm9, %v3376_v50 }
 0x4be   :  { %v7428_v5 = vsel %vm2927_vm1, %v6337_v18, -inf  ;;  %v6301_v37 = vrot.slane %v6300_v30, 1  ;;  %v6308_v8 = vrot.slane %v6307_v63, 1  ;;  %v3377_v7 = vsel %vm3317_vm8, %v3312_v12, %v14708_v11 }
 0x4bf   :  { %v7423_v9 = vmax.f32 %v14702_v4, %v7422_v35  ;;  %v6314_v14 = vmax.f32 %v6312_v19, %v6313_v16  ;;  %v7410_v59 = vsel %vm2927_vm1, %v6295_v53, -inf  ;;  %v3903_v3 = vadd.f32 %v14582_v26, %v10393_v56  ;;  %10407 = vmatmul.mubr.msk.f32.gmra.mxu1 %vm3394_vm9, %v3377_v7 }
 0x4c0   :  { %v7425_v40 = vsel %vm2927_vm1, %v6330_v10, -inf  ;;  %v6302_v29 = vmax.f32 %v6300_v30, %v6301_v37  ;;  %v6309_v22 = vmax.f32 %v6307_v63, %v6308_v8  ;;  %v3898_v27 = vadd.f32 %v14582_v26, %v3897_v38  ;;  %v14949_v63 = vpop.permute.xlu0 %2795  ;;  %v14954_v50 = vpop.permute.xlu1 %8113 }
 0x4c1   :  { %v7429_v11 = vmax.f32 %v14714_v13, %v7428_v5  ;;  %v7431_v4 = vsel %vm2927_vm1, %v6344_v46, -inf  ;;  %v6315_v57 = vrot.slane %v6314_v14, 1  ;;  %v4025_v39 = vmax.f32 %v3903_v3, 0.0 }
 0x4c2   :  { %v7411_v28 = vmax.f32 %v14733_v43, %v7410_v59  ;;  %v7413_v23 = vsel %vm2927_vm1, %v6302_v29, -inf  ;;  %v7416_v32 = vsel %vm2927_vm1, %v6309_v22, -inf  ;;  %v4024_v25 = vmax.f32 %v3898_v27, 0.0 }
 0x4c3   :  { %v6316_v56 = vmax.f32 %v6314_v14, %v6315_v57  ;;  %v7414_v18 = vmax.f32 %v14810_v0, %v7413_v23  ;;  %v7417_v33 = vmax.f32 %v14817_v24, %v7416_v32  ;;  %v4937_v36 = vcombine.high %v4025_v39, %v4025_v39 }
 0x4c4   :  { %v7426_v17 = vmax.f32 %v14711_v51, %v7425_v40  ;;  %v4944_v13 = vrot.slane %v4025_v39, %v12625_v58  ;;  %v4920_v10 = vcombine.high %v4024_v25, %v4024_v25  ;;  %v4927_v2 = vrot.slane %v4024_v25, %v12625_v58  ;;  %v14965_v57 = vpop.permute.xlu0 %8111  ;;  %v14968_v32 = vpop.permute.xlu1 %8177 }
 0x4c5   :  { %v7432_v43 = vmax.f32 %v14730_v44, %v7431_v4  ;;  %v7419_v19 = vsel %vm2927_vm1, %v6316_v56, -inf  ;;  %v7855_v35 = vsel %vm7799_vm11, %v7414_v18, %v7411_v28  ;;  %v4951_v30 = vrot.slane %v4937_v36, %v12625_v58 }
 0x4c6   :  { %v7420_v0 = vmax.f32 %v14887_v31, %v7419_v19  ;;  %v7856_v24 = vsel %vm7801_vm12, %v7417_v33, %v7855_v35  ;;  %v4952_v51 = vcombine.high %v4944_v13, %v4944_v13  ;;  %v6821_v61 = vsel %vm5448_vm10, %v4944_v13, -inf  ;;  %v17138_v35 = vld [vmem:[#allocation53_spill] sm:$0xff] }
 0x4c7   :  { %v4953_v46 = vcombine.high %v4951_v30, %v4951_v30  ;;  %v6822_v53 = vrot.slane %v6821_v61, 4  ;;  %v6835_v44 = vsel %vm5448_vm10, %v4951_v30, -inf  ;;  %v4934_v16 = vrot.slane %v4920_v10, %v12625_v58 }
 0x4c8   :  { %v7857_v21 = vsel %vm16701_vm13, %v7420_v0, %v7856_v24  ;;  %v6828_v12 = vsel %vm5448_vm10, %v4952_v51, -inf  ;;  %v6836_v38 = vrot.slane %v6835_v44, 4  ;;  %v4935_v5 = vcombine.high %v4927_v2, %v4927_v2 }
 0x4c9   :  { %v7858_v31 = vsel %vm7805_vm14, %v7423_v9, %v7857_v21  ;;  %v6823_v37 = vmax.f32 %v6821_v61, %v6822_v53  ;;  %v6829_v8 = vrot.slane %v6828_v12, 4  ;;  %v6842_v7 = vsel %vm5448_vm10, %v4953_v46, -inf  ;;  %v17139_v61 = vld [vmem:[#allocation52_spill] sm:$0xff]  ;;  %v14980_v21 = vpop.permute.xlu0 %8175 }
 0x4ca   :  { %vm17135_vm0 = vcmask 1045509   ;;  %v6837_v59 = vmax.f32 %v6835_v44, %v6836_v38  ;;  %v6843_v3 = vrot.slane %v6842_v7, 4  ;;  %v4936_v40 = vcombine.high %v4934_v16, %v4934_v16 }
 0x4cb   :  { %v7859_v14 = vsel %vm17135_vm0, %v7426_v17, %v7858_v31  ;;  %vm17136_vm15 = vcmask 1046534   ;;  %v6824_v22 = vrot.slane %v6823_v37, 2  ;;  %v6830_v27 = vmax.f32 %v6828_v12, %v6829_v8  ;;  %v17140_v12 = vld [vmem:[#allocation54_spill] sm:$0xff]  ;;  %v17141_v31 = vld [vmem:[#allocation63_spill] sm:$0xff]  ;;  %v10369_v8 = vpop.f32.mrf.mxu0  ;;  %vm17149_vm0 = vmmov %vm17132_vm2 }
 0x4cc   :  { %v7860_v29 = vsel %vm17136_vm15, %v7429_v11, %v7859_v14  ;;  %v6793_v4 = vsel %vm5448_vm10, %v4927_v2, -inf  ;;  %vm17137_vm3 = vcmask 1047559   ;;  %v6838_v9 = vrot.slane %v6837_v59, 2 }
 0x4cd   :  { %v7861_v39 = vsel %vm17137_vm3, %v7432_v43, %v7860_v29  ;;  %v6844_v28 = vmax.f32 %v6842_v7, %v6843_v3  ;;  %v6794_v23 = vrot.slane %v6793_v4, 4  ;;  %v6825_v25 = vmax.f32 %v6823_v37, %v6824_v22  ;;  %v14986_v7 = vpop.permute.xlu1 %8241  ;;  %v17142_v22 = vld [vmem:[#allocation55_spill] sm:$0xff] }
 0x4ce   :  { %7941 = vst.msk [vmem:[#allocation3 + $0xc8] sm:$0xff] %vm2927_vm1, %v7861_v39  ;;  %v6831_v56 = vrot.slane %v6830_v27, 2  ;;  %v6800_v18 = vsel %vm5448_vm10, %v4935_v5, -inf  ;;  %v6807_v11 = vsel %vm5448_vm10, %v4934_v16, -inf  ;;  %v6839_v33 = vmax.f32 %v6837_v59, %v6838_v9  ;;  %v17144_v39 = vld [vmem:[#allocation65_spill] sm:$0xff] }
 0x4cf   :  { %v6845_v36 = vrot.slane %v6844_v28, 2  ;;  %v6795_v17 = vmax.f32 %v6793_v4, %v6794_v23  ;;  %v6801_v13 = vrot.slane %v6800_v18, 4  ;;  %v6826_v10 = vrot.slane %v6825_v25, 1 }
 0x4d0   :  { %v6832_v2 = vmax.f32 %v6830_v27, %v6831_v56  ;;  %v6808_v43 = vrot.slane %v6807_v11, 4  ;;  %v6814_v19 = vsel %vm5448_vm10, %v4936_v40, -inf  ;;  %v3119_v30 = vsel %vm3057_vm4, %v14908_v48, %v17138_v35  ;;  %v17143_v27 = vld [vmem:[#allocation111_spill] sm:$0xff]  ;;  %v3817_v35 = vpop.f32.mrf.mxu0 }
 0x4d1   :  { %v6846_v0 = vmax.f32 %v6844_v28, %v6845_v36  ;;  %v6796_v24 = vrot.slane %v6795_v17, 2  ;;  %v6802_v51 = vmax.f32 %v6800_v18, %v6801_v13  ;;  %v3183_v46 = vsel %vm3122_vm5, %v14914_v52, %v17139_v61 }
 0x4d2   :  { %v6840_v53 = vrot.slane %v6839_v33, 1  ;;  %v6809_v44 = vmax.f32 %v6807_v11, %v6808_v43  ;;  %v6815_v16 = vrot.slane %v6814_v19, 4  ;;  %v3184_v38 = vsel %vm3122_vm5, %v3119_v30, %v17140_v12 }
 0x4d3   :  { %v6833_v5 = vrot.slane %v6832_v2, 1  ;;  %v3248_v37 = vsel %vm3187_vm6, %v3183_v46, %v17141_v31  ;;  %v6797_v48 = vmax.f32 %v6795_v17, %v6796_v24  ;;  %v6827_v14 = vmax.f32 %v6825_v25, %v6826_v10  ;;  %v17147_v25 = vld [vmem:[#allocation64_spill] sm:$0xff]  ;;  %v17148_v17 = vld [vmem:[#allocation11_spill] sm:$0xff] }
 0x4d4   :  { %v6847_v59 = vrot.slane %v6846_v0, 1  ;;  %v6803_v3 = vrot.slane %v6802_v51, 2  ;;  %v6816_v52 = vmax.f32 %v6814_v19, %v6815_v16  ;;  %v6810_v29 = vrot.slane %v6809_v44, 2  ;;  %v17150_v31 = vld [vmem:[#allocation56_spill] sm:$0xff] }
 0x4d5   :  { %v6798_v40 = vrot.slane %v6797_v48, 1  ;;  %v3055_v4 = vsel %vm17132_vm2, %v17143_v27, %v17142_v22  ;;  %v3249_v9 = vsel %vm3187_vm6, %v3184_v38, %v17144_v39  ;;  %v14993_v28 = vld [vmem:[#allocation3 + $0xc7] sm:$0xff]  ;;  %v6841_v11 = vmax.f32 %v6839_v33, %v6840_v53  ;;  %v15032_v53 = vpop.permute.xlu1 %8115 }
 0x4d6   :  { %v14995_v23 = vld [vmem:[#allocation3 + $0xc8] sm:$0xff]  ;;  %v3313_v36 = vsel %vm3252_vm7, %v3248_v37, %v17147_v25  ;;  %v3056_v13 = vsel %vm17149_vm0, %v17148_v17, %v14796_v45  ;;  %8253 = vrot.lane.b32.xlu0 %v14993_v28, %s10608_s25  ;;  %v15007_v10 = vmax.f32 %v6832_v2, %v6833_v5  ;;  %v6817_v43 = vrot.slane %v6816_v52, 2  ;;  %v15023_v2 = vpop.permute.xlu0 %8239 }
 0x4d7   :  { %17145 = vst [vmem:[#allocation66_spill] sm:$0xff] %v14995_v23  ;;  %8317 = vrot.lane.b32.xlu1 %v14995_v23, %s10610_s1  ;;  %v3120_v19 = vsel %vm3057_vm4, %v3055_v4, %v14789_v42  ;;  %v3378_v33 = vsel %vm3317_vm8, %v3313_v36, %v14806_v54  ;;  %v15013_v30 = vmax.f32 %v6846_v0, %v6847_v59  ;;  %v15016_v45 = vsel %vm2927_vm1, %v6827_v14, -inf }
 0x4d8   :  { %v15018_v24 = vmax.f32 %v6802_v51, %v6803_v3  ;;  %v3314_v61 = vsel %vm3252_vm7, %v3249_v9, %v14837_v15  ;;  %10409 = vmatprep.mubr.msk.f32.mxu1 %vm3394_vm9, %v3378_v33  ;;  %v15025_v46 = vmax.f32 %v6797_v48, %v6798_v40  ;;  %v15027_v42 = vmax.f32 %v6809_v44, %v6810_v29  ;;  %v7990_v48 = vld [vmem:[#allocation3 + $0xf9] sm:$0xff] }
 0x4d9   :  { %v3823_v54 = vadd.f32 %v14582_v26, %v10369_v8  ;;  %v3379_v0 = vsel %vm3317_vm8, %v3314_v61, %v14879_v60  ;;  %v15035_v51 = vsel %vm2927_vm1, %v6841_v11, -inf  ;;  %v3121_v15 = vsel %vm3057_vm4, %v3056_v13, %v14866_v62  ;;  %v7974_v62 = vld [vmem:[#allocation3 + $0xf8] sm:$0xff]  ;;  %v15076_v22 = vpop.permute.xlu1 %8367 }
 0x4da   :  { %v3185_v16 = vsel %vm3122_vm5, %v3120_v19, %v14844_v41  ;;  %v3818_v12 = vadd.f32 %v14582_v26, %v3817_v35  ;;  %10410 = vmatmul.mubr.msk.f32.gmra.mxu1 %vm3394_vm9, %v3379_v0  ;;  %8505 = vrot.lane.b32.xlu0 %v14671_v47, %s10614_s21  ;;  %v15045_v44 = vmax.f32 %v6816_v52, %v6817_v43  ;;  %v6805_v26 = vrot.slane %v15018_v24, 1 }
 0x4db   :  { %v4009_v60 = vmax.f32 %v3823_v54, 0.0  ;;  %v3186_v38 = vsel %vm3122_vm5, %v3121_v15, %v14870_v55  ;;  %v3250_v5 = vsel %vm3187_vm6, %v3185_v16, %v14903_v49  ;;  %8569 = vrot.lane.b32.xlu1 %v17150_v31, %s10615_s22  ;;  %v6812_v59 = vrot.slane %v15027_v42, 1 }
 0x4dc   :  { %v4008_v41 = vmax.f32 %v3818_v12, 0.0  ;;  %v3251_v37 = vsel %vm3187_vm6, %v3186_v38, %v14883_v34  ;;  %v3315_v47 = vsel %vm3252_vm7, %v3250_v5, %v14929_v6  ;;  %v15069_v6 = vpop.permute.xlu0 %8303  ;;  %v6819_v40 = vrot.slane %v15045_v44, 1 }
 0x4dd   :  { %v4665_v8 = vcombine.high %v4009_v60, %v4009_v60  ;;  %v4672_v55 = vrot.slane %v4009_v60, %v12625_v58  ;;  %v3316_v49 = vsel %vm3252_vm7, %v3251_v37, %v14910_v1  ;;  %v3380_v14 = vsel %vm3317_vm8, %v3315_v47, %v14949_v63 }
 0x4de   :  { %v4648_v3 = vcombine.high %v4008_v41, %v4008_v41  ;;  %v4655_v52 = vrot.slane %v4008_v41, %v12625_v58  ;;  %8127 = vrot.lane.b32.xlu0 %v7974_v62, %s10604_s10  ;;  %v3381_v34 = vsel %vm3317_vm8, %v3316_v49, %v14933_v20  ;;  %10412 = vmatprep.mubr.msk.f32.mxu1 %vm3394_vm9, %v3380_v14  ;;  %v15092_v41 = vpop.permute.xlu1 %8179  ;;  %vm8671_vm5 = vcmask 326656  }
 0x4df   :  { %v4679_v1 = vrot.slane %v4665_v8, %v12625_v58  ;;  %v4680_v29 = vcombine.high %v4672_v55, %v4672_v55  ;;  %v6373_v63 = vsel %vm5448_vm10, %v4672_v55, -inf  ;;  %10413 = vmatmul.mubr.msk.f32.gmra.mxu1 %vm3394_vm9, %v3381_v34  ;;  %8191 = vrot.lane.b32.xlu1 %v7990_v48, %s10606_s15  ;;  %vm17151_vm7 = vcmask 1045509   ;;  %vm17152_vm9 = vmmov %vm17136_vm15 }
 0x4e0   :  { %v6374_v27 = vrot.slane %v6373_v63, 4  ;;  %v4662_v20 = vrot.slane %v4648_v3, %v12625_v58  ;;  %v4663_v4 = vcombine.high %v4655_v52, %v4655_v52  ;;  %v6345_v39 = vsel %vm5448_vm10, %v4655_v52, -inf  ;;  %v15089_v60 = vpop.permute.xlu0 %8305  ;;  %vm17153_vm15 = vmmov %vm17137_vm3 }
 0x4e1   :  { %v4681_v9 = vcombine.high %v4679_v1, %v4679_v1  ;;  %v6380_v11 = vsel %vm5448_vm10, %v4680_v29, -inf  ;;  %v6387_v25 = vsel %vm5448_vm10, %v4679_v1, -inf  ;;  %v6346_v36 = vrot.slane %v6345_v39, 4 }
 0x4e2   :  { %v6375_v17 = vmax.f32 %v6373_v63, %v6374_v27  ;;  %v6381_v13 = vrot.slane %v6380_v11, 4  ;;  %v6388_v43 = vrot.slane %v6387_v25, 4  ;;  %v4664_v19 = vcombine.high %v4662_v20, %v4662_v20  ;;  %8379 = vrot.lane.b32.xlu0 %v17150_v31, %s10612_s14 }
 0x4e3   :  { %v6394_v33 = vsel %vm5448_vm10, %v4681_v9, -inf  ;;  %v6347_v35 = vmax.f32 %v6345_v39, %v6346_v36  ;;  %v6352_v61 = vsel %vm5448_vm10, %v4663_v4, -inf  ;;  %v6359_v54 = vsel %vm5448_vm10, %v4662_v20, -inf  ;;  %8443 = vrot.lane.b32.xlu1 %v14993_v28, %s10613_s20  ;;  %v10396_v4 = vpop.f32.mrf.mxu1 }
 0x4e4   :  { %v6376_v0 = vrot.slane %v6375_v17, 2  ;;  %v6382_v15 = vmax.f32 %v6380_v11, %v6381_v13  ;;  %v6389_v16 = vmax.f32 %v6387_v25, %v6388_v43  ;;  %v6395_v12 = vrot.slane %v6394_v33, 4  ;;  %v15097_v36 = vpop.permute.xlu0 %8117 }
 0x4e5   :  { %v6348_v38 = vrot.slane %v6347_v35, 2  ;;  %v6353_v5 = vrot.slane %v6352_v61, 4  ;;  %v6360_v62 = vrot.slane %v6359_v54, 4  ;;  %v6366_v31 = vsel %vm5448_vm10, %v4664_v19, -inf }
 0x4e6   :  { %v6377_v37 = vmax.f32 %v6375_v17, %v6376_v0  ;;  %v6383_v47 = vrot.slane %v6382_v15, 2  ;;  %v6390_v48 = vrot.slane %v6389_v16, 2  ;;  %v6396_v8 = vmax.f32 %v6394_v33, %v6395_v12  ;;  %v15102_v33 = vpop.permute.xlu1 %8431 }
 0x4e7   :  { %v6349_v55 = vmax.f32 %v6347_v35, %v6348_v38  ;;  %v6354_v49 = vmax.f32 %v6352_v61, %v6353_v5  ;;  %v6361_v28 = vmax.f32 %v6359_v54, %v6360_v62  ;;  %v6367_v14 = vrot.slane %v6366_v31, 4  ;;  %v15128_v62 = vld [vmem:[%s16684_s2] ss:$0 sm:$0xff] }
 0x4e8   :  { %v6378_v3 = vrot.slane %v6377_v37, 1  ;;  %v6384_v52 = vmax.f32 %v6382_v15, %v6383_v47  ;;  %v6391_v34 = vmax.f32 %v6389_v16, %v6390_v48  ;;  %v6397_v1 = vrot.slane %v6396_v8, 2  ;;  %v7950_v15 = vld [vmem:[#allocation3 + $0x7] sm:$0xff]  ;;  %v3907_v16 = vpop.f32.mrf.mxu1 }
 0x4e9   :  { %v6350_v29 = vrot.slane %v6349_v55, 1  ;;  %v6355_v63 = vrot.slane %v6354_v49, 2  ;;  %v6362_v27 = vrot.slane %v6361_v28, 2  ;;  %v6368_v20 = vmax.f32 %v6366_v31, %v6367_v14  ;;  %v7951_v14 = vld [vmem:[#allocation3 + $0x1f] sm:$0xff] }
 0x4ea   :  { %v6806_v39 = vmax.f32 %v15018_v24, %v6805_v26  ;;  %v6385_v9 = vrot.slane %v6384_v52, 1  ;;  %v6392_v11 = vrot.slane %v6391_v34, 1  ;;  %v6398_v25 = vmax.f32 %v6396_v8, %v6397_v1  ;;  %v15140_v8 = vpop.permute.xlu0 %8369 }
 0x4eb   :  { %v6813_v17 = vmax.f32 %v15027_v42, %v6812_v59  ;;  %v6356_v13 = vmax.f32 %v6354_v49, %v6355_v63  ;;  %v6363_v43 = vmax.f32 %v6361_v28, %v6362_v27  ;;  %v6369_v19 = vrot.slane %v6368_v20, 2 }
 0x4ec   :  { %v15106_v35 = vsel %vm2927_vm1, %v15007_v10, -inf  ;;  %v6820_v24 = vmax.f32 %v15045_v44, %v6819_v40  ;;  %v6379_v26 = vmax.f32 %v6377_v37, %v6378_v3  ;;  %v6399_v61 = vrot.slane %v6398_v25, 1 }
 0x4ed   :  { %v15113_v54 = vsel %vm2927_vm1, %v15013_v30, -inf  ;;  %v6386_v42 = vmax.f32 %v6384_v52, %v6385_v9  ;;  %v6351_v59 = vmax.f32 %v6349_v55, %v6350_v29  ;;  %v6370_v0 = vmax.f32 %v6368_v20, %v6369_v19  ;;  %v15148_v52 = vpop.permute.xlu1 %8243 }
 0x4ee   :  { %v15117_v12 = vsel %vm2927_vm1, %v15025_v46, -inf  ;;  %v15120_v10 = vsel %vm2927_vm1, %v6806_v39, -inf  ;;  %v6393_v38 = vmax.f32 %v6391_v34, %v6392_v11  ;;  %v6357_v44 = vrot.slane %v6356_v13, 1 }
 0x4ef   :  { %v15123_v40 = vsel %vm2927_vm1, %v6813_v17, -inf  ;;  %v6400_v5 = vmax.f32 %v6398_v25, %v6399_v61  ;;  %v6364_v30 = vrot.slane %v6363_v43, 1  ;;  %v3913_v31 = vadd.f32 %v15128_v62, %v10396_v4  ;;  %v15174_v61 = vpop.permute.xlu0 %8181 }
 0x4f0   :  { %v15132_v46 = vsel %vm2927_vm1, %v6820_v24, -inf  ;;  %v15135_v37 = vsel %vm2927_vm1, %v6379_v26, -inf  ;;  %v8607_v47 = vsel %vm2927_vm1, %v7950_v15, %v14965_v57  ;;  %v3908_v48 = vadd.f32 %v15128_v62, %v3907_v16 }
 0x4f1   :  { %v15143_v55 = vsel %vm2927_vm1, %v6386_v42, -inf  ;;  %v6371_v49 = vrot.slane %v6370_v0, 1  ;;  %v15146_v28 = vsel %vm2927_vm1, %v6351_v59, -inf  ;;  %v4027_v3 = vmax.f32 %v3913_v31, 0.0  ;;  %v15178_v15 = vpop.permute.xlu1 %8495 }
 0x4f2   :  { %v15151_v34 = vsel %vm2927_vm1, %v6393_v38, -inf  ;;  %v6358_v1 = vmax.f32 %v6356_v13, %v6357_v44  ;;  %v8608_v57 = vsel %vm2927_vm1, %v7951_v14, %v14954_v50  ;;  %v4026_v29 = vmax.f32 %v3908_v48, 0.0 }
 0x4f3   :  { %v15156_v63 = vsel %vm2927_vm1, %v6400_v5, -inf  ;;  %v15158_v27 = vmax.f32 %v6363_v43, %v6364_v30  ;;  %v4971_v20 = vcombine.high %v4027_v3, %v4027_v3  ;;  %v4978_v4 = vrot.slane %v4027_v3, %v12625_v58 }
 0x4f4   :  { %v15163_v39 = vsel %vm3057_vm4, %v8607_v47, %v14980_v21  ;;  %v4954_v9 = vcombine.high %v4026_v29, %v4026_v29  ;;  %v4961_v11 = vrot.slane %v4026_v29, %v12625_v58  ;;  %v8624_v25 = vsel %vm3057_vm4, %v8608_v57, %v14968_v32 }
 0x4f5   :  { %v15168_v50 = vmax.f32 %v6370_v0, %v6371_v49  ;;  %v4985_v17 = vrot.slane %v4971_v20, %v12625_v58  ;;  %v4986_v13 = vcombine.high %v4978_v4, %v4978_v4  ;;  %v6877_v43 = vsel %vm5448_vm10, %v4978_v4, -inf }
 0x4f6   :  { %v6878_v19 = vrot.slane %v6877_v43, 4  ;;  %v4968_v24 = vrot.slane %v4954_v9, %v12625_v58  ;;  %v4969_v26 = vcombine.high %v4961_v11, %v4961_v11  ;;  %v6849_v21 = vsel %vm5448_vm10, %v4961_v11, -inf }
 0x4f7   :  { %v4987_v42 = vcombine.high %v4985_v17, %v4985_v17  ;;  %v6884_v59 = vsel %vm5448_vm10, %v4986_v13, -inf  ;;  %v6891_v32 = vsel %vm5448_vm10, %v4985_v17, -inf  ;;  %v6850_v0 = vrot.slane %v6849_v21, 4 }
 0x4f8   :  { %v6879_v16 = vmax.f32 %v6877_v43, %v6878_v19  ;;  %v6885_v38 = vrot.slane %v6884_v59, 4  ;;  %v6892_v44 = vrot.slane %v6891_v32, 4  ;;  %v4970_v5 = vcombine.high %v4968_v24, %v4968_v24  ;;  %v15184_v19 = vpop.permute.xlu0 %8433 }
 0x4f9   :  { %v6898_v30 = vsel %vm5448_vm10, %v4987_v42, -inf  ;;  %v6851_v31 = vmax.f32 %v6849_v21, %v6850_v0  ;;  %v6856_v47 = vsel %vm5448_vm10, %v4969_v26, -inf  ;;  %v6863_v48 = vsel %vm5448_vm10, %v4968_v24, -inf  ;;  %v15186_v24 = vpop.permute.xlu1 %8307 }
 0x4fa   :  { %v6880_v49 = vrot.slane %v6879_v16, 2  ;;  %v6886_v14 = vmax.f32 %v6884_v59, %v6885_v38  ;;  %v6893_v3 = vmax.f32 %v6891_v32, %v6892_v44  ;;  %v6899_v57 = vrot.slane %v6898_v30, 4 }
 0x4fb   :  { %v6852_v29 = vrot.slane %v6851_v31, 2  ;;  %v6857_v20 = vrot.slane %v6856_v47, 4  ;;  %v6864_v4 = vrot.slane %v6863_v48, 4  ;;  %v6870_v9 = vsel %vm5448_vm10, %v4970_v5, -inf }
 0x4fc   :  { %v6881_v11 = vmax.f32 %v6879_v16, %v6880_v49  ;;  %v6887_v17 = vrot.slane %v6886_v14, 2  ;;  %v6894_v13 = vrot.slane %v6893_v3, 2  ;;  %v6900_v43 = vmax.f32 %v6898_v30, %v6899_v57 }
 0x4fd   :  { %v6853_v21 = vmax.f32 %v6851_v31, %v6852_v29  ;;  %v6858_v42 = vmax.f32 %v6856_v47, %v6857_v20  ;;  %v6865_v26 = vmax.f32 %v6863_v48, %v6864_v4  ;;  %v6871_v0 = vrot.slane %v6870_v9, 4  ;;  %v10372_v4 = vpop.f32.mrf.mxu0 }
 0x4fe   :  { %v6882_v59 = vrot.slane %v6881_v11, 1  ;;  %v6888_v32 = vmax.f32 %v6886_v14, %v6887_v17  ;;  %v6895_v38 = vmax.f32 %v6893_v3, %v6894_v13  ;;  %v6901_v44 = vrot.slane %v6900_v43, 2  ;;  %v7952_v13 = vld [vmem:[#allocation3 + $0x37] sm:$0xff] }
 0x4ff   :  { %v6854_v18 = vrot.slane %v6853_v21, 1  ;;  %v6859_v56 = vrot.slane %v6858_v42, 2  ;;  %v6866_v23 = vrot.slane %v6865_v26, 2  ;;  %v6872_v5 = vmax.f32 %v6870_v9, %v6871_v0  ;;  %v15200_v9 = vpop.permute.xlu0 %8245 }
 0x500   :  { %v15189_v16 = vsel %vm2927_vm1, %v6358_v1, -inf  ;;  %v6889_v30 = vrot.slane %v6888_v32, 1  ;;  %v6896_v49 = vrot.slane %v6895_v38, 1  ;;  %v6902_v57 = vmax.f32 %v6900_v43, %v6901_v44  ;;  %v15202_v43 = vpop.permute.xlu1 %8559 }
 0x501   :  { %v6855_v31 = vmax.f32 %v6853_v21, %v6854_v18  ;;  %v6860_v47 = vmax.f32 %v6858_v42, %v6859_v56  ;;  %v6867_v48 = vmax.f32 %v6865_v26, %v6866_v23  ;;  %v6873_v29 = vrot.slane %v6872_v5, 2 }
 0x502   :  { %v15193_v20 = vsel %vm2927_vm1, %v15158_v27, -inf  ;;  %v6903_v14 = vrot.slane %v6902_v57, 1  ;;  %v8639_v3 = vsel %vm3187_vm6, %v15163_v39, %v15023_v2  ;;  %v8640_v1 = vsel %vm3187_vm6, %v8624_v25, %v14986_v7 }
 0x503   :  { %v6883_v17 = vmax.f32 %v6881_v11, %v6882_v59  ;;  %v6861_v18 = vrot.slane %v6860_v47, 1  ;;  %v6868_v56 = vrot.slane %v6867_v48, 1  ;;  %v6874_v23 = vmax.f32 %v6872_v5, %v6873_v29 }
 0x504   :  { %v15206_v27 = vsel %vm2927_vm1, %v15168_v50, -inf  ;;  %v7530_v21 = vsel %vm2927_vm1, %v6855_v31, -inf  ;;  %v8655_v2 = vsel %vm3317_vm8, %v8639_v3, %v15069_v6  ;;  %v15213_v7 = vsel %vm2927_vm1, %v7952_v13, %v15032_v53  ;;  %v3827_v50 = vpop.f32.mrf.mxu0 }
 0x505   :  { %v6890_v39 = vmax.f32 %v6888_v32, %v6889_v30  ;;  %v6897_v25 = vmax.f32 %v6895_v38, %v6896_v49  ;;  %v6862_v11 = vmax.f32 %v6860_v47, %v6861_v18  ;;  %v6869_v42 = vmax.f32 %v6867_v48, %v6868_v56  ;;  %v15235_v48 = vpop.permute.xlu1 %8309 }
 0x506   :  { %v6904_v26 = vmax.f32 %v6902_v57, %v6903_v14  ;;  %v6875_v0 = vrot.slane %v6874_v23, 1  ;;  %v15217_v59 = vsel %vm3317_vm8, %v8640_v1, %v15089_v60  ;;  %v7542_v44 = vsel %vm2927_vm1, %v6883_v17, -inf  ;;  %v15226_v57 = vpop.permute.xlu0 %8497 }
 0x507   :  { %v7531_v6 = vmax.f32 %v15117_v12, %v7530_v21  ;;  %v7533_v5 = vsel %vm2927_vm1, %v6862_v11, -inf  ;;  %v7536_v53 = vsel %vm2927_vm1, %v6869_v42, -inf  ;;  %v3833_v49 = vadd.f32 %v15128_v62, %v10372_v4 }
 0x508   :  { %v6876_v32 = vmax.f32 %v6874_v23, %v6875_v0  ;;  %v7534_v38 = vmax.f32 %v15120_v10, %v7533_v5  ;;  %v7537_v30 = vmax.f32 %v15123_v40, %v7536_v53  ;;  %v7545_v60 = vsel %vm2927_vm1, %v6890_v39, -inf }
 0x509   :  { %v7548_v31 = vsel %vm2927_vm1, %v6897_v25, -inf  ;;  %v15232_v12 = vsel %vm8671_vm5, %v8655_v2, %v15076_v22  ;;  %v3828_v47 = vadd.f32 %v15128_v62, %v3827_v50  ;;  %v7551_v10 = vsel %vm2927_vm1, %v6904_v26, -inf  ;;  %v15256_v0 = vpop.permute.xlu1 %8561 }
 0x50a   :  { %v7539_v40 = vsel %vm2927_vm1, %v6876_v32, -inf  ;;  %v7890_v29 = vsel %vm7799_vm11, %v7534_v38, %v7531_v6  ;;  %v4011_v14 = vmax.f32 %v3833_v49, 0.0  ;;  %v7543_v3 = vmax.f32 %v15016_v45, %v7542_v44 }
 0x50b   :  { %v7540_v1 = vmax.f32 %v15132_v46, %v7539_v40  ;;  %v7891_v4 = vsel %vm7801_vm12, %v7537_v30, %v7890_v29  ;;  %v4010_v17 = vmax.f32 %v3828_v47, 0.0  ;;  %v7546_v22 = vmax.f32 %v15106_v35, %v7545_v60  ;;  %v15252_v35 = vpop.permute.xlu0 %8119 }
 0x50c   :  { %v7549_v18 = vmax.f32 %v15035_v51, %v7548_v31  ;;  %v4699_v56 = vcombine.high %v4011_v14, %v4011_v14  ;;  %v4706_v23 = vrot.slane %v4011_v14, %v12625_v58  ;;  %v7552_v13 = vmax.f32 %v15113_v54, %v7551_v10 }
 0x50d   :  { %v7892_v21 = vsel %vm16701_vm13, %v7540_v1, %v7891_v4  ;;  %v4682_v2 = vcombine.high %v4010_v17, %v4010_v17  ;;  %v4689_v39 = vrot.slane %v4010_v17, %v12625_v58  ;;  %vm8688_vm3 = vcmask 392192  }
 0x50e   :  { %v7893_v45 = vsel %vm7805_vm14, %v7543_v3, %v7892_v21  ;;  %v4713_v46 = vrot.slane %v4699_v56, %v12625_v58  ;;  %v4714_v25 = vcombine.high %v4706_v23, %v4706_v23  ;;  %v6429_v11 = vsel %vm5448_vm10, %v4706_v23, -inf  ;;  %v15270_v21 = vpop.permute.xlu1 %8183 }
 0x50f   :  { %v7894_v51 = vsel %vm17151_vm7, %v7546_v22, %v7893_v45  ;;  %v6430_v42 = vrot.slane %v6429_v11, 4  ;;  %v4696_v26 = vrot.slane %v4682_v2, %v12625_v58  ;;  %v4697_v54 = vcombine.high %v4689_v39, %v4689_v39  ;;  %v15268_v22 = vpop.permute.xlu0 %8371 }
 0x510   :  { %v7895_v50 = vsel %vm17152_vm9, %v7549_v18, %v7894_v51  ;;  %v4715_v44 = vcombine.high %v4713_v46, %v4713_v46  ;;  %v6436_v6 = vsel %vm5448_vm10, %v4714_v25, -inf  ;;  %v6443_v5 = vsel %vm5448_vm10, %v4713_v46, -inf }
 0x511   :  { %v7896_v53 = vsel %vm17153_vm15, %v7552_v13, %v7895_v50  ;;  %v6431_v32 = vmax.f32 %v6429_v11, %v6430_v42  ;;  %v6437_v38 = vrot.slane %v6436_v6, 4  ;;  %v6444_v30 = vrot.slane %v6443_v5, 4 }
 0x512   :  { %7946 = vst.msk [vmem:[#allocation3 + $0x170] sm:$0xff] %vm2927_vm1, %v7896_v53  ;;  %v6450_v49 = vsel %vm5448_vm10, %v4715_v44, -inf  ;;  %v4698_v60 = vcombine.high %v4696_v26, %v4696_v26  ;;  %v6401_v31 = vsel %vm5448_vm10, %v4689_v39, -inf  ;;  %v6408_v47 = vsel %vm5448_vm10, %v4697_v54, -inf }
 0x513   :  { %v6432_v10 = vrot.slane %v6431_v32, 2  ;;  %v6438_v40 = vmax.f32 %v6436_v6, %v6437_v38  ;;  %v6445_v29 = vmax.f32 %v6443_v5, %v6444_v30  ;;  %v6451_v14 = vrot.slane %v6450_v49, 4 }
 0x514   :  { %v6402_v3 = vrot.slane %v6401_v31, 4  ;;  %v6409_v1 = vrot.slane %v6408_v47, 4  ;;  %v6415_v4 = vsel %vm5448_vm10, %v4696_v26, -inf  ;;  %v6422_v17 = vsel %vm5448_vm10, %v4698_v60, -inf  ;;  %v15272_v60 = vpop.permute.xlu0 %8121 }
 0x515   :  { %v6433_v18 = vmax.f32 %v6431_v32, %v6432_v10  ;;  %v6439_v56 = vrot.slane %v6438_v40, 2  ;;  %v6446_v23 = vrot.slane %v6445_v29, 2  ;;  %v6452_v13 = vmax.f32 %v6450_v49, %v6451_v14 }
 0x516   :  { %v6403_v2 = vmax.f32 %v6401_v31, %v6402_v3  ;;  %v6410_v39 = vmax.f32 %v6408_v47, %v6409_v1  ;;  %v6416_v45 = vrot.slane %v6415_v4, 4  ;;  %v6423_v46 = vrot.slane %v6422_v17, 4 }
 0x517   :  { %v6434_v25 = vrot.slane %v6433_v18, 1  ;;  %v6440_v11 = vmax.f32 %v6438_v40, %v6439_v56  ;;  %v6447_v51 = vmax.f32 %v6445_v29, %v6446_v23  ;;  %v6453_v42 = vrot.slane %v6452_v13, 2  ;;  %v15274_v40 = vpop.permute.xlu1 %8435 }
 0x518   :  { %v6404_v54 = vrot.slane %v6403_v2, 2  ;;  %v6411_v26 = vrot.slane %v6410_v39, 2  ;;  %v6417_v50 = vmax.f32 %v6415_v4, %v6416_v45  ;;  %v6424_v44 = vmax.f32 %v6422_v17, %v6423_v46 }
 0x519   :  { %v6441_v6 = vrot.slane %v6440_v11, 1  ;;  %v6448_v5 = vrot.slane %v6447_v51, 1  ;;  %v6454_v53 = vmax.f32 %v6452_v13, %v6453_v42  ;;  %v6435_v31 = vmax.f32 %v6433_v18, %v6434_v25  ;;  %v10399_v18 = vpop.f32.mrf.mxu1  ;;  %v15292_v42 = vpop.permute.xlu0 %8373 }
 0x51a   :  { %v6405_v32 = vmax.f32 %v6403_v2, %v6404_v54  ;;  %v6412_v38 = vmax.f32 %v6410_v39, %v6411_v26  ;;  %v6418_v30 = vrot.slane %v6417_v50, 2  ;;  %v6425_v49 = vrot.slane %v6424_v44, 2 }
 0x51b   :  { %v6442_v47 = vmax.f32 %v6440_v11, %v6441_v6  ;;  %v6455_v10 = vrot.slane %v6454_v53, 1  ;;  %vm8705_vm2 = vcmask 457728   ;;  %v6449_v29 = vmax.f32 %v6447_v51, %v6448_v5 }
 0x51c   :  { %v6406_v14 = vrot.slane %v6405_v32, 1  ;;  %v6413_v3 = vrot.slane %v6412_v38, 1  ;;  %v6419_v1 = vmax.f32 %v6417_v50, %v6418_v30  ;;  %v6426_v17 = vmax.f32 %v6424_v44, %v6425_v49  ;;  %v3917_v50 = vpop.f32.mrf.mxu1  ;;  %v15296_v44 = vpop.permute.xlu1 %8247 }
 0x51d   :  { %v6456_v4 = vmax.f32 %v6454_v53, %v6455_v10  ;;  %v8673_v56 = vsel %vm8671_vm5, %v15217_v59, %v15140_v8  ;;  %v8689_v23 = vsel %vm8688_vm3, %v15232_v12, %v15102_v33  ;;  %v7446_v46 = vsel %vm2927_vm1, %v6435_v31, -inf }
 0x51e   :  { %v6407_v13 = vmax.f32 %v6405_v32, %v6406_v14  ;;  %v6414_v2 = vmax.f32 %v6412_v38, %v6413_v3  ;;  %v8690_v39 = vsel %vm8688_vm3, %v8673_v56, %v15184_v19  ;;  %v8706_v45 = vsel %vm8705_vm2, %v8689_v23, %v15178_v15 }
 0x51f   :  { %v7449_v25 = vsel %vm2927_vm1, %v6442_v47, -inf  ;;  %v6420_v11 = vrot.slane %v6419_v1, 1  ;;  %v6427_v51 = vrot.slane %v6426_v17, 1  ;;  %v7452_v8 = vsel %vm2927_vm1, %v6449_v29, -inf }
 0x520   :  { %v7455_v59 = vsel %vm2927_vm1, %v6456_v4, -inf  ;;  %v7434_v33 = vsel %vm2927_vm1, %v6407_v13, -inf  ;;  %v7437_v12 = vsel %vm2927_vm1, %v6414_v2, -inf  ;;  %v8707_v6 = vsel %vm8705_vm2, %v8690_v39, %v15226_v57  ;;  %v15331_v4 = vpop.permute.xlu1 %8499 }
 0x521   :  { %v6421_v19 = vmax.f32 %v6419_v1, %v6420_v11  ;;  %v6428_v54 = vmax.f32 %v6426_v17, %v6427_v51  ;;  %v7435_v15 = vmax.f32 %v15146_v28, %v7434_v33  ;;  %v7438_v26 = vmax.f32 %v15189_v16, %v7437_v12  ;;  %v7953_v16 = vld [vmem:[#allocation3 + $0x4f] sm:$0xff] }
 0x522   :  { %vm8722_vm0 = vcmask 523264   ;;  %v3923_v5 = vadd.f32 %v15128_v62, %v10399_v18  ;;  %vm8755_vm7 = vcmask 588800   ;;  %v3918_v57 = vadd.f32 %v15128_v62, %v3917_v50 }
 0x523   :  { %v7440_v53 = vsel %vm2927_vm1, %v6421_v19, -inf  ;;  %v7443_v32 = vsel %vm2927_vm1, %v6428_v54, -inf  ;;  %v7862_v38 = vsel %vm7799_vm11, %v7438_v26, %v7435_v15  ;;  %v8723_v28 = vsel %vm8722_vm0, %v8706_v45, %v15202_v43 }
 0x524   :  { %v7441_v30 = vmax.f32 %v15193_v20, %v7440_v53  ;;  %v7444_v49 = vmax.f32 %v15206_v27, %v7443_v32  ;;  %v4029_v31 = vmax.f32 %v3923_v5, 0.0  ;;  %10433 = vmatprep.mubr.msk.f32.mxu1 %vm8755_vm7, %v8723_v28  ;;  %v15312_v47 = vsel %vm2927_vm1, %v7953_v16, %v15097_v36  ;;  %v15325_v36 = vpop.permute.xlu0 %8185 }
 0x525   :  { %v15317_v10 = vsel %vm3057_vm4, %v15213_v7, %v15092_v41  ;;  %v7447_v43 = vmax.f32 %v15135_v37, %v7446_v46  ;;  %v8724_v20 = vsel %vm8722_vm0, %v8707_v6, %v15256_v0  ;;  %v4028_v3 = vmax.f32 %v3918_v57, 0.0  ;;  %v15348_v6 = vpop.permute.xlu1 %8311 }
 0x526   :  { %v7863_v27 = vsel %vm7801_vm12, %v7441_v30, %v7862_v38  ;;  %v5005_v29 = vcombine.high %v4029_v31, %v4029_v31  ;;  %v5012_v14 = vrot.slane %v4029_v31, %v12625_v58  ;;  %10434 = vmatmul.mubr.msk.f32.vlgmr.msra.gmra.mxu1 %vm8755_vm7, %v8724_v20  ;;  %v7450_v1 = vmax.f32 %v15143_v55, %v7449_v25 }
 0x527   :  { %v7453_v41 = vmax.f32 %v15151_v34, %v7452_v8  ;;  %v7456_v7 = vmax.f32 %v15156_v63, %v7455_v59  ;;  %v7864_v37 = vsel %vm16701_vm13, %v7444_v49, %v7863_v27  ;;  %vm17154_vm9 = vcmask 1045509  }
 0x528   :  { %v7865_v0 = vsel %vm7805_vm14, %v7447_v43, %v7864_v37  ;;  %v5019_v17 = vrot.slane %v5005_v29, %v12625_v58  ;;  %v5020_v56 = vcombine.high %v5012_v14, %v5012_v14  ;;  %v6933_v23 = vsel %vm5448_vm10, %v5012_v14, -inf  ;;  %v15346_v19 = vpop.permute.xlu0 %8437 }
 0x529   :  { %v7866_v18 = vsel %vm17154_vm9, %v7450_v1, %v7865_v0  ;;  %v6934_v13 = vrot.slane %v6933_v23, 4  ;;  %v4988_v2 = vcombine.high %v4028_v3, %v4028_v3  ;;  %v4995_v55 = vrot.slane %v4028_v3, %v12625_v58 }
 0x52a   :  { %vm17155_vm15 = vcmask 1046534   ;;  %v5021_v63 = vcombine.high %v5019_v17, %v5019_v17  ;;  %v6940_v39 = vsel %vm5448_vm10, %v5020_v56, -inf  ;;  %v6947_v45 = vsel %vm5448_vm10, %v5019_v17, -inf }
 0x52b   :  { %v7867_v34 = vsel %vm17155_vm15, %v7453_v41, %v7866_v18  ;;  %vm17156_vm13 = vcmask 1047559   ;;  %v6935_v25 = vmax.f32 %v6933_v23, %v6934_v13  ;;  %v6941_v11 = vrot.slane %v6940_v39, 4 }
 0x52c   :  { %v7868_v46 = vsel %vm17156_vm13, %v7456_v7, %v7867_v34  ;;  %v6948_v51 = vrot.slane %v6947_v45, 4  ;;  %v6954_v8 = vsel %vm5448_vm10, %v5021_v63, -inf  ;;  %v5002_v59 = vrot.slane %v4988_v2, %v12625_v58  ;;  %v15353_v0 = vpop.permute.xlu0 %8249 }
 0x52d   :  { %7942 = vst.msk [vmem:[#allocation3 + $0x110] sm:$0xff] %vm2927_vm1, %v7868_v46  ;;  %v5003_v33 = vcombine.high %v4995_v55, %v4995_v55  ;;  %v6905_v12 = vsel %vm5448_vm10, %v4995_v55, -inf  ;;  %v6936_v54 = vrot.slane %v6935_v25, 2  ;;  %v6942_v15 = vmax.f32 %v6940_v39, %v6941_v11  ;;  %v8564_v55 = vpop.permute.xlu1 %8563  ;;  %v10375_v46 = vpop.f32.mrf.mxu0 }
 0x52e   :  { %v6949_v26 = vmax.f32 %v6947_v45, %v6948_v51  ;;  %v6955_v50 = vrot.slane %v6954_v8, 4  ;;  %v5004_v5 = vcombine.high %v5002_v59, %v5002_v59  ;;  %v6906_v53 = vrot.slane %v6905_v12, 4 }
 0x52f   :  { %v6912_v32 = vsel %vm5448_vm10, %v5003_v33, -inf  ;;  %v6919_v38 = vsel %vm5448_vm10, %v5002_v59, -inf  ;;  %v6937_v28 = vmax.f32 %v6935_v25, %v6936_v54  ;;  %v6943_v16 = vrot.slane %v6942_v15, 2  ;;  %v17157_v25 = vld [vmem:[#allocation45_spill] sm:$0xff]  ;;  %v7954_v54 = vld [vmem:[#allocation3 + $0x67] sm:$0xff] }
 0x530   :  { %v6950_v30 = vrot.slane %v6949_v26, 2  ;;  %v6956_v49 = vmax.f32 %v6954_v8, %v6955_v50  ;;  %v6907_v31 = vmax.f32 %v6905_v12, %v6906_v53  ;;  %v6913_v57 = vrot.slane %v6912_v32, 4 }
 0x531   :  { %v6920_v43 = vrot.slane %v6919_v38, 4  ;;  %v6926_v20 = vsel %vm5448_vm10, %v5004_v5, -inf  ;;  %v6938_v27 = vrot.slane %v6937_v28, 1  ;;  %v6944_v29 = vmax.f32 %v6942_v15, %v6943_v16  ;;  %v15377_v16 = vpop.permute.xlu0 %8501 }
 0x532   :  { %v6951_v14 = vmax.f32 %v6949_v26, %v6950_v30  ;;  %v6957_v3 = vrot.slane %v6956_v49, 2  ;;  %v6908_v1 = vrot.slane %v6907_v31, 2  ;;  %v6914_v41 = vmax.f32 %v6912_v32, %v6913_v57 }
 0x533   :  { %v6921_v7 = vmax.f32 %v6919_v38, %v6920_v43  ;;  %v6927_v37 = vrot.slane %v6926_v20, 4  ;;  %v8626_v17 = vsel %vm3057_vm4, %v15312_v47, %v15174_v61  ;;  %v6945_v56 = vrot.slane %v6944_v29, 1  ;;  %v7955_v38 = vld [vmem:[#allocation3 + $0x7f] sm:$0xff] }
 0x534   :  { %v6952_v23 = vrot.slane %v6951_v14, 1  ;;  %v6958_v18 = vmax.f32 %v6956_v49, %v6957_v3  ;;  %v7975_v13 = vld [vmem:[#allocation3 + $0x110] sm:$0xff]  ;;  %v6909_v34 = vmax.f32 %v6907_v31, %v6908_v1  ;;  %v6915_v63 = vrot.slane %v6914_v41, 2  ;;  %v15388_v49 = vpop.permute.xlu1 %8313 }
 0x535   :  { %v8006_v2 = vld [vmem:[#allocation3 + $0x10f] sm:$0xff]  ;;  %v6922_v39 = vrot.slane %v6921_v7, 2  ;;  %v6928_v45 = vmax.f32 %v6926_v20, %v6927_v37  ;;  %8129 = vrot.lane.b32.xlu0 %v7975_v13, %s10604_s10  ;;  %v6651_v11 = vrot.slane %v17157_v25, 1  ;;  %v8641_v61 = vsel %vm3187_vm6, %v15317_v10, %v15148_v52 }
 0x536   :  { %8255 = vrot.lane.b32.xlu1 %v8006_v2, %s10608_s25  ;;  %v8642_v47 = vsel %vm3187_vm6, %v8626_v17, %v15200_v9  ;;  %v6959_v51 = vrot.slane %v6958_v18, 1  ;;  %v6939_v8 = vmax.f32 %v6937_v28, %v6938_v27  ;;  %v6946_v59 = vmax.f32 %v6944_v29, %v6945_v56  ;;  %v8037_v52 = vld [vmem:[#allocation3 + $0xc9] sm:$0xff]  ;;  %v3837_v28 = vpop.f32.mrf.mxu0  ;;  %v7991_v29 = vld [vmem:[#allocation3 + $0x111] sm:$0xff]  ;;  %v8054_v56 = vld [vmem:[#allocation3 + $0xdf] sm:$0xff] }
 0x537   :  { %v6916_v33 = vmax.f32 %v6914_v41, %v6915_v63  ;;  %v6923_v12 = vmax.f32 %v6921_v7, %v6922_v39  ;;  %v8657_v15 = vsel %vm3317_vm8, %v8641_v61, %v15186_v24  ;;  %v6953_v26 = vmax.f32 %v6951_v14, %v6952_v23  ;;  %v17158_v24 = vld [vmem:[#allocation66_spill] sm:$0xff] }
 0x538   :  { %v8611_v50 = vsel %vm2927_vm1, %v7954_v54, %v15252_v35  ;;  %v8658_v5 = vsel %vm3317_vm8, %v8642_v47, %v15235_v48  ;;  %v6960_v10 = vmax.f32 %v6958_v18, %v6959_v51  ;;  %v6910_v53 = vrot.slane %v6909_v34, 1 }
 0x539   :  { %v6929_v9 = vrot.slane %v6928_v45, 2  ;;  %v8674_v32 = vsel %vm8671_vm5, %v8657_v15, %v15268_v22  ;;  %8381 = vrot.lane.b32.xlu0 %v8037_v52, %s10612_s14  ;;  %v8612_v35 = vsel %vm2927_vm1, %v7955_v38, %v15272_v60  ;;  %v8627_v48 = vsel %vm3057_vm4, %v8611_v50, %v15270_v21 }
 0x53a   :  { %8507 = vrot.lane.b32.xlu1 %v17158_v24, %s10614_s21  ;;  %v15385_v30 = vsel %vm8671_vm5, %v8658_v5, %v15292_v42  ;;  %v3843_v22 = vadd.f32 %v15128_v62, %v10375_v46  ;;  %v15391_v31 = vsel %vm2927_vm1, %v6939_v8, -inf  ;;  %v15394_v57 = vsel %vm2927_vm1, %v6946_v59, -inf }
 0x53b   :  { %v6917_v43 = vrot.slane %v6916_v33, 1  ;;  %v6924_v20 = vrot.slane %v6923_v12, 1  ;;  %v15397_v60 = vsel %vm2927_vm1, %v6953_v26, -inf  ;;  %v8691_v21 = vsel %vm8688_vm3, %v8674_v32, %v15274_v40 }
 0x53c   :  { %v4013_v42 = vmax.f32 %v3843_v22, 0.0  ;;  %v3838_v27 = vadd.f32 %v15128_v62, %v3837_v28  ;;  %v15403_v14 = vsel %vm2927_vm1, %v6960_v10, -inf  ;;  %v6911_v3 = vmax.f32 %v6909_v34, %v6910_v53  ;;  %v15425_v34 = vpop.permute.xlu0 %8123 }
 0x53d   :  { %v15405_v1 = vmax.f32 %v6928_v45, %v6929_v9  ;;  %v15409_v41 = vsel %vm3057_vm4, %v8612_v35, %v15325_v36  ;;  %8193 = vrot.lane.b32.xlu0 %v7991_v29, %s10606_s15  ;;  %v8708_v17 = vsel %vm8705_vm2, %v8691_v21, %v15331_v4  ;;  %v15416_v23 = vmax.f32 %v6916_v33, %v6917_v43  ;;  %v15430_v4 = vpop.permute.xlu1 %8565 }
 0x53e   :  { %8319 = vrot.lane.b32.xlu1 %v7975_v13, %s10610_s1  ;;  %v4733_v7 = vcombine.high %v4013_v42, %v4013_v42  ;;  %v4740_v40 = vrot.slane %v4013_v42, %v12625_v58  ;;  %v4012_v37 = vmax.f32 %v3838_v27, 0.0  ;;  %v15418_v18 = vmax.f32 %v6923_v12, %v6924_v20 }
 0x53f   :  { %v15422_v36 = vsel %vm3187_vm6, %v8627_v48, %v15296_v44  ;;  %v8725_v2 = vsel %vm8722_vm0, %v8708_v17, %v8564_v55  ;;  %v6931_v46 = vrot.slane %v15405_v1, 1  ;;  %v15434_v61 = vsel %vm2927_vm1, %v6911_v3, -inf }
 0x540   :  { %v4747_v13 = vrot.slane %v4733_v7, %v12625_v58  ;;  %v4748_v63 = vcombine.high %v4740_v40, %v4740_v40  ;;  %v6485_v39 = vsel %vm5448_vm10, %v4740_v40, -inf  ;;  %v4716_v45 = vcombine.high %v4012_v37, %v4012_v37  ;;  %10436 = vmatprep.mubr.msk.f32.mxu1 %vm8755_vm7, %v8725_v2  ;;  %v15445_v38 = vpop.permute.xlu0 %8375 }
 0x541   :  { %v6486_v44 = vrot.slane %v6485_v39, 4  ;;  %v4723_v55 = vrot.slane %v4012_v37, %v12625_v58  ;;  %8445 = vrot.lane.b32.xlu0 %v8054_v56, %s10613_s20  ;;  %v15449_v22 = vpop.permute.xlu1 %8187  ;;  %v8692_v56 = vsel %vm8688_vm3, %v15385_v30, %v15346_v19  ;;  %v15457_v19 = vsel %vm2927_vm1, %v15416_v23, -inf }
 0x542   :  { %8571 = vrot.lane.b32.xlu1 %v8037_v52, %s10615_s22  ;;  %v4749_v47 = vcombine.high %v4747_v13, %v4747_v13  ;;  %v6492_v51 = vsel %vm5448_vm10, %v4748_v63, -inf  ;;  %v6499_v8 = vsel %vm5448_vm10, %v4747_v13, -inf  ;;  %v4730_v59 = vrot.slane %v4716_v45, %v12625_v58  ;;  %v10402_v45 = vpop.f32.mrf.mxu1 }
 0x543   :  { %v6487_v33 = vmax.f32 %v6485_v39, %v6486_v44  ;;  %v6493_v12 = vrot.slane %v6492_v51, 4  ;;  %v6500_v54 = vrot.slane %v6499_v8, 4  ;;  %v4731_v15 = vcombine.high %v4723_v55, %v4723_v55 }
 0x544   :  { %v6506_v26 = vsel %vm5448_vm10, %v4749_v47, -inf  ;;  %v4732_v50 = vcombine.high %v4730_v59, %v4730_v59  ;;  %v6457_v5 = vsel %vm5448_vm10, %v4723_v55, -inf  ;;  %v6471_v10 = vsel %vm5448_vm10, %v4730_v59, -inf }
 0x545   :  { %v6488_v53 = vrot.slane %v6487_v33, 2  ;;  %v6494_v52 = vmax.f32 %v6492_v51, %v6493_v12  ;;  %v6501_v9 = vmax.f32 %v6499_v8, %v6500_v54  ;;  %v6507_v32 = vrot.slane %v6506_v26, 4  ;;  %v8126_v8 = vpop.permute.xlu0 %8125 }
 0x546   :  { %v6458_v28 = vrot.slane %v6457_v5, 4  ;;  %v6464_v24 = vsel %vm5448_vm10, %v4731_v15, -inf  ;;  %v6472_v35 = vrot.slane %v6471_v10, 4  ;;  %v6478_v48 = vsel %vm5448_vm10, %v4732_v50, -inf  ;;  %v8440_v15 = vpop.permute.xlu1 %8439 }
 0x547   :  { %v6489_v43 = vmax.f32 %v6487_v33, %v6488_v53  ;;  %v6495_v20 = vrot.slane %v6494_v52, 2  ;;  %v6502_v21 = vrot.slane %v6501_v9, 2  ;;  %v6508_v42 = vmax.f32 %v6506_v26, %v6507_v32 }
 0x548   :  { %v6459_v27 = vmax.f32 %v6457_v5, %v6458_v28  ;;  %v6465_v29 = vrot.slane %v6464_v24, 4  ;;  %v6473_v3 = vmax.f32 %v6471_v10, %v6472_v35  ;;  %v6479_v7 = vrot.slane %v6478_v48, 4 }
 0x549   :  { %v6496_v40 = vmax.f32 %v6494_v52, %v6495_v20  ;;  %v6503_v37 = vmax.f32 %v6501_v9, %v6502_v21  ;;  %v6509_v17 = vrot.slane %v6508_v42, 2  ;;  %v6490_v44 = vrot.slane %v6489_v43, 1  ;;  %v3927_v9 = vpop.f32.mrf.mxu1 }
 0x54a   :  { %v6460_v2 = vrot.slane %v6459_v27, 2  ;;  %v6466_v13 = vmax.f32 %v6464_v24, %v6465_v29  ;;  %v6474_v63 = vrot.slane %v6473_v3, 2  ;;  %v6480_v39 = vmax.f32 %v6478_v48, %v6479_v7 }
 0x54b   :  { %v6497_v55 = vrot.slane %v6496_v40, 1  ;;  %v6504_v47 = vrot.slane %v6503_v37, 1  ;;  %v6510_v51 = vmax.f32 %v6508_v42, %v6509_v17  ;;  %v6932_v26 = vmax.f32 %v15405_v1, %v6931_v46 }
 0x54c   :  { %v6461_v59 = vmax.f32 %v6459_v27, %v6460_v2  ;;  %v6467_v33 = vrot.slane %v6466_v13, 2  ;;  %v6475_v12 = vmax.f32 %v6473_v3, %v6474_v63  ;;  %v6481_v54 = vrot.slane %v6480_v39, 2  ;;  %v7957_v3 = vld [vmem:[#allocation3 + $0xaf] sm:$0xff] }
 0x54d   :  { %v6511_v30 = vrot.slane %v6510_v51, 1  ;;  %v8709_v50 = vsel %vm8705_vm2, %v8692_v56, %v15377_v16  ;;  %v15463_v32 = vsel %vm2927_vm1, %v15418_v18, -inf  ;;  %v6491_v28 = vmax.f32 %v6489_v43, %v6490_v44 }
 0x54e   :  { %v6462_v5 = vrot.slane %v6461_v59, 1  ;;  %v6468_v10 = vmax.f32 %v6466_v13, %v6467_v33  ;;  %v6476_v53 = vrot.slane %v6475_v12, 1  ;;  %v6482_v52 = vmax.f32 %v6480_v39, %v6481_v54 }
 0x54f   :  { %v8644_v1 = vsel %vm3187_vm6, %v15409_v41, %v15353_v0  ;;  %v8726_v23 = vsel %vm8722_vm0, %v8709_v50, %v15430_v4  ;;  %v6498_v46 = vmax.f32 %v6496_v40, %v6497_v55  ;;  %v6505_v24 = vmax.f32 %v6503_v37, %v6504_v47  ;;  %v15483_v4 = vpop.permute.xlu0 %8377 }
 0x550   :  { %v6512_v16 = vmax.f32 %v6510_v51, %v6511_v30  ;;  %v8659_v35 = vsel %vm3317_vm8, %v15422_v36, %v15348_v6  ;;  %10437 = vmatmul.mubr.msk.f32.gmra.mxu1 %vm8755_vm7, %v8726_v23  ;;  %v15475_v18 = vsel %vm2927_vm1, %v6932_v26, -inf  ;;  %v15479_v48 = vsel %vm3317_vm8, %v8644_v1, %v15388_v49  ;;  %v15485_v6 = vpop.permute.xlu1 %8251 }
 0x551   :  { %v3933_v0 = vadd.f32 %v15128_v62, %v10402_v45  ;;  %v3928_v41 = vadd.f32 %v15128_v62, %v3927_v9  ;;  %v6463_v43 = vmax.f32 %v6461_v59, %v6462_v5  ;;  %v6469_v20 = vrot.slane %v6468_v10, 1 }
 0x552   :  { %v6477_v21 = vmax.f32 %v6475_v12, %v6476_v53  ;;  %v6483_v42 = vrot.slane %v6482_v52, 1  ;;  %v15488_v36 = vsel %vm2927_vm1, %v6491_v28, -inf  ;;  %v8676_v27 = vsel %vm8671_vm5, %v8659_v35, %v15445_v38 }
 0x553   :  { %v4031_v49 = vmax.f32 %v3933_v0, 0.0  ;;  %v4030_v29 = vmax.f32 %v3928_v41, 0.0  ;;  %v15493_v7 = vsel %vm2927_vm1, %v6498_v46, -inf  ;;  %v15496_v62 = vsel %vm2927_vm1, %v6505_v24, -inf }
 0x554   :  { %v15499_v40 = vsel %vm2927_vm1, %v6512_v16, -inf  ;;  %v15502_v37 = vsel %vm2927_vm1, %v7957_v3, %v8126_v8  ;;  %v15506_v13 = vmax.f32 %v6468_v10, %v6469_v20  ;;  %v15508_v63 = vmax.f32 %v6482_v52, %v6483_v42  ;;  %v15519_v8 = vpop.permute.xlu0 %8189  ;;  %v8504_v26 = vpop.permute.xlu1 %8503 }
 0x555   :  { %v5039_v17 = vcombine.high %v4031_v49, %v4031_v49  ;;  %v5046_v56 = vrot.slane %v4031_v49, %v12625_v58  ;;  %v5022_v2 = vcombine.high %v4030_v29, %v4030_v29  ;;  %v5029_v38 = vrot.slane %v4030_v29, %v12625_v58 }
 0x556   :  { %v15511_v39 = vsel %vm2927_vm1, %v6463_v43, -inf  ;;  %v15514_v45 = vsel %vm2927_vm1, %v6477_v21, -inf  ;;  %v8693_v54 = vsel %vm8688_vm3, %v8676_v27, %v8440_v15  ;;  %vm17159_vm13 = vcmask 1043459  }
 0x557   :  { %v5053_v44 = vrot.slane %v5039_v17, %v12625_v58  ;;  %v5054_v55 = vcombine.high %v5046_v56, %v5046_v56  ;;  %v6989_v47 = vsel %vm5448_vm10, %v5046_v56, -inf  ;;  %v5036_v51 = vrot.slane %v5022_v2, %v12625_v58 }
 0x558   :  { %v6990_v59 = vrot.slane %v6989_v47, 4  ;;  %v5037_v33 = vcombine.high %v5029_v38, %v5029_v38  ;;  %v6961_v12 = vsel %vm5448_vm10, %v5029_v38, -inf  ;;  %v15529_v42 = vpop.permute.xlu0 %8441  ;;  %v15531_v17 = vpop.permute.xlu1 %8315 }
 0x559   :  { %v5055_v30 = vcombine.high %v5053_v44, %v5053_v44  ;;  %v6996_v50 = vsel %vm5448_vm10, %v5054_v55, -inf  ;;  %v7003_v5 = vsel %vm5448_vm10, %v5053_v44, -inf  ;;  %v5038_v10 = vcombine.high %v5036_v51, %v5036_v51 }
 0x55a   :  { %v6991_v53 = vmax.f32 %v6989_v47, %v6990_v59  ;;  %v6997_v52 = vrot.slane %v6996_v50, 4  ;;  %v7004_v9 = vrot.slane %v7003_v5, 4  ;;  %v6962_v28 = vrot.slane %v6961_v12, 4 }
 0x55b   :  { %v7010_v1 = vsel %vm5448_vm10, %v5055_v30, -inf  ;;  %v6968_v23 = vsel %vm5448_vm10, %v5037_v33, -inf  ;;  %v6975_v46 = vsel %vm5448_vm10, %v5036_v51, -inf  ;;  %v6982_v24 = vsel %vm5448_vm10, %v5038_v10, -inf }
 0x55c   :  { %v6992_v15 = vrot.slane %v6991_v53, 2  ;;  %v6998_v16 = vmax.f32 %v6996_v50, %v6997_v52  ;;  %v7005_v35 = vmax.f32 %v7003_v5, %v7004_v9  ;;  %v7011_v0 = vrot.slane %v7010_v1, 4 }
 0x55d   :  { %v6963_v41 = vmax.f32 %v6961_v12, %v6962_v28  ;;  %v6969_v43 = vrot.slane %v6968_v23, 4  ;;  %v6976_v20 = vrot.slane %v6975_v46, 4  ;;  %v6983_v21 = vrot.slane %v6982_v24, 4 }
 0x55e   :  { %v6993_v27 = vmax.f32 %v6991_v53, %v6992_v15  ;;  %v6999_v49 = vrot.slane %v6998_v16, 2  ;;  %v7006_v29 = vrot.slane %v7005_v35, 2  ;;  %v7012_v3 = vmax.f32 %v7010_v1, %v7011_v0  ;;  %v8254_v0 = vpop.permute.xlu0 %8253 }
 0x55f   :  { %v6964_v56 = vrot.slane %v6963_v41, 2  ;;  %v6970_v2 = vmax.f32 %v6968_v23, %v6969_v43  ;;  %v6977_v38 = vmax.f32 %v6975_v46, %v6976_v20  ;;  %v6984_v44 = vmax.f32 %v6982_v24, %v6983_v21  ;;  %v8568_v43 = vpop.permute.xlu1 %8567 }
 0x560   :  { %v6994_v55 = vrot.slane %v6993_v27, 1  ;;  %v7000_v47 = vmax.f32 %v6998_v16, %v6999_v49  ;;  %v7007_v51 = vmax.f32 %v7005_v35, %v7006_v29  ;;  %v7013_v59 = vrot.slane %v7012_v3, 2  ;;  %v10378_v35 = vpop.f32.mrf.mxu0 }
 0x561   :  { %v6965_v33 = vmax.f32 %v6963_v41, %v6964_v56  ;;  %v6971_v12 = vrot.slane %v6970_v2, 2  ;;  %v6978_v30 = vrot.slane %v6977_v38, 2  ;;  %v6985_v50 = vrot.slane %v6984_v44, 2 }
 0x562   :  { %v6995_v5 = vmax.f32 %v6993_v27, %v6994_v55  ;;  %v7001_v10 = vrot.slane %v7000_v47, 1  ;;  %v7008_v53 = vrot.slane %v7007_v51, 1  ;;  %v7014_v52 = vmax.f32 %v7012_v3, %v7013_v59 }
 0x563   :  { %v6966_v9 = vrot.slane %v6965_v33, 1  ;;  %v6972_v28 = vmax.f32 %v6970_v2, %v6971_v12  ;;  %v6979_v1 = vmax.f32 %v6977_v38, %v6978_v30  ;;  %v6986_v15 = vmax.f32 %v6984_v44, %v6985_v50 }
 0x564   :  { %v7002_v23 = vmax.f32 %v7000_v47, %v7001_v10  ;;  %v7009_v46 = vmax.f32 %v7007_v51, %v7008_v53  ;;  %v7015_v24 = vrot.slane %v7014_v52, 1  ;;  %v7566_v16 = vsel %vm2927_vm1, %v6995_v5, -inf  ;;  %v8318_v53 = vpop.permute.xlu1 %8317 }
 0x565   :  { %v6967_v41 = vmax.f32 %v6965_v33, %v6966_v9  ;;  %v6973_v20 = vrot.slane %v6972_v28, 1  ;;  %v6980_v21 = vrot.slane %v6979_v1, 1  ;;  %v8630_v27 = vsel %vm3057_vm4, %v15502_v37, %v15519_v8  ;;  %v15546_v37 = vld [vmem:[%s16684_s2] ss:$0 sm:$0xff] }
 0x566   :  { %v7016_v49 = vmax.f32 %v7014_v52, %v7015_v24  ;;  %v6987_v29 = vrot.slane %v6986_v15, 1  ;;  %v8710_v3 = vsel %vm8705_vm2, %v8693_v54, %v8504_v26  ;;  %v8646_v56 = vsel %vm3187_vm6, %v8630_v27, %v8254_v0  ;;  %v3847_v54 = vpop.f32.mrf.mxu0 }
 0x567   :  { %v7567_v2 = vmax.f32 %v15391_v31, %v7566_v16  ;;  %v7569_v38 = vsel %vm2927_vm1, %v7002_v23, -inf  ;;  %v6974_v44 = vmax.f32 %v6972_v28, %v6973_v20  ;;  %v6981_v55 = vmax.f32 %v6979_v1, %v6980_v21 }
 0x568   :  { %v7572_v47 = vsel %vm2927_vm1, %v7009_v46, -inf  ;;  %v6988_v51 = vmax.f32 %v6986_v15, %v6987_v29  ;;  %v7554_v59 = vsel %vm2927_vm1, %v6967_v41, -inf  ;;  %v3853_v8 = vadd.f32 %v15546_v37, %v10378_v35 }
 0x569   :  { %v7575_v26 = vsel %vm2927_vm1, %v7016_v49, -inf  ;;  %v7555_v31 = vmax.f32 %v15434_v61, %v7554_v59  ;;  %v7557_v33 = vsel %vm2927_vm1, %v6974_v44, -inf  ;;  %v7560_v12 = vsel %vm2927_vm1, %v6981_v55, -inf }
 0x56a   :  { %v7558_v30 = vmax.f32 %v15457_v19, %v7557_v33  ;;  %v7561_v50 = vmax.f32 %v15463_v32, %v7560_v12  ;;  %v7563_v5 = vsel %vm2927_vm1, %v6988_v51, -inf  ;;  %v4015_v10 = vmax.f32 %v3853_v8, 0.0 }
 0x56b   :  { %v7570_v52 = vmax.f32 %v15394_v57, %v7569_v38  ;;  %v7564_v9 = vmax.f32 %v15475_v18, %v7563_v5  ;;  %v3848_v28 = vadd.f32 %v15546_v37, %v3847_v54  ;;  %v8727_v61 = vsel %vm8722_vm0, %v8710_v3, %v8568_v43 }
 0x56c   :  { %v7573_v1 = vmax.f32 %v15397_v60, %v7572_v47  ;;  %v7897_v15 = vsel %vm7799_vm11, %v7558_v30, %v7555_v31  ;;  %v4767_v0 = vcombine.high %v4015_v10, %v4015_v10  ;;  %v4774_v19 = vrot.slane %v4015_v10, %v12625_v58  ;;  %10439 = vmatprep.mubr.msk.f32.mxu1 %vm8755_vm7, %v8727_v61  ;;  %v8506_v61 = vpop.permute.xlu0 %8505 }
 0x56d   :  { %v7576_v32 = vmax.f32 %v15403_v14, %v7575_v26  ;;  %v7898_v23 = vsel %vm7801_vm12, %v7561_v50, %v7897_v15  ;;  %v4014_v57 = vmax.f32 %v3848_v28, 0.0  ;;  %v15567_v18 = vsel %vm3317_vm8, %v8646_v56, %v8318_v53 }
 0x56e   :  { %v7899_v46 = vsel %vm17159_vm13, %v7564_v9, %v7898_v23  ;;  %v4781_v24 = vrot.slane %v4767_v0, %v12625_v58  ;;  %v4782_v60 = vcombine.high %v4774_v19, %v4774_v19  ;;  %v6541_v16 = vsel %vm5448_vm10, %v4774_v19, -inf }
 0x56f   :  { %v7900_v35 = vsel %vm7805_vm14, %v7567_v2, %v7899_v46  ;;  %v6542_v43 = vrot.slane %v6541_v16, 4  ;;  %v4750_v41 = vcombine.high %v4014_v57, %v4014_v57  ;;  %v4757_v20 = vrot.slane %v4014_v57, %v12625_v58 }
 0x570   :  { %v7901_v14 = vsel %vm17154_vm9, %v7570_v52, %v7900_v35  ;;  %v4783_v21 = vcombine.high %v4781_v24, %v4781_v24  ;;  %v6548_v27 = vsel %vm5448_vm10, %v4782_v60, -inf  ;;  %v6555_v49 = vsel %vm5448_vm10, %v4781_v24, -inf }
 0x571   :  { %v7902_v29 = vsel %vm17155_vm15, %v7573_v1, %v7901_v14  ;;  %v6543_v3 = vmax.f32 %v6541_v16, %v6542_v43  ;;  %v6549_v56 = vrot.slane %v6548_v27, 4  ;;  %v6556_v38 = vrot.slane %v6555_v49, 4  ;;  %v8570_v43 = vpop.permute.xlu1 %8569 }
 0x572   :  { %vm17160_vm13 = vcmask 1047559   ;;  %v6562_v2 = vsel %vm5448_vm10, %v4783_v21, -inf  ;;  %v4764_v55 = vrot.slane %v4750_v41, %v12625_v58  ;;  %v4765_v47 = vcombine.high %v4757_v20, %v4757_v20 }
 0x573   :  { %v7903_v44 = vsel %vm17160_vm13, %v7576_v32, %v7902_v29  ;;  %v6544_v51 = vrot.slane %v6543_v3, 2  ;;  %v6550_v59 = vmax.f32 %v6548_v27, %v6549_v56  ;;  %v6557_v8 = vmax.f32 %v6555_v49, %v6556_v38  ;;  %v7958_v27 = vld [vmem:[#allocation3 + $0xf7] sm:$0xff]  ;;  %v10405_v38 = vpop.f32.mrf.mxu1 }
 0x574   :  { %7947 = vst.msk [vmem:[#allocation3 + $0x188] sm:$0xff] %vm2927_vm1, %v7903_v44  ;;  %v6563_v54 = vrot.slane %v6562_v2, 4  ;;  %v4766_v26 = vcombine.high %v4764_v55, %v4764_v55  ;;  %v6513_v31 = vsel %vm5448_vm10, %v4757_v20, -inf  ;;  %v6520_v33 = vsel %vm5448_vm10, %v4765_v47, -inf }
 0x575   :  { %v6527_v12 = vsel %vm5448_vm10, %v4764_v55, -inf  ;;  %v6545_v30 = vmax.f32 %v6543_v3, %v6544_v51  ;;  %v6551_v50 = vrot.slane %v6550_v59, 2  ;;  %v6558_v5 = vrot.slane %v6557_v8, 2  ;;  %v8128_v51 = vpop.permute.xlu0 %8127 }
 0x576   :  { %v6564_v10 = vmax.f32 %v6562_v2, %v6563_v54  ;;  %v6514_v53 = vrot.slane %v6513_v31, 4  ;;  %v6521_v52 = vrot.slane %v6520_v33, 4  ;;  %v6528_v9 = vrot.slane %v6527_v12, 4 }
 0x577   :  { %v6534_v28 = vsel %vm5448_vm10, %v4766_v26, -inf  ;;  %v6546_v1 = vrot.slane %v6545_v30, 1  ;;  %v6552_v15 = vmax.f32 %v6550_v59, %v6551_v50  ;;  %v6559_v0 = vmax.f32 %v6557_v8, %v6558_v5  ;;  %v8192_v50 = vpop.permute.xlu1 %8191  ;;  %v3937_v5 = vpop.f32.mrf.mxu1 }
 0x578   :  { %v6565_v19 = vrot.slane %v6564_v10, 2  ;;  %v6515_v32 = vmax.f32 %v6513_v31, %v6514_v53  ;;  %v6522_v23 = vmax.f32 %v6520_v33, %v6521_v52  ;;  %v6529_v57 = vmax.f32 %v6527_v12, %v6528_v9 }
 0x579   :  { %v6535_v46 = vrot.slane %v6534_v28, 4  ;;  %v6547_v24 = vmax.f32 %v6545_v30, %v6546_v1  ;;  %v6553_v60 = vrot.slane %v6552_v15, 1  ;;  %v6560_v16 = vrot.slane %v6559_v0, 1 }
 0x57a   :  { %v6566_v35 = vmax.f32 %v6564_v10, %v6565_v19  ;;  %v6516_v41 = vrot.slane %v6515_v32, 2  ;;  %v6523_v20 = vrot.slane %v6522_v23, 2  ;;  %v6530_v14 = vrot.slane %v6529_v57, 2 }
 0x57b   :  { %v6536_v21 = vmax.f32 %v6534_v28, %v6535_v46  ;;  %v7460_v49 = vsel %vm2927_vm1, %v15506_v13, -inf  ;;  %v7466_v29 = vsel %vm2927_vm1, %v15508_v63, -inf  ;;  %v8677_v3 = vsel %vm8671_vm5, %v15479_v48, %v15483_v4 }
 0x57c   :  { %v6567_v56 = vrot.slane %v6566_v35, 1  ;;  %v7470_v44 = vsel %vm2927_vm1, %v6547_v24, -inf  ;;  %v6517_v2 = vmax.f32 %v6515_v32, %v6516_v41  ;;  %v6524_v55 = vmax.f32 %v6522_v23, %v6523_v20 }
 0x57d   :  { %v6531_v47 = vmax.f32 %v6529_v57, %v6530_v14  ;;  %v8694_v59 = vsel %vm8688_vm3, %v8677_v3, %v15529_v42  ;;  %v6554_v8 = vmax.f32 %v6552_v15, %v6553_v60  ;;  %v6537_v13 = vrot.slane %v6536_v21, 2 }
 0x57e   :  { %v8615_v54 = vsel %vm2927_vm1, %v7958_v27, %v8128_v51  ;;  %v6561_v63 = vmax.f32 %v6559_v0, %v6560_v16  ;;  %v6518_v26 = vrot.slane %v6517_v2, 1  ;;  %v6525_v31 = vrot.slane %v6524_v55, 1 }
 0x57f   :  { %v8711_v48 = vsel %vm8705_vm2, %v8694_v59, %v8506_v61  ;;  %v7471_v4 = vmax.f32 %v15488_v36, %v7470_v44  ;;  %v6532_v33 = vrot.slane %v6531_v47, 1  ;;  %v6538_v12 = vmax.f32 %v6536_v21, %v6537_v13 }
 0x580   :  { %v8728_v30 = vsel %vm8722_vm0, %v8711_v48, %v8570_v43  ;;  %v6568_v10 = vmax.f32 %v6566_v35, %v6567_v56  ;;  %v6519_v53 = vmax.f32 %v6517_v2, %v6518_v26  ;;  %v6526_v42 = vmax.f32 %v6524_v55, %v6525_v31  ;;  %v10381_v43 = vpop.f32.mrf.mxu0 }
 0x581   :  { %10440 = vmatmul.mubr.msk.f32.gmra.mxu1 %vm8755_vm7, %v8728_v30  ;;  %v15602_v52 = vsel %vm3057_vm4, %v8615_v54, %v8192_v50  ;;  %v7473_v9 = vsel %vm2927_vm1, %v6554_v8, -inf  ;;  %v6533_v28 = vmax.f32 %v6531_v47, %v6532_v33  ;;  %v6539_v61 = vrot.slane %v6538_v12, 1 }
 0x582   :  { %v3943_v36 = vadd.f32 %v15546_v37, %v10405_v38  ;;  %v7476_v1 = vsel %vm2927_vm1, %v6561_v63, -inf  ;;  %v7458_v15 = vsel %vm2927_vm1, %v6519_v53, -inf  ;;  %v7461_v0 = vsel %vm2927_vm1, %v6526_v42, -inf  ;;  %v17165_v42 = vld [vmem:[#allocation40_spill] sm:$0xff] }
 0x583   :  { %v3938_v19 = vadd.f32 %v15546_v37, %v3937_v5  ;;  %v6540_v32 = vmax.f32 %v6538_v12, %v6539_v61  ;;  %v7459_v23 = vmax.f32 %v15511_v39, %v7458_v15  ;;  %v7462_v57 = vmax.f32 %v7460_v49, %v7461_v0 }
 0x584   :  { %v7464_v46 = vsel %vm2927_vm1, %v6533_v28, -inf  ;;  %v7479_v24 = vsel %vm2927_vm1, %v6568_v10, -inf  ;;  %v4033_v16 = vmax.f32 %v3943_v36, 0.0  ;;  %v7474_v41 = vmax.f32 %v15493_v7, %v7473_v9 }
 0x585   :  { %v7465_v60 = vmax.f32 %v15514_v45, %v7464_v46  ;;  %v4032_v35 = vmax.f32 %v3938_v19, 0.0  ;;  %v7477_v20 = vmax.f32 %v15496_v62, %v7476_v1  ;;  %v7467_v14 = vsel %vm2927_vm1, %v6540_v32, -inf  ;;  %v7956_v46 = vld [vmem:[#allocation3 + $0x97] sm:$0xff] }
 0x586   :  { %v7869_v21 = vsel %vm7799_vm11, %v7462_v57, %v7459_v23  ;;  %v7468_v27 = vmax.f32 %v7466_v29, %v7467_v14  ;;  %v5073_v49 = vcombine.high %v4033_v16, %v4033_v16  ;;  %v5080_v3 = vrot.slane %v4033_v16, %v12625_v58  ;;  %v17167_v23 = vld [vmem:[#allocation46_spill] sm:$0xff] }
 0x587   :  { %v7870_v39 = vsel %vm7801_vm12, %v7465_v60, %v7869_v21  ;;  %v7480_v56 = vmax.f32 %v15499_v40, %v7479_v24  ;;  %v5056_v45 = vcombine.high %v4032_v35, %v4032_v35  ;;  %v5063_v38 = vrot.slane %v4032_v35, %v12625_v58  ;;  %v17168_v35 = vld [vmem:[#allocation43_spill] sm:$0xff] }
 0x588   :  { %v3863_v44 = vadd.f32 %v15546_v37, %v10381_v43  ;;  %vm17161_vm9 = vcmask 1043459   ;;  %v5087_v62 = vrot.slane %v5073_v49, %v12625_v58  ;;  %v5088_v2 = vcombine.high %v5080_v3, %v5080_v3 }
 0x589   :  { %v7871_v7 = vsel %vm17161_vm9, %v7468_v27, %v7870_v39  ;;  %v7045_v55 = vsel %vm5448_vm10, %v5080_v3, -inf  ;;  %v5070_v51 = vrot.slane %v5056_v45, %v12625_v58  ;;  %v5071_v59 = vcombine.high %v5063_v38, %v5063_v38 }
 0x58a   :  { %v7872_v29 = vsel %vm7805_vm14, %v7471_v4, %v7871_v7  ;;  %v7046_v47 = vrot.slane %v7045_v55, 4  ;;  %vm17162_vm15 = vcmask 1045509   ;;  %v5089_v8 = vcombine.high %v5087_v62, %v5087_v62 }
 0x58b   :  { %v7873_v40 = vsel %vm17162_vm15, %v7474_v41, %v7872_v29  ;;  %v7052_v13 = vsel %vm5448_vm10, %v5088_v2, -inf  ;;  %v7059_v54 = vsel %vm5448_vm10, %v5087_v62, -inf  ;;  %vm17163_vm13 = vcmask 1046534  }
 0x58c   :  { %v7874_v63 = vsel %vm17163_vm13, %v7477_v20, %v7873_v40  ;;  %v7047_v26 = vmax.f32 %v7045_v55, %v7046_v47  ;;  %v7053_v31 = vrot.slane %v7052_v13, 4  ;;  %v7060_v48 = vrot.slane %v7059_v54, 4  ;;  %v3857_v55 = vpop.f32.mrf.mxu0 }
 0x58d   :  { %vm17164_vm9 = vcmask 1047559   ;;  %v7066_v4 = vsel %vm5448_vm10, %v5089_v8, -inf  ;;  %v5072_v12 = vcombine.high %v5070_v51, %v5070_v51  ;;  %v7017_v30 = vsel %vm5448_vm10, %v5063_v38, -inf }
 0x58e   :  { %v7875_v33 = vsel %vm17164_vm9, %v7480_v56, %v7874_v63  ;;  %v7048_v50 = vrot.slane %v7047_v26, 2  ;;  %v7054_v5 = vmax.f32 %v7052_v13, %v7053_v31  ;;  %v7061_v10 = vmax.f32 %v7059_v54, %v7060_v48  ;;  %v17170_v56 = vld [vmem:[#allocation49_spill] sm:$0xff]  ;;  %v8086_v31 = vld [vmem:[#allocation3 + $0xe1] sm:$0xff] }
 0x58f   :  { %7943 = vst.msk [vmem:[#allocation3 + $0x128] sm:$0xff] %vm2927_vm1, %v7875_v33  ;;  %v7067_v53 = vrot.slane %v7066_v4, 4  ;;  %v17166_v9 = vrot.slane %v17165_v42, 1  ;;  %v7018_v61 = vrot.slane %v7017_v30, 4  ;;  %v7024_v36 = vsel %vm5448_vm10, %v5071_v59, -inf }
 0x590   :  { %v4017_v1 = vmax.f32 %v3863_v44, 0.0  ;;  %v7055_v15 = vrot.slane %v7054_v5, 2  ;;  %v7062_v0 = vrot.slane %v7061_v10, 2  ;;  %v7031_v19 = vsel %vm5448_vm10, %v5070_v51, -inf }
 0x591   :  { %v6645_v28 = vmax.f32 %v17165_v42, %v17166_v9  ;;  %v7038_v32 = vsel %vm5448_vm10, %v5072_v12, -inf  ;;  %v15644_v57 = vsel %vm2927_vm1, %v17167_v23, -inf  ;;  %v7049_v24 = vmax.f32 %v7047_v26, %v7048_v50  ;;  %v8070_v26 = vld [vmem:[#allocation3 + $0xe0] sm:$0xff] }
 0x592   :  { %v7068_v60 = vmax.f32 %v7066_v4, %v7067_v53  ;;  %v7019_v16 = vmax.f32 %v7017_v30, %v7018_v61  ;;  %v17169_v43 = vrot.slane %v17168_v35, 1  ;;  %v6652_v20 = vmax.f32 %v17157_v25, %v6651_v11  ;;  %v8380_v11 = vpop.permute.xlu0 %8379 }
 0x593   :  { %v8613_v14 = vsel %vm2927_vm1, %v7956_v46, %v15425_v34  ;;  %v7025_v21 = vrot.slane %v7024_v36, 4  ;;  %v7056_v27 = vmax.f32 %v7054_v5, %v7055_v15  ;;  %v7063_v39 = vmax.f32 %v7061_v10, %v7062_v0 }
 0x594   :  { %v6638_v41 = vmax.f32 %v17168_v35, %v17169_v43  ;;  %v7032_v49 = vrot.slane %v7031_v19, 4  ;;  %v7039_v3 = vrot.slane %v7038_v32, 4  ;;  %v15656_v45 = vsel %vm2927_vm1, %v17170_v56, -inf }
 0x595   :  { %v15659_v38 = vsel %vm2927_vm1, %v6645_v28, -inf  ;;  %v8629_v44 = vsel %vm3057_vm4, %v8613_v14, %v15449_v22  ;;  %v4801_v7 = vcombine.high %v4017_v1, %v4017_v1  ;;  %v7050_v34 = vrot.slane %v7049_v24, 1 }
 0x596   :  { %v8645_v25 = vsel %vm3187_vm6, %v8629_v44, %v15485_v6  ;;  %v7069_v62 = vrot.slane %v7068_v60, 2  ;;  %v7020_v2 = vrot.slane %v7019_v16, 2  ;;  %v15665_v29 = vld [vmem:[#allocation3 + $0x127] sm:$0xff]  ;;  %v15670_v51 = vsel %vm2927_vm1, %v6638_v41, -inf  ;;  %v10408_v6 = vpop.f32.mrf.mxu1 }
 0x597   :  { %v15667_v47 = vld [vmem:[#allocation3 + $0x128] sm:$0xff]  ;;  %v8661_v59 = vsel %vm3317_vm8, %v8645_v25, %v15531_v17  ;;  %v7026_v22 = vmax.f32 %v7024_v36, %v7025_v21  ;;  %v4808_v40 = vrot.slane %v4017_v1, %v12625_v58  ;;  %8257 = vrot.lane.b32.xlu0 %v15665_v29, %s10608_s25  ;;  %v7057_v8 = vrot.slane %v7056_v27, 1 }
 0x598   :  { %8321 = vrot.lane.b32.xlu1 %v15667_v47, %s10610_s1  ;;  %v7064_v13 = vrot.slane %v7063_v39, 1  ;;  %v7033_v54 = vmax.f32 %v7031_v19, %v7032_v49  ;;  %v7040_v63 = vmax.f32 %v7038_v32, %v7039_v3  ;;  %v15680_v48 = vsel %vm2927_vm1, %v6652_v20, -inf }
 0x599   :  { %v15683_v17 = vsel %vm8671_vm5, %v8661_v59, %v8380_v11  ;;  %v4815_v33 = vrot.slane %v4801_v7, %v12625_v58  ;;  %v3858_v4 = vadd.f32 %v15546_v37, %v3857_v55  ;;  %v7051_v12 = vmax.f32 %v7049_v24, %v7050_v34 }
 0x59a   :  { %v7070_v30 = vmax.f32 %v7068_v60, %v7069_v62  ;;  %v7021_v50 = vmax.f32 %v7019_v16, %v7020_v2  ;;  %v3953_v5 = vadd.f32 %v15546_v37, %v10408_v6  ;;  %v7027_v10 = vrot.slane %v7026_v22, 2  ;;  %v15697_v16 = vld [vmem:[#allocation3 + $0x129] sm:$0xff]  ;;  %v8038_v62 = vld [vmem:[#allocation3 + $0x111] sm:$0xff] }
 0x59b   :  { %v4816_v53 = vcombine.high %v4808_v40, %v4808_v40  ;;  %v4817_v42 = vcombine.high %v4815_v33, %v4815_v33  ;;  %v6597_v9 = vsel %vm5448_vm10, %v4808_v40, -inf  ;;  %8509 = vrot.lane.b32.xlu0 %v8070_v26, %s10614_s21  ;;  %v7058_v28 = vmax.f32 %v7056_v27, %v7057_v8 }
 0x59c   :  { %8573 = vrot.lane.b32.xlu1 %v8086_v31, %s10615_s22  ;;  %v7065_v61 = vmax.f32 %v7063_v39, %v7064_v13  ;;  %v7034_v36 = vrot.slane %v7033_v54, 2  ;;  %v7041_v1 = vrot.slane %v7040_v63, 2  ;;  %v6598_v15 = vrot.slane %v6597_v9, 4 }
 0x59d   :  { %v6604_v0 = vsel %vm5448_vm10, %v4816_v53, -inf  ;;  %v6611_v19 = vsel %vm5448_vm10, %v4815_v33, -inf  ;;  %v6618_v32 = vsel %vm5448_vm10, %v4817_v42, -inf  ;;  %v7071_v23 = vrot.slane %v7070_v30, 1 }
 0x59e   :  { %v15695_v46 = vsel %vm2927_vm1, %v7051_v12, -inf  ;;  %v7022_v24 = vrot.slane %v7021_v50, 1  ;;  %v6605_v60 = vrot.slane %v6604_v0, 4  ;;  %v6599_v35 = vmax.f32 %v6597_v9, %v6598_v15 }
 0x59f   :  { %v6612_v43 = vrot.slane %v6611_v19, 4  ;;  %v6619_v41 = vrot.slane %v6618_v32, 4  ;;  %v4016_v20 = vmax.f32 %v3858_v4, 0.0  ;;  %8131 = vrot.lane.b32.xlu0 %v15667_v47, %s10604_s10  ;;  %v7028_v14 = vmax.f32 %v7026_v22, %v7027_v10 }
 0x5a0   :  { %8195 = vrot.lane.b32.xlu1 %v15697_v16, %s10606_s15  ;;  %v7035_v21 = vmax.f32 %v7033_v54, %v7034_v36  ;;  %v6606_v27 = vmax.f32 %v6604_v0, %v6605_v60  ;;  %v4035_v39 = vmax.f32 %v3953_v5, 0.0  ;;  %v6600_v49 = vrot.slane %v6599_v35, 2 }
 0x5a1   :  { %v6613_v3 = vmax.f32 %v6611_v19, %v6612_v43  ;;  %v6620_v56 = vmax.f32 %v6618_v32, %v6619_v41  ;;  %v4784_v44 = vcombine.high %v4016_v20, %v4016_v20  ;;  %v7072_v7 = vmax.f32 %v7070_v30, %v7071_v23 }
 0x5a2   :  { %v15704_v25 = vsel %vm2927_vm1, %v7058_v28, -inf  ;;  %v15706_v11 = vmax.f32 %v7040_v63, %v7041_v1  ;;  %v4791_v34 = vrot.slane %v4016_v20, %v12625_v58  ;;  %v15710_v2 = vsel %vm2927_vm1, %v7065_v61, -inf  ;;  %v3947_v61 = vpop.f32.mrf.mxu1 }
 0x5a3   :  { %v15712_v55 = vmax.f32 %v7021_v50, %v7022_v24  ;;  %v6607_v59 = vrot.slane %v6606_v27, 2  ;;  %v4798_v22 = vrot.slane %v4784_v44, %v12625_v58  ;;  %8383 = vrot.lane.b32.xlu0 %v8038_v62, %s10612_s14  ;;  %v6601_v40 = vmax.f32 %v6599_v35, %v6600_v49 }
 0x5a4   :  { %8447 = vrot.lane.b32.xlu1 %v15665_v29, %s10613_s20  ;;  %v6614_v6 = vrot.slane %v6613_v3, 2  ;;  %v4799_v8 = vcombine.high %v4791_v34, %v4791_v34  ;;  %v6569_v13 = vsel %vm5448_vm10, %v4791_v34, -inf  ;;  %v7029_v54 = vrot.slane %v7028_v14, 1 }
 0x5a5   :  { %v7036_v63 = vrot.slane %v7035_v21, 1  ;;  %v6621_v26 = vrot.slane %v6620_v56, 2  ;;  %v5107_v31 = vcombine.high %v4035_v39, %v4035_v39  ;;  %v4800_v33 = vcombine.high %v4798_v22, %v4798_v22 }
 0x5a6   :  { %v6570_v4 = vrot.slane %v6569_v13, 4  ;;  %v6576_v12 = vsel %vm5448_vm10, %v4799_v8, -inf  ;;  %v6583_v30 = vsel %vm5448_vm10, %v4798_v22, -inf  ;;  %v15722_v50 = vsel %vm2927_vm1, %v7072_v7, -inf }
 0x5a7   :  { %v7043_v29 = vrot.slane %v15706_v11, 1  ;;  %v6608_v5 = vmax.f32 %v6606_v27, %v6607_v59  ;;  %v6577_v10 = vrot.slane %v6576_v12, 4  ;;  %v6602_v53 = vrot.slane %v6601_v40, 1 }
 0x5a8   :  { %v6615_v42 = vmax.f32 %v6613_v3, %v6614_v6  ;;  %v6571_v9 = vmax.f32 %v6569_v13, %v6570_v4  ;;  %v6584_v28 = vrot.slane %v6583_v30, 4  ;;  %v15725_v36 = vmax.f32 %v7028_v14, %v7029_v54 }
 0x5a9   :  { %v6622_v1 = vmax.f32 %v6620_v56, %v6621_v26  ;;  %v6578_v15 = vmax.f32 %v6576_v12, %v6577_v10  ;;  %v5114_v0 = vrot.slane %v4035_v39, %v12625_v58  ;;  %v6590_v23 = vsel %vm5448_vm10, %v4800_v33, -inf }
 0x5aa   :  { %v6572_v19 = vrot.slane %v6571_v9, 2  ;;  %v6585_v32 = vmax.f32 %v6583_v30, %v6584_v28  ;;  %v5121_v24 = vrot.slane %v5107_v31, %v12625_v58  ;;  %v15730_v60 = vmax.f32 %v7035_v21, %v7036_v63 }
 0x5ab   :  { %v6609_v35 = vrot.slane %v6608_v5, 1  ;;  %v6579_v43 = vrot.slane %v6578_v15, 2  ;;  %v3948_v41 = vadd.f32 %v15546_v37, %v3947_v61  ;;  %v6603_v20 = vmax.f32 %v6601_v40, %v6602_v53 }
 0x5ac   :  { %v6616_v27 = vrot.slane %v6615_v42, 1  ;;  %v6573_v14 = vmax.f32 %v6571_v9, %v6572_v19  ;;  %v6586_v49 = vrot.slane %v6585_v32, 2  ;;  %v6623_v3 = vrot.slane %v6622_v1, 1 }
 0x5ad   :  { %v6580_v56 = vmax.f32 %v6578_v15, %v6579_v43  ;;  %v6591_v44 = vrot.slane %v6590_v23, 4  ;;  %v5122_v39 = vcombine.high %v5114_v0, %v5114_v0  ;;  %v5123_v62 = vcombine.high %v5121_v24, %v5121_v24 }
 0x5ae   :  { %v6574_v7 = vrot.slane %v6573_v14, 1  ;;  %v6587_v34 = vmax.f32 %v6585_v32, %v6586_v49  ;;  %v7101_v59 = vsel %vm5448_vm10, %v5114_v0, -inf  ;;  %v7115_v63 = vsel %vm5448_vm10, %v5121_v24, -inf }
 0x5af   :  { %v6581_v22 = vrot.slane %v6580_v56, 1  ;;  %v6592_v21 = vmax.f32 %v6590_v23, %v6591_v44  ;;  %v7102_v6 = vrot.slane %v7101_v59, 4  ;;  %v7108_v8 = vsel %vm5448_vm10, %v5122_v39, -inf }
 0x5b0   :  { %v6575_v13 = vmax.f32 %v6573_v14, %v6574_v7  ;;  %v6588_v54 = vrot.slane %v6587_v34, 1  ;;  %v7109_v40 = vrot.slane %v7108_v8, 4  ;;  %v6610_v26 = vmax.f32 %v6608_v5, %v6609_v35 }
 0x5b1   :  { %v6582_v31 = vmax.f32 %v6580_v56, %v6581_v22  ;;  %v6593_v33 = vrot.slane %v6592_v21, 2  ;;  %v7103_v4 = vmax.f32 %v7101_v59, %v7102_v6  ;;  %v6617_v12 = vmax.f32 %v6615_v42, %v6616_v27  ;;  %v10411_v56 = vpop.f32.mrf.mxu1 }
 0x5b2   :  { %v6589_v30 = vmax.f32 %v6587_v34, %v6588_v54  ;;  %v7481_v10 = vsel %vm2927_vm1, %v6575_v13, -inf  ;;  %v7122_v53 = vsel %vm5448_vm10, %v5123_v62, -inf  ;;  %v6624_v9 = vmax.f32 %v6622_v1, %v6623_v3 }
 0x5b3   :  { %v6594_v28 = vmax.f32 %v6592_v21, %v6593_v33  ;;  %v7484_v61 = vsel %vm2927_vm1, %v6582_v31, -inf  ;;  %v7116_v15 = vrot.slane %v7115_v63, 4  ;;  %v7483_v0 = vmax.f32 %v7481_v10, %v15656_v45  ;;  %v17171_v21 = vld [vmem:[#allocation42_spill] sm:$0xff] }
 0x5b4   :  { %v7486_v19 = vmax.f32 %v7484_v61, %v15670_v51  ;;  %v7487_v5 = vsel %vm2927_vm1, %v6589_v30, -inf  ;;  %v7110_v32 = vmax.f32 %v7108_v8, %v7109_v40  ;;  %v7104_v24 = vrot.slane %v7103_v4, 2  ;;  %v17172_v8 = vld [vmem:[#allocation47_spill] sm:$0xff] }
 0x5b5   :  { %v6595_v23 = vrot.slane %v6594_v28, 1  ;;  %v7489_v42 = vmax.f32 %v7487_v5, %v15659_v38  ;;  %v7123_v35 = vrot.slane %v7122_v53, 4  ;;  %v15744_v43 = vmax.f32 %v15706_v11, %v7043_v29 }
 0x5b6   :  { %v7493_v1 = vsel %vm2927_vm1, %v6603_v20, -inf  ;;  %v7876_v27 = vsel %vm7799_vm11, %v7486_v19, %v7483_v0  ;;  %v4034_v14 = vmax.f32 %v3948_v41, 0.0  ;;  %v7496_v45 = vsel %vm2927_vm1, %v6610_v26, -inf }
 0x5b7   :  { %v7499_v51 = vsel %vm2927_vm1, %v6617_v12, -inf  ;;  %v7502_v49 = vsel %vm2927_vm1, %v6624_v9, -inf  ;;  %v6596_v3 = vmax.f32 %v6594_v28, %v6595_v23  ;;  %v7111_v44 = vrot.slane %v7110_v32, 2 }
 0x5b8   :  { %v7117_v38 = vmax.f32 %v7115_v63, %v7116_v15  ;;  %v5090_v39 = vcombine.high %v4034_v14, %v4034_v14  ;;  %v5097_v7 = vrot.slane %v4034_v14, %v12625_v58  ;;  %v7877_v29 = vsel %vm7801_vm12, %v7489_v42, %v7876_v27  ;;  %v17173_v63 = vld [vmem:[#allocation48_spill] sm:$0xff] }
 0x5b9   :  { %v7490_v11 = vsel %vm2927_vm1, %v6596_v3, -inf  ;;  %v7105_v20 = vmax.f32 %v7103_v4, %v7104_v24  ;;  %v7124_v34 = vmax.f32 %v7122_v53, %v7123_v35  ;;  %v15756_v41 = vsel %vm2927_vm1, %v15712_v55, -inf  ;;  %v15767_v4 = vpop.permute.xlu1 %8443 }
 0x5ba   :  { %v7492_v62 = vmax.f32 %v7490_v11, %v15680_v48  ;;  %v5104_v59 = vrot.slane %v5090_v39, %v12625_v58  ;;  %v3963_v22 = vadd.f32 %v15546_v37, %v10411_v56  ;;  %v7495_v6 = vmax.f32 %v7493_v1, %v17171_v21 }
 0x5bb   :  { %v7498_v13 = vmax.f32 %v7496_v45, %v17172_v8  ;;  %v5105_v54 = vcombine.high %v5097_v7, %v5097_v7  ;;  %v7073_v40 = vsel %vm5448_vm10, %v5097_v7, -inf  ;;  %v7501_v26 = vmax.f32 %v7499_v51, %v17173_v63 }
 0x5bc   :  { %v7504_v31 = vmax.f32 %v7502_v49, %v15644_v57  ;;  %vm17174_vm15 = vcmask 1043459   ;;  %v7118_v33 = vrot.slane %v7117_v38, 2  ;;  %v7106_v12 = vrot.slane %v7105_v20, 1 }
 0x5bd   :  { %v7878_v55 = vsel %vm17174_vm15, %v7492_v62, %v7877_v29  ;;  %v7112_v30 = vmax.f32 %v7110_v32, %v7111_v44  ;;  %v7125_v10 = vrot.slane %v7124_v34, 2  ;;  %vm17175_vm13 = vcmask 1045509   ;;  %v15777_v14 = vpop.permute.xlu1 %8255  ;;  %v15784_v62 = vpop.permute.xlu0 %8129 }
 0x5be   :  { %v7879_v48 = vsel %vm7805_vm14, %v7495_v6, %v7878_v55  ;;  %v5106_v9 = vcombine.high %v5104_v59, %v5104_v59  ;;  %v7074_v28 = vrot.slane %v7073_v40, 4  ;;  %v7080_v61 = vsel %vm5448_vm10, %v5105_v54, -inf }
 0x5bf   :  { %v7880_v53 = vsel %vm17175_vm13, %v7498_v13, %v7879_v48  ;;  %vm17176_vm9 = vcmask 1046534   ;;  %v7081_v0 = vrot.slane %v7080_v61, 4  ;;  %v7087_v57 = vsel %vm5448_vm10, %v5104_v59, -inf }
 0x5c0   :  { %v7881_v15 = vsel %vm17176_vm9, %v7501_v26, %v7880_v53  ;;  %v4037_v19 = vmax.f32 %v3963_v22, 0.0  ;;  %vm17177_vm15 = vcmask 1047559   ;;  %v7075_v23 = vmax.f32 %v7073_v40, %v7074_v28 }
 0x5c1   :  { %v7882_v5 = vsel %vm17177_vm15, %v7504_v31, %v7881_v15  ;;  %v7088_v42 = vrot.slane %v7087_v57, 4  ;;  %v7094_v24 = vsel %vm5448_vm10, %v5106_v9, -inf  ;;  %v7119_v32 = vmax.f32 %v7117_v38, %v7118_v33 }
 0x5c2   :  { %7944 = vst.msk [vmem:[#allocation3 + $0x140] sm:$0xff] %vm2927_vm1, %v7882_v5  ;;  %v7126_v35 = vmax.f32 %v7124_v34, %v7125_v10  ;;  %v7082_v1 = vmax.f32 %v7080_v61, %v7081_v0  ;;  %v7095_v27 = vrot.slane %v7094_v24, 4  ;;  %v7107_v45 = vmax.f32 %v7105_v20, %v7106_v12 }
 0x5c3   :  { %v7113_v51 = vrot.slane %v7112_v30, 1  ;;  %v7076_v49 = vrot.slane %v7075_v23, 2  ;;  %v7089_v3 = vmax.f32 %v7087_v57, %v7088_v42  ;;  %v7580_v56 = vsel %vm2927_vm1, %v15725_v36, -inf  ;;  %v15803_v57 = vpop.permute.xlu0 %8381 }
 0x5c4   :  { %v7083_v44 = vrot.slane %v7082_v1, 2  ;;  %v7096_v39 = vmax.f32 %v7094_v24, %v7095_v27  ;;  %v5148_v7 = vrot.slane %v4037_v19, %v12625_v58  ;;  %v7583_v11 = vsel %vm2927_vm1, %v15730_v60, -inf  ;;  %v15788_v60 = vpop.permute.xlu1 %8507 }
 0x5c5   :  { %v7077_v38 = vmax.f32 %v7075_v23, %v7076_v49  ;;  %v7090_v29 = vrot.slane %v7089_v3, 2  ;;  %v5141_v34 = vcombine.high %v4037_v19, %v4037_v19  ;;  %v7120_v59 = vrot.slane %v7119_v32, 1  ;;  %v3957_v49 = vpop.f32.mrf.mxu1 }
 0x5c6   :  { %v7127_v20 = vrot.slane %v7126_v35, 1  ;;  %v7084_v22 = vmax.f32 %v7082_v1, %v7083_v44  ;;  %v7097_v21 = vrot.slane %v7096_v39, 2  ;;  %v7114_v6 = vmax.f32 %v7112_v30, %v7113_v51 }
 0x5c7   :  { %v7590_v8 = vsel %vm2927_vm1, %v7107_v45, -inf  ;;  %v7078_v36 = vrot.slane %v7077_v38, 1  ;;  %v7091_v13 = vmax.f32 %v7089_v3, %v7090_v29  ;;  %v5156_v63 = vcombine.high %v5148_v7, %v5148_v7 }
 0x5c8   :  { %v7085_v54 = vrot.slane %v7084_v22, 1  ;;  %v7098_v40 = vmax.f32 %v7096_v39, %v7097_v21  ;;  %v7157_v26 = vsel %vm5448_vm10, %v5148_v7, -inf  ;;  %v7586_v31 = vsel %vm2927_vm1, %v15744_v43, -inf  ;;  %v8194_v21 = vpop.permute.xlu0 %8193 }
 0x5c9   :  { %v7079_v55 = vmax.f32 %v7077_v38, %v7078_v36  ;;  %v7092_v33 = vrot.slane %v7091_v13, 1  ;;  %v5155_v48 = vrot.slane %v5141_v34, %v12625_v58  ;;  %v15793_v12 = vld [vmem:[#allocation3 + $0x140] sm:$0xff]  ;;  %v7121_v10 = vmax.f32 %v7119_v32, %v7120_v59 }
 0x5ca   :  { %v15795_v30 = vld [vmem:[#allocation3 + $0x13f] sm:$0xff]  ;;  %v7128_v53 = vmax.f32 %v7126_v35, %v7127_v20  ;;  %v7086_v9 = vmax.f32 %v7084_v22, %v7085_v54  ;;  %v7099_v28 = vrot.slane %v7098_v40, 1  ;;  %8133 = vrot.lane.b32.xlu0 %v15793_v12, %s10604_s10  ;;  %v7591_v43 = vmax.f32 %v15695_v46, %v7590_v8  ;;  %v7959_v20 = vld [vmem:[#allocation3 + $0x10f] sm:$0xff]  ;;  %v10414_v54 = vpop.f32.mrf.mxu1 }
 0x5cb   :  { %8259 = vrot.lane.b32.xlu1 %v15795_v30, %s10608_s25  ;;  %v7093_v61 = vmax.f32 %v7091_v13, %v7092_v33  ;;  %v7578_v15 = vsel %vm2927_vm1, %v7079_v55, -inf  ;;  %v7158_v0 = vrot.slane %v7157_v26, 4  ;;  %v7593_v19 = vsel %vm2927_vm1, %v7114_v6, -inf  ;;  %v15827_v6 = vld [vmem:[#allocation3 + $0x141] sm:$0xff] }
 0x5cc   :  { %v7100_v5 = vmax.f32 %v7098_v40, %v7099_v28  ;;  %v7581_v23 = vsel %vm2927_vm1, %v7086_v9, -inf  ;;  %v7164_v42 = vsel %vm5448_vm10, %v5156_v63, -inf  ;;  %v7579_v24 = vmax.f32 %v15756_v41, %v7578_v15  ;;  %v8320_v41 = vpop.permute.xlu1 %8319 }
 0x5cd   :  { %v7582_v32 = vmax.f32 %v7580_v56, %v7581_v23  ;;  %v7584_v35 = vsel %vm2927_vm1, %v7093_v61, -inf  ;;  %v7171_v46 = vsel %vm5448_vm10, %v5155_v48, -inf  ;;  %v7596_v1 = vsel %vm2927_vm1, %v7121_v10, -inf  ;;  %v3967_v61 = vpop.f32.mrf.mxu1 }
 0x5ce   :  { %v7599_v27 = vsel %vm2927_vm1, %v7128_v53, -inf  ;;  %v7585_v45 = vmax.f32 %v7583_v11, %v7584_v35  ;;  %v7587_v51 = vsel %vm2927_vm1, %v7100_v5, -inf  ;;  %8385 = vrot.lane.b32.xlu0 %v15697_v16, %s10612_s14  ;;  %v5157_v44 = vcombine.high %v5155_v48, %v5155_v48 }
 0x5cf   :  { %8511 = vrot.lane.b32.xlu1 %v15667_v47, %s10614_s21  ;;  %v7588_v3 = vmax.f32 %v7586_v31, %v7587_v51  ;;  %v7904_v56 = vsel %vm7799_vm11, %v7582_v32, %v7579_v24  ;;  %v7159_v39 = vmax.f32 %v7157_v26, %v7158_v0  ;;  %v7165_v38 = vrot.slane %v7164_v42, 4  ;;  %v15864_v32 = vld [vmem:[#allocation3 + $0x157] sm:$0xff] }
 0x5d0   :  { %v7905_v7 = vsel %vm7801_vm12, %v7585_v45, %v7904_v56  ;;  %v7172_v29 = vrot.slane %v7171_v46, 4  ;;  %v8647_v11 = vsel %vm3187_vm6, %v15602_v52, %v15777_v14  ;;  %v7594_v34 = vmax.f32 %v15704_v25, %v7593_v19 }
 0x5d1   :  { %v7597_v59 = vmax.f32 %v15710_v2, %v7596_v1  ;;  %vm17178_vm13 = vcmask 1043459   ;;  %v3958_v22 = vadd.f32 %v15546_v37, %v3957_v49  ;;  %v7600_v8 = vmax.f32 %v15722_v50, %v7599_v27  ;;  %v15870_v27 = vld [vmem:[#allocation3 + $0x158] sm:$0xff] }
 0x5d2   :  { %v7906_v47 = vsel %vm17178_vm13, %v7588_v3, %v7905_v7  ;;  %v8616_v13 = vsel %vm2927_vm1, %v7959_v20, %v15784_v62  ;;  %8197 = vrot.lane.b32.xlu0 %v15827_v6, %s10606_s15  ;;  %vm17179_vm9 = vcmask 1045509   ;;  %v7160_v25 = vrot.slane %v7159_v39, 2  ;;  %v8572_v62 = vpop.permute.xlu1 %8571 }
 0x5d3   :  { %v7907_v36 = vsel %vm7805_vm14, %v7591_v43, %v7906_v47  ;;  %8323 = vrot.lane.b32.xlu1 %v15793_v12, %s10610_s1  ;;  %v7178_v2 = vsel %vm5448_vm10, %v5157_v44, -inf  ;;  %v4036_v14 = vmax.f32 %v3958_v22, 0.0  ;;  %vm17180_vm15 = vcmask 1046534  }
 0x5d4   :  { %v7908_v52 = vsel %vm17179_vm9, %v7594_v34, %v7907_v36  ;;  %v7166_v40 = vmax.f32 %v7164_v42, %v7165_v38  ;;  %v7173_v63 = vmax.f32 %v7171_v46, %v7172_v29  ;;  %v15841_v26 = vsel %vm3057_vm4, %v8616_v13, %v8194_v21 }
 0x5d5   :  { %v7909_v50 = vsel %vm17180_vm15, %v7597_v59, %v7908_v52  ;;  %v8695_v31 = vsel %vm8688_vm3, %v15683_v17, %v15767_v4  ;;  %vm17181_vm13 = vcmask 1047559   ;;  %v5124_v33 = vcombine.high %v4036_v14, %v4036_v14 }
 0x5d6   :  { %v7910_v55 = vsel %vm17181_vm13, %v7600_v8, %v7909_v50  ;;  %v7179_v48 = vrot.slane %v7178_v2, 4  ;;  %v5131_v10 = vrot.slane %v4036_v14, %v12625_v58  ;;  %v8712_v53 = vsel %vm8705_vm2, %v8695_v31, %v15788_v60  ;;  %8449 = vrot.lane.b32.xlu0 %v15795_v30, %s10613_s20 }
 0x5d7   :  { %7948 = vst.msk [vmem:[#allocation3 + $0x1a0] sm:$0xff] %vm2927_vm1, %v7910_v55  ;;  %v15852_v9 = vsel %vm3317_vm8, %v8647_v11, %v8320_v41  ;;  %v7161_v28 = vmax.f32 %v7159_v39, %v7160_v25  ;;  %v5138_v17 = vrot.slane %v5124_v33, %v12625_v58  ;;  %v8729_v4 = vsel %vm8722_vm0, %v8712_v53, %v8572_v62 }
 0x5d8   :  { %v3973_v43 = vadd.f32 %v15546_v37, %v10414_v54  ;;  %8575 = vrot.lane.b32.xlu1 %v15697_v16, %s10615_s22  ;;  %v7167_v15 = vrot.slane %v7166_v40, 2  ;;  %v7174_v0 = vrot.slane %v7173_v63, 2  ;;  %v5139_v60 = vcombine.high %v5131_v10, %v5131_v10  ;;  %10442 = vmatprep.mubr.msk.f32.mxu1 %vm8755_vm7, %v8729_v4 }
 0x5d9   :  { %v7129_v19 = vsel %vm5448_vm10, %v5131_v10, -inf  ;;  %v5140_v5 = vcombine.high %v5138_v17, %v5138_v17  ;;  %v7143_v42 = vsel %vm5448_vm10, %v5138_v17, -inf  ;;  %v7180_v35 = vmax.f32 %v7178_v2, %v7179_v48 }
 0x5da   :  { %v7130_v23 = vrot.slane %v7129_v19, 4  ;;  %v4039_v24 = vmax.f32 %v3973_v43, 0.0  ;;  %v7136_v46 = vsel %vm5448_vm10, %v5139_v60, -inf  ;;  %v7144_v1 = vrot.slane %v7143_v42, 4  ;;  %8261 = vrot.lane.b32.xlu0 %v15864_v32, %s10608_s25 }
 0x5db   :  { %v3968_v16 = vadd.f32 %v15546_v37, %v3967_v61  ;;  %v7137_v51 = vrot.slane %v7136_v46, 4  ;;  %v7150_v49 = vsel %vm5448_vm10, %v5140_v5, -inf  ;;  %v7162_v39 = vrot.slane %v7161_v28, 1 }
 0x5dc   :  { %v7131_v45 = vmax.f32 %v7129_v19, %v7130_v23  ;;  %v5175_v41 = vcombine.high %v4039_v24, %v4039_v24  ;;  %8325 = vrot.lane.b32.xlu1 %v15870_v27, %s10610_s1  ;;  %v7145_v3 = vmax.f32 %v7143_v42, %v7144_v1  ;;  %v7151_v56 = vrot.slane %v7150_v49, 4 }
 0x5dd   :  { %v5182_v44 = vrot.slane %v4039_v24, %v12625_v58  ;;  %v7168_v7 = vmax.f32 %v7166_v40, %v7167_v15  ;;  %v7138_v29 = vmax.f32 %v7136_v46, %v7137_v51  ;;  %v7175_v47 = vmax.f32 %v7173_v63, %v7174_v0  ;;  %v15887_v40 = vld [vmem:[#allocation3 + $0x159] sm:$0xff] }
 0x5de   :  { %v7132_v37 = vrot.slane %v7131_v45, 2  ;;  %v5189_v38 = vrot.slane %v5175_v41, %v12625_v58  ;;  %v7152_v11 = vmax.f32 %v7150_v49, %v7151_v56  ;;  %8513 = vrot.lane.b32.xlu0 %v15793_v12, %s10614_s21  ;;  %v7181_v20 = vrot.slane %v7180_v35, 2  ;;  %v15913_v56 = vld [vmem:[#allocation3 + $0x16f] sm:$0xff] }
 0x5df   :  { %v5190_v34 = vcombine.high %v5182_v44, %v5182_v44  ;;  %v7213_v59 = vsel %vm5448_vm10, %v5182_v44, -inf  ;;  %v4038_v21 = vmax.f32 %v3968_v16, 0.0  ;;  %v7146_v8 = vrot.slane %v7145_v3, 2 }
 0x5e0   :  { %v5191_v22 = vcombine.high %v5189_v38, %v5189_v38  ;;  %8577 = vrot.lane.b32.xlu1 %v15827_v6, %s10615_s22  ;;  %v7214_v36 = vrot.slane %v7213_v59, 4  ;;  %v7163_v52 = vmax.f32 %v7161_v28, %v7162_v39  ;;  %v7133_v25 = vmax.f32 %v7131_v45, %v7132_v37 }
 0x5e1   :  { %v7220_v13 = vsel %vm5448_vm10, %v5190_v34, -inf  ;;  %v7227_v2 = vsel %vm5448_vm10, %v5189_v38, -inf  ;;  %v7169_v14 = vrot.slane %v7168_v7, 1  ;;  %v7139_v54 = vrot.slane %v7138_v29, 2 }
 0x5e2   :  { %v7153_v50 = vrot.slane %v7152_v11, 2  ;;  %v7234_v12 = vsel %vm5448_vm10, %v5191_v22, -inf  ;;  %8135 = vrot.lane.b32.xlu0 %v15870_v27, %s10604_s10  ;;  %v7176_v63 = vrot.slane %v7175_v47, 1  ;;  %v15889_v62 = vmax.f32 %v7180_v35, %v7181_v20 }
 0x5e3   :  { %v7221_v31 = vrot.slane %v7220_v13, 4  ;;  %v5158_v55 = vcombine.high %v4038_v21, %v4038_v21  ;;  %v7147_v33 = vmax.f32 %v7145_v3, %v7146_v8  ;;  %v7215_v48 = vmax.f32 %v7213_v59, %v7214_v36 }
 0x5e4   :  { %8199 = vrot.lane.b32.xlu1 %v15887_v40, %s10606_s15  ;;  %v7228_v10 = vrot.slane %v7227_v2, 4  ;;  %v5165_v53 = vrot.slane %v4038_v21, %v12625_v58  ;;  %v7134_v28 = vrot.slane %v7133_v25, 1  ;;  %v7235_v17 = vrot.slane %v7234_v12, 4  ;;  %v15922_v21 = vld [vmem:[%s16686_s4] ss:$0 sm:$0xff] }
 0x5e5   :  { %v15894_v4 = vmax.f32 %v7168_v7, %v7169_v14  ;;  %v15897_v43 = vsel %vm2927_vm1, %v7163_v52, -inf  ;;  %v7140_v61 = vmax.f32 %v7138_v29, %v7139_v54  ;;  %v7154_v15 = vmax.f32 %v7152_v11, %v7153_v50 }
 0x5e6   :  { %8387 = vrot.lane.b32.xlu0 %v15827_v6, %s10612_s14  ;;  %v15901_v0 = vmax.f32 %v7175_v47, %v7176_v63  ;;  %v7183_v60 = vrot.slane %v15889_v62, 1  ;;  %v7222_v19 = vmax.f32 %v7220_v13, %v7221_v31  ;;  %v5172_v5 = vrot.slane %v5158_v55, %v12625_v58  ;;  %v15908_v6 = vld [vmem:[#allocation3 + $0x170] sm:$0xff]  ;;  %v10435_v37 = vpop.f32.mrf.mxu1 }
 0x5e7   :  { %v7148_v23 = vrot.slane %v7147_v33, 1  ;;  %v7216_v42 = vrot.slane %v7215_v48, 2  ;;  %v7229_v24 = vmax.f32 %v7227_v2, %v7228_v10  ;;  %v5173_v35 = vcombine.high %v5165_v53, %v5165_v53 }
 0x5e8   :  { %8451 = vrot.lane.b32.xlu1 %v15864_v32, %s10613_s20  ;;  %v7135_v46 = vmax.f32 %v7133_v25, %v7134_v28  ;;  %v7236_v1 = vmax.f32 %v7234_v12, %v7235_v17  ;;  %v5174_v16 = vcombine.high %v5172_v5, %v5172_v5  ;;  %v7185_v45 = vsel %vm5448_vm10, %v5165_v53, -inf  ;;  %v8870_v50 = vpop.f32.mrf.mxu1  ;;  %v15932_v28 = vld [vmem:[#allocation3 + $0x171] sm:$0xff] }
 0x5e9   :  { %v7141_v51 = vrot.slane %v7140_v61, 1  ;;  %v7155_v49 = vrot.slane %v7154_v15, 1  ;;  %v7186_v41 = vrot.slane %v7185_v45, 4  ;;  %v7192_v3 = vsel %vm5448_vm10, %v5173_v35, -inf }
 0x5ea   :  { %8137 = vrot.lane.b32.xlu0 %v15908_v6, %s10604_s10  ;;  %v7223_v44 = vrot.slane %v7222_v19, 2  ;;  %v7193_v39 = vrot.slane %v7192_v3, 4  ;;  %v7199_v7 = vsel %vm5448_vm10, %v5172_v5, -inf  ;;  %vm9317_vm9 = vcmask 123904  }
 0x5eb   :  { %v7149_v38 = vmax.f32 %v7147_v33, %v7148_v23  ;;  %v7217_v29 = vmax.f32 %v7215_v48, %v7216_v42  ;;  %v7230_v11 = vrot.slane %v7229_v24, 2  ;;  %v7187_v34 = vmax.f32 %v7185_v45, %v7186_v41 }
 0x5ec   :  { %8263 = vrot.lane.b32.xlu1 %v15913_v56, %s10608_s25  ;;  %v7237_v59 = vrot.slane %v7236_v1, 2  ;;  %v7194_v47 = vmax.f32 %v7192_v3, %v7193_v39  ;;  %v7200_v20 = vrot.slane %v7199_v7, 4  ;;  %v7206_v22 = vsel %vm5448_vm10, %v5174_v16, -inf }
 0x5ed   :  { %v7142_v8 = vmax.f32 %v7140_v61, %v7141_v51  ;;  %v15924_v36 = vmax.f32 %v7154_v15, %v7155_v49  ;;  %v7601_v13 = vsel %vm2927_vm1, %v7135_v46, -inf  ;;  %v7188_v52 = vrot.slane %v7187_v34, 2 }
 0x5ee   :  { %8389 = vrot.lane.b32.xlu0 %v15887_v40, %s10612_s14  ;;  %v7224_v25 = vmax.f32 %v7222_v19, %v7223_v44  ;;  %v7195_v2 = vrot.slane %v7194_v47, 2  ;;  %v7201_v14 = vmax.f32 %v7199_v7, %v7200_v20  ;;  %v7207_v54 = vrot.slane %v7206_v22, 4 }
 0x5ef   :  { %v7218_v12 = vrot.slane %v7217_v29, 1  ;;  %v7231_v63 = vmax.f32 %v7229_v24, %v7230_v11  ;;  %v7189_v31 = vmax.f32 %v7187_v34, %v7188_v52  ;;  %v8876_v55 = vadd.f32 %v10435_v37, %v15922_v21 }
 0x5f0   :  { %8515 = vrot.lane.b32.xlu1 %v15870_v27, %s10614_s21  ;;  %v7238_v33 = vmax.f32 %v7236_v1, %v7237_v59  ;;  %v7196_v48 = vmax.f32 %v7194_v47, %v7195_v2  ;;  %v7202_v10 = vrot.slane %v7201_v14, 2  ;;  %v7208_v53 = vmax.f32 %v7206_v22, %v7207_v54  ;;  %v15959_v2 = vld [vmem:[#allocation3 + $0x187] sm:$0xff] }
 0x5f1   :  { %v7607_v17 = vsel %vm2927_vm1, %v7149_v38, -inf  ;;  %v7190_v61 = vrot.slane %v7189_v31, 1  ;;  %v15937_v15 = vmax.f32 %v8876_v55, 0.0  ;;  %v8871_v27 = vadd.f32 %v15922_v21, %v8870_v50  ;;  %v8027_v54 = vld [vmem:[#allocation3 + $0x188] sm:$0xff] }
 0x5f2   :  { %8201 = vrot.lane.b32.xlu0 %v15932_v28, %s10606_s15  ;;  %v7225_v19 = vrot.slane %v7224_v25, 1  ;;  %v7197_v5 = vrot.slane %v7196_v48, 1  ;;  %v7203_v23 = vmax.f32 %v7201_v14, %v7202_v10  ;;  %v7209_v42 = vrot.slane %v7208_v53, 2 }
 0x5f3   :  { %v7219_v24 = vmax.f32 %v7217_v29, %v7218_v12  ;;  %v7232_v35 = vrot.slane %v7231_v63, 1  ;;  %v7191_v46 = vmax.f32 %v7189_v31, %v7190_v61  ;;  %v15944_v1 = vrot.slane %v15937_v15, %v12625_v58 }
 0x5f4   :  { %8327 = vrot.lane.b32.xlu1 %v15908_v6, %s10610_s1  ;;  %v7239_v16 = vrot.slane %v7238_v33, 1  ;;  %v7198_v45 = vmax.f32 %v7196_v48, %v7197_v5  ;;  %v7204_v51 = vrot.slane %v7203_v23, 1  ;;  %v7210_v49 = vmax.f32 %v7208_v53, %v7209_v42 }
 0x5f5   :  { %v7604_v41 = vsel %vm2927_vm1, %v7142_v8, -inf  ;;  %v7602_v3 = vsel %vm2927_vm1, %v7191_v46, -inf  ;;  %v9346_v44 = vsel %vm9317_vm9, %v15944_v1, -inf  ;;  %v15952_v39 = vmax.f32 %v8871_v27, 0.0  ;;  %v7996_v46 = vld [vmem:[#allocation3 + $0x189] sm:$0xff] }
 0x5f6   :  { %8453 = vrot.lane.b32.xlu0 %v15913_v56, %s10613_s20  ;;  %v7226_v7 = vmax.f32 %v7224_v25, %v7225_v19  ;;  %v7205_v37 = vmax.f32 %v7203_v23, %v7204_v51  ;;  %v7211_v38 = vrot.slane %v7210_v49, 1  ;;  %v7605_v29 = vsel %vm2927_vm1, %v7198_v45, -inf }
 0x5f7   :  { %v7233_v11 = vmax.f32 %v7231_v63, %v7232_v35  ;;  %v7603_v34 = vmax.f32 %v7601_v13, %v7602_v3  ;;  %v7606_v59 = vmax.f32 %v7604_v41, %v7605_v29  ;;  %v9347_v47 = vrot.slane %v9346_v44, 4 }
 0x5f8   :  { %8579 = vrot.lane.b32.xlu1 %v15887_v40, %s10615_s22  ;;  %v7240_v20 = vmax.f32 %v7238_v33, %v7239_v16  ;;  %v7614_v22 = vsel %vm2927_vm1, %v7219_v24, -inf  ;;  %v7212_v8 = vmax.f32 %v7210_v49, %v7211_v38  ;;  %v7608_v52 = vsel %vm2927_vm1, %v7205_v37, -inf  ;;  %v8446_v49 = vpop.permute.xlu0 %8445  ;;  %v16004_v37 = vld [vmem:[#allocation3 + $0x19f] sm:$0xff] }
 0x5f9   :  { %v7609_v25 = vmax.f32 %v7607_v17, %v7608_v52  ;;  %v7911_v14 = vsel %vm7799_vm11, %v7606_v59, %v7603_v34  ;;  %v9348_v40 = vmax.f32 %v9346_v44, %v9347_v47  ;;  %v15966_v13 = vrot.slane %v15952_v39, %v12625_v58  ;;  %v7981_v44 = vld [vmem:[#allocation3 + $0x1a0] sm:$0xff] }
 0x5fa   :  { %8265 = vrot.lane.b32.xlu0 %v15959_v2, %s10608_s25  ;;  %v7184_v50 = vmax.f32 %v15889_v62, %v7183_v60  ;;  %v7610_v12 = vsel %vm2927_vm1, %v15924_v36, -inf  ;;  %v7617_v63 = vsel %vm2927_vm1, %v7226_v7, -inf  ;;  %v7611_v31 = vsel %vm2927_vm1, %v7212_v8, -inf }
 0x5fb   :  { %v7620_v55 = vsel %vm2927_vm1, %v7233_v11, -inf  ;;  %v7612_v33 = vmax.f32 %v7610_v12, %v7611_v31  ;;  %v7912_v48 = vsel %vm7801_vm12, %v7609_v25, %v7911_v14  ;;  %v9349_v10 = vrot.slane %v9348_v40, 2  ;;  %v7997_v14 = vld [vmem:[#allocation3 + $0x1a1] sm:$0xff]  ;;  %v8094_v12 = vld [vmem:[#allocation3 + $0x1d1] sm:$0xff] }
 0x5fc   :  { %8329 = vrot.lane.b32.xlu1 %v8027_v54, %s10610_s1  ;;  %v7616_v53 = vsel %vm2927_vm1, %v15894_v4, -inf  ;;  %v7615_v62 = vmax.f32 %v15897_v43, %v7614_v22  ;;  %v7623_v60 = vsel %vm2927_vm1, %v7240_v20, -inf  ;;  %v7619_v36 = vsel %vm2927_vm1, %v15901_v0, -inf }
 0x5fd   :  { %v7618_v17 = vmax.f32 %v7616_v53, %v7617_v63  ;;  %vm17182_vm10 = vcmask 1043459   ;;  %v9318_v27 = vsel %vm9317_vm9, %v15966_v13, -inf  ;;  %v7622_v19 = vsel %vm2927_vm1, %v7184_v50, -inf  ;;  %v8078_v50 = vld [vmem:[#allocation3 + $0x1d0] sm:$0xff] }
 0x5fe   :  { %v7913_v61 = vsel %vm17182_vm10, %v7612_v33, %v7912_v48  ;;  %8517 = vrot.lane.b32.xlu0 %v15908_v6, %s10614_s21  ;;  %v7621_v5 = vmax.f32 %v7619_v36, %v7620_v55  ;;  %v9319_v43 = vrot.slane %v9318_v27, 4  ;;  %v7624_v23 = vmax.f32 %v7622_v19, %v7623_v60 }
 0x5ff   :  { %v7914_v4 = vsel %vm7805_vm14, %v7615_v62, %v7913_v61  ;;  %vm17183_vm12 = vcmask 1045509   ;;  %v9350_v42 = vmax.f32 %v9348_v40, %v9349_v10  ;;  %v8679_v47 = vsel %vm8671_vm5, %v15567_v18, %v15803_v57 }
 0x600   :  { %8581 = vrot.lane.b32.xlu1 %v15932_v28, %s10615_s22  ;;  %v7915_v0 = vsel %vm17183_vm12, %v7618_v17, %v7914_v4  ;;  %v9320_v35 = vmax.f32 %v9318_v27, %v9319_v43  ;;  %v8696_v22 = vsel %vm8688_vm3, %v8679_v47, %v8446_v49 }
 0x601   :  { %v7916_v24 = vsel %vm17180_vm15, %v7621_v5, %v7915_v0  ;;  %v9351_v45 = vrot.slane %v9350_v42, 1 }
 0x602   :  { %v7917_v6 = vsel %vm17181_vm13, %v7624_v23, %v7916_v24  ;;  %8139 = vrot.lane.b32.xlu0 %v8027_v54, %s10604_s10  ;;  %v9321_v16 = vrot.slane %v9320_v35, 2 }
 0x603   :  { %7949 = vst.msk [vmem:[#allocation3 + $0x1b8] sm:$0xff] %vm2927_vm1, %v7917_v6  ;;  %v9352_v3 = vmax.f32 %v9350_v42, %v9351_v45 }
 0x604   :  { %8203 = vrot.lane.b32.xlu1 %v7996_v46, %s10606_s15  ;;  %v9322_v51 = vmax.f32 %v9320_v35, %v9321_v16 }
 0x605   :  { %v16014_v34 = vsel %vm3057_vm4, %v9352_v3, -inf }
 0x606   :  { %8391 = vrot.lane.b32.xlu0 %v15932_v28, %s10612_s14  ;;  %v9323_v41 = vrot.slane %v9322_v51, 1 }
 0x608   :  { %8455 = vrot.lane.b32.xlu1 %v15959_v2, %s10613_s20  ;;  %v9324_v7 = vmax.f32 %v9322_v51, %v9323_v41 }
 0x609   :  { %v8258_v38 = vpop.permute.xlu0 %8257 }
 0x60a   :  { %8141 = vrot.lane.b32.xlu0 %v7981_v44, %s10604_s10  ;;  %v8322_v29 = vpop.permute.xlu1 %8321  ;;  %v16009_v11 = vsel %vm3057_vm4, %v9324_v7, -inf  ;;  %v8648_v28 = vsel %vm3187_vm6, %v15841_v26, %v8258_v38  ;;  %v8013_v18 = vld [vmem:[#allocation3 + $0x1b7] sm:$0xff] }
 0x60b   :  { %v16017_v59 = vsel %vm3317_vm8, %v8648_v28, %v8322_v29  ;;  %v9768_v20 = vmax.f32 %v16009_v11, %v16014_v34  ;;  %v8045_v57 = vld [vmem:[#allocation3 + $0x1b9] sm:$0xff] }
 0x60c   :  { %8267 = vrot.lane.b32.xlu1 %v16004_v37, %s10608_s25  ;;  %v8029_v40 = vld [vmem:[#allocation3 + $0x1b8] sm:$0xff] }
 0x60d   :  { %v8510_v8 = vpop.permute.xlu0 %8509 }
 0x60e   :  { %8393 = vrot.lane.b32.xlu0 %v7996_v46, %s10612_s14  ;;  %v8574_v52 = vpop.permute.xlu1 %8573  ;;  %v8713_v26 = vsel %vm8705_vm2, %v8696_v22, %v8510_v8 }
 0x60f   :  { %v8730_v25 = vsel %vm8722_vm0, %v8713_v26, %v8574_v52 }
 0x610   :  { %8519 = vrot.lane.b32.xlu1 %v8027_v54, %s10614_s21  ;;  %10443 = vmatmul.mubr.msk.f32.gmra.mxu1 %vm8755_vm7, %v8730_v25  ;;  %v8062_v54 = vld [vmem:[#allocation3 + $0x1cf] sm:$0xff]  ;;  %v16051_v53 = vpop.f32.mrf.mxu1 }
 0x611   :  { %v8132_v63 = vpop.permute.xlu0 %8131 }
 0x612   :  { %8205 = vrot.lane.b32.xlu0 %v7997_v14, %s10606_s15  ;;  %v16046_v31 = vpop.permute.xlu1 %8195  ;;  %v16053_v36 = vpop.f32.mrf.mxu1 }
 0x614   :  { %8331 = vrot.lane.b32.xlu1 %v7981_v44, %s10610_s1 }
 0x615   :  { %v8384_v55 = vpop.permute.xlu0 %8383 }
 0x616   :  { %8457 = vrot.lane.b32.xlu0 %v16004_v37, %s10613_s20  ;;  %v8448_v33 = vpop.permute.xlu1 %8447  ;;  %v8680_v5 = vsel %vm8671_vm5, %v15852_v9, %v8384_v55 }
 0x617   :  { %v8697_v0 = vsel %vm8688_vm3, %v8680_v5, %v8448_v33 }
 0x618   :  { %8583 = vrot.lane.b32.xlu1 %v7996_v46, %s10615_s22 }
 0x61a   :  { %8269 = vrot.lane.b32.xlu0 %v8013_v18, %s10608_s25 }
 0x61c   :  { %8395 = vrot.lane.b32.xlu1 %v7997_v14, %s10612_s14 }
 0x61e   :  { %8521 = vrot.lane.b32.xlu0 %v7981_v44, %s10614_s21 }
 0x620   :  { %8397 = vrot.lane.b32.xlu1 %v8045_v57, %s10612_s14 }
 0x622   :  { %8333 = vrot.lane.b32.xlu0 %v8029_v40, %s10610_s1 }
 0x624   :  { %8461 = vrot.lane.b32.xlu1 %v8062_v54, %s10613_s20 }
 0x626   :  { %8585 = vrot.lane.b32.xlu0 %v7997_v14, %s10615_s22 }
 0x628   :  { %8525 = vrot.lane.b32.xlu1 %v8078_v50, %s10614_s21 }
 0x62a   :  { %8459 = vrot.lane.b32.xlu0 %v8013_v18, %s10613_s20 }
 0x62c   :  { %8589 = vrot.lane.b32.xlu1 %v8094_v12, %s10615_s22 }
 0x62e   :  { %8523 = vrot.lane.b32.xlu0 %v8029_v40, %s10614_s21 }
 0x632   :  { %8587 = vrot.lane.b32.xlu0 %v8045_v57, %s10615_s22 }
 0x63c   :  { %v16049_v48 = vpop.permute.xlu0 %8133 }
 0x63d   :  { %v8260_v10 = vpop.permute.xlu1 %8259 }
 0x640   :  { %v8386_v62 = vpop.permute.xlu0 %8385 }
 0x641   :  { %v8512_v60 = vpop.permute.xlu1 %8511  ;;  %v10441_v17 = vpop.f32.mrf.mxu1  ;;  %v8681_v18 = vsel %vm8671_vm5, %v16017_v59, %v8386_v62  ;;  %v10578_v62 = vld [vmem:[#allocation3 + $0x127] sm:$0xff] }
 0x642   :  { %v8896_v19 = vadd.f32 %v10441_v17, %v15922_v21  ;;  %v8714_v6 = vsel %vm8705_vm2, %v8697_v0, %v8512_v60 }
 0x643   :  { %v8890_v4 = vpop.f32.mrf.mxu1 }
 0x644   :  { %v16055_v61 = vpop.permute.xlu0 %8197  ;;  %v16060_v43 = vmax.f32 %v8896_v19, 0.0  ;;  %v8891_v23 = vadd.f32 %v15922_v21, %v8890_v4  ;;  %v8617_v4 = vsel %vm2927_vm1, %v10578_v62, %v8132_v63  ;;  %v8618_v63 = vsel %vm2927_vm1, %v15795_v30, %v16049_v48 }
 0x645   :  { %v8324_v27 = vpop.permute.xlu1 %8323 }
 0x646   :  { %v16066_v24 = vrot.slane %v16060_v43, %v12625_v58  ;;  %v16068_v35 = vmax.f32 %v8891_v23, 0.0 }
 0x648   :  { %v8450_v42 = vpop.permute.xlu0 %8449  ;;  %v9458_v9 = vsel %vm9317_vm9, %v16066_v24, -inf  ;;  %v16076_v51 = vrot.slane %v16068_v35, %v12625_v58 }
 0x649   :  { %v9459_v45 = vrot.slane %v9458_v9, 4  ;;  %v8698_v57 = vsel %vm8688_vm3, %v8681_v18, %v8450_v42 }
 0x64a   :  { %v8576_v46 = vpop.permute.xlu1 %8575  ;;  %v9430_v44 = vsel %vm9317_vm9, %v16076_v51, -inf }
 0x64b   :  { %v8731_v16 = vsel %vm8722_vm0, %v8714_v6, %v8576_v46  ;;  %v9460_v41 = vmax.f32 %v9458_v9, %v9459_v45  ;;  %v9431_v38 = vrot.slane %v9430_v44, 4  ;;  %v8633_v6 = vsel %vm3057_vm4, %v8617_v4, %v16046_v31 }
 0x64c   :  { %10445 = vmatprep.mubr.msk.f32.mxu1 %vm8755_vm7, %v8731_v16  ;;  %v8262_v49 = vpop.permute.xlu0 %8261  ;;  %v8649_v46 = vsel %vm3187_vm6, %v8633_v6, %v8260_v10  ;;  %v8634_v31 = vsel %vm3057_vm4, %v8618_v63, %v16055_v61 }
 0x64d   :  { %v9461_v7 = vrot.slane %v9460_v41, 2  ;;  %v9432_v22 = vmax.f32 %v9430_v44, %v9431_v38  ;;  %v8665_v16 = vsel %vm3317_vm8, %v8649_v46, %v8324_v27  ;;  %v8650_v27 = vsel %vm3187_vm6, %v8634_v31, %v8262_v49 }
 0x64e   :  { %v8326_v3 = vpop.permute.xlu1 %8325 }
 0x64f   :  { %v9462_v47 = vmax.f32 %v9460_v41, %v9461_v7  ;;  %v9433_v8 = vrot.slane %v9432_v22, 2 }
 0x650   :  { %v8514_v29 = vpop.permute.xlu0 %8513 }
 0x651   :  { %v9463_v25 = vrot.slane %v9462_v47, 1  ;;  %v9434_v14 = vmax.f32 %v9432_v22, %v9433_v8  ;;  %v8715_v50 = vsel %vm8705_vm2, %v8698_v57, %v8514_v29  ;;  %v8666_v22 = vsel %vm3317_vm8, %v8650_v27, %v8326_v3 }
 0x652   :  { %v8578_v28 = vpop.permute.xlu1 %8577 }
 0x653   :  { %v9435_v54 = vrot.slane %v9434_v14, 1  ;;  %v9464_v55 = vmax.f32 %v9462_v47, %v9463_v25  ;;  %v8732_v60 = vsel %vm8722_vm0, %v8715_v50, %v8578_v28 }
 0x654   :  { %v8136_v52 = vpop.permute.xlu0 %8135  ;;  %10446 = vmatmul.mubr.msk.f32.gmra.mxu1 %vm8755_vm7, %v8732_v60 }
 0x655   :  { %v9436_v33 = vmax.f32 %v9434_v14, %v9435_v54  ;;  %v16091_v59 = vsel %vm3057_vm4, %v9464_v55, -inf  ;;  %v8619_v3 = vsel %vm2927_vm1, %v15864_v32, %v8136_v52 }
 0x656   :  { %v8200_v26 = vpop.permute.xlu1 %8199  ;;  %17185 = vst [vmem:[#allocation68_spill] sm:$0xff] %v16091_v59 }
 0x657   :  { %v16087_v17 = vsel %vm3057_vm4, %v9436_v33, -inf  ;;  %v8635_v33 = vsel %vm3057_vm4, %v8619_v3, %v8200_v26 }
 0x658   :  { %v8388_v40 = vpop.permute.xlu0 %8387  ;;  %17184 = vst [vmem:[#allocation67_spill] sm:$0xff] %v16087_v17 }
 0x659   :  { %v8682_v45 = vsel %vm8671_vm5, %v8665_v16, %v8388_v40 }
 0x65a   :  { %v8452_v12 = vpop.permute.xlu1 %8451 }
 0x65b   :  { %v8699_v44 = vsel %vm8688_vm3, %v8682_v45, %v8452_v12 }
 0x65c   :  { %v8138_v19 = vpop.permute.xlu0 %8137 }
 0x65e   :  { %v8264_v5 = vpop.permute.xlu1 %8263 }
 0x65f   :  { %v8651_v60 = vsel %vm3187_vm6, %v8635_v33, %v8264_v5  ;;  %v8620_v5 = vsel %vm2927_vm1, %v15913_v56, %v8138_v19 }
 0x660   :  { %v8390_v0 = vpop.permute.xlu0 %8389 }
 0x661   :  { %v8683_v8 = vsel %vm8671_vm5, %v8666_v22, %v8390_v0 }
 0x662   :  { %v8516_v42 = vpop.permute.xlu1 %8515 }
 0x663   :  { %v8716_v38 = vsel %vm8705_vm2, %v8699_v44, %v8516_v42 }
 0x664   :  { %v8202_v9 = vpop.permute.xlu0 %8201 }
 0x665   :  { %v8636_v44 = vsel %vm3057_vm4, %v8620_v5, %v8202_v9 }
 0x666   :  { %v8328_v41 = vpop.permute.xlu1 %8327 }
 0x667   :  { %v8667_v62 = vsel %vm3317_vm8, %v8651_v60, %v8328_v41 }
 0x668   :  { %v8454_v7 = vpop.permute.xlu0 %8453 }
 0x669   :  { %v8700_v30 = vsel %vm8688_vm3, %v8683_v8, %v8454_v7 }
 0x66a   :  { %v8580_v29 = vpop.permute.xlu1 %8579 }
 0x66b   :  { %v8733_v10 = vsel %vm8722_vm0, %v8716_v38, %v8580_v29 }
 0x66c   :  { %10448 = vmatprep.mubr.msk.f32.mxu1 %vm8755_vm7, %v8733_v10  ;;  %v8266_v28 = vpop.permute.xlu0 %8265 }
 0x66d   :  { %v8652_v63 = vsel %vm3187_vm6, %v8636_v44, %v8266_v28 }
 0x66e   :  { %v8330_v47 = vpop.permute.xlu1 %8329 }
 0x66f   :  { %v8668_v29 = vsel %vm3317_vm8, %v8652_v63, %v8330_v47 }
 0x670   :  { %v8518_v48 = vpop.permute.xlu0 %8517 }
 0x671   :  { %v8717_v25 = vsel %vm8705_vm2, %v8700_v30, %v8518_v48 }
 0x672   :  { %v8582_v14 = vpop.permute.xlu1 %8581 }
 0x673   :  { %v8734_v61 = vsel %vm8722_vm0, %v8717_v25, %v8582_v14 }
 0x674   :  { %10449 = vmatmul.mubr.msk.f32.gmra.mxu1 %vm8755_vm7, %v8734_v61  ;;  %v8140_v18 = vpop.permute.xlu0 %8139 }
 0x675   :  { %v8621_v47 = vsel %vm2927_vm1, %v15959_v2, %v8140_v18 }
 0x676   :  { %v8204_v49 = vpop.permute.xlu1 %8203 }
 0x677   :  { %v8637_v14 = vsel %vm3057_vm4, %v8621_v47, %v8204_v49 }
 0x678   :  { %v8392_v57 = vpop.permute.xlu0 %8391 }
 0x679   :  { %v8684_v0 = vsel %vm8671_vm5, %v8667_v62, %v8392_v57 }
 0x67a   :  { %v8456_v54 = vpop.permute.xlu1 %8455 }
 0x67b   :  { %v8701_v6 = vsel %vm8688_vm3, %v8684_v0, %v8456_v54  ;;  %v8981_v0 = vcombine.high %v15952_v39, %v15952_v39  ;;  %v8886_v39 = vadd.f32 %v16051_v53, %v15922_v21 }
 0x67c   :  { %v8142_v40 = vpop.permute.xlu0 %8141 }
 0x67d   :  { %v8622_v56 = vsel %vm2927_vm1, %v16004_v37, %v8142_v40  ;;  %vm9958_vm1 = vcmask 654336  }
 0x67e   :  { %v8268_v50 = vpop.permute.xlu1 %8267 }
 0x67f   :  { %v8653_v37 = vsel %vm3187_vm6, %v8637_v14, %v8268_v50  ;;  %v8998_v50 = vcombine.high %v15937_v15, %v15937_v15 }
 0x680   :  { %v8394_v12 = vpop.permute.xlu0 %8393 }
 0x681   :  { %v8685_v31 = vsel %vm8671_vm5, %v8668_v29, %v8394_v12  ;;  %v9012_v62 = vrot.slane %v8998_v50, %v12625_v58 }
 0x682   :  { %v8520_v55 = vpop.permute.xlu1 %8519 }
 0x683   :  { %v8718_v16 = vsel %vm8705_vm2, %v8701_v6, %v8520_v55 }
 0x684   :  { %v8206_v4 = vpop.permute.xlu0 %8205 }
 0x685   :  { %v8638_v9 = vsel %vm3057_vm4, %v8622_v56, %v8206_v4  ;;  %v9013_v4 = vcombine.high %v15944_v1, %v15944_v1 }
 0x686   :  { %v8332_v42 = vpop.permute.xlu1 %8331 }
 0x687   :  { %v8669_v54 = vsel %vm3317_vm8, %v8653_v37, %v8332_v42  ;;  %v9014_v42 = vcombine.high %v9012_v62, %v9012_v62  ;;  %v9353_v6 = vsel %vm9317_vm9, %v9013_v4, -inf }
 0x688   :  { %v8458_v46 = vpop.permute.xlu0 %8457 }
 0x689   :  { %v8702_v10 = vsel %vm8688_vm3, %v8685_v31, %v8458_v46  ;;  %v8996_v46 = vcombine.high %v15966_v13, %v15966_v13  ;;  %v9367_v15 = vsel %vm9317_vm9, %v9014_v42, -inf  ;;  %v8881_v13 = vadd.f32 %v15922_v21, %v16053_v36 }
 0x68a   :  { %v8584_v45 = vpop.permute.xlu1 %8583 }
 0x68b   :  { %v8735_v32 = vsel %vm8722_vm0, %v8718_v16, %v8584_v45  ;;  %v8995_v16 = vrot.slane %v8981_v0, %v12625_v58  ;;  %v9354_v45 = vrot.slane %v9353_v6, 4 }
 0x68c   :  { %10451 = vmatprep.mubr.msk.f32.mxu1 %vm8755_vm7, %v8735_v32  ;;  %v8270_v52 = vpop.permute.xlu0 %8269  ;;  %v9360_v32 = vsel %vm9317_vm9, %v9012_v62, -inf }
 0x68d   :  { %v8654_v28 = vsel %vm3187_vm6, %v8638_v9, %v8270_v52  ;;  %v9325_v52 = vsel %vm9317_vm9, %v8996_v46, -inf  ;;  %v9332_v1 = vsel %vm9317_vm9, %v8995_v16, -inf  ;;  %v9361_v5 = vrot.slane %v9360_v32, 4 }
 0x68e   :  { %v8396_v26 = vpop.permute.xlu1 %8395  ;;  %v9326_v44 = vrot.slane %v9325_v52, 4  ;;  %v9333_v63 = vrot.slane %v9332_v1, 4  ;;  %vm9962_vm6 = vcmask 916480  }
 0x68f   :  { %v8686_v40 = vsel %vm8671_vm5, %v8669_v54, %v8396_v26  ;;  %v9355_v26 = vmax.f32 %v9353_v6, %v9354_v45  ;;  %v9362_v31 = vmax.f32 %v9360_v32, %v9361_v5 }
 0x690   :  { %v8522_v41 = vpop.permute.xlu0 %8521 }
 0x691   :  { %v8719_v22 = vsel %vm8705_vm2, %v8702_v10, %v8522_v41  ;;  %v9368_v41 = vrot.slane %v9367_v15, 4  ;;  %v9356_v29 = vrot.slane %v9355_v26, 2 }
 0x692   :  { %v8398_v7 = vpop.permute.xlu1 %8397 }
 0x693   :  { %v9369_v10 = vmax.f32 %v9367_v15, %v9368_v41  ;;  %v9357_v9 = vmax.f32 %v9355_v26, %v9356_v29  ;;  %v9066_v41 = vcombine.high %v16060_v43, %v16060_v43 }
 0x694   :  { %v8334_v38 = vpop.permute.xlu0 %8333 }
 0x695   :  { %v8670_v30 = vsel %vm3317_vm8, %v8654_v28, %v8334_v38  ;;  %v8952_v38 = vmax.f32 %v8886_v39, 0.0  ;;  %v9363_v28 = vrot.slane %v9362_v31, 2  ;;  %v9370_v47 = vrot.slane %v9369_v10, 2 }
 0x696   :  { %v8462_v27 = vpop.permute.xlu1 %8461  ;;  %v8687_v61 = vsel %vm8671_vm5, %v8670_v30, %v8398_v7  ;;  %v8997_v7 = vcombine.high %v8995_v16, %v8995_v16 }
 0x697   :  { %v8704_v3 = vsel %vm8688_vm3, %v8687_v61, %v8462_v27  ;;  %v9327_v27 = vmax.f32 %v9325_v52, %v9326_v44  ;;  %v9039_v53 = vrot.slane %v8952_v38, %v12625_v58  ;;  %v9364_v54 = vmax.f32 %v9362_v31, %v9363_v28 }
 0x698   :  { %v8586_v8 = vpop.permute.xlu0 %8585  ;;  %v9339_v56 = vsel %vm9317_vm9, %v8997_v7, -inf }
 0x699   :  { %v8736_v19 = vsel %vm8722_vm0, %v8719_v22, %v8586_v8  ;;  %v8951_v22 = vmax.f32 %v8881_v13, 0.0  ;;  %v9334_v8 = vmax.f32 %v9332_v1, %v9333_v63  ;;  %v9328_v30 = vrot.slane %v9327_v27, 2 }
 0x69a   :  { %10452 = vmatmul.mubr.msk.f32.gmra.mxu1 %vm8755_vm7, %v8736_v19  ;;  %v8526_v25 = vpop.permute.xlu1 %8525  ;;  %v9032_v19 = vcombine.high %v8952_v38, %v8952_v38  ;;  %v9047_v37 = vcombine.high %v9039_v53, %v9039_v53  ;;  %v9365_v4 = vrot.slane %v9364_v54, 1 }
 0x69b   :  { %v8721_v33 = vsel %vm8705_vm2, %v8704_v3, %v8526_v25  ;;  %v9015_v36 = vcombine.high %v8951_v22, %v8951_v22  ;;  %v9335_v25 = vrot.slane %v9334_v8, 2  ;;  %v9022_v14 = vrot.slane %v8951_v22, %v12625_v58 }
 0x69c   :  { %v8460_v48 = vpop.permute.xlu0 %8459  ;;  %v9046_v61 = vrot.slane %v9032_v19, %v12625_v58  ;;  %v9402_v3 = vsel %vm9317_vm9, %v9039_v53, -inf  ;;  %v9409_v50 = vsel %vm9317_vm9, %v9047_v37, -inf  ;;  %v9366_v44 = vmax.f32 %v9364_v54, %v9365_v4 }
 0x69d   :  { %v8703_v12 = vsel %vm8688_vm3, %v8686_v40, %v8460_v48  ;;  %v9340_v48 = vrot.slane %v9339_v56, 4  ;;  %v9371_v40 = vmax.f32 %v9369_v10, %v9370_v47  ;;  %v9374_v45 = vsel %vm9317_vm9, %v9022_v14, -inf }
 0x69e   :  { %v8590_v2 = vpop.permute.xlu1 %8589  ;;  %v9416_v42 = vsel %vm9317_vm9, %v9046_v61, -inf  ;;  %v9410_v15 = vrot.slane %v9409_v50, 4  ;;  %v9375_v7 = vrot.slane %v9374_v45, 4  ;;  %v9080_v53 = vrot.slane %v9066_v41, %v12625_v58 }
 0x69f   :  { %v8738_v60 = vsel %vm8722_vm0, %v8721_v33, %v8590_v2  ;;  %v9341_v2 = vmax.f32 %v9339_v56, %v9340_v48  ;;  %v9030_v33 = vcombine.high %v9022_v14, %v9022_v14  ;;  %v9372_v0 = vrot.slane %v9371_v40, 1 }
 0x6a0   :  { %v8524_v57 = vpop.permute.xlu0 %8523  ;;  %v9417_v26 = vrot.slane %v9416_v42, 4  ;;  %v9411_v22 = vmax.f32 %v9409_v50, %v9410_v15  ;;  %v9376_v43 = vmax.f32 %v9374_v45, %v9375_v7  ;;  %v9081_v47 = vcombine.high %v16066_v24, %v16066_v24 }
 0x6a1   :  { %v8720_v18 = vsel %vm8705_vm2, %v8703_v12, %v8524_v57  ;;  %v9358_v57 = vrot.slane %v9357_v9, 1  ;;  %v9329_v12 = vmax.f32 %v9327_v27, %v9328_v30  ;;  %v9342_v46 = vrot.slane %v9341_v2, 2 }
 0x6a2   :  { %v9381_v52 = vsel %vm9317_vm9, %v9030_v33, -inf  ;;  %v9373_v13 = vmax.f32 %v9371_v40, %v9372_v0  ;;  %v9418_v19 = vmax.f32 %v9416_v42, %v9417_v26  ;;  %v16198_v30 = vsel %vm3057_vm4, %v9366_v44, -inf }
 0x6a3   :  { %v9359_v62 = vmax.f32 %v9357_v9, %v9358_v57  ;;  %v9330_v6 = vrot.slane %v9329_v12, 1  ;;  %v9343_v63 = vmax.f32 %v9341_v2, %v9342_v46  ;;  %v9382_v38 = vrot.slane %v9381_v52, 4 }
 0x6a4   :  { %v8588_v55 = vpop.permute.xlu0 %8587  ;;  %v16201_v14 = vsel %vm3057_vm4, %v9373_v13, -inf  ;;  %v9082_v24 = vcombine.high %v9080_v53, %v9080_v53  ;;  %v9377_v2 = vrot.slane %v9376_v43, 2  ;;  %v9064_v33 = vcombine.high %v16076_v51, %v16076_v51 }
 0x6a5   :  { %v8737_v49 = vsel %vm8722_vm0, %v8720_v18, %v8588_v55  ;;  %v9029_v18 = vrot.slane %v9015_v36, %v12625_v58  ;;  %v9336_v55 = vmax.f32 %v9334_v8, %v9335_v25  ;;  %v9331_v10 = vmax.f32 %v9329_v12, %v9330_v6 }
 0x6a6   :  { %10454 = vmatprep.mubr.msk.f32.mxu1 %vm8755_vm7, %v8737_v49  ;;  %v9048_v49 = vcombine.high %v9046_v61, %v9046_v61  ;;  %v16193_v9 = vsel %vm3057_vm4, %v9359_v62, -inf  ;;  %v9344_v48 = vrot.slane %v9343_v63, 1  ;;  %v9383_v36 = vmax.f32 %v9381_v52, %v9382_v38 }
 0x6a7   :  { %10455 = vmatmul.mubr.msk.f32.gmra.mxu1 %vm8755_vm7, %v8738_v60  ;;  %v9403_v60 = vrot.slane %v9402_v3, 4  ;;  %v9031_v16 = vcombine.high %v9029_v18, %v9029_v18  ;;  %v9337_v32 = vrot.slane %v9336_v55, 1  ;;  %v9388_v1 = vsel %vm9317_vm9, %v9029_v18, -inf }
 0x6a8   :  { %v9423_v5 = vsel %vm9317_vm9, %v9048_v49, -inf  ;;  %v9389_v29 = vrot.slane %v9388_v1, 4  ;;  %v9412_v61 = vrot.slane %v9411_v22, 2  ;;  %v16204_v57 = vsel %vm3057_vm4, %v9331_v10, -inf }
 0x6a9   :  { %v9404_v39 = vmax.f32 %v9402_v3, %v9403_v60  ;;  %v9395_v31 = vsel %vm9317_vm9, %v9031_v16, -inf  ;;  %v9338_v27 = vmax.f32 %v9336_v55, %v9337_v32  ;;  %v9424_v8 = vrot.slane %v9423_v5, 4 }
 0x6aa   :  { %v9396_v28 = vrot.slane %v9395_v31, 4  ;;  %v9390_v25 = vmax.f32 %v9388_v1, %v9389_v29  ;;  %v9419_v3 = vrot.slane %v9418_v19, 2  ;;  %v9049_v12 = vcombine.high %v16068_v35, %v16068_v35 }
 0x6ab   :  { %v9405_v56 = vrot.slane %v9404_v39, 2  ;;  %v9425_v37 = vmax.f32 %v9423_v5, %v9424_v8  ;;  %v16207_v54 = vsel %vm3057_vm4, %v9338_v27, -inf  ;;  %v9465_v55 = vsel %vm9317_vm9, %v9081_v47, -inf }
 0x6ac   :  { %v9397_v18 = vmax.f32 %v9395_v31, %v9396_v28  ;;  %v9345_v49 = vmax.f32 %v9343_v63, %v9344_v48  ;;  %v9384_v60 = vrot.slane %v9383_v36, 2  ;;  %v9391_v50 = vrot.slane %v9390_v25, 2 }
 0x6ad   :  { %v9406_v40 = vmax.f32 %v9404_v39, %v9405_v56  ;;  %v9413_v4 = vmax.f32 %v9411_v22, %v9412_v61  ;;  %v9426_v0 = vrot.slane %v9425_v37, 2  ;;  %v9472_v42 = vsel %vm9317_vm9, %v9080_v53, -inf }
 0x6ae   :  { %v9420_v6 = vmax.f32 %v9418_v19, %v9419_v3  ;;  %v9466_v46 = vrot.slane %v9465_v55, 4  ;;  %v9479_v16 = vsel %vm9317_vm9, %v9082_v24, -inf  ;;  %v9063_v45 = vrot.slane %v9049_v12, %v12625_v58  ;;  %v10001_v3 = vld [vmem:[%s16687_s5 + $0xf0] sm:$0xff] }
 0x6af   :  { %v9407_v32 = vrot.slane %v9406_v40, 1  ;;  %v9378_v15 = vmax.f32 %v9376_v43, %v9377_v2  ;;  %v9398_v52 = vrot.slane %v9397_v18, 2  ;;  %v9437_v1 = vsel %vm9317_vm9, %v9064_v33, -inf }
 0x6b0   :  { %v9385_v39 = vmax.f32 %v9383_v36, %v9384_v60  ;;  %v9392_v26 = vmax.f32 %v9390_v25, %v9391_v50  ;;  %v9473_v5 = vrot.slane %v9472_v42, 4  ;;  %v16223_v41 = vsel %vm3057_vm4, %v9345_v49, -inf }
 0x6b1   :  { %v9414_v44 = vrot.slane %v9413_v4, 1  ;;  %v9427_v13 = vmax.f32 %v9425_v37, %v9426_v0  ;;  %v9480_v7 = vrot.slane %v9479_v16, 4  ;;  %v9421_v38 = vrot.slane %v9420_v6, 1  ;;  %v10002_v37 = vld [vmem:[%s16687_s5 + $0xf8] sm:$0xff] }
 0x6b2   :  { %v9467_v29 = vmax.f32 %v9465_v55, %v9466_v46  ;;  %v9438_v31 = vrot.slane %v9437_v1, 4  ;;  %v9444_v10 = vsel %vm9317_vm9, %v9063_v45, -inf  ;;  %v9408_v27 = vmax.f32 %v9406_v40, %v9407_v32  ;;  %v9986_v40 = vld [vmem:[%s16687_s5 + $0x78] sm:$0xff]  ;;  %10274 = vmatprep.subr.mxu1 %v10002_v37  ;;  %v9985_v55 = vld [vmem:[%s16687_s5 + $0x70] sm:$0xff] }
 0x6b3   :  { %v9379_v22 = vrot.slane %v9378_v15, 1  ;;  %v9399_v8 = vmax.f32 %v9397_v18, %v9398_v52  ;;  %v9065_v56 = vcombine.high %v9063_v45, %v9063_v45  ;;  %v9386_v19 = vrot.slane %v9385_v39, 1  ;;  %10275 = vmatpush3.msra.mxu1 %v9986_v40  ;;  %v9999_v52 = vld [vmem:[%s16687_s5 + $0xe0] sm:$0xff] }
 0x6b4   :  { %v9393_v53 = vrot.slane %v9392_v26, 1  ;;  %v9474_v43 = vmax.f32 %v9472_v42, %v9473_v5  ;;  %v9428_v47 = vrot.slane %v9427_v13, 1  ;;  %v9481_v48 = vmax.f32 %v9479_v16, %v9480_v7  ;;  %10276 = vmatprep.subr.mxu1 %v10001_v3  ;;  %v9984_v16 = vld [vmem:[%s16687_s5 + $0x68] sm:$0xff] }
 0x6b5   :  { %v9445_v36 = vrot.slane %v9444_v10, 4  ;;  %v9415_v24 = vmax.f32 %v9413_v4, %v9414_v44  ;;  %v9422_v12 = vmax.f32 %v9420_v6, %v9421_v38  ;;  %v9468_v2 = vrot.slane %v9467_v29, 2  ;;  %v10000_v4 = vld [vmem:[%s16687_s5 + $0xe8] sm:$0xff]  ;;  %10277 = vmatpush3.msra.mxu1 %v9985_v55  ;;  %v9983_v44 = vld [vmem:[%s16687_s5 + $0x60] sm:$0xff] }
 0x6b6   :  { %v9439_v18 = vmax.f32 %v9437_v1, %v9438_v31  ;;  %v16242_v33 = vsel %vm3057_vm4, %v9408_v27, -inf  ;;  %v9380_v49 = vmax.f32 %v9378_v15, %v9379_v22  ;;  %v9400_v60 = vrot.slane %v9399_v8, 1  ;;  %10278 = vmatprep.subr.mxu1 %v10000_v4 }
 0x6b7   :  { %v9451_v50 = vsel %vm9317_vm9, %v9065_v56, -inf  ;;  %v9387_v0 = vmax.f32 %v9385_v39, %v9386_v19  ;;  %v9394_v42 = vmax.f32 %v9392_v26, %v9393_v53  ;;  %v9475_v6 = vrot.slane %v9474_v43, 2  ;;  %10279 = vmatpush3.msra.mxu1 %v9984_v16  ;;  %v9982_v56 = vld [vmem:[%s16687_s5 + $0x58] sm:$0xff] }
 0x6b8   :  { %v16252_v45 = vmax.f32 %v9427_v13, %v9428_v47  ;;  %v9446_v32 = vmax.f32 %v9444_v10, %v9445_v36  ;;  %v9469_v1 = vmax.f32 %v9467_v29, %v9468_v2  ;;  %v9440_v39 = vrot.slane %v9439_v18, 2  ;;  %v9998_v29 = vld [vmem:[%s16687_s5 + $0xd8] sm:$0xff]  ;;  %10280 = vmatprep.subr.mxu1 %v9999_v52 }
 0x6b9   :  { %v9452_v26 = vrot.slane %v9451_v50, 4  ;;  %v16259_v5 = vsel %vm3057_vm4, %v9415_v24, -inf  ;;  %v16264_v13 = vmax.f32 %v9399_v8, %v9400_v60  ;;  %v16267_v7 = vsel %vm3057_vm4, %v9380_v49, -inf  ;;  %10281 = vmatpush3.msra.mxu1 %v9983_v44 }
 0x6ba   :  { %17186 = vst [vmem:[#allocation69_spill] sm:$0xff] %v16252_v45  ;;  %17187 = vst [vmem:[#allocation70_spill] sm:$0xff] %v16259_v5  ;;  %v16270_v38 = vsel %vm3057_vm4, %v9422_v12, -inf  ;;  %v9476_v31 = vmax.f32 %v9474_v43, %v9475_v6  ;;  %v16276_v22 = vsel %vm3057_vm4, %v9387_v0, -inf  ;;  %v16279_v8 = vsel %vm3057_vm4, %v9394_v42, -inf  ;;  %v9997_v43 = vld [vmem:[%s16687_s5 + $0xd0] sm:$0xff]  ;;  %10282 = vmatprep.subr.mxu1 %v9998_v29 }
 0x6bb   :  { %17188 = vst [vmem:[#allocation71_spill] sm:$0xff] %v16264_v13  ;;  %17189 = vst [vmem:[#allocation72_spill] sm:$0xff] %v16270_v38  ;;  %v9447_v53 = vrot.slane %v9446_v32, 2  ;;  %v9453_v37 = vmax.f32 %v9451_v50, %v9452_v26  ;;  %10283 = vmatpush3.msra.mxu1 %v9982_v56 }
 0x6bc   :  { %17190 = vst [vmem:[#allocation73_spill] sm:$0xff] %v16276_v22  ;;  %17191 = vst [vmem:[#allocation74_spill] sm:$0xff] %v16279_v8  ;;  %v9477_v49 = vrot.slane %v9476_v31, 1  ;;  %10284 = vmatprep.subr.mxu1 %v9997_v43 }
 0x6bd   :  { %v9448_v0 = vmax.f32 %v9446_v32, %v9447_v53  ;;  %v9454_v16 = vrot.slane %v9453_v37, 2 }
 0x6bf   :  { %v9449_v56 = vrot.slane %v9448_v0, 1 }
 0x6d0   :  { %v10444_v51 = vpop.f32.mrf.mxu1 }
 0x6d1   :  { %v8906_v63 = vadd.f32 %v10444_v51, %v15922_v21  ;;  %v9482_v51 = vrot.slane %v9481_v48, 2 }
 0x6d2   :  { %v8900_v61 = vpop.f32.mrf.mxu1 }
 0x6d3   :  { %v8956_v25 = vmax.f32 %v8906_v63, 0.0  ;;  %v8901_v46 = vadd.f32 %v15922_v21, %v8900_v61  ;;  %v9483_v19 = vmax.f32 %v9481_v48, %v9482_v51  ;;  %v9441_v61 = vmax.f32 %v9439_v18, %v9440_v39  ;;  %v9981_v48 = vld [vmem:[%s16687_s5 + $0x50] sm:$0xff] }
 0x6d4   :  { %10285 = vmatpush3.msra.mxu1 %v9981_v48 }
 0x6d5   :  { %v9107_v15 = vrot.slane %v8956_v25, %v12625_v58  ;;  %v9100_v63 = vcombine.high %v8956_v25, %v8956_v25  ;;  %v8955_v10 = vmax.f32 %v8901_v46, 0.0  ;;  %v9470_v25 = vrot.slane %v9469_v1, 1 }
 0x6d6   :  { %v9484_v4 = vrot.slane %v9483_v19, 1  ;;  %v9442_v46 = vrot.slane %v9441_v61, 1 }
 0x6d7   :  { %v9514_v47 = vsel %vm9317_vm9, %v9107_v15, -inf  ;;  %v9115_v40 = vcombine.high %v9107_v15, %v9107_v15  ;;  %v9114_v24 = vrot.slane %v9100_v63, %v12625_v58  ;;  %v9083_v60 = vcombine.high %v8955_v10, %v8955_v10 }
 0x6d8   :  { %v9515_v18 = vrot.slane %v9514_v47, 4  ;;  %v9090_v39 = vrot.slane %v8955_v10, %v12625_v58 }
 0x6d9   :  { %v9521_v51 = vsel %vm9317_vm9, %v9115_v40, -inf  ;;  %v9116_v15 = vcombine.high %v9114_v24, %v9114_v24  ;;  %v9528_v52 = vsel %vm9317_vm9, %v9114_v24, -inf  ;;  %v9097_v44 = vrot.slane %v9083_v60, %v12625_v58 }
 0x6da   :  { %v9516_v26 = vmax.f32 %v9514_v47, %v9515_v18  ;;  %v9522_v53 = vrot.slane %v9521_v51, 4  ;;  %v9529_v43 = vrot.slane %v9528_v52, 4  ;;  %v9443_v40 = vmax.f32 %v9441_v61, %v9442_v46 }
 0x6db   :  { %v9535_v47 = vsel %vm9317_vm9, %v9116_v15, -inf  ;;  %v9099_v18 = vcombine.high %v9097_v44, %v9097_v44 }
 0x6dc   :  { %v9517_v24 = vrot.slane %v9516_v26, 2  ;;  %v16329_v23 = vsel %vm3057_vm4, %v9443_v40, -inf }
 0x6de   :  { %v9518_v50 = vmax.f32 %v9516_v26, %v9517_v24 }
 0x6e0   :  { %v9519_v40 = vrot.slane %v9518_v50, 1 }
 0x714   :  { %v10447_v27 = vpop.f32.mrf.mxu1 }
 0x715   :  { %v8916_v36 = vadd.f32 %v10447_v27, %v15922_v21  ;;  %v9485_v27 = vmax.f32 %v9483_v19, %v9484_v4 }
 0x716   :  { %v8910_v3 = vpop.f32.mrf.mxu1 }
 0x717   :  { %v16293_v12 = vmax.f32 %v8916_v36, 0.0  ;;  %v8911_v2 = vadd.f32 %v15922_v21, %v8910_v3  ;;  %v9471_v21 = vmax.f32 %v9469_v1, %v9470_v25  ;;  %v9478_v1 = vmax.f32 %v9476_v31, %v9477_v49 }
 0x718   :  { %v9455_v36 = vmax.f32 %v9453_v37, %v9454_v16  ;;  %v9098_v3 = vcombine.high %v9090_v39, %v9090_v39  ;;  %v9500_v31 = vsel %vm9317_vm9, %v9097_v44, -inf  ;;  %v9450_v49 = vmax.f32 %v9448_v0, %v9449_v56 }
 0x719   :  { %v16302_v42 = vrot.slane %v16293_v12, %v12625_v58  ;;  %v16304_v6 = vmax.f32 %v8911_v2, 0.0  ;;  %v16317_v10 = vsel %vm3057_vm4, %v9471_v21, -inf  ;;  %v9486_v2 = vsel %vm9317_vm9, %v9090_v39, -inf }
 0x71a   :  { %v9523_v37 = vmax.f32 %v9521_v51, %v9522_v53  ;;  %v9456_v4 = vrot.slane %v9455_v36, 1  ;;  %v9530_v21 = vmax.f32 %v9528_v52, %v9529_v43  ;;  %v9536_v16 = vrot.slane %v9535_v47, 4 }
 0x71b   :  { %v9570_v32 = vsel %vm9317_vm9, %v16302_v42, -inf  ;;  %v16314_v29 = vrot.slane %v16304_v6, %v12625_v58  ;;  %v9487_v46 = vrot.slane %v9486_v2, 4  ;;  %v9501_v15 = vrot.slane %v9500_v31, 4 }
 0x71c   :  { %v9571_v63 = vrot.slane %v9570_v32, 4  ;;  %v9493_v39 = vsel %vm9317_vm9, %v9098_v3, -inf  ;;  %v16332_v0 = vsel %vm3057_vm4, %v9485_v27, -inf  ;;  %v9524_v51 = vrot.slane %v9523_v37, 2 }
 0x71d   :  { %v9542_v48 = vsel %vm9317_vm9, %v16314_v29, -inf  ;;  %17193 = vst [vmem:[#allocation76_spill] sm:$0xff] %v16332_v0  ;;  %v9507_v52 = vsel %vm9317_vm9, %v9099_v18, -inf  ;;  %v9457_v53 = vmax.f32 %v9455_v36, %v9456_v4  ;;  %v9531_v43 = vrot.slane %v9530_v21, 2 }
 0x71e   :  { %v9572_v25 = vmax.f32 %v9570_v32, %v9571_v63  ;;  %v9543_v60 = vrot.slane %v9542_v48, 4  ;;  %v16325_v63 = vsel %vm3057_vm4, %v9478_v1, -inf  ;;  %v16336_v1 = vsel %vm3057_vm4, %v9450_v49, -inf }
 0x71f   :  { %17192 = vst [vmem:[#allocation75_spill] sm:$0xff] %v16325_v63  ;;  %v9488_v26 = vmax.f32 %v9486_v2, %v9487_v46  ;;  %v9502_v3 = vmax.f32 %v9500_v31, %v9501_v15  ;;  %v9117_v27 = vcombine.high %v16304_v6, %v16304_v6  ;;  %v9134_v36 = vcombine.high %v16293_v12, %v16293_v12  ;;  %v16353_v12 = vld [vmem:[%s16686_s4] ss:$0 sm:$0xff] }
 0x720   :  { %v9573_v19 = vrot.slane %v9572_v25, 2  ;;  %v9544_v32 = vmax.f32 %v9542_v48, %v9543_v60  ;;  %v9494_v48 = vrot.slane %v9493_v39, 4  ;;  %v9525_v60 = vmax.f32 %v9523_v37, %v9524_v51 }
 0x721   :  { %v9532_v49 = vmax.f32 %v9530_v21, %v9531_v43  ;;  %v16347_v31 = vsel %vm3057_vm4, %v9457_v53, -inf  ;;  %v9489_v46 = vrot.slane %v9488_v26, 2  ;;  %v9503_v6 = vrot.slane %v9502_v3, 2 }
 0x722   :  { %v9574_v61 = vmax.f32 %v9572_v25, %v9573_v19  ;;  %v9545_v56 = vrot.slane %v9544_v32, 2  ;;  %v9537_v25 = vmax.f32 %v9535_v47, %v9536_v16  ;;  %v9508_v19 = vrot.slane %v9507_v52, 4  ;;  %17194 = vst [vmem:[#allocation77_spill] sm:$0xff] %v16347_v31 }
 0x723   :  { %v9495_v15 = vmax.f32 %v9493_v39, %v9494_v48  ;;  %v9520_v18 = vmax.f32 %v9518_v50, %v9519_v40  ;;  %v9131_v51 = vrot.slane %v9117_v27, %v12625_v58  ;;  %v9533_v48 = vrot.slane %v9532_v49, 1 }
 0x724   :  { %v9575_v44 = vrot.slane %v9574_v61, 1  ;;  %v9546_v24 = vmax.f32 %v9544_v32, %v9545_v56  ;;  %v9538_v16 = vrot.slane %v9537_v25, 2  ;;  %v9509_v37 = vmax.f32 %v9507_v52, %v9508_v19 }
 0x725   :  { %v9490_v40 = vmax.f32 %v9488_v26, %v9489_v46  ;;  %v9496_v19 = vrot.slane %v9495_v15, 2  ;;  %v9504_v27 = vmax.f32 %v9502_v3, %v9503_v6  ;;  %v16373_v6 = vsel %vm3057_vm4, %v9520_v18, -inf }
 0x726   :  { %v9576_v47 = vmax.f32 %v9574_v61, %v9575_v44  ;;  %v9547_v4 = vrot.slane %v9546_v24, 1  ;;  %v9526_v61 = vrot.slane %v9525_v60, 1  ;;  %v9148_v44 = vrot.slane %v9134_v36, %v12625_v58 }
 0x727   :  { %v9539_v50 = vmax.f32 %v9537_v25, %v9538_v16  ;;  %v9133_v36 = vcombine.high %v9131_v51, %v9131_v51  ;;  %v9510_v55 = vrot.slane %v9509_v37, 2  ;;  %v9534_v16 = vmax.f32 %v9532_v49, %v9533_v48 }
 0x728   :  { %v9548_v32 = vmax.f32 %v9546_v24, %v9547_v4  ;;  %v9815_v53 = vsel %vm3057_vm4, %v9576_v47, -inf  ;;  %v9150_v25 = vcombine.high %v9148_v44, %v9148_v44  ;;  %v9527_v3 = vmax.f32 %v9525_v60, %v9526_v61 }
 0x729   :  { %v9540_v46 = vrot.slane %v9539_v50, 1  ;;  %v9505_v61 = vrot.slane %v9504_v27, 1 }
 0x72a   :  { %v9814_v39 = vsel %vm3057_vm4, %v9548_v32, -inf  ;;  %v9149_v32 = vcombine.high %v16302_v42, %v16302_v42  ;;  %v9591_v60 = vsel %vm9317_vm9, %v9150_v25, -inf }
 0x72b   :  { %v9816_v24 = vmax.f32 %v9814_v39, %v9815_v53  ;;  %v9584_v53 = vsel %vm9317_vm9, %v9148_v44, -inf  ;;  %v9556_v39 = vsel %vm9317_vm9, %v9131_v51, -inf  ;;  %v9506_v38 = vmax.f32 %v9504_v27, %v9505_v61 }
 0x72c   :  { %v9585_v48 = vrot.slane %v9584_v53, 4  ;;  %v9557_v44 = vrot.slane %v9556_v39, 4 }
 0x72d   :  { %v16370_v26 = vsel %vm7799_vm11, %v9816_v24, %v9768_v20  ;;  %v9577_v20 = vsel %vm9317_vm9, %v9149_v32, -inf }
 0x72e   :  { %17195 = vst [vmem:[#allocation78_spill] sm:$0xff] %v16370_v26  ;;  %v9558_v28 = vmax.f32 %v9556_v39, %v9557_v44 }
 0x734   :  { %v10450_v56 = vpop.f32.mrf.mxu1 }
 0x735   :  { %v8926_v21 = vadd.f32 %v16353_v12, %v10450_v56  ;;  %v9132_v56 = vcombine.high %v16314_v29, %v16314_v29  ;;  %v9491_v29 = vrot.slane %v9490_v40, 1 }
 0x736   :  { %v8920_v43 = vpop.f32.mrf.mxu1 }
 0x737   :  { %v8921_v52 = vadd.f32 %v16353_v12, %v8920_v43  ;;  %v8960_v2 = vmax.f32 %v8926_v21, 0.0  ;;  %v9497_v21 = vmax.f32 %v9495_v15, %v9496_v19  ;;  %v9549_v42 = vsel %vm9317_vm9, %v9132_v56, -inf }
 0x738   :  { %v9563_v43 = vsel %vm9317_vm9, %v9133_v36, -inf  ;;  %v9511_v15 = vmax.f32 %v9509_v37, %v9510_v55  ;;  %v9550_v51 = vrot.slane %v9549_v42, 4  ;;  %v16386_v19 = vsel %vm3057_vm4, %v9527_v3, -inf }
 0x739   :  { %v8959_v47 = vmax.f32 %v8921_v52, 0.0  ;;  %v9168_v11 = vcombine.high %v8960_v2, %v8960_v2  ;;  %v9175_v18 = vrot.slane %v8960_v2, %v12625_v58  ;;  %v16383_v52 = vmax.f32 %v9539_v50, %v9540_v46 }
 0x73a   :  { %v9564_v24 = vrot.slane %v9563_v43, 4  ;;  %v9578_v56 = vrot.slane %v9577_v20, 4  ;;  %v9592_v36 = vrot.slane %v9591_v60, 4  ;;  %v16393_v37 = vsel %vm3057_vm4, %v9534_v16, -inf }
 0x73b   :  { %v9158_v34 = vrot.slane %v8959_v47, %v12625_v58  ;;  %v9151_v49 = vcombine.high %v8959_v47, %v8959_v47  ;;  %17196 = vst [vmem:[#allocation79_spill] sm:$0xff] %v16383_v52  ;;  %v9182_v32 = vrot.slane %v9168_v11, %v12625_v58  ;;  %v9183_v4 = vcombine.high %v9175_v18, %v9175_v18 }
 0x73c   :  { %v9626_v2 = vsel %vm9317_vm9, %v9175_v18, -inf  ;;  %v9492_v50 = vmax.f32 %v9490_v40, %v9491_v29  ;;  %v9498_v47 = vrot.slane %v9497_v21, 1  ;;  %v9586_v46 = vmax.f32 %v9584_v53, %v9585_v48 }
 0x73d   :  { %v9598_v25 = vsel %vm9317_vm9, %v9158_v34, -inf  ;;  %v9165_v55 = vrot.slane %v9151_v49, %v12625_v58  ;;  %v9551_v3 = vmax.f32 %v9549_v42, %v9550_v51  ;;  %v9565_v62 = vmax.f32 %v9563_v43, %v9564_v24 }
 0x73e   :  { %v9166_v35 = vcombine.high %v9158_v34, %v9158_v34  ;;  %v9599_v26 = vrot.slane %v9598_v25, 4  ;;  %v9579_v45 = vmax.f32 %v9577_v20, %v9578_v56  ;;  %v9593_v11 = vmax.f32 %v9591_v60, %v9592_v36 }
 0x73f   :  { %v9184_v52 = vcombine.high %v9182_v32, %v9182_v32  ;;  %v9627_v13 = vrot.slane %v9626_v2, 4  ;;  %v9633_v8 = vsel %vm9317_vm9, %v9183_v4, -inf  ;;  %v9640_v18 = vsel %vm9317_vm9, %v9182_v32, -inf }
 0x740   :  { %v9167_v49 = vcombine.high %v9165_v55, %v9165_v55  ;;  %v9612_v16 = vsel %vm9317_vm9, %v9165_v55, -inf  ;;  %v9512_v40 = vrot.slane %v9511_v15, 1  ;;  %v9587_v29 = vrot.slane %v9586_v46, 2 }
 0x741   :  { %v9559_v53 = vrot.slane %v9558_v28, 2  ;;  %v9552_v39 = vrot.slane %v9551_v3, 2  ;;  %v9566_v42 = vrot.slane %v9565_v62, 2  ;;  %v9600_v43 = vmax.f32 %v9598_v25, %v9599_v26 }
 0x742   :  { %v9605_v34 = vsel %vm9317_vm9, %v9166_v35, -inf  ;;  %v9634_v20 = vrot.slane %v9633_v8, 4  ;;  %v9641_v60 = vrot.slane %v9640_v18, 4  ;;  %v9647_v48 = vsel %vm9317_vm9, %v9184_v52, -inf }
 0x743   :  { %v9613_v44 = vrot.slane %v9612_v16, 4  ;;  %v9580_v4 = vrot.slane %v9579_v45, 2  ;;  %v9594_v51 = vrot.slane %v9593_v11, 2  ;;  %v9628_v24 = vmax.f32 %v9626_v2, %v9627_v13 }
 0x744   :  { %v9619_v56 = vsel %vm9317_vm9, %v9167_v49, -inf  ;;  %v9499_v36 = vmax.f32 %v9497_v21, %v9498_v47  ;;  %v9588_v27 = vmax.f32 %v9586_v46, %v9587_v29  ;;  %v9560_v61 = vmax.f32 %v9558_v28, %v9559_v53 }
 0x745   :  { %v9606_v32 = vrot.slane %v9605_v34, 4  ;;  %v9553_v55 = vmax.f32 %v9551_v3, %v9552_v39  ;;  %v9567_v5 = vmax.f32 %v9565_v62, %v9566_v42  ;;  %v9648_v22 = vrot.slane %v9647_v48, 4 }
 0x746   :  { %v9601_v26 = vrot.slane %v9600_v43, 2  ;;  %v9635_v25 = vmax.f32 %v9633_v8, %v9634_v20  ;;  %v9642_v35 = vmax.f32 %v9640_v18, %v9641_v60  ;;  %v9614_v59 = vmax.f32 %v9612_v16, %v9613_v44 }
 0x747   :  { %v9620_v17 = vrot.slane %v9619_v56, 4  ;;  %v9513_v0 = vmax.f32 %v9511_v15, %v9512_v40  ;;  %v9581_v52 = vmax.f32 %v9579_v45, %v9580_v4  ;;  %v9595_v31 = vmax.f32 %v9593_v11, %v9594_v51 }
 0x748   :  { %v9629_v63 = vrot.slane %v9628_v24, 2  ;;  %v16402_v13 = vsel %vm3057_vm4, %v9492_v50, -inf  ;;  %v9589_v2 = vrot.slane %v9588_v27, 1  ;;  %v9561_v21 = vrot.slane %v9560_v61, 1 }
 0x749   :  { %v9607_v47 = vmax.f32 %v9605_v34, %v9606_v32  ;;  %v9554_v28 = vrot.slane %v9553_v55, 1  ;;  %v9568_v46 = vrot.slane %v9567_v5, 1  ;;  %v9649_v3 = vmax.f32 %v9647_v48, %v9648_v22 }
 0x74a   :  { %v9602_v62 = vmax.f32 %v9600_v43, %v9601_v26  ;;  %v9636_v49 = vrot.slane %v9635_v25, 2  ;;  %v9643_v29 = vrot.slane %v9642_v35, 2  ;;  %v9615_v8 = vrot.slane %v9614_v59, 2 }
 0x74b   :  { %v9621_v18 = vmax.f32 %v9619_v56, %v9620_v17  ;;  %v9582_v16 = vrot.slane %v9581_v52, 1  ;;  %v9596_v53 = vrot.slane %v9595_v31, 1  ;;  %v9630_v15 = vmax.f32 %v9628_v24, %v9629_v63 }
 0x74c   :  { %v16405_v45 = vsel %vm3057_vm4, %v9506_v38, -inf  ;;  %v9590_v11 = vmax.f32 %v9588_v27, %v9589_v2  ;;  %v9562_v50 = vmax.f32 %v9560_v61, %v9561_v21  ;;  %v9608_v40 = vrot.slane %v9607_v47, 2 }
 0x74d   :  { %v9804_v39 = vmax.f32 %v16402_v13, %v16373_v6  ;;  %v9555_v42 = vmax.f32 %v9553_v55, %v9554_v28  ;;  %v9569_v34 = vmax.f32 %v9567_v5, %v9568_v46  ;;  %v9650_v22 = vrot.slane %v9649_v3, 2 }
 0x74e   :  { %v9603_v43 = vrot.slane %v9602_v62, 1  ;;  %v9637_v20 = vmax.f32 %v9635_v25, %v9636_v49  ;;  %v9644_v60 = vmax.f32 %v9642_v35, %v9643_v29  ;;  %v9616_v48 = vmax.f32 %v9614_v59, %v9615_v8 }
 0x74f   :  { %v9622_v17 = vrot.slane %v9621_v18, 2  ;;  %v9583_v44 = vmax.f32 %v9581_v52, %v9582_v16  ;;  %v9597_v4 = vmax.f32 %v9595_v31, %v9596_v53  ;;  %v9631_v63 = vrot.slane %v9630_v15, 1 }
 0x750   :  { %v9609_v51 = vmax.f32 %v9607_v47, %v9608_v40  ;;  %v9820_v24 = vsel %vm3057_vm4, %v9562_v50, -inf  ;;  %v9821_v56 = vsel %vm3057_vm4, %v9590_v11, -inf  ;;  %v16414_v27 = vsel %vm3057_vm4, %v9499_v36, -inf }
 0x751   :  { %v9651_v5 = vmax.f32 %v9649_v3, %v9650_v22  ;;  %v9604_v61 = vmax.f32 %v9602_v62, %v9603_v43  ;;  %v9817_v32 = vsel %vm3057_vm4, %v9555_v42, -inf  ;;  %v9823_v59 = vsel %vm3057_vm4, %v9569_v34, -inf }
 0x752   :  { %v9638_v55 = vrot.slane %v9637_v20, 1  ;;  %v9645_v31 = vrot.slane %v9644_v60, 1  ;;  %v9617_v26 = vrot.slane %v9616_v48, 1  ;;  %v9623_v25 = vmax.f32 %v9621_v18, %v9622_v17 }
 0x753   :  { %v9632_v35 = vmax.f32 %v9630_v15, %v9631_v63  ;;  %v9818_v52 = vsel %vm3057_vm4, %v9583_v44, -inf  ;;  %v9822_v2 = vmax.f32 %v9820_v24, %v9821_v56  ;;  %v9824_v21 = vsel %vm3057_vm4, %v9597_v4, -inf }
 0x754   :  { %v9610_v47 = vrot.slane %v9609_v51, 1  ;;  %v9819_v36 = vmax.f32 %v9817_v32, %v9818_v52  ;;  %v9825_v46 = vmax.f32 %v9823_v59, %v9824_v21  ;;  %v16421_v3 = vsel %vm3057_vm4, %v9513_v0, -inf }
 0x755   :  { %v9652_v62 = vrot.slane %v9651_v5, 1  ;;  %v9826_v49 = vsel %vm3057_vm4, %v9604_v61, -inf  ;;  %v9807_v8 = vmax.f32 %v16414_v27, %v16386_v19  ;;  %v9639_v18 = vmax.f32 %v9637_v20, %v9638_v55  ;;  %v17214_v27 = vld [vmem:[#allocation72_spill] sm:$0xff] }
 0x756   :  { %v9646_v16 = vmax.f32 %v9644_v60, %v9645_v31  ;;  %v9618_v53 = vmax.f32 %v9616_v48, %v9617_v26  ;;  %v9624_v15 = vrot.slane %v9623_v25, 1  ;;  %v9827_v50 = vsel %vm3057_vm4, %v9632_v35, -inf }
 0x757   :  { %v17197_v0 = vmax.f32 %v16207_v54, %v16198_v30  ;;  %v9611_v22 = vmax.f32 %v9609_v51, %v9610_v47  ;;  %v17198_v43 = vmax.f32 %v16204_v57, %v16193_v9  ;;  %v17199_v60 = vmax.f32 %v16223_v41, %v16201_v14 }
 0x758   :  { %v9828_v17 = vmax.f32 %v9826_v49, %v9827_v50  ;;  %v16447_v44 = vmax.f32 %v9651_v5, %v9652_v62  ;;  %v16450_v63 = vmax.f32 %v9623_v25, %v9624_v15  ;;  %v16453_v9 = vsel %vm3057_vm4, %v9639_v18, -inf }
 0x759   :  { %v16433_v34 = vsel %vm7799_vm11, %v9822_v2, %v17197_v0  ;;  %v16439_v20 = vsel %vm7799_vm11, %v9819_v36, %v17198_v43  ;;  %v16445_v48 = vsel %vm7799_vm11, %v9825_v46, %v17199_v60  ;;  %v16456_v57 = vsel %vm3057_vm4, %v9618_v53, -inf }
 0x75a   :  { %v10453_v28 = vpop.f32.mrf.mxu1  ;;  %v16459_v14 = vsel %vm3057_vm4, %v9646_v16, -inf  ;;  %v17200_v32 = vmax.f32 %v16267_v7, %v16242_v33  ;;  %v16471_v55 = vsel %vm3057_vm4, %v9611_v22, -inf }
 0x75b   :  { %v8936_v29 = vadd.f32 %v16353_v12, %v10453_v28 }
 0x75c   :  { %v8930_v11 = vpop.f32.mrf.mxu1  ;;  %v16468_v59 = vsel %vm7799_vm11, %v9828_v17, %v17200_v32 }
 0x75d   :  { %v8962_v40 = vmax.f32 %v8936_v29, 0.0  ;;  %v8931_v42 = vadd.f32 %v16353_v12, %v8930_v11 }
 0x75f   :  { %v9202_v30 = vcombine.high %v8962_v40, %v8962_v40  ;;  %v9209_v54 = vrot.slane %v8962_v40, %v12625_v58  ;;  %v8961_v4 = vmax.f32 %v8931_v42, 0.0 }
 0x761   :  { %v9216_v41 = vrot.slane %v9202_v30, %v12625_v58  ;;  %v9217_v51 = vcombine.high %v9209_v54, %v9209_v54  ;;  %v9682_v24 = vsel %vm9317_vm9, %v9209_v54, -inf  ;;  %v9185_v56 = vcombine.high %v8961_v4, %v8961_v4 }
 0x762   :  { %v9683_v5 = vrot.slane %v9682_v24, 4  ;;  %v9192_v61 = vrot.slane %v8961_v4, %v12625_v58 }
 0x763   :  { %v9218_v31 = vcombine.high %v9216_v41, %v9216_v41  ;;  %v9689_v26 = vsel %vm9317_vm9, %v9217_v51, -inf  ;;  %v9696_v25 = vsel %vm9317_vm9, %v9216_v41, -inf  ;;  %v9199_v35 = vrot.slane %v9185_v56, %v12625_v58 }
 0x764   :  { %v9684_v52 = vmax.f32 %v9682_v24, %v9683_v5  ;;  %v9690_v2 = vrot.slane %v9689_v26, 4  ;;  %v9697_v21 = vrot.slane %v9696_v25, 4  ;;  %v9200_v47 = vcombine.high %v9192_v61, %v9192_v61 }
 0x765   :  { %v9703_v28 = vsel %vm9317_vm9, %v9218_v31, -inf  ;;  %v9201_v33 = vcombine.high %v9199_v35, %v9199_v35  ;;  %v9654_v7 = vsel %vm9317_vm9, %v9192_v61, -inf  ;;  %v9668_v36 = vsel %vm9317_vm9, %v9199_v35, -inf }
 0x766   :  { %v9685_v46 = vrot.slane %v9684_v52, 2  ;;  %v9691_v62 = vmax.f32 %v9689_v26, %v9690_v2  ;;  %v9698_v49 = vmax.f32 %v9696_v25, %v9697_v21  ;;  %v9704_v29 = vrot.slane %v9703_v28, 4 }
 0x767   :  { %v9655_v18 = vrot.slane %v9654_v7, 4  ;;  %v9661_v16 = vsel %vm9317_vm9, %v9200_v47, -inf  ;;  %v9669_v53 = vrot.slane %v9668_v36, 4  ;;  %v9675_v15 = vsel %vm9317_vm9, %v9201_v33, -inf  ;;  %v10456_v17 = vpop.f32.mrf.mxu1 }
 0x768   :  { %v9686_v11 = vmax.f32 %v9684_v52, %v9685_v46  ;;  %v9692_v50 = vrot.slane %v9691_v62, 2  ;;  %v9699_v40 = vrot.slane %v9698_v49, 2  ;;  %v9705_v42 = vmax.f32 %v9703_v28, %v9704_v29 }
 0x769   :  { %v9656_v0 = vmax.f32 %v9654_v7, %v9655_v18  ;;  %v9662_v22 = vrot.slane %v9661_v16, 4  ;;  %v9670_v43 = vmax.f32 %v9668_v36, %v9669_v53  ;;  %v9676_v60 = vrot.slane %v9675_v15, 4  ;;  %v8940_v21 = vpop.f32.mrf.mxu1 }
 0x76a   :  { %v9687_v30 = vrot.slane %v9686_v11, 1  ;;  %v9693_v54 = vmax.f32 %v9691_v62, %v9692_v50  ;;  %v9700_v4 = vmax.f32 %v9698_v49, %v9699_v40  ;;  %v9706_v41 = vrot.slane %v9705_v42, 2 }
 0x76b   :  { %v9657_v51 = vrot.slane %v9656_v0, 2  ;;  %v9663_v24 = vmax.f32 %v9661_v16, %v9662_v22  ;;  %v9671_v56 = vrot.slane %v9670_v43, 2  ;;  %v9677_v5 = vmax.f32 %v9675_v15, %v9676_v60 }
 0x76c   :  { %v9688_v61 = vmax.f32 %v9686_v11, %v9687_v30  ;;  %v9694_v32 = vrot.slane %v9693_v54, 1  ;;  %v9701_v31 = vrot.slane %v9700_v4, 1  ;;  %v9707_v26 = vmax.f32 %v9705_v42, %v9706_v41 }
 0x76d   :  { %v9658_v25 = vmax.f32 %v9656_v0, %v9657_v51  ;;  %v9664_v35 = vrot.slane %v9663_v24, 2  ;;  %v9672_v52 = vmax.f32 %v9670_v43, %v9671_v56  ;;  %v9678_v2 = vrot.slane %v9677_v5, 2 }
 0x76e   :  { %v9695_v47 = vmax.f32 %v9693_v54, %v9694_v32  ;;  %v9702_v28 = vmax.f32 %v9700_v4, %v9701_v31  ;;  %v9708_v33 = vrot.slane %v9707_v26, 1  ;;  %v16486_v18 = vsel %vm3057_vm4, %v9688_v61, -inf }
 0x76f   :  { %v9659_v36 = vrot.slane %v9658_v25, 1  ;;  %v9665_v46 = vmax.f32 %v9663_v24, %v9664_v35  ;;  %v9673_v62 = vrot.slane %v9672_v52, 1  ;;  %v9679_v49 = vmax.f32 %v9677_v5, %v9678_v2 }
 0x770   :  { %v16483_v29 = vmax.f32 %v9707_v26, %v9708_v33  ;;  %v8946_v16 = vadd.f32 %v16353_v12, %v10456_v17  ;;  %v8941_v53 = vadd.f32 %v16353_v12, %v8940_v21  ;;  %v16491_v22 = vsel %vm3057_vm4, %v9695_v47, -inf }
 0x771   :  { %v9660_v15 = vmax.f32 %v9658_v25, %v9659_v36  ;;  %v9666_v11 = vrot.slane %v9665_v46, 1  ;;  %v9674_v50 = vmax.f32 %v9672_v52, %v9673_v62  ;;  %v9680_v40 = vrot.slane %v9679_v49, 1 }
 0x772   :  { %v8964_v42 = vmax.f32 %v8946_v16, 0.0  ;;  %v8963_v0 = vmax.f32 %v8941_v53, 0.0  ;;  %v16494_v43 = vsel %vm3057_vm4, %v9702_v28, -inf }
 0x773   :  { %v9667_v60 = vmax.f32 %v9665_v46, %v9666_v11  ;;  %v9681_v30 = vmax.f32 %v9679_v49, %v9680_v40  ;;  %v16497_v54 = vsel %vm3057_vm4, %v9660_v15, -inf  ;;  %v16500_v17 = vsel %vm3057_vm4, %v9674_v50, -inf }
 0x774   :  { %v9236_v12 = vcombine.high %v8964_v42, %v8964_v42  ;;  %v9243_v4 = vrot.slane %v8964_v42, %v12625_v58  ;;  %v9219_v41 = vcombine.high %v8963_v0, %v8963_v0  ;;  %v9226_v51 = vrot.slane %v8963_v0, %v12625_v58 }
 0x775   :  { %v16505_v24 = vsel %vm3057_vm4, %v9667_v60, -inf  ;;  %v9846_v56 = vmax.f32 %v16500_v17, %v16494_v43  ;;  %v16510_v5 = vsel %vm3057_vm4, %v9681_v30, -inf  ;;  %v9840_v61 = vmax.f32 %v16497_v54, %v16486_v18  ;;  %v9990_v18 = vld [vmem:[%s16687_s5 + $0x98] sm:$0xff] }
 0x776   :  { %v9250_v32 = vrot.slane %v9236_v12, %v12625_v58  ;;  %v9251_v31 = vcombine.high %v9243_v4, %v9243_v4  ;;  %v9738_v26 = vsel %vm9317_vm9, %v9243_v4, -inf  ;;  %v9233_v25 = vrot.slane %v9219_v41, %v12625_v58  ;;  %v17210_v54 = vld [vmem:[#allocation73_spill] sm:$0xff] }
 0x777   :  { %v9739_v35 = vrot.slane %v9738_v26, 4  ;;  %v9234_v52 = vcombine.high %v9226_v51, %v9226_v51  ;;  %v9710_v2 = vsel %vm9317_vm9, %v9226_v51, -inf  ;;  %v9843_v21 = vmax.f32 %v16505_v24, %v16491_v22 }
 0x778   :  { %v9252_v47 = vcombine.high %v9250_v32, %v9250_v32  ;;  %v9745_v28 = vsel %vm9317_vm9, %v9251_v31, -inf  ;;  %v9752_v33 = vsel %vm9317_vm9, %v9250_v32, -inf  ;;  %v9235_v36 = vcombine.high %v9233_v25, %v9233_v25 }
 0x779   :  { %v9740_v46 = vmax.f32 %v9738_v26, %v9739_v35  ;;  %v9746_v62 = vrot.slane %v9745_v28, 4  ;;  %v9753_v49 = vrot.slane %v9752_v33, 4  ;;  %v9711_v16 = vrot.slane %v9710_v2, 4 }
 0x77a   :  { %v9759_v53 = vsel %vm9317_vm9, %v9252_v47, -inf  ;;  %v9717_v58 = vsel %vm9317_vm9, %v9234_v52, -inf  ;;  %v9724_v15 = vsel %vm9317_vm9, %v9233_v25, -inf  ;;  %v9731_v11 = vsel %vm9317_vm9, %v9235_v36, -inf }
 0x77b   :  { %v9741_v50 = vrot.slane %v9740_v46, 2  ;;  %v9747_v40 = vmax.f32 %v9745_v28, %v9746_v62  ;;  %v9754_v42 = vmax.f32 %v9752_v33, %v9753_v49  ;;  %v9760_v0 = vrot.slane %v9759_v53, 4  ;;  %v9996_v28 = vld [vmem:[%s16687_s5 + $0xc8] sm:$0xff]  ;;  %v9995_v33 = vld [vmem:[%s16687_s5 + $0xc0] sm:$0xff] }
 0x77c   :  { %v9712_v60 = vmax.f32 %v9710_v2, %v9711_v16  ;;  %v9718_v30 = vrot.slane %v9717_v58, 4  ;;  %v9725_v12 = vrot.slane %v9724_v15, 4  ;;  %v9732_v4 = vrot.slane %v9731_v11, 4  ;;  %v9980_v2 = vld [vmem:[%s16687_s5 + $0x48] sm:$0xff]  ;;  %10286 = vmatprep.subr.mxu1 %v9996_v28 }
 0x77d   :  { %v9742_v41 = vmax.f32 %v9740_v46, %v9741_v50  ;;  %v9748_v51 = vrot.slane %v9747_v40, 2  ;;  %v9755_v32 = vrot.slane %v9754_v42, 2  ;;  %v9761_v31 = vmax.f32 %v9759_v53, %v9760_v0  ;;  %v9979_v53 = vld [vmem:[%s16687_s5 + $0x40] sm:$0xff]  ;;  %10287 = vmatpush3.msra.mxu1 %v9980_v2 }
 0x77e   :  { %v9713_v26 = vrot.slane %v9712_v60, 2  ;;  %v9719_v35 = vmax.f32 %v9717_v58, %v9718_v30  ;;  %v9726_v47 = vmax.f32 %v9724_v15, %v9725_v12  ;;  %v9733_v52 = vmax.f32 %v9731_v11, %v9732_v4  ;;  %10288 = vmatprep.subr.mxu1 %v9995_v33  ;;  %v9978_v12 = vld [vmem:[%s16687_s5 + $0x38] sm:$0xff] }
 0x77f   :  { %v9743_v38 = vrot.slane %v9742_v41, 1  ;;  %v9749_v25 = vmax.f32 %v9747_v40, %v9748_v51  ;;  %v9756_v7 = vmax.f32 %v9754_v42, %v9755_v32  ;;  %v9762_v36 = vrot.slane %v9761_v31, 2  ;;  %10289 = vmatpush3.msra.mxu1 %v9979_v53  ;;  %v9993_v32 = vld [vmem:[%s16687_s5 + $0xb0] sm:$0xff] }
 0x780   :  { %v9714_v46 = vmax.f32 %v9712_v60, %v9713_v26  ;;  %v9720_v62 = vrot.slane %v9719_v35, 2  ;;  %v9727_v49 = vrot.slane %v9726_v47, 2  ;;  %v9734_v16 = vrot.slane %v9733_v52, 2  ;;  %v9994_v60 = vld [vmem:[%s16687_s5 + $0xb8] sm:$0xff] }
 0x781   :  { %v9744_v58 = vmax.f32 %v9742_v41, %v9743_v38  ;;  %v9750_v15 = vrot.slane %v9749_v25, 1  ;;  %v9757_v11 = vrot.slane %v9756_v7, 1  ;;  %v9763_v50 = vmax.f32 %v9761_v31, %v9762_v36  ;;  %10290 = vmatprep.subr.mxu1 %v9994_v60  ;;  %v17202_v36 = vld [vmem:[#allocation75_spill] sm:$0xff] }
 0x782   :  { %v9715_v40 = vrot.slane %v9714_v46, 1  ;;  %v9721_v42 = vmax.f32 %v9719_v35, %v9720_v62  ;;  %v9728_v0 = vmax.f32 %v9726_v47, %v9727_v49  ;;  %v9735_v30 = vmax.f32 %v9733_v52, %v9734_v16  ;;  %v9977_v52 = vld [vmem:[%s16687_s5 + $0x30] sm:$0xff]  ;;  %10291 = vmatpush3.msra.mxu1 %v9978_v12  ;;  %v17207_v12 = vld [vmem:[#allocation67_spill] sm:$0xff] }
 0x783   :  { %v9751_v4 = vmax.f32 %v9749_v25, %v9750_v15  ;;  %v9758_v51 = vmax.f32 %v9756_v7, %v9757_v11  ;;  %v9764_v38 = vrot.slane %v9763_v50, 1  ;;  %v9848_v41 = vsel %vm3057_vm4, %v16483_v29, -inf  ;;  %10292 = vmatprep.subr.mxu1 %v9993_v32  ;;  %v17205_v62 = vld [vmem:[#allocation76_spill] sm:$0xff] }
 0x784   :  { %v9716_v31 = vmax.f32 %v9714_v46, %v9715_v40  ;;  %v9722_v26 = vrot.slane %v9721_v42, 1  ;;  %v9729_v35 = vrot.slane %v9728_v0, 1  ;;  %v9736_v47 = vrot.slane %v9735_v30, 1  ;;  %10293 = vmatpush3.msra.mxu1 %v9977_v52 }
 0x785   :  { %v9851_v7 = vsel %vm3057_vm4, %v9744_v58, -inf  ;;  %v17201_v25 = vmax.f32 %v16329_v23, %v16317_v10  ;;  %v17203_v28 = vmax.f32 %v16336_v1, %v17202_v36  ;;  %v9849_v33 = vmax.f32 %v16510_v5, %v9848_v41  ;;  %v9992_v23 = vld [vmem:[%s16687_s5 + $0xa8] sm:$0xff]  ;;  %v17204_v5 = vld [vmem:[#allocation77_spill] sm:$0xff] }
 0x786   :  { %v9723_v10 = vmax.f32 %v9721_v42, %v9722_v26  ;;  %v9730_v46 = vmax.f32 %v9728_v0, %v9729_v35  ;;  %v9737_v22 = vmax.f32 %v9735_v30, %v9736_v47  ;;  %v9850_v24 = vsel %vm3057_vm4, %v9716_v31, -inf  ;;  %10294 = vmatprep.subr.mxu1 %v9992_v23  ;;  %v9975_v42 = vld [vmem:[%s16687_s5 + $0x20] sm:$0xff]  ;;  %v9974_v31 = vld [vmem:[%s16687_s5 + $0x18] sm:$0xff]  ;;  %v9988_v23 = vld [vmem:[%s16687_s5 + $0x88] sm:$0xff] }
 0x787   :  { %v9914_v29 = vsel %vm7799_vm11, %v9843_v21, %v17201_v25  ;;  %v9920_v2 = vsel %vm7799_vm11, %v9846_v56, %v17203_v28  ;;  %v9765_v21 = vmax.f32 %v9763_v50, %v9764_v38  ;;  %v9852_v17 = vmax.f32 %v9850_v24, %v9851_v7  ;;  %v9976_v56 = vld [vmem:[%s16687_s5 + $0x28] sm:$0xff]  ;;  %v17219_v36 = vld [vmem:[#allocation69_spill] sm:$0xff]  ;;  %v9971_v24 = vld [vmem:[%s16687_s5] sm:$0xff] }
 0x788   :  { %v10485_v1 = vpack.i.bf16 %v16439_v20, %v9914_v29  ;;  %v10490_v43 = vpack.i.bf16 %v16433_v34, %v9920_v2  ;;  %v17206_v49 = vmax.f32 %v17204_v5, %v17205_v62  ;;  %v9853_v53 = vsel %vm3057_vm4, %v9723_v10, -inf  ;;  %v9991_v34 = vld [vmem:[%s16687_s5 + $0xa0] sm:$0xff]  ;;  %10295 = vmatpush3.msra.mxu1 %v9976_v56  ;;  %v9973_v2 = vld [vmem:[%s16687_s5 + $0x10] sm:$0xff] }
 0x789   :  { %v9854_v58 = vsel %vm3057_vm4, %v9751_v4, -inf  ;;  %v9856_v15 = vsel %vm3057_vm4, %v9730_v46, -inf  ;;  %v9932_v20 = vsel %vm7799_vm11, %v9852_v17, %v9804_v39  ;;  %v9857_v50 = vsel %vm3057_vm4, %v9758_v51, -inf  ;;  %v17208_v4 = vld [vmem:[#allocation68_spill] sm:$0xff]  ;;  %10296 = vmatprep.subr.mxu1 %v9991_v34  ;;  %v17218_v35 = vld [vmem:[#allocation79_spill] sm:$0xff]  ;;  %v17220_v62 = vld [vmem:[#allocation78_spill] sm:$0xff] }
 0x78a   :  { %v9926_v16 = vsel %vm7799_vm11, %v9849_v33, %v17206_v49  ;;  %10486 = vrot.lane.b32.xlu0 %v10485_v1, %s10606_s15  ;;  %10491 = vrot.lane.b32.xlu1 %v10490_v43, %s10610_s1  ;;  %v9855_v11 = vmax.f32 %v9853_v53, %v9854_v58  ;;  %v9859_v40 = vsel %vm3057_vm4, %v9737_v22, -inf  ;;  %v10500_v0 = vpack.i.bf16 %v16468_v59, %v9932_v20  ;;  %v9987_v46 = vld [vmem:[%s16687_s5 + $0x80] sm:$0xff] }
 0x78b   :  { %v9834_v30 = vmax.f32 %v16456_v57, %v16459_v14  ;;  %v9858_v60 = vmax.f32 %v9856_v15, %v9857_v50  ;;  %v17209_v6 = vmax.f32 %v17207_v12, %v17208_v4  ;;  %v10495_v39 = vpack.i.bf16 %v16445_v48, %v9926_v16  ;;  %10297 = vmatpush3.msra.mxu1 %v9975_v42 }
 0x78c   :  { %v9938_v59 = vsel %vm7799_vm11, %v9855_v11, %v9807_v8  ;;  %v9835_v57 = vsel %vm3057_vm4, %v16450_v63, -inf  ;;  %v9860_v14 = vsel %vm3057_vm4, %v9765_v21, -inf  ;;  %v17213_v48 = vmax.f32 %v16471_v55, %v16453_v9  ;;  %v17215_v8 = vld [vmem:[#allocation74_spill] sm:$0xff]  ;;  %v17217_v55 = vld [vmem:[#allocation71_spill] sm:$0xff]  ;;  %10298 = vmatprep.subr.mxu1 %v9990_v18 }
 0x78d   :  { %v9910_v13 = vsel %vm7799_vm11, %v9840_v61, %v17209_v6  ;;  %v17211_v61 = vld [vmem:[#allocation70_spill] sm:$0xff]  ;;  %v9786_v38 = vmax.f32 %v17215_v8, %v17214_v27  ;;  %v17216_v63 = vmax.f32 %v16405_v45, %v16393_v37  ;;  %v9861_v32 = vmax.f32 %v9859_v40, %v9860_v14  ;;  %v9989_v45 = vld [vmem:[%s16687_s5 + $0x90] sm:$0xff]  ;;  %10299 = vmatpush3.msra.mxu1 %v9974_v31 }
 0x78e   :  { %v17212_v51 = vmax.f32 %v17210_v54, %v17211_v61  ;;  %10496 = vrot.lane.b32.xlu0 %v10495_v39, %s10613_s20  ;;  %10501 = vrot.lane.b32.xlu1 %v10500_v0, %s10615_s22  ;;  %v9787_v26 = vsel %vm3057_vm4, %v17217_v55, -inf  ;;  %v9812_v47 = vsel %vm3057_vm4, %v17218_v35, -inf  ;;  %v9836_v37 = vsel %vm3057_vm4, %v16447_v44, -inf }
 0x78f   :  { %v9944_v41 = vsel %vm7799_vm11, %v9858_v60, %v17216_v63  ;;  %v9898_v52 = vsel %vm7799_vm11, %v9834_v30, %v9786_v38  ;;  %v9813_v7 = vmax.f32 %v16421_v3, %v9812_v47  ;;  %v9837_v25 = vmax.f32 %v9835_v57, %v9836_v37  ;;  %10300 = vmatprep.subr.mxu1 %v9989_v45  ;;  %v9972_v3 = vld [vmem:[%s16687_s5 + $0x8] sm:$0xff]  ;;  %v10179_v38 = vld [vmem:[%s16688_s6] ss:$0 sm:$0xff] }
 0x790   :  { %v9892_v19 = vsel %vm7799_vm11, %v17213_v48, %v17212_v51  ;;  %v10510_v29 = vpack.i.bf16 %v9898_v52, %v9944_v41  ;;  %v9788_v28 = vsel %vm3057_vm4, %v17219_v36, -inf  ;;  %10301 = vmatpush3.msra.mxu1 %v9973_v2 }
 0x791   :  { %v10505_v9 = vpack.i.bf16 %v9892_v19, %v9938_v59  ;;  %v9789_v44 = vmax.f32 %v9787_v26, %v9788_v28  ;;  %v9950_v33 = vsel %vm7799_vm11, %v9861_v32, %v9813_v7  ;;  %10302 = vmatprep.subr.mxu1 %v9988_v23 }
 0x792   :  { %10511 = vrot.lane.b32.xlu1 %v10510_v29, %s10617_s16  ;;  %10303 = vmatpush3.msra.mxu1 %v9972_v3 }
 0x793   :  { %10506 = vrot.lane.b32.xlu0 %v10505_v9, %s10616_s13  ;;  %v9904_v10 = vsel %vm7799_vm11, %v9837_v25, %v9789_v44  ;;  %10304 = vmatprep.subr.mxu1 %v9987_v46 }
 0x794   :  { %v10515_v22 = vpack.i.bf16 %v9904_v10, %v9950_v33  ;;  %10305 = vmatpush3.msra.mxu1 %v9971_v24 }
 0x797   :  { %10516 = vrot.lane.b32.xlu0 %v10515_v22, %s10618_s27 }
 0x7fc   :  { %v10487_v21 = vpop.permute.xlu0 %10486  ;;  %v10492_v1 = vpop.permute.xlu1 %10491 }
 0x7fd   :  { %v10489_v43 = vunpack.i.h.bf16 %v10487_v21  ;;  %v10488_v17 = vunpack.i.l.bf16 %v10487_v21  ;;  %v10494_v56 = vunpack.i.h.bf16 %v10492_v1  ;;  %v10493_v5 = vunpack.i.l.bf16 %v10492_v1 }
 0x7ff   :  { %v9954_v49 = vsel %vm3057_vm4, %v17220_v62, %v10489_v43  ;;  %v9964_v16 = vsel %vm3057_vm4, %v9910_v13, %v10488_v17  ;;  %vm9960_vm4 = vcmask 785408  }
 0x800   :  { %v10497_v53 = vpop.permute.xlu0 %10496  ;;  %v10502_v58 = vpop.permute.xlu1 %10501  ;;  %v9955_v50 = vsel %vm3317_vm8, %v9954_v49, %v10494_v56  ;;  %v9965_v40 = vsel %vm3317_vm8, %v9964_v16, %v10493_v5  ;;  %vm10080_vm8 = vcmask 74752  }
 0x801   :  { %v10499_v15 = vunpack.i.h.bf16 %v10497_v53  ;;  %v10498_v34 = vunpack.i.l.bf16 %v10497_v53  ;;  %v10504_v20 = vunpack.i.h.bf16 %v10502_v58  ;;  %v10503_v11 = vunpack.i.l.bf16 %v10502_v58 }
 0x803   :  { %v9956_v42 = vsel %vm8688_vm3, %v9955_v50, %v10499_v15  ;;  %v9966_v0 = vsel %vm8688_vm3, %v9965_v40, %v10498_v34 }
 0x804   :  { %v9957_v30 = vsel %vm8722_vm0, %v9956_v42, %v10504_v20  ;;  %v9967_v60 = vsel %vm8722_vm0, %v9966_v0, %v10503_v11  ;;  %v10512_v4 = vpop.permute.xlu1 %10511 }
 0x805   :  { %v10507_v12 = vpop.permute.xlu0 %10506  ;;  %v10514_v39 = vunpack.i.h.bf16 %v10512_v4  ;;  %v10513_v59 = vunpack.i.l.bf16 %v10512_v4 }
 0x806   :  { %v10509_v6 = vunpack.i.h.bf16 %v10507_v12  ;;  %v10508_v13 = vunpack.i.l.bf16 %v10507_v12 }
 0x808   :  { %v9959_v57 = vsel %vm9958_vm1, %v9957_v30, %v10509_v6  ;;  %v9968_v14 = vsel %vm9958_vm1, %v9967_v60, %v10508_v13 }
 0x809   :  { %v9961_v18 = vsel %vm9960_vm4, %v9959_v57, %v10514_v39  ;;  %v10517_v54 = vpop.permute.xlu0 %10516  ;;  %v9969_v61 = vsel %vm9960_vm4, %v9968_v14, %v10513_v59 }
 0x80a   :  { %v10519_v51 = vunpack.i.h.bf16 %v10517_v54  ;;  %v10518_v48 = vunpack.i.l.bf16 %v10517_v54 }
 0x80c   :  { %v9970_v19 = vsel %vm9962_vm6, %v9969_v61, %v10518_v48  ;;  %v9963_v27 = vsel %vm9962_vm6, %v9961_v18, %v10519_v51 }
 0x80d   :  { %10074 = vmatprep.mubr.f32.mxu1 %v9970_v19 }
 0x80e   :  { %10075 = vmatmul.mubr.f32.vlgmr.msra.gmra.mxu1 %v9963_v27 }
 0x8ce   :  { %v10306_v8 = vpop.f32.mrf.mxu1 }
 0x8d0   :  { %v10307_v63 = vpop.f32.mrf.mxu1 }
 0x8d1   :  { %v10308_v41 = vadd.f32 %v10307_v63, %v10306_v8 }
 0x8d3   :  { %v10077_v32 = vadd.f32 %v10308_v41, %v10179_v38 }
 0x8d5   :  { %10081 = vst.msk [vmem:[#allocation4] sm:$0x3] %vm10080_vm8, %v10077_v32 }
 0x8d6   :  { %10591 = shalt.err (!%p10588_p4)
}
 0x8d7   :  { %10091 = dma.vmem_to_hbm [thread:$0]  %s10089_s29, 32, %s16689_s7, [#allocation5]  }
 0x8d8   :  { %10600 = dma.done.wait [#allocation5], 32  }
 0x8d9   :  { %10601 = vsyncadd [#allocation5], 4294967264 }
 0x8da   :  { %10095 = vsyncpa [#allocation5], 1 }

</bundles_post_ra>
